<compile_context>
chip_gen: v6e
topology: v6e:2x2x1
jax: 0.10.0
libtpu: 0.0.40
codegen_flags: <defaults>
</compile_context>

<pallas_src>
import math

import jax
import jax.numpy as jnp
from jax.experimental import pallas as pl
from jax.experimental.pallas import tpu as pltpu

E = 30            # embed_dim
H = 5             # num_heads
DH = E // H       # head_dim = 6
N_LAYERS = 5
FFN = 4 * E       # 120
U_DIM = 30
K_PARTIES = 2
EMBED_SCALE = math.sqrt(E)
LN_EPS = 1e-5


# ---------------------------------------------------------------------------
# Fused whole-model kernel (single pallas_call, everything in VMEM)
# ---------------------------------------------------------------------------
def _build_fused_kernel(BBLK, L):
    """BBLK = batch elements handled per grid program; rows per program = BBLK*L."""
    scale = 1.0 / math.sqrt(DH)

    def kernel(x_ref, pos_ref, convw_ref,
               ln1g_ref, ln1b_ref,
               wq_ref, wk_ref, wv_ref, bq_ref, bk_ref, bv_ref,
               wout_ref, bout_ref,
               ln2g_ref, ln2b_ref, wfc1_ref, bfc1_ref, wfc2_ref, bfc2_ref,
               lnfg_ref, lnfb_ref, p1w_ref, p1b_ref, p2w_ref, p2b_ref,
               clswa_ref, clswb_ref, clsb_ref, ub_ref, o_ref):
        f32 = jnp.float32

        def layer_norm(x, g, b):
            mu = jnp.mean(x, axis=-1, keepdims=True)
            var = jnp.mean((x - mu) ** 2, axis=-1, keepdims=True)
            return (x - mu) * jax.lax.rsqrt(var + LN_EPS) * g + b

        def cat0(parts):
            return parts[0] if len(parts) == 1 else jnp.concatenate(parts, axis=0)

        # conv1 (kernel_size=1, no bias) == feature matmul.  EMBED_SCALE is
        # already folded into convw; pos is pre-tiled per batch row-block.
        h = (jnp.dot(x_ref[...], convw_ref[...], preferred_element_type=f32)
             + pos_ref[...])                                        # (RB, E)

        # ------------------ 5 pre-LN encoder layers, fully unrolled ----------
        for l in range(N_LAYERS):
            # --- self-attention block ---
            xn = layer_norm(h, ln1g_ref[l], ln1b_ref[l])            # (RB, E)

            s_blocks = []
            v_heads = []
            for hh in range(H):
                # per-head projections over ALL rows (lane-aligned small dots,
                # no column slicing of a fused qkv buffer)
                q_h = (jnp.dot(xn, wq_ref[l, hh], preferred_element_type=f32)
                       + bq_ref[l, hh]) * scale                     # (RB, DH)
                k_h = (jnp.dot(xn, wk_ref[l, hh], preferred_element_type=f32)
                       + bk_ref[l, hh])                             # (RB, DH)
                v_h = (jnp.dot(xn, wv_ref[l, hh], preferred_element_type=f32)
                       + bv_ref[l, hh])                             # (RB, DH)
                v_heads.append(v_h)
                for b in range(BBLK):
                    r0 = b * L
                    s_blocks.append(jax.lax.dot_general(
                        q_h[r0:r0 + L], k_h[r0:r0 + L],
                        (((1,), (1,)), ((), ())),
                        preferred_element_type=f32))                # (L, L)

            # one batched softmax per layer for all B*H heads (exact divide)
            s_all = cat0(s_blocks)                                  # (H*BBLK*L, L)
            p_all = jnp.exp(s_all - jnp.max(s_all, axis=-1, keepdims=True))
            p_all = p_all / jnp.sum(p_all, axis=-1, keepdims=True)

            # fold the head concat into the output projection: accumulate
            # (p @ v_h) @ w_out[l,h] per head and add straight into the residual
            attn_blocks = []
            for b in range(BBLK):
                r0 = b * L
                acc = None
                for hh in range(H):
                    idx = (hh * BBLK + b) * L                       # sublane-aligned
                    ctx = jnp.dot(p_all[idx:idx + L],
                                  v_heads[hh][r0:r0 + L],
                                  preferred_element_type=f32)       # (L, DH)
                    contrib = jnp.dot(ctx, wout_ref[l, hh],
                                      preferred_element_type=f32)   # (L, E)
                    acc = contrib if acc is None else acc + contrib
                attn_blocks.append(acc)
            h = h + cat0(attn_blocks) + bout_ref[l]

            # --- feed-forward block ---
            xn = layer_norm(h, ln2g_ref[l], ln2b_ref[l])
            ff = jnp.maximum(
                jnp.dot(xn, wfc1_ref[l], preferred_element_type=f32)
                + bfc1_ref[l], 0.0)                                 # (RB, 4E)
            h = h + jnp.dot(ff, wfc2_ref[l],
                            preferred_element_type=f32) + bfc2_ref[l]

        # ------------------ epilogue: only the B last-timestep rows -----------
        last = cat0([h[b * L + L - 1: b * L + L, :] for b in range(BBLK)])  # (BBLK, E)
        last = layer_norm(last, lnfg_ref[...], lnfb_ref[...])

        y = jnp.maximum(
            jnp.dot(last, p1w_ref[...], preferred_element_type=f32)
            + p1b_ref[...], 0.0)
        out = (jnp.dot(y, p2w_ref[...], preferred_element_type=f32)
               + p2b_ref[...])                                      # (BBLK, 30)

        # classifier with concat([out, U_B]) folded into two weight halves
        ub = ub_ref[...][:, 0, :]                                   # (BBLK, u_extra)
        logits = (jnp.dot(out, clswa_ref[...], preferred_element_type=f32)
                  + jnp.dot(ub, clswb_ref[...], preferred_element_type=f32)
                  + clsb_ref[...])                                  # (BBLK, C)
        o_ref[...] = logits[:, None, :].astype(o_ref.dtype)

    return kernel


# ---------------------------------------------------------------------------
# Host-side glue
# ---------------------------------------------------------------------------
def sinusoidal_pos_emb(seq_len, dim):
    half = dim // 2
    log_timescale = math.log(10000.0) / (half - 1)
    inv_freq = jnp.exp(-log_timescale * jnp.arange(half, dtype=jnp.float32))
    ang = jnp.arange(seq_len, dtype=jnp.float32)[:, None] * inv_freq[None, :]
    return jnp.concatenate([jnp.sin(ang), jnp.cos(ang)], axis=1)  # (L, dim)


def manual_a_forward(params, x, U_B, *, batch_blocks=None):
    """x: (B, L, D_in); U_B: list of (B, u_dim) arrays -> (B, num_classes)."""
    B, L, Din = x.shape
    num_classes = params["cls_b"].shape[-1]
    u_extra = params["cls_w_b"].shape[0]

    # Split the batch across grid programs: both v7x TensorCores take a slice
    # (harmless single-/two-step sequential grid on v5e/v6e).
    if batch_blocks is None:
        batch_blocks = 2 if (B % 2 == 0 and ((B // 2) * L) % 8 == 0) else 1
    assert B % batch_blocks == 0
    BBLK = B // batch_blocks
    RB = BBLK * L
    assert batch_blocks == 1 or RB % 8 == 0, "row block must stay sublane-aligned"

    x2 = x.reshape(B * L, Din).astype(jnp.float32)           # batch-major rows
    pos_bl = jnp.tile(sinusoidal_pos_emb(L, E), (B, 1))      # constant, folded by XLA

    if U_B is not None:
        u_cat = jnp.concatenate(list(U_B), axis=1).astype(jnp.float32)
    else:
        # TODO(synk): PyTorch would shape-error with U_B=None; zeros keep the
        # fused classifier input at u_dim*k columns.
        u_cat = jnp.zeros((B, u_extra), jnp.float32)
    ub3 = u_cat.reshape(B, 1, u_extra)                        # (B,1,u) keeps blocks legal

    def full(arr):
        nd = arr.ndim
        return pl.BlockSpec(arr.shape, lambda i, _nd=nd: (0,) * _nd)

    p = params
    in_specs = [
        pl.BlockSpec((RB, Din), lambda i: (i, 0)),            # x rows (batch-major)
        pl.BlockSpec((RB, E), lambda i: (i, 0)),              # positional rows
        full(p["conv1_w"]),
        full(p["ln1_g"]), full(p["ln1_b"]),
        full(p["w_q"]), full(p["w_k"]), full(p["w_v"]),
        full(p["b_q"]), full(p["b_k"]), full(p["b_v"]),
        full(p["w_out"]), full(p["b_out"]),
        full(p["ln2_g"]), full(p["ln2_b"]),
        full(p["w_fc1"]), full(p["b_fc1"]),
        full(p["w_fc2"]), full(p["b_fc2"]),
        full(p["lnf_g"]), full(p["lnf_b"]),
        full(p["proj1_w"]), full(p["proj1_b"]),
        full(p["proj2_w"]), full(p["proj2_b"]),
        full(p["cls_w_a"]), full(p["cls_w_b"]), full(p["cls_b"]),
        pl.BlockSpec((BBLK, 1, u_extra), lambda i: (i, 0, 0)),  # U_B block
    ]
    out_spec = pl.BlockSpec((BBLK, 1, num_classes), lambda i: (i, 0, 0))

    kernel = _build_fused_kernel(BBLK, L)
    out3 = pl.pallas_call(
        kernel,
        out_shape=jax.ShapeDtypeStruct((B, 1, num_classes), jnp.float32),
        grid_spec=pltpu.PrefetchScalarGridSpec(
            num_scalar_prefetch=0,
            grid=(batch_blocks,),
            in_specs=in_specs,
            out_specs=out_spec,
        ),
        compiler_params=pltpu.CompilerParams(
            dimension_semantics=("parallel",)),
    )(x2, pos_bl, p["conv1_w"],
      p["ln1_g"], p["ln1_b"],
      p["w_q"], p["w_k"], p["w_v"],
      p["b_q"], p["b_k"], p["b_v"],
      p["w_out"], p["b_out"],
      p["ln2_g"], p["ln2_b"],
      p["w_fc1"], p["b_fc1"],
      p["w_fc2"], p["b_fc2"],
      p["lnf_g"], p["lnf_b"],
      p["proj1_w"], p["proj1_b"],
      p["proj2_w"], p["proj2_b"],
      p["cls_w_a"], p["cls_w_b"], p["cls_b"],
      ub3)
    return out3.reshape(B, num_classes)


# ---------------------------------------------------------------------------
# Deterministic parameter init (layer params pre-stacked / pre-split per head)
# ---------------------------------------------------------------------------
def init_params(key, num_classes, input_dim):
    def nrm(k, shape, scale=0.02):
        return scale * jax.random.normal(k, shape, jnp.float32)

    ks = iter(jax.random.split(key, 16))
    return {
        # EMBED_SCALE folded into the conv weight (h = x @ (W*sqrt(E)) + pos)
        "conv1_w": nrm(next(ks), (input_dim, E)) * EMBED_SCALE,
        "ln1_g": jnp.ones((N_LAYERS, 1, E), jnp.float32),
        "ln1_b": jnp.zeros((N_LAYERS, 1, E), jnp.float32),
        # per-head split of the fused in-projection (lane-aligned per-head dots)
        "w_q": nrm(next(ks), (N_LAYERS, H, E, DH)),
        "w_k": nrm(next(ks), (N_LAYERS, H, E, DH)),
        "w_v": nrm(next(ks), (N_LAYERS, H, E, DH)),
        "b_q": jnp.zeros((N_LAYERS, H, 1, DH), jnp.float32),
        "b_k": jnp.zeros((N_LAYERS, H, 1, DH), jnp.float32),
        "b_v": jnp.zeros((N_LAYERS, H, 1, DH), jnp.float32),
        # out-projection pre-reshaped so the head concat folds into it
        "w_out": nrm(next(ks), (N_LAYERS, H, DH, E)),
        "b_out": jnp.zeros((N_LAYERS, 1, E), jnp.float32),
        "ln2_g": jnp.ones((N_LAYERS, 1, E), jnp.float32),
        "ln2_b": jnp.zeros((N_LAYERS, 1, E), jnp.float32),
        "w_fc1": nrm(next(ks), (N_LAYERS, E, FFN)),
        "b_fc1": jnp.zeros((N_LAYERS, 1, FFN), jnp.float32),
        "w_fc2": nrm(next(ks), (N_LAYERS, FFN, E)),
        "b_fc2": jnp.zeros((N_LAYERS, 1, E), jnp.float32),
        "lnf_g": jnp.ones((1, E), jnp.float32),
        "lnf_b": jnp.zeros((1, E), jnp.float32),
        "proj1_w": nrm(next(ks), (E, E)),
        "proj1_b": jnp.zeros((1, E), jnp.float32),
        "proj2_w": nrm(next(ks), (E, E)),
        "proj2_b": jnp.zeros((1, E), jnp.float32),
        # classifier weight pre-split into [own-party | other-party] halves
        "cls_w_a": nrm(next(ks), (U_DIM, num_classes)),
        "cls_w_b": nrm(next(ks), (U_DIM * (K_PARTIES - 1), num_classes)),
        "cls_b": jnp.zeros((1, num_classes), jnp.float32),
    }


# ---------------------------------------------------------------------------
if __name__ == "__main__":
    key = jax.random.PRNGKey(0)
    kx, ku, kp = jax.random.split(key, 3)

    B, L, Din = 2, 8, 16
    num_classes = 4

    x = jax.random.normal(kx, (B, L, Din), jnp.float32)
    u_b = jax.random.normal(ku, (B, U_DIM), jnp.float32)   # the other party (k=2)
    params = init_params(kp, num_classes, Din)

    fwd = jax.jit(manual_a_forward)
    logits = fwd(params, x, [u_b])
    logits = jax.block_until_ready(logits)

    assert logits.shape == (B, num_classes), logits.shape
    assert jnp.all(jnp.isfinite(logits))
    print("KERNEL_OK")
</pallas_src>

<mosaic_0001>
module attributes {stable_mosaic.version = 11 : i64} {
  func.func @kernel(%arg0: i32, %arg1: memref<8x16xf32, #tpu.memory_space<vmem>>, %arg2: memref<8x30xf32, #tpu.memory_space<vmem>>, %arg3: memref<16x30xf32, #tpu.memory_space<vmem>>, %arg4: memref<5x1x30xf32, #tpu.memory_space<vmem>>, %arg5: memref<5x1x30xf32, #tpu.memory_space<vmem>>, %arg6: memref<5x5x30x6xf32, #tpu.memory_space<vmem>>, %arg7: memref<5x5x30x6xf32, #tpu.memory_space<vmem>>, %arg8: memref<5x5x30x6xf32, #tpu.memory_space<vmem>>, %arg9: memref<5x5x1x6xf32, #tpu.memory_space<vmem>>, %arg10: memref<5x5x1x6xf32, #tpu.memory_space<vmem>>, %arg11: memref<5x5x1x6xf32, #tpu.memory_space<vmem>>, %arg12: memref<5x5x6x30xf32, #tpu.memory_space<vmem>>, %arg13: memref<5x1x30xf32, #tpu.memory_space<vmem>>, %arg14: memref<5x1x30xf32, #tpu.memory_space<vmem>>, %arg15: memref<5x1x30xf32, #tpu.memory_space<vmem>>, %arg16: memref<5x30x120xf32, #tpu.memory_space<vmem>>, %arg17: memref<5x1x120xf32, #tpu.memory_space<vmem>>, %arg18: memref<5x120x30xf32, #tpu.memory_space<vmem>>, %arg19: memref<5x1x30xf32, #tpu.memory_space<vmem>>, %arg20: memref<1x30xf32, #tpu.memory_space<vmem>>, %arg21: memref<1x30xf32, #tpu.memory_space<vmem>>, %arg22: memref<30x30xf32, #tpu.memory_space<vmem>>, %arg23: memref<1x30xf32, #tpu.memory_space<vmem>>, %arg24: memref<30x30xf32, #tpu.memory_space<vmem>>, %arg25: memref<1x30xf32, #tpu.memory_space<vmem>>, %arg26: memref<30x4xf32, #tpu.memory_space<vmem>>, %arg27: memref<30x4xf32, #tpu.memory_space<vmem>>, %arg28: memref<1x4xf32, #tpu.memory_space<vmem>>, %arg29: memref<1x1x30xf32, #tpu.memory_space<vmem>>, %arg30: memref<1x1x4xf32, #tpu.memory_space<vmem>>) attributes {dimension_semantics = [#tpu.dimension_semantics<parallel>], iteration_bounds = array<i64: 2>, scalar_prefetch = 0 : i64, scratch_operands = 0 : i64, tpu.core_type = #tpu.core_type<tc>, window_params = [{transform_indices = @transform_0, window_bounds = array<i64: 8, 16>}, {transform_indices = @transform_1, window_bounds = array<i64: 8, 30>}, {pipeline_mode = #tpu.pipeline_mode<synchronous>, transform_indices = @transform_2, window_bounds = array<i64: 16, 30>}, {pipeline_mode = #tpu.pipeline_mode<synchronous>, transform_indices = @transform_3, window_bounds = array<i64: 5, 1, 30>}, {pipeline_mode = #tpu.pipeline_mode<synchronous>, transform_indices = @transform_4, window_bounds = array<i64: 5, 1, 30>}, {pipeline_mode = #tpu.pipeline_mode<synchronous>, transform_indices = @transform_5, window_bounds = array<i64: 5, 5, 30, 6>}, {pipeline_mode = #tpu.pipeline_mode<synchronous>, transform_indices = @transform_6, window_bounds = array<i64: 5, 5, 30, 6>}, {pipeline_mode = #tpu.pipeline_mode<synchronous>, transform_indices = @transform_7, window_bounds = array<i64: 5, 5, 30, 6>}, {pipeline_mode = #tpu.pipeline_mode<synchronous>, transform_indices = @transform_8, window_bounds = array<i64: 5, 5, 1, 6>}, {pipeline_mode = #tpu.pipeline_mode<synchronous>, transform_indices = @transform_9, window_bounds = array<i64: 5, 5, 1, 6>}, {pipeline_mode = #tpu.pipeline_mode<synchronous>, transform_indices = @transform_10, window_bounds = array<i64: 5, 5, 1, 6>}, {pipeline_mode = #tpu.pipeline_mode<synchronous>, transform_indices = @transform_11, window_bounds = array<i64: 5, 5, 6, 30>}, {pipeline_mode = #tpu.pipeline_mode<synchronous>, transform_indices = @transform_12, window_bounds = array<i64: 5, 1, 30>}, {pipeline_mode = #tpu.pipeline_mode<synchronous>, transform_indices = @transform_13, window_bounds = array<i64: 5, 1, 30>}, {pipeline_mode = #tpu.pipeline_mode<synchronous>, transform_indices = @transform_14, window_bounds = array<i64: 5, 1, 30>}, {pipeline_mode = #tpu.pipeline_mode<synchronous>, transform_indices = @transform_15, window_bounds = array<i64: 5, 30, 120>}, {pipeline_mode = #tpu.pipeline_mode<synchronous>, transform_indices = @transform_16, window_bounds = array<i64: 5, 1, 120>}, {pipeline_mode = #tpu.pipeline_mode<synchronous>, transform_indices = @transform_17, window_bounds = array<i64: 5, 120, 30>}, {pipeline_mode = #tpu.pipeline_mode<synchronous>, transform_indices = @transform_18, window_bounds = array<i64: 5, 1, 30>}, {pipeline_mode = #tpu.pipeline_mode<synchronous>, transform_indices = @transform_19, window_bounds = array<i64: 1, 30>}, {pipeline_mode = #tpu.pipeline_mode<synchronous>, transform_indices = @transform_20, window_bounds = array<i64: 1, 30>}, {pipeline_mode = #tpu.pipeline_mode<synchronous>, transform_indices = @transform_21, window_bounds = array<i64: 30, 30>}, {pipeline_mode = #tpu.pipeline_mode<synchronous>, transform_indices = @transform_22, window_bounds = array<i64: 1, 30>}, {pipeline_mode = #tpu.pipeline_mode<synchronous>, transform_indices = @transform_23, window_bounds = array<i64: 30, 30>}, {pipeline_mode = #tpu.pipeline_mode<synchronous>, transform_indices = @transform_24, window_bounds = array<i64: 1, 30>}, {pipeline_mode = #tpu.pipeline_mode<synchronous>, transform_indices = @transform_25, window_bounds = array<i64: 30, 4>}, {pipeline_mode = #tpu.pipeline_mode<synchronous>, transform_indices = @transform_26, window_bounds = array<i64: 30, 4>}, {pipeline_mode = #tpu.pipeline_mode<synchronous>, transform_indices = @transform_27, window_bounds = array<i64: 1, 4>}, {transform_indices = @transform_28, window_bounds = array<i64: 1, 1, 30>}, {transform_indices = @transform_29, window_bounds = array<i64: 1, 1, 4>}]} {
    %c0 = arith.constant 0 : index
    %c0_0 = arith.constant 0 : index
    %0 = vector.load %arg1[%c0, %c0_0] : memref<8x16xf32, #tpu.memory_space<vmem>>, vector<8x16xf32>
    %c0_1 = arith.constant 0 : index
    %c0_2 = arith.constant 0 : index
    %1 = vector.load %arg3[%c0_1, %c0_2] : memref<16x30xf32, #tpu.memory_space<vmem>>, vector<16x30xf32>
    %cst = arith.constant dense<0.000000e+00> : vector<8x30xf32>
    %2 = tpu.matmul %0, %1, %cst {dimension_numbers = #tpu.dot_dimension_numbers<[1], [0], [0], [1], [0, 0, 1, 1], [], []>} : vector<8x16xf32>, vector<16x30xf32>, vector<8x30xf32> -> vector<8x30xf32>
    %c0_3 = arith.constant 0 : index
    %c0_4 = arith.constant 0 : index
    %3 = vector.load %arg2[%c0_3, %c0_4] : memref<8x30xf32, #tpu.memory_space<vmem>>, vector<8x30xf32>
    %4 = arith.addf %2, %3 : vector<8x30xf32>
    %c0_5 = arith.constant 0 : index
    %c0_6 = arith.constant 0 : index
    %c0_7 = arith.constant 0 : index
    %5 = vector.load %arg4[%c0_5, %c0_6, %c0_7] : memref<5x1x30xf32, #tpu.memory_space<vmem>>, vector<1x1x30xf32>
    %6 = vector.shape_cast %5 : vector<1x1x30xf32> to vector<1x30xf32>
    %c0_8 = arith.constant 0 : index
    %c0_9 = arith.constant 0 : index
    %c0_10 = arith.constant 0 : index
    %7 = vector.load %arg5[%c0_8, %c0_9, %c0_10] : memref<5x1x30xf32, #tpu.memory_space<vmem>>, vector<1x1x30xf32>
    %8 = vector.shape_cast %7 : vector<1x1x30xf32> to vector<1x30xf32>
    %cst_11 = arith.constant dense<0.000000e+00> : vector<8xf32>
    %9 = vector.multi_reduction <add>, %4, %cst_11 [1] : vector<8x30xf32> to vector<8xf32>
    %10 = vector.shape_cast %9 : vector<8xf32> to vector<8x1xf32>
    %cst_12 = arith.constant 3.000000e+01 : f32
    %11 = vector.broadcast %cst_12 : f32 to vector<8x1xf32>
    %12 = arith.divf %10, %11 : vector<8x1xf32>
    %13 = vector.broadcast %12 : vector<8x1xf32> to vector<8x30xf32>
    %14 = arith.subf %4, %13 : vector<8x30xf32>
    %15 = arith.mulf %14, %14 : vector<8x30xf32>
    %cst_13 = arith.constant dense<0.000000e+00> : vector<8xf32>
    %16 = vector.multi_reduction <add>, %15, %cst_13 [1] : vector<8x30xf32> to vector<8xf32>
    %17 = vector.shape_cast %16 : vector<8xf32> to vector<8x1xf32>
    %cst_14 = arith.constant 3.000000e+01 : f32
    %18 = vector.broadcast %cst_14 : f32 to vector<8x1xf32>
    %19 = arith.divf %17, %18 : vector<8x1xf32>
    %20 = vector.broadcast %12 : vector<8x1xf32> to vector<8x30xf32>
    %21 = arith.subf %4, %20 : vector<8x30xf32>
    %cst_15 = arith.constant 9.99999974E-6 : f32
    %22 = vector.broadcast %cst_15 : f32 to vector<8x1xf32>
    %23 = arith.addf %19, %22 : vector<8x1xf32>
    %24 = math.rsqrt %23 : vector<8x1xf32>
    %25 = vector.broadcast %24 : vector<8x1xf32> to vector<8x30xf32>
    %26 = arith.mulf %21, %25 : vector<8x30xf32>
    %27 = vector.broadcast %6 : vector<1x30xf32> to vector<8x30xf32>
    %28 = arith.mulf %26, %27 : vector<8x30xf32>
    %29 = vector.broadcast %8 : vector<1x30xf32> to vector<8x30xf32>
    %30 = arith.addf %28, %29 : vector<8x30xf32>
    %c0_16 = arith.constant 0 : index
    %c0_17 = arith.constant 0 : index
    %c0_18 = arith.constant 0 : index
    %c0_19 = arith.constant 0 : index
    %31 = vector.load %arg6[%c0_16, %c0_17, %c0_18, %c0_19] : memref<5x5x30x6xf32, #tpu.memory_space<vmem>>, vector<1x1x30x6xf32>
    %32 = vector.shape_cast %31 : vector<1x1x30x6xf32> to vector<30x6xf32>
    %cst_20 = arith.constant dense<0.000000e+00> : vector<8x6xf32>
    %33 = tpu.matmul %30, %32, %cst_20 {dimension_numbers = #tpu.dot_dimension_numbers<[1], [0], [0], [1], [0, 0, 1, 1], [], []>} : vector<8x30xf32>, vector<30x6xf32>, vector<8x6xf32> -> vector<8x6xf32>
    %c0_21 = arith.constant 0 : index
    %c0_22 = arith.constant 0 : index
    %c0_23 = arith.constant 0 : index
    %c0_24 = arith.constant 0 : index
    %34 = vector.load %arg9[%c0_21, %c0_22, %c0_23, %c0_24] : memref<5x5x1x6xf32, #tpu.memory_space<vmem>>, vector<1x1x1x6xf32>
    %35 = vector.shape_cast %34 : vector<1x1x1x6xf32> to vector<1x6xf32>
    %36 = vector.broadcast %35 : vector<1x6xf32> to vector<8x6xf32>
    %37 = arith.addf %33, %36 : vector<8x6xf32>
    %cst_25 = arith.constant 0.408248305 : f32
    %38 = vector.broadcast %cst_25 : f32 to vector<8x6xf32>
    %39 = arith.mulf %37, %38 : vector<8x6xf32>
    %c0_26 = arith.constant 0 : index
    %c0_27 = arith.constant 0 : index
    %c0_28 = arith.constant 0 : index
    %c0_29 = arith.constant 0 : index
    %40 = vector.load %arg7[%c0_26, %c0_27, %c0_28, %c0_29] : memref<5x5x30x6xf32, #tpu.memory_space<vmem>>, vector<1x1x30x6xf32>
    %41 = vector.shape_cast %40 : vector<1x1x30x6xf32> to vector<30x6xf32>
    %cst_30 = arith.constant dense<0.000000e+00> : vector<8x6xf32>
    %42 = tpu.matmul %30, %41, %cst_30 {dimension_numbers = #tpu.dot_dimension_numbers<[1], [0], [0], [1], [0, 0, 1, 1], [], []>} : vector<8x30xf32>, vector<30x6xf32>, vector<8x6xf32> -> vector<8x6xf32>
    %c0_31 = arith.constant 0 : index
    %c0_32 = arith.constant 0 : index
    %c0_33 = arith.constant 0 : index
    %c0_34 = arith.constant 0 : index
    %43 = vector.load %arg10[%c0_31, %c0_32, %c0_33, %c0_34] : memref<5x5x1x6xf32, #tpu.memory_space<vmem>>, vector<1x1x1x6xf32>
    %44 = vector.shape_cast %43 : vector<1x1x1x6xf32> to vector<1x6xf32>
    %45 = vector.broadcast %44 : vector<1x6xf32> to vector<8x6xf32>
    %46 = arith.addf %42, %45 : vector<8x6xf32>
    %c0_35 = arith.constant 0 : index
    %c0_36 = arith.constant 0 : index
    %c0_37 = arith.constant 0 : index
    %c0_38 = arith.constant 0 : index
    %47 = vector.load %arg8[%c0_35, %c0_36, %c0_37, %c0_38] : memref<5x5x30x6xf32, #tpu.memory_space<vmem>>, vector<1x1x30x6xf32>
    %48 = vector.shape_cast %47 : vector<1x1x30x6xf32> to vector<30x6xf32>
    %cst_39 = arith.constant dense<0.000000e+00> : vector<8x6xf32>
    %49 = tpu.matmul %30, %48, %cst_39 {dimension_numbers = #tpu.dot_dimension_numbers<[1], [0], [0], [1], [0, 0, 1, 1], [], []>} : vector<8x30xf32>, vector<30x6xf32>, vector<8x6xf32> -> vector<8x6xf32>
    %c0_40 = arith.constant 0 : index
    %c0_41 = arith.constant 0 : index
    %c0_42 = arith.constant 0 : index
    %c0_43 = arith.constant 0 : index
    %50 = vector.load %arg11[%c0_40, %c0_41, %c0_42, %c0_43] : memref<5x5x1x6xf32, #tpu.memory_space<vmem>>, vector<1x1x1x6xf32>
    %51 = vector.shape_cast %50 : vector<1x1x1x6xf32> to vector<1x6xf32>
    %52 = vector.broadcast %51 : vector<1x6xf32> to vector<8x6xf32>
    %53 = arith.addf %49, %52 : vector<8x6xf32>
    %cst_44 = arith.constant dense<0.000000e+00> : vector<8x8xf32>
    %54 = tpu.matmul %39, %46, %cst_44 {dimension_numbers = #tpu.dot_dimension_numbers<[1], [1], [0], [0], [0, 0, 1, 0], [], []>} : vector<8x6xf32>, vector<8x6xf32>, vector<8x8xf32> -> vector<8x8xf32>
    %c0_45 = arith.constant 0 : index
    %c1 = arith.constant 1 : index
    %c0_46 = arith.constant 0 : index
    %c0_47 = arith.constant 0 : index
    %55 = vector.load %arg6[%c0_45, %c1, %c0_46, %c0_47] : memref<5x5x30x6xf32, #tpu.memory_space<vmem>>, vector<1x1x30x6xf32>
    %56 = vector.shape_cast %55 : vector<1x1x30x6xf32> to vector<30x6xf32>
    %cst_48 = arith.constant dense<0.000000e+00> : vector<8x6xf32>
    %57 = tpu.matmul %30, %56, %cst_48 {dimension_numbers = #tpu.dot_dimension_numbers<[1], [0], [0], [1], [0, 0, 1, 1], [], []>} : vector<8x30xf32>, vector<30x6xf32>, vector<8x6xf32> -> vector<8x6xf32>
    %c0_49 = arith.constant 0 : index
    %c1_50 = arith.constant 1 : index
    %c0_51 = arith.constant 0 : index
    %c0_52 = arith.constant 0 : index
    %58 = vector.load %arg9[%c0_49, %c1_50, %c0_51, %c0_52] : memref<5x5x1x6xf32, #tpu.memory_space<vmem>>, vector<1x1x1x6xf32>
    %59 = vector.shape_cast %58 : vector<1x1x1x6xf32> to vector<1x6xf32>
    %60 = vector.broadcast %59 : vector<1x6xf32> to vector<8x6xf32>
    %61 = arith.addf %57, %60 : vector<8x6xf32>
    %cst_53 = arith.constant 0.408248305 : f32
    %62 = vector.broadcast %cst_53 : f32 to vector<8x6xf32>
    %63 = arith.mulf %61, %62 : vector<8x6xf32>
    %c0_54 = arith.constant 0 : index
    %c1_55 = arith.constant 1 : index
    %c0_56 = arith.constant 0 : index
    %c0_57 = arith.constant 0 : index
    %64 = vector.load %arg7[%c0_54, %c1_55, %c0_56, %c0_57] : memref<5x5x30x6xf32, #tpu.memory_space<vmem>>, vector<1x1x30x6xf32>
    %65 = vector.shape_cast %64 : vector<1x1x30x6xf32> to vector<30x6xf32>
    %cst_58 = arith.constant dense<0.000000e+00> : vector<8x6xf32>
    %66 = tpu.matmul %30, %65, %cst_58 {dimension_numbers = #tpu.dot_dimension_numbers<[1], [0], [0], [1], [0, 0, 1, 1], [], []>} : vector<8x30xf32>, vector<30x6xf32>, vector<8x6xf32> -> vector<8x6xf32>
    %c0_59 = arith.constant 0 : index
    %c1_60 = arith.constant 1 : index
    %c0_61 = arith.constant 0 : index
    %c0_62 = arith.constant 0 : index
    %67 = vector.load %arg10[%c0_59, %c1_60, %c0_61, %c0_62] : memref<5x5x1x6xf32, #tpu.memory_space<vmem>>, vector<1x1x1x6xf32>
    %68 = vector.shape_cast %67 : vector<1x1x1x6xf32> to vector<1x6xf32>
    %69 = vector.broadcast %68 : vector<1x6xf32> to vector<8x6xf32>
    %70 = arith.addf %66, %69 : vector<8x6xf32>
    %c0_63 = arith.constant 0 : index
    %c1_64 = arith.constant 1 : index
    %c0_65 = arith.constant 0 : index
    %c0_66 = arith.constant 0 : index
    %71 = vector.load %arg8[%c0_63, %c1_64, %c0_65, %c0_66] : memref<5x5x30x6xf32, #tpu.memory_space<vmem>>, vector<1x1x30x6xf32>
    %72 = vector.shape_cast %71 : vector<1x1x30x6xf32> to vector<30x6xf32>
    %cst_67 = arith.constant dense<0.000000e+00> : vector<8x6xf32>
    %73 = tpu.matmul %30, %72, %cst_67 {dimension_numbers = #tpu.dot_dimension_numbers<[1], [0], [0], [1], [0, 0, 1, 1], [], []>} : vector<8x30xf32>, vector<30x6xf32>, vector<8x6xf32> -> vector<8x6xf32>
    %c0_68 = arith.constant 0 : index
    %c1_69 = arith.constant 1 : index
    %c0_70 = arith.constant 0 : index
    %c0_71 = arith.constant 0 : index
    %74 = vector.load %arg11[%c0_68, %c1_69, %c0_70, %c0_71] : memref<5x5x1x6xf32, #tpu.memory_space<vmem>>, vector<1x1x1x6xf32>
    %75 = vector.shape_cast %74 : vector<1x1x1x6xf32> to vector<1x6xf32>
    %76 = vector.broadcast %75 : vector<1x6xf32> to vector<8x6xf32>
    %77 = arith.addf %73, %76 : vector<8x6xf32>
    %cst_72 = arith.constant dense<0.000000e+00> : vector<8x8xf32>
    %78 = tpu.matmul %63, %70, %cst_72 {dimension_numbers = #tpu.dot_dimension_numbers<[1], [1], [0], [0], [0, 0, 1, 0], [], []>} : vector<8x6xf32>, vector<8x6xf32>, vector<8x8xf32> -> vector<8x8xf32>
    %c0_73 = arith.constant 0 : index
    %c2 = arith.constant 2 : index
    %c0_74 = arith.constant 0 : index
    %c0_75 = arith.constant 0 : index
    %79 = vector.load %arg6[%c0_73, %c2, %c0_74, %c0_75] : memref<5x5x30x6xf32, #tpu.memory_space<vmem>>, vector<1x1x30x6xf32>
    %80 = vector.shape_cast %79 : vector<1x1x30x6xf32> to vector<30x6xf32>
    %cst_76 = arith.constant dense<0.000000e+00> : vector<8x6xf32>
    %81 = tpu.matmul %30, %80, %cst_76 {dimension_numbers = #tpu.dot_dimension_numbers<[1], [0], [0], [1], [0, 0, 1, 1], [], []>} : vector<8x30xf32>, vector<30x6xf32>, vector<8x6xf32> -> vector<8x6xf32>
    %c0_77 = arith.constant 0 : index
    %c2_78 = arith.constant 2 : index
    %c0_79 = arith.constant 0 : index
    %c0_80 = arith.constant 0 : index
    %82 = vector.load %arg9[%c0_77, %c2_78, %c0_79, %c0_80] : memref<5x5x1x6xf32, #tpu.memory_space<vmem>>, vector<1x1x1x6xf32>
    %83 = vector.shape_cast %82 : vector<1x1x1x6xf32> to vector<1x6xf32>
    %84 = vector.broadcast %83 : vector<1x6xf32> to vector<8x6xf32>
    %85 = arith.addf %81, %84 : vector<8x6xf32>
    %cst_81 = arith.constant 0.408248305 : f32
    %86 = vector.broadcast %cst_81 : f32 to vector<8x6xf32>
    %87 = arith.mulf %85, %86 : vector<8x6xf32>
    %c0_82 = arith.constant 0 : index
    %c2_83 = arith.constant 2 : index
    %c0_84 = arith.constant 0 : index
    %c0_85 = arith.constant 0 : index
    %88 = vector.load %arg7[%c0_82, %c2_83, %c0_84, %c0_85] : memref<5x5x30x6xf32, #tpu.memory_space<vmem>>, vector<1x1x30x6xf32>
    %89 = vector.shape_cast %88 : vector<1x1x30x6xf32> to vector<30x6xf32>
    %cst_86 = arith.constant dense<0.000000e+00> : vector<8x6xf32>
    %90 = tpu.matmul %30, %89, %cst_86 {dimension_numbers = #tpu.dot_dimension_numbers<[1], [0], [0], [1], [0, 0, 1, 1], [], []>} : vector<8x30xf32>, vector<30x6xf32>, vector<8x6xf32> -> vector<8x6xf32>
    %c0_87 = arith.constant 0 : index
    %c2_88 = arith.constant 2 : index
    %c0_89 = arith.constant 0 : index
    %c0_90 = arith.constant 0 : index
    %91 = vector.load %arg10[%c0_87, %c2_88, %c0_89, %c0_90] : memref<5x5x1x6xf32, #tpu.memory_space<vmem>>, vector<1x1x1x6xf32>
    %92 = vector.shape_cast %91 : vector<1x1x1x6xf32> to vector<1x6xf32>
    %93 = vector.broadcast %92 : vector<1x6xf32> to vector<8x6xf32>
    %94 = arith.addf %90, %93 : vector<8x6xf32>
    %c0_91 = arith.constant 0 : index
    %c2_92 = arith.constant 2 : index
    %c0_93 = arith.constant 0 : index
    %c0_94 = arith.constant 0 : index
    %95 = vector.load %arg8[%c0_91, %c2_92, %c0_93, %c0_94] : memref<5x5x30x6xf32, #tpu.memory_space<vmem>>, vector<1x1x30x6xf32>
    %96 = vector.shape_cast %95 : vector<1x1x30x6xf32> to vector<30x6xf32>
    %cst_95 = arith.constant dense<0.000000e+00> : vector<8x6xf32>
    %97 = tpu.matmul %30, %96, %cst_95 {dimension_numbers = #tpu.dot_dimension_numbers<[1], [0], [0], [1], [0, 0, 1, 1], [], []>} : vector<8x30xf32>, vector<30x6xf32>, vector<8x6xf32> -> vector<8x6xf32>
    %c0_96 = arith.constant 0 : index
    %c2_97 = arith.constant 2 : index
    %c0_98 = arith.constant 0 : index
    %c0_99 = arith.constant 0 : index
    %98 = vector.load %arg11[%c0_96, %c2_97, %c0_98, %c0_99] : memref<5x5x1x6xf32, #tpu.memory_space<vmem>>, vector<1x1x1x6xf32>
    %99 = vector.shape_cast %98 : vector<1x1x1x6xf32> to vector<1x6xf32>
    %100 = vector.broadcast %99 : vector<1x6xf32> to vector<8x6xf32>
    %101 = arith.addf %97, %100 : vector<8x6xf32>
    %cst_100 = arith.constant dense<0.000000e+00> : vector<8x8xf32>
    %102 = tpu.matmul %87, %94, %cst_100 {dimension_numbers = #tpu.dot_dimension_numbers<[1], [1], [0], [0], [0, 0, 1, 0], [], []>} : vector<8x6xf32>, vector<8x6xf32>, vector<8x8xf32> -> vector<8x8xf32>
    %c0_101 = arith.constant 0 : index
    %c3 = arith.constant 3 : index
    %c0_102 = arith.constant 0 : index
    %c0_103 = arith.constant 0 : index
    %103 = vector.load %arg6[%c0_101, %c3, %c0_102, %c0_103] : memref<5x5x30x6xf32, #tpu.memory_space<vmem>>, vector<1x1x30x6xf32>
    %104 = vector.shape_cast %103 : vector<1x1x30x6xf32> to vector<30x6xf32>
    %cst_104 = arith.constant dense<0.000000e+00> : vector<8x6xf32>
    %105 = tpu.matmul %30, %104, %cst_104 {dimension_numbers = #tpu.dot_dimension_numbers<[1], [0], [0], [1], [0, 0, 1, 1], [], []>} : vector<8x30xf32>, vector<30x6xf32>, vector<8x6xf32> -> vector<8x6xf32>
    %c0_105 = arith.constant 0 : index
    %c3_106 = arith.constant 3 : index
    %c0_107 = arith.constant 0 : index
    %c0_108 = arith.constant 0 : index
    %106 = vector.load %arg9[%c0_105, %c3_106, %c0_107, %c0_108] : memref<5x5x1x6xf32, #tpu.memory_space<vmem>>, vector<1x1x1x6xf32>
    %107 = vector.shape_cast %106 : vector<1x1x1x6xf32> to vector<1x6xf32>
    %108 = vector.broadcast %107 : vector<1x6xf32> to vector<8x6xf32>
    %109 = arith.addf %105, %108 : vector<8x6xf32>
    %cst_109 = arith.constant 0.408248305 : f32
    %110 = vector.broadcast %cst_109 : f32 to vector<8x6xf32>
    %111 = arith.mulf %109, %110 : vector<8x6xf32>
    %c0_110 = arith.constant 0 : index
    %c3_111 = arith.constant 3 : index
    %c0_112 = arith.constant 0 : index
    %c0_113 = arith.constant 0 : index
    %112 = vector.load %arg7[%c0_110, %c3_111, %c0_112, %c0_113] : memref<5x5x30x6xf32, #tpu.memory_space<vmem>>, vector<1x1x30x6xf32>
    %113 = vector.shape_cast %112 : vector<1x1x30x6xf32> to vector<30x6xf32>
    %cst_114 = arith.constant dense<0.000000e+00> : vector<8x6xf32>
    %114 = tpu.matmul %30, %113, %cst_114 {dimension_numbers = #tpu.dot_dimension_numbers<[1], [0], [0], [1], [0, 0, 1, 1], [], []>} : vector<8x30xf32>, vector<30x6xf32>, vector<8x6xf32> -> vector<8x6xf32>
    %c0_115 = arith.constant 0 : index
    %c3_116 = arith.constant 3 : index
    %c0_117 = arith.constant 0 : index
    %c0_118 = arith.constant 0 : index
    %115 = vector.load %arg10[%c0_115, %c3_116, %c0_117, %c0_118] : memref<5x5x1x6xf32, #tpu.memory_space<vmem>>, vector<1x1x1x6xf32>
    %116 = vector.shape_cast %115 : vector<1x1x1x6xf32> to vector<1x6xf32>
    %117 = vector.broadcast %116 : vector<1x6xf32> to vector<8x6xf32>
    %118 = arith.addf %114, %117 : vector<8x6xf32>
    %c0_119 = arith.constant 0 : index
    %c3_120 = arith.constant 3 : index
    %c0_121 = arith.constant 0 : index
    %c0_122 = arith.constant 0 : index
    %119 = vector.load %arg8[%c0_119, %c3_120, %c0_121, %c0_122] : memref<5x5x30x6xf32, #tpu.memory_space<vmem>>, vector<1x1x30x6xf32>
    %120 = vector.shape_cast %119 : vector<1x1x30x6xf32> to vector<30x6xf32>
    %cst_123 = arith.constant dense<0.000000e+00> : vector<8x6xf32>
    %121 = tpu.matmul %30, %120, %cst_123 {dimension_numbers = #tpu.dot_dimension_numbers<[1], [0], [0], [1], [0, 0, 1, 1], [], []>} : vector<8x30xf32>, vector<30x6xf32>, vector<8x6xf32> -> vector<8x6xf32>
    %c0_124 = arith.constant 0 : index
    %c3_125 = arith.constant 3 : index
    %c0_126 = arith.constant 0 : index
    %c0_127 = arith.constant 0 : index
    %122 = vector.load %arg11[%c0_124, %c3_125, %c0_126, %c0_127] : memref<5x5x1x6xf32, #tpu.memory_space<vmem>>, vector<1x1x1x6xf32>
    %123 = vector.shape_cast %122 : vector<1x1x1x6xf32> to vector<1x6xf32>
    %124 = vector.broadcast %123 : vector<1x6xf32> to vector<8x6xf32>
    %125 = arith.addf %121, %124 : vector<8x6xf32>
    %cst_128 = arith.constant dense<0.000000e+00> : vector<8x8xf32>
    %126 = tpu.matmul %111, %118, %cst_128 {dimension_numbers = #tpu.dot_dimension_numbers<[1], [1], [0], [0], [0, 0, 1, 0], [], []>} : vector<8x6xf32>, vector<8x6xf32>, vector<8x8xf32> -> vector<8x8xf32>
    %c0_129 = arith.constant 0 : index
    %c4 = arith.constant 4 : index
    %c0_130 = arith.constant 0 : index
    %c0_131 = arith.constant 0 : index
    %127 = vector.load %arg6[%c0_129, %c4, %c0_130, %c0_131] : memref<5x5x30x6xf32, #tpu.memory_space<vmem>>, vector<1x1x30x6xf32>
    %128 = vector.shape_cast %127 : vector<1x1x30x6xf32> to vector<30x6xf32>
    %cst_132 = arith.constant dense<0.000000e+00> : vector<8x6xf32>
    %129 = tpu.matmul %30, %128, %cst_132 {dimension_numbers = #tpu.dot_dimension_numbers<[1], [0], [0], [1], [0, 0, 1, 1], [], []>} : vector<8x30xf32>, vector<30x6xf32>, vector<8x6xf32> -> vector<8x6xf32>
    %c0_133 = arith.constant 0 : index
    %c4_134 = arith.constant 4 : index
    %c0_135 = arith.constant 0 : index
    %c0_136 = arith.constant 0 : index
    %130 = vector.load %arg9[%c0_133, %c4_134, %c0_135, %c0_136] : memref<5x5x1x6xf32, #tpu.memory_space<vmem>>, vector<1x1x1x6xf32>
    %131 = vector.shape_cast %130 : vector<1x1x1x6xf32> to vector<1x6xf32>
    %132 = vector.broadcast %131 : vector<1x6xf32> to vector<8x6xf32>
    %133 = arith.addf %129, %132 : vector<8x6xf32>
    %cst_137 = arith.constant 0.408248305 : f32
    %134 = vector.broadcast %cst_137 : f32 to vector<8x6xf32>
    %135 = arith.mulf %133, %134 : vector<8x6xf32>
    %c0_138 = arith.constant 0 : index
    %c4_139 = arith.constant 4 : index
    %c0_140 = arith.constant 0 : index
    %c0_141 = arith.constant 0 : index
    %136 = vector.load %arg7[%c0_138, %c4_139, %c0_140, %c0_141] : memref<5x5x30x6xf32, #tpu.memory_space<vmem>>, vector<1x1x30x6xf32>
    %137 = vector.shape_cast %136 : vector<1x1x30x6xf32> to vector<30x6xf32>
    %cst_142 = arith.constant dense<0.000000e+00> : vector<8x6xf32>
    %138 = tpu.matmul %30, %137, %cst_142 {dimension_numbers = #tpu.dot_dimension_numbers<[1], [0], [0], [1], [0, 0, 1, 1], [], []>} : vector<8x30xf32>, vector<30x6xf32>, vector<8x6xf32> -> vector<8x6xf32>
    %c0_143 = arith.constant 0 : index
    %c4_144 = arith.constant 4 : index
    %c0_145 = arith.constant 0 : index
    %c0_146 = arith.constant 0 : index
    %139 = vector.load %arg10[%c0_143, %c4_144, %c0_145, %c0_146] : memref<5x5x1x6xf32, #tpu.memory_space<vmem>>, vector<1x1x1x6xf32>
    %140 = vector.shape_cast %139 : vector<1x1x1x6xf32> to vector<1x6xf32>
    %141 = vector.broadcast %140 : vector<1x6xf32> to vector<8x6xf32>
    %142 = arith.addf %138, %141 : vector<8x6xf32>
    %c0_147 = arith.constant 0 : index
    %c4_148 = arith.constant 4 : index
    %c0_149 = arith.constant 0 : index
    %c0_150 = arith.constant 0 : index
    %143 = vector.load %arg8[%c0_147, %c4_148, %c0_149, %c0_150] : memref<5x5x30x6xf32, #tpu.memory_space<vmem>>, vector<1x1x30x6xf32>
    %144 = vector.shape_cast %143 : vector<1x1x30x6xf32> to vector<30x6xf32>
    %cst_151 = arith.constant dense<0.000000e+00> : vector<8x6xf32>
    %145 = tpu.matmul %30, %144, %cst_151 {dimension_numbers = #tpu.dot_dimension_numbers<[1], [0], [0], [1], [0, 0, 1, 1], [], []>} : vector<8x30xf32>, vector<30x6xf32>, vector<8x6xf32> -> vector<8x6xf32>
    %c0_152 = arith.constant 0 : index
    %c4_153 = arith.constant 4 : index
    %c0_154 = arith.constant 0 : index
    %c0_155 = arith.constant 0 : index
    %146 = vector.load %arg11[%c0_152, %c4_153, %c0_154, %c0_155] : memref<5x5x1x6xf32, #tpu.memory_space<vmem>>, vector<1x1x1x6xf32>
    %147 = vector.shape_cast %146 : vector<1x1x1x6xf32> to vector<1x6xf32>
    %148 = vector.broadcast %147 : vector<1x6xf32> to vector<8x6xf32>
    %149 = arith.addf %145, %148 : vector<8x6xf32>
    %cst_156 = arith.constant dense<0.000000e+00> : vector<8x8xf32>
    %150 = tpu.matmul %135, %142, %cst_156 {dimension_numbers = #tpu.dot_dimension_numbers<[1], [1], [0], [0], [0, 0, 1, 0], [], []>} : vector<8x6xf32>, vector<8x6xf32>, vector<8x8xf32> -> vector<8x8xf32>
    %151 = tpu.concatenate %54, %78, %102, %126, %150 in 0 : vector<8x8xf32>, vector<8x8xf32>, vector<8x8xf32>, vector<8x8xf32>, vector<8x8xf32> -> vector<40x8xf32>
    %cst_157 = arith.constant dense<0xFF800000> : vector<40xf32>
    %152 = vector.multi_reduction <maximumf>, %151, %cst_157 [1] : vector<40x8xf32> to vector<40xf32>
    %153 = vector.shape_cast %152 : vector<40xf32> to vector<40x1xf32>
    %154 = vector.broadcast %153 : vector<40x1xf32> to vector<40x8xf32>
    %155 = arith.subf %151, %154 : vector<40x8xf32>
    %156 = math.exp %155 : vector<40x8xf32>
    %cst_158 = arith.constant dense<0.000000e+00> : vector<40xf32>
    %157 = vector.multi_reduction <add>, %156, %cst_158 [1] : vector<40x8xf32> to vector<40xf32>
    %158 = vector.shape_cast %157 : vector<40xf32> to vector<40x1xf32>
    %159 = vector.broadcast %158 : vector<40x1xf32> to vector<40x8xf32>
    %160 = arith.divf %156, %159 : vector<40x8xf32>
    %161 = vector.extract_strided_slice %160 {offsets = [0, 0], sizes = [8, 8], strides = [1, 1]} : vector<40x8xf32> to vector<8x8xf32>
    %cst_159 = arith.constant dense<0.000000e+00> : vector<8x6xf32>
    %162 = tpu.matmul %161, %53, %cst_159 {dimension_numbers = #tpu.dot_dimension_numbers<[1], [0], [0], [1], [0, 0, 1, 1], [], []>} : vector<8x8xf32>, vector<8x6xf32>, vector<8x6xf32> -> vector<8x6xf32>
    %c0_160 = arith.constant 0 : index
    %c0_161 = arith.constant 0 : index
    %c0_162 = arith.constant 0 : index
    %c0_163 = arith.constant 0 : index
    %163 = vector.load %arg12[%c0_160, %c0_161, %c0_162, %c0_163] : memref<5x5x6x30xf32, #tpu.memory_space<vmem>>, vector<1x1x6x30xf32>
    %164 = vector.shape_cast %163 : vector<1x1x6x30xf32> to vector<6x30xf32>
    %cst_164 = arith.constant dense<0.000000e+00> : vector<8x30xf32>
    %165 = tpu.matmul %162, %164, %cst_164 {dimension_numbers = #tpu.dot_dimension_numbers<[1], [0], [0], [1], [0, 0, 1, 1], [], []>} : vector<8x6xf32>, vector<6x30xf32>, vector<8x30xf32> -> vector<8x30xf32>
    %166 = vector.extract_strided_slice %160 {offsets = [8, 0], sizes = [8, 8], strides = [1, 1]} : vector<40x8xf32> to vector<8x8xf32>
    %cst_165 = arith.constant dense<0.000000e+00> : vector<8x6xf32>
    %167 = tpu.matmul %166, %77, %cst_165 {dimension_numbers = #tpu.dot_dimension_numbers<[1], [0], [0], [1], [0, 0, 1, 1], [], []>} : vector<8x8xf32>, vector<8x6xf32>, vector<8x6xf32> -> vector<8x6xf32>
    %c0_166 = arith.constant 0 : index
    %c1_167 = arith.constant 1 : index
    %c0_168 = arith.constant 0 : index
    %c0_169 = arith.constant 0 : index
    %168 = vector.load %arg12[%c0_166, %c1_167, %c0_168, %c0_169] : memref<5x5x6x30xf32, #tpu.memory_space<vmem>>, vector<1x1x6x30xf32>
    %169 = vector.shape_cast %168 : vector<1x1x6x30xf32> to vector<6x30xf32>
    %cst_170 = arith.constant dense<0.000000e+00> : vector<8x30xf32>
    %170 = tpu.matmul %167, %169, %cst_170 {dimension_numbers = #tpu.dot_dimension_numbers<[1], [0], [0], [1], [0, 0, 1, 1], [], []>} : vector<8x6xf32>, vector<6x30xf32>, vector<8x30xf32> -> vector<8x30xf32>
    %171 = arith.addf %165, %170 : vector<8x30xf32>
    %172 = vector.extract_strided_slice %160 {offsets = [16, 0], sizes = [8, 8], strides = [1, 1]} : vector<40x8xf32> to vector<8x8xf32>
    %cst_171 = arith.constant dense<0.000000e+00> : vector<8x6xf32>
    %173 = tpu.matmul %172, %101, %cst_171 {dimension_numbers = #tpu.dot_dimension_numbers<[1], [0], [0], [1], [0, 0, 1, 1], [], []>} : vector<8x8xf32>, vector<8x6xf32>, vector<8x6xf32> -> vector<8x6xf32>
    %c0_172 = arith.constant 0 : index
    %c2_173 = arith.constant 2 : index
    %c0_174 = arith.constant 0 : index
    %c0_175 = arith.constant 0 : index
    %174 = vector.load %arg12[%c0_172, %c2_173, %c0_174, %c0_175] : memref<5x5x6x30xf32, #tpu.memory_space<vmem>>, vector<1x1x6x30xf32>
    %175 = vector.shape_cast %174 : vector<1x1x6x30xf32> to vector<6x30xf32>
    %cst_176 = arith.constant dense<0.000000e+00> : vector<8x30xf32>
    %176 = tpu.matmul %173, %175, %cst_176 {dimension_numbers = #tpu.dot_dimension_numbers<[1], [0], [0], [1], [0, 0, 1, 1], [], []>} : vector<8x6xf32>, vector<6x30xf32>, vector<8x30xf32> -> vector<8x30xf32>
    %177 = arith.addf %171, %176 : vector<8x30xf32>
    %178 = vector.extract_strided_slice %160 {offsets = [24, 0], sizes = [8, 8], strides = [1, 1]} : vector<40x8xf32> to vector<8x8xf32>
    %cst_177 = arith.constant dense<0.000000e+00> : vector<8x6xf32>
    %179 = tpu.matmul %178, %125, %cst_177 {dimension_numbers = #tpu.dot_dimension_numbers<[1], [0], [0], [1], [0, 0, 1, 1], [], []>} : vector<8x8xf32>, vector<8x6xf32>, vector<8x6xf32> -> vector<8x6xf32>
    %c0_178 = arith.constant 0 : index
    %c3_179 = arith.constant 3 : index
    %c0_180 = arith.constant 0 : index
    %c0_181 = arith.constant 0 : index
    %180 = vector.load %arg12[%c0_178, %c3_179, %c0_180, %c0_181] : memref<5x5x6x30xf32, #tpu.memory_space<vmem>>, vector<1x1x6x30xf32>
    %181 = vector.shape_cast %180 : vector<1x1x6x30xf32> to vector<6x30xf32>
    %cst_182 = arith.constant dense<0.000000e+00> : vector<8x30xf32>
    %182 = tpu.matmul %179, %181, %cst_182 {dimension_numbers = #tpu.dot_dimension_numbers<[1], [0], [0], [1], [0, 0, 1, 1], [], []>} : vector<8x6xf32>, vector<6x30xf32>, vector<8x30xf32> -> vector<8x30xf32>
    %183 = arith.addf %177, %182 : vector<8x30xf32>
    %184 = vector.extract_strided_slice %160 {offsets = [32, 0], sizes = [8, 8], strides = [1, 1]} : vector<40x8xf32> to vector<8x8xf32>
    %cst_183 = arith.constant dense<0.000000e+00> : vector<8x6xf32>
    %185 = tpu.matmul %184, %149, %cst_183 {dimension_numbers = #tpu.dot_dimension_numbers<[1], [0], [0], [1], [0, 0, 1, 1], [], []>} : vector<8x8xf32>, vector<8x6xf32>, vector<8x6xf32> -> vector<8x6xf32>
    %c0_184 = arith.constant 0 : index
    %c4_185 = arith.constant 4 : index
    %c0_186 = arith.constant 0 : index
    %c0_187 = arith.constant 0 : index
    %186 = vector.load %arg12[%c0_184, %c4_185, %c0_186, %c0_187] : memref<5x5x6x30xf32, #tpu.memory_space<vmem>>, vector<1x1x6x30xf32>
    %187 = vector.shape_cast %186 : vector<1x1x6x30xf32> to vector<6x30xf32>
    %cst_188 = arith.constant dense<0.000000e+00> : vector<8x30xf32>
    %188 = tpu.matmul %185, %187, %cst_188 {dimension_numbers = #tpu.dot_dimension_numbers<[1], [0], [0], [1], [0, 0, 1, 1], [], []>} : vector<8x6xf32>, vector<6x30xf32>, vector<8x30xf32> -> vector<8x30xf32>
    %189 = arith.addf %183, %188 : vector<8x30xf32>
    %190 = arith.addf %4, %189 : vector<8x30xf32>
    %c0_189 = arith.constant 0 : index
    %c0_190 = arith.constant 0 : index
    %c0_191 = arith.constant 0 : index
    %191 = vector.load %arg13[%c0_189, %c0_190, %c0_191] : memref<5x1x30xf32, #tpu.memory_space<vmem>>, vector<1x1x30xf32>
    %192 = vector.shape_cast %191 : vector<1x1x30xf32> to vector<1x30xf32>
    %193 = vector.broadcast %192 : vector<1x30xf32> to vector<8x30xf32>
    %194 = arith.addf %190, %193 : vector<8x30xf32>
    %c0_192 = arith.constant 0 : index
    %c0_193 = arith.constant 0 : index
    %c0_194 = arith.constant 0 : index
    %195 = vector.load %arg14[%c0_192, %c0_193, %c0_194] : memref<5x1x30xf32, #tpu.memory_space<vmem>>, vector<1x1x30xf32>
    %196 = vector.shape_cast %195 : vector<1x1x30xf32> to vector<1x30xf32>
    %c0_195 = arith.constant 0 : index
    %c0_196 = arith.constant 0 : index
    %c0_197 = arith.constant 0 : index
    %197 = vector.load %arg15[%c0_195, %c0_196, %c0_197] : memref<5x1x30xf32, #tpu.memory_space<vmem>>, vector<1x1x30xf32>
    %198 = vector.shape_cast %197 : vector<1x1x30xf32> to vector<1x30xf32>
    %cst_198 = arith.constant dense<0.000000e+00> : vector<8xf32>
    %199 = vector.multi_reduction <add>, %194, %cst_198 [1] : vector<8x30xf32> to vector<8xf32>
    %200 = vector.shape_cast %199 : vector<8xf32> to vector<8x1xf32>
    %cst_199 = arith.constant 3.000000e+01 : f32
    %201 = vector.broadcast %cst_199 : f32 to vector<8x1xf32>
    %202 = arith.divf %200, %201 : vector<8x1xf32>
    %203 = vector.broadcast %202 : vector<8x1xf32> to vector<8x30xf32>
    %204 = arith.subf %194, %203 : vector<8x30xf32>
    %205 = arith.mulf %204, %204 : vector<8x30xf32>
    %cst_200 = arith.constant dense<0.000000e+00> : vector<8xf32>
    %206 = vector.multi_reduction <add>, %205, %cst_200 [1] : vector<8x30xf32> to vector<8xf32>
    %207 = vector.shape_cast %206 : vector<8xf32> to vector<8x1xf32>
    %cst_201 = arith.constant 3.000000e+01 : f32
    %208 = vector.broadcast %cst_201 : f32 to vector<8x1xf32>
    %209 = arith.divf %207, %208 : vector<8x1xf32>
    %210 = vector.broadcast %202 : vector<8x1xf32> to vector<8x30xf32>
    %211 = arith.subf %194, %210 : vector<8x30xf32>
    %cst_202 = arith.constant 9.99999974E-6 : f32
    %212 = vector.broadcast %cst_202 : f32 to vector<8x1xf32>
    %213 = arith.addf %209, %212 : vector<8x1xf32>
    %214 = math.rsqrt %213 : vector<8x1xf32>
    %215 = vector.broadcast %214 : vector<8x1xf32> to vector<8x30xf32>
    %216 = arith.mulf %211, %215 : vector<8x30xf32>
    %217 = vector.broadcast %196 : vector<1x30xf32> to vector<8x30xf32>
    %218 = arith.mulf %216, %217 : vector<8x30xf32>
    %219 = vector.broadcast %198 : vector<1x30xf32> to vector<8x30xf32>
    %220 = arith.addf %218, %219 : vector<8x30xf32>
    %c0_203 = arith.constant 0 : index
    %c0_204 = arith.constant 0 : index
    %c0_205 = arith.constant 0 : index
    %221 = vector.load %arg16[%c0_203, %c0_204, %c0_205] : memref<5x30x120xf32, #tpu.memory_space<vmem>>, vector<1x30x120xf32>
    %222 = vector.shape_cast %221 : vector<1x30x120xf32> to vector<30x120xf32>
    %cst_206 = arith.constant dense<0.000000e+00> : vector<8x120xf32>
    %223 = tpu.matmul %220, %222, %cst_206 {dimension_numbers = #tpu.dot_dimension_numbers<[1], [0], [0], [1], [0, 0, 1, 1], [], []>} : vector<8x30xf32>, vector<30x120xf32>, vector<8x120xf32> -> vector<8x120xf32>
    %c0_207 = arith.constant 0 : index
    %c0_208 = arith.constant 0 : index
    %c0_209 = arith.constant 0 : index
    %224 = vector.load %arg17[%c0_207, %c0_208, %c0_209] : memref<5x1x120xf32, #tpu.memory_space<vmem>>, vector<1x1x120xf32>
    %225 = vector.shape_cast %224 : vector<1x1x120xf32> to vector<1x120xf32>
    %226 = vector.broadcast %225 : vector<1x120xf32> to vector<8x120xf32>
    %227 = arith.addf %223, %226 : vector<8x120xf32>
    %cst_210 = arith.constant 0.000000e+00 : f32
    %228 = vector.broadcast %cst_210 : f32 to vector<8x120xf32>
    %229 = arith.maximumf %227, %228 : vector<8x120xf32>
    %c0_211 = arith.constant 0 : index
    %c0_212 = arith.constant 0 : index
    %c0_213 = arith.constant 0 : index
    %230 = vector.load %arg18[%c0_211, %c0_212, %c0_213] : memref<5x120x30xf32, #tpu.memory_space<vmem>>, vector<1x120x30xf32>
    %231 = vector.shape_cast %230 : vector<1x120x30xf32> to vector<120x30xf32>
    %cst_214 = arith.constant dense<0.000000e+00> : vector<8x30xf32>
    %232 = tpu.matmul %229, %231, %cst_214 {dimension_numbers = #tpu.dot_dimension_numbers<[1], [0], [0], [1], [0, 0, 1, 1], [], []>} : vector<8x120xf32>, vector<120x30xf32>, vector<8x30xf32> -> vector<8x30xf32>
    %233 = arith.addf %194, %232 : vector<8x30xf32>
    %c0_215 = arith.constant 0 : index
    %c0_216 = arith.constant 0 : index
    %c0_217 = arith.constant 0 : index
    %234 = vector.load %arg19[%c0_215, %c0_216, %c0_217] : memref<5x1x30xf32, #tpu.memory_space<vmem>>, vector<1x1x30xf32>
    %235 = vector.shape_cast %234 : vector<1x1x30xf32> to vector<1x30xf32>
    %236 = vector.broadcast %235 : vector<1x30xf32> to vector<8x30xf32>
    %237 = arith.addf %233, %236 : vector<8x30xf32>
    %c1_218 = arith.constant 1 : index
    %c0_219 = arith.constant 0 : index
    %c0_220 = arith.constant 0 : index
    %238 = vector.load %arg4[%c1_218, %c0_219, %c0_220] : memref<5x1x30xf32, #tpu.memory_space<vmem>>, vector<1x1x30xf32>
    %239 = vector.shape_cast %238 : vector<1x1x30xf32> to vector<1x30xf32>
    %c1_221 = arith.constant 1 : index
    %c0_222 = arith.constant 0 : index
    %c0_223 = arith.constant 0 : index
    %240 = vector.load %arg5[%c1_221, %c0_222, %c0_223] : memref<5x1x30xf32, #tpu.memory_space<vmem>>, vector<1x1x30xf32>
    %241 = vector.shape_cast %240 : vector<1x1x30xf32> to vector<1x30xf32>
    %cst_224 = arith.constant dense<0.000000e+00> : vector<8xf32>
    %242 = vector.multi_reduction <add>, %237, %cst_224 [1] : vector<8x30xf32> to vector<8xf32>
    %243 = vector.shape_cast %242 : vector<8xf32> to vector<8x1xf32>
    %cst_225 = arith.constant 3.000000e+01 : f32
    %244 = vector.broadcast %cst_225 : f32 to vector<8x1xf32>
    %245 = arith.divf %243, %244 : vector<8x1xf32>
    %246 = vector.broadcast %245 : vector<8x1xf32> to vector<8x30xf32>
    %247 = arith.subf %237, %246 : vector<8x30xf32>
    %248 = arith.mulf %247, %247 : vector<8x30xf32>
    %cst_226 = arith.constant dense<0.000000e+00> : vector<8xf32>
    %249 = vector.multi_reduction <add>, %248, %cst_226 [1] : vector<8x30xf32> to vector<8xf32>
    %250 = vector.shape_cast %249 : vector<8xf32> to vector<8x1xf32>
    %cst_227 = arith.constant 3.000000e+01 : f32
    %251 = vector.broadcast %cst_227 : f32 to vector<8x1xf32>
    %252 = arith.divf %250, %251 : vector<8x1xf32>
    %253 = vector.broadcast %245 : vector<8x1xf32> to vector<8x30xf32>
    %254 = arith.subf %237, %253 : vector<8x30xf32>
    %cst_228 = arith.constant 9.99999974E-6 : f32
    %255 = vector.broadcast %cst_228 : f32 to vector<8x1xf32>
    %256 = arith.addf %252, %255 : vector<8x1xf32>
    %257 = math.rsqrt %256 : vector<8x1xf32>
    %258 = vector.broadcast %257 : vector<8x1xf32> to vector<8x30xf32>
    %259 = arith.mulf %254, %258 : vector<8x30xf32>
    %260 = vector.broadcast %239 : vector<1x30xf32> to vector<8x30xf32>
    %261 = arith.mulf %259, %260 : vector<8x30xf32>
    %262 = vector.broadcast %241 : vector<1x30xf32> to vector<8x30xf32>
    %263 = arith.addf %261, %262 : vector<8x30xf32>
    %c1_229 = arith.constant 1 : index
    %c0_230 = arith.constant 0 : index
    %c0_231 = arith.constant 0 : index
    %c0_232 = arith.constant 0 : index
    %264 = vector.load %arg6[%c1_229, %c0_230, %c0_231, %c0_232] : memref<5x5x30x6xf32, #tpu.memory_space<vmem>>, vector<1x1x30x6xf32>
    %265 = vector.shape_cast %264 : vector<1x1x30x6xf32> to vector<30x6xf32>
    %cst_233 = arith.constant dense<0.000000e+00> : vector<8x6xf32>
    %266 = tpu.matmul %263, %265, %cst_233 {dimension_numbers = #tpu.dot_dimension_numbers<[1], [0], [0], [1], [0, 0, 1, 1], [], []>} : vector<8x30xf32>, vector<30x6xf32>, vector<8x6xf32> -> vector<8x6xf32>
    %c1_234 = arith.constant 1 : index
    %c0_235 = arith.constant 0 : index
    %c0_236 = arith.constant 0 : index
    %c0_237 = arith.constant 0 : index
    %267 = vector.load %arg9[%c1_234, %c0_235, %c0_236, %c0_237] : memref<5x5x1x6xf32, #tpu.memory_space<vmem>>, vector<1x1x1x6xf32>
    %268 = vector.shape_cast %267 : vector<1x1x1x6xf32> to vector<1x6xf32>
    %269 = vector.broadcast %268 : vector<1x6xf32> to vector<8x6xf32>
    %270 = arith.addf %266, %269 : vector<8x6xf32>
    %cst_238 = arith.constant 0.408248305 : f32
    %271 = vector.broadcast %cst_238 : f32 to vector<8x6xf32>
    %272 = arith.mulf %270, %271 : vector<8x6xf32>
    %c1_239 = arith.constant 1 : index
    %c0_240 = arith.constant 0 : index
    %c0_241 = arith.constant 0 : index
    %c0_242 = arith.constant 0 : index
    %273 = vector.load %arg7[%c1_239, %c0_240, %c0_241, %c0_242] : memref<5x5x30x6xf32, #tpu.memory_space<vmem>>, vector<1x1x30x6xf32>
    %274 = vector.shape_cast %273 : vector<1x1x30x6xf32> to vector<30x6xf32>
    %cst_243 = arith.constant dense<0.000000e+00> : vector<8x6xf32>
    %275 = tpu.matmul %263, %274, %cst_243 {dimension_numbers = #tpu.dot_dimension_numbers<[1], [0], [0], [1], [0, 0, 1, 1], [], []>} : vector<8x30xf32>, vector<30x6xf32>, vector<8x6xf32> -> vector<8x6xf32>
    %c1_244 = arith.constant 1 : index
    %c0_245 = arith.constant 0 : index
    %c0_246 = arith.constant 0 : index
    %c0_247 = arith.constant 0 : index
    %276 = vector.load %arg10[%c1_244, %c0_245, %c0_246, %c0_247] : memref<5x5x1x6xf32, #tpu.memory_space<vmem>>, vector<1x1x1x6xf32>
    %277 = vector.shape_cast %276 : vector<1x1x1x6xf32> to vector<1x6xf32>
    %278 = vector.broadcast %277 : vector<1x6xf32> to vector<8x6xf32>
    %279 = arith.addf %275, %278 : vector<8x6xf32>
    %c1_248 = arith.constant 1 : index
    %c0_249 = arith.constant 0 : index
    %c0_250 = arith.constant 0 : index
    %c0_251 = arith.constant 0 : index
    %280 = vector.load %arg8[%c1_248, %c0_249, %c0_250, %c0_251] : memref<5x5x30x6xf32, #tpu.memory_space<vmem>>, vector<1x1x30x6xf32>
    %281 = vector.shape_cast %280 : vector<1x1x30x6xf32> to vector<30x6xf32>
    %cst_252 = arith.constant dense<0.000000e+00> : vector<8x6xf32>
    %282 = tpu.matmul %263, %281, %cst_252 {dimension_numbers = #tpu.dot_dimension_numbers<[1], [0], [0], [1], [0, 0, 1, 1], [], []>} : vector<8x30xf32>, vector<30x6xf32>, vector<8x6xf32> -> vector<8x6xf32>
    %c1_253 = arith.constant 1 : index
    %c0_254 = arith.constant 0 : index
    %c0_255 = arith.constant 0 : index
    %c0_256 = arith.constant 0 : index
    %283 = vector.load %arg11[%c1_253, %c0_254, %c0_255, %c0_256] : memref<5x5x1x6xf32, #tpu.memory_space<vmem>>, vector<1x1x1x6xf32>
    %284 = vector.shape_cast %283 : vector<1x1x1x6xf32> to vector<1x6xf32>
    %285 = vector.broadcast %284 : vector<1x6xf32> to vector<8x6xf32>
    %286 = arith.addf %282, %285 : vector<8x6xf32>
    %cst_257 = arith.constant dense<0.000000e+00> : vector<8x8xf32>
    %287 = tpu.matmul %272, %279, %cst_257 {dimension_numbers = #tpu.dot_dimension_numbers<[1], [1], [0], [0], [0, 0, 1, 0], [], []>} : vector<8x6xf32>, vector<8x6xf32>, vector<8x8xf32> -> vector<8x8xf32>
    %c1_258 = arith.constant 1 : index
    %c1_259 = arith.constant 1 : index
    %c0_260 = arith.constant 0 : index
    %c0_261 = arith.constant 0 : index
    %288 = vector.load %arg6[%c1_258, %c1_259, %c0_260, %c0_261] : memref<5x5x30x6xf32, #tpu.memory_space<vmem>>, vector<1x1x30x6xf32>
    %289 = vector.shape_cast %288 : vector<1x1x30x6xf32> to vector<30x6xf32>
    %cst_262 = arith.constant dense<0.000000e+00> : vector<8x6xf32>
    %290 = tpu.matmul %263, %289, %cst_262 {dimension_numbers = #tpu.dot_dimension_numbers<[1], [0], [0], [1], [0, 0, 1, 1], [], []>} : vector<8x30xf32>, vector<30x6xf32>, vector<8x6xf32> -> vector<8x6xf32>
    %c1_263 = arith.constant 1 : index
    %c1_264 = arith.constant 1 : index
    %c0_265 = arith.constant 0 : index
    %c0_266 = arith.constant 0 : index
    %291 = vector.load %arg9[%c1_263, %c1_264, %c0_265, %c0_266] : memref<5x5x1x6xf32, #tpu.memory_space<vmem>>, vector<1x1x1x6xf32>
    %292 = vector.shape_cast %291 : vector<1x1x1x6xf32> to vector<1x6xf32>
    %293 = vector.broadcast %292 : vector<1x6xf32> to vector<8x6xf32>
    %294 = arith.addf %290, %293 : vector<8x6xf32>
    %cst_267 = arith.constant 0.408248305 : f32
    %295 = vector.broadcast %cst_267 : f32 to vector<8x6xf32>
    %296 = arith.mulf %294, %295 : vector<8x6xf32>
    %c1_268 = arith.constant 1 : index
    %c1_269 = arith.constant 1 : index
    %c0_270 = arith.constant 0 : index
    %c0_271 = arith.constant 0 : index
    %297 = vector.load %arg7[%c1_268, %c1_269, %c0_270, %c0_271] : memref<5x5x30x6xf32, #tpu.memory_space<vmem>>, vector<1x1x30x6xf32>
    %298 = vector.shape_cast %297 : vector<1x1x30x6xf32> to vector<30x6xf32>
    %cst_272 = arith.constant dense<0.000000e+00> : vector<8x6xf32>
    %299 = tpu.matmul %263, %298, %cst_272 {dimension_numbers = #tpu.dot_dimension_numbers<[1], [0], [0], [1], [0, 0, 1, 1], [], []>} : vector<8x30xf32>, vector<30x6xf32>, vector<8x6xf32> -> vector<8x6xf32>
    %c1_273 = arith.constant 1 : index
    %c1_274 = arith.constant 1 : index
    %c0_275 = arith.constant 0 : index
    %c0_276 = arith.constant 0 : index
    %300 = vector.load %arg10[%c1_273, %c1_274, %c0_275, %c0_276] : memref<5x5x1x6xf32, #tpu.memory_space<vmem>>, vector<1x1x1x6xf32>
    %301 = vector.shape_cast %300 : vector<1x1x1x6xf32> to vector<1x6xf32>
    %302 = vector.broadcast %301 : vector<1x6xf32> to vector<8x6xf32>
    %303 = arith.addf %299, %302 : vector<8x6xf32>
    %c1_277 = arith.constant 1 : index
    %c1_278 = arith.constant 1 : index
    %c0_279 = arith.constant 0 : index
    %c0_280 = arith.constant 0 : index
    %304 = vector.load %arg8[%c1_277, %c1_278, %c0_279, %c0_280] : memref<5x5x30x6xf32, #tpu.memory_space<vmem>>, vector<1x1x30x6xf32>
    %305 = vector.shape_cast %304 : vector<1x1x30x6xf32> to vector<30x6xf32>
    %cst_281 = arith.constant dense<0.000000e+00> : vector<8x6xf32>
    %306 = tpu.matmul %263, %305, %cst_281 {dimension_numbers = #tpu.dot_dimension_numbers<[1], [0], [0], [1], [0, 0, 1, 1], [], []>} : vector<8x30xf32>, vector<30x6xf32>, vector<8x6xf32> -> vector<8x6xf32>
    %c1_282 = arith.constant 1 : index
    %c1_283 = arith.constant 1 : index
    %c0_284 = arith.constant 0 : index
    %c0_285 = arith.constant 0 : index
    %307 = vector.load %arg11[%c1_282, %c1_283, %c0_284, %c0_285] : memref<5x5x1x6xf32, #tpu.memory_space<vmem>>, vector<1x1x1x6xf32>
    %308 = vector.shape_cast %307 : vector<1x1x1x6xf32> to vector<1x6xf32>
    %309 = vector.broadcast %308 : vector<1x6xf32> to vector<8x6xf32>
    %310 = arith.addf %306, %309 : vector<8x6xf32>
    %cst_286 = arith.constant dense<0.000000e+00> : vector<8x8xf32>
    %311 = tpu.matmul %296, %303, %cst_286 {dimension_numbers = #tpu.dot_dimension_numbers<[1], [1], [0], [0], [0, 0, 1, 0], [], []>} : vector<8x6xf32>, vector<8x6xf32>, vector<8x8xf32> -> vector<8x8xf32>
    %c1_287 = arith.constant 1 : index
    %c2_288 = arith.constant 2 : index
    %c0_289 = arith.constant 0 : index
    %c0_290 = arith.constant 0 : index
    %312 = vector.load %arg6[%c1_287, %c2_288, %c0_289, %c0_290] : memref<5x5x30x6xf32, #tpu.memory_space<vmem>>, vector<1x1x30x6xf32>
    %313 = vector.shape_cast %312 : vector<1x1x30x6xf32> to vector<30x6xf32>
    %cst_291 = arith.constant dense<0.000000e+00> : vector<8x6xf32>
    %314 = tpu.matmul %263, %313, %cst_291 {dimension_numbers = #tpu.dot_dimension_numbers<[1], [0], [0], [1], [0, 0, 1, 1], [], []>} : vector<8x30xf32>, vector<30x6xf32>, vector<8x6xf32> -> vector<8x6xf32>
    %c1_292 = arith.constant 1 : index
    %c2_293 = arith.constant 2 : index
    %c0_294 = arith.constant 0 : index
    %c0_295 = arith.constant 0 : index
    %315 = vector.load %arg9[%c1_292, %c2_293, %c0_294, %c0_295] : memref<5x5x1x6xf32, #tpu.memory_space<vmem>>, vector<1x1x1x6xf32>
    %316 = vector.shape_cast %315 : vector<1x1x1x6xf32> to vector<1x6xf32>
    %317 = vector.broadcast %316 : vector<1x6xf32> to vector<8x6xf32>
    %318 = arith.addf %314, %317 : vector<8x6xf32>
    %cst_296 = arith.constant 0.408248305 : f32
    %319 = vector.broadcast %cst_296 : f32 to vector<8x6xf32>
    %320 = arith.mulf %318, %319 : vector<8x6xf32>
    %c1_297 = arith.constant 1 : index
    %c2_298 = arith.constant 2 : index
    %c0_299 = arith.constant 0 : index
    %c0_300 = arith.constant 0 : index
    %321 = vector.load %arg7[%c1_297, %c2_298, %c0_299, %c0_300] : memref<5x5x30x6xf32, #tpu.memory_space<vmem>>, vector<1x1x30x6xf32>
    %322 = vector.shape_cast %321 : vector<1x1x30x6xf32> to vector<30x6xf32>
    %cst_301 = arith.constant dense<0.000000e+00> : vector<8x6xf32>
    %323 = tpu.matmul %263, %322, %cst_301 {dimension_numbers = #tpu.dot_dimension_numbers<[1], [0], [0], [1], [0, 0, 1, 1], [], []>} : vector<8x30xf32>, vector<30x6xf32>, vector<8x6xf32> -> vector<8x6xf32>
    %c1_302 = arith.constant 1 : index
    %c2_303 = arith.constant 2 : index
    %c0_304 = arith.constant 0 : index
    %c0_305 = arith.constant 0 : index
    %324 = vector.load %arg10[%c1_302, %c2_303, %c0_304, %c0_305] : memref<5x5x1x6xf32, #tpu.memory_space<vmem>>, vector<1x1x1x6xf32>
    %325 = vector.shape_cast %324 : vector<1x1x1x6xf32> to vector<1x6xf32>
    %326 = vector.broadcast %325 : vector<1x6xf32> to vector<8x6xf32>
    %327 = arith.addf %323, %326 : vector<8x6xf32>
    %c1_306 = arith.constant 1 : index
    %c2_307 = arith.constant 2 : index
    %c0_308 = arith.constant 0 : index
    %c0_309 = arith.constant 0 : index
    %328 = vector.load %arg8[%c1_306, %c2_307, %c0_308, %c0_309] : memref<5x5x30x6xf32, #tpu.memory_space<vmem>>, vector<1x1x30x6xf32>
    %329 = vector.shape_cast %328 : vector<1x1x30x6xf32> to vector<30x6xf32>
    %cst_310 = arith.constant dense<0.000000e+00> : vector<8x6xf32>
    %330 = tpu.matmul %263, %329, %cst_310 {dimension_numbers = #tpu.dot_dimension_numbers<[1], [0], [0], [1], [0, 0, 1, 1], [], []>} : vector<8x30xf32>, vector<30x6xf32>, vector<8x6xf32> -> vector<8x6xf32>
    %c1_311 = arith.constant 1 : index
    %c2_312 = arith.constant 2 : index
    %c0_313 = arith.constant 0 : index
    %c0_314 = arith.constant 0 : index
    %331 = vector.load %arg11[%c1_311, %c2_312, %c0_313, %c0_314] : memref<5x5x1x6xf32, #tpu.memory_space<vmem>>, vector<1x1x1x6xf32>
    %332 = vector.shape_cast %331 : vector<1x1x1x6xf32> to vector<1x6xf32>
    %333 = vector.broadcast %332 : vector<1x6xf32> to vector<8x6xf32>
    %334 = arith.addf %330, %333 : vector<8x6xf32>
    %cst_315 = arith.constant dense<0.000000e+00> : vector<8x8xf32>
    %335 = tpu.matmul %320, %327, %cst_315 {dimension_numbers = #tpu.dot_dimension_numbers<[1], [1], [0], [0], [0, 0, 1, 0], [], []>} : vector<8x6xf32>, vector<8x6xf32>, vector<8x8xf32> -> vector<8x8xf32>
    %c1_316 = arith.constant 1 : index
    %c3_317 = arith.constant 3 : index
    %c0_318 = arith.constant 0 : index
    %c0_319 = arith.constant 0 : index
    %336 = vector.load %arg6[%c1_316, %c3_317, %c0_318, %c0_319] : memref<5x5x30x6xf32, #tpu.memory_space<vmem>>, vector<1x1x30x6xf32>
    %337 = vector.shape_cast %336 : vector<1x1x30x6xf32> to vector<30x6xf32>
    %cst_320 = arith.constant dense<0.000000e+00> : vector<8x6xf32>
    %338 = tpu.matmul %263, %337, %cst_320 {dimension_numbers = #tpu.dot_dimension_numbers<[1], [0], [0], [1], [0, 0, 1, 1], [], []>} : vector<8x30xf32>, vector<30x6xf32>, vector<8x6xf32> -> vector<8x6xf32>
    %c1_321 = arith.constant 1 : index
    %c3_322 = arith.constant 3 : index
    %c0_323 = arith.constant 0 : index
    %c0_324 = arith.constant 0 : index
    %339 = vector.load %arg9[%c1_321, %c3_322, %c0_323, %c0_324] : memref<5x5x1x6xf32, #tpu.memory_space<vmem>>, vector<1x1x1x6xf32>
    %340 = vector.shape_cast %339 : vector<1x1x1x6xf32> to vector<1x6xf32>
    %341 = vector.broadcast %340 : vector<1x6xf32> to vector<8x6xf32>
    %342 = arith.addf %338, %341 : vector<8x6xf32>
    %cst_325 = arith.constant 0.408248305 : f32
    %343 = vector.broadcast %cst_325 : f32 to vector<8x6xf32>
    %344 = arith.mulf %342, %343 : vector<8x6xf32>
    %c1_326 = arith.constant 1 : index
    %c3_327 = arith.constant 3 : index
    %c0_328 = arith.constant 0 : index
    %c0_329 = arith.constant 0 : index
    %345 = vector.load %arg7[%c1_326, %c3_327, %c0_328, %c0_329] : memref<5x5x30x6xf32, #tpu.memory_space<vmem>>, vector<1x1x30x6xf32>
    %346 = vector.shape_cast %345 : vector<1x1x30x6xf32> to vector<30x6xf32>
    %cst_330 = arith.constant dense<0.000000e+00> : vector<8x6xf32>
    %347 = tpu.matmul %263, %346, %cst_330 {dimension_numbers = #tpu.dot_dimension_numbers<[1], [0], [0], [1], [0, 0, 1, 1], [], []>} : vector<8x30xf32>, vector<30x6xf32>, vector<8x6xf32> -> vector<8x6xf32>
    %c1_331 = arith.constant 1 : index
    %c3_332 = arith.constant 3 : index
    %c0_333 = arith.constant 0 : index
    %c0_334 = arith.constant 0 : index
    %348 = vector.load %arg10[%c1_331, %c3_332, %c0_333, %c0_334] : memref<5x5x1x6xf32, #tpu.memory_space<vmem>>, vector<1x1x1x6xf32>
    %349 = vector.shape_cast %348 : vector<1x1x1x6xf32> to vector<1x6xf32>
    %350 = vector.broadcast %349 : vector<1x6xf32> to vector<8x6xf32>
    %351 = arith.addf %347, %350 : vector<8x6xf32>
    %c1_335 = arith.constant 1 : index
    %c3_336 = arith.constant 3 : index
    %c0_337 = arith.constant 0 : index
    %c0_338 = arith.constant 0 : index
    %352 = vector.load %arg8[%c1_335, %c3_336, %c0_337, %c0_338] : memref<5x5x30x6xf32, #tpu.memory_space<vmem>>, vector<1x1x30x6xf32>
    %353 = vector.shape_cast %352 : vector<1x1x30x6xf32> to vector<30x6xf32>
    %cst_339 = arith.constant dense<0.000000e+00> : vector<8x6xf32>
    %354 = tpu.matmul %263, %353, %cst_339 {dimension_numbers = #tpu.dot_dimension_numbers<[1], [0], [0], [1], [0, 0, 1, 1], [], []>} : vector<8x30xf32>, vector<30x6xf32>, vector<8x6xf32> -> vector<8x6xf32>
    %c1_340 = arith.constant 1 : index
    %c3_341 = arith.constant 3 : index
    %c0_342 = arith.constant 0 : index
    %c0_343 = arith.constant 0 : index
    %355 = vector.load %arg11[%c1_340, %c3_341, %c0_342, %c0_343] : memref<5x5x1x6xf32, #tpu.memory_space<vmem>>, vector<1x1x1x6xf32>
    %356 = vector.shape_cast %355 : vector<1x1x1x6xf32> to vector<1x6xf32>
    %357 = vector.broadcast %356 : vector<1x6xf32> to vector<8x6xf32>
    %358 = arith.addf %354, %357 : vector<8x6xf32>
    %cst_344 = arith.constant dense<0.000000e+00> : vector<8x8xf32>
    %359 = tpu.matmul %344, %351, %cst_344 {dimension_numbers = #tpu.dot_dimension_numbers<[1], [1], [0], [0], [0, 0, 1, 0], [], []>} : vector<8x6xf32>, vector<8x6xf32>, vector<8x8xf32> -> vector<8x8xf32>
    %c1_345 = arith.constant 1 : index
    %c4_346 = arith.constant 4 : index
    %c0_347 = arith.constant 0 : index
    %c0_348 = arith.constant 0 : index
    %360 = vector.load %arg6[%c1_345, %c4_346, %c0_347, %c0_348] : memref<5x5x30x6xf32, #tpu.memory_space<vmem>>, vector<1x1x30x6xf32>
    %361 = vector.shape_cast %360 : vector<1x1x30x6xf32> to vector<30x6xf32>
    %cst_349 = arith.constant dense<0.000000e+00> : vector<8x6xf32>
    %362 = tpu.matmul %263, %361, %cst_349 {dimension_numbers = #tpu.dot_dimension_numbers<[1], [0], [0], [1], [0, 0, 1, 1], [], []>} : vector<8x30xf32>, vector<30x6xf32>, vector<8x6xf32> -> vector<8x6xf32>
    %c1_350 = arith.constant 1 : index
    %c4_351 = arith.constant 4 : index
    %c0_352 = arith.constant 0 : index
    %c0_353 = arith.constant 0 : index
    %363 = vector.load %arg9[%c1_350, %c4_351, %c0_352, %c0_353] : memref<5x5x1x6xf32, #tpu.memory_space<vmem>>, vector<1x1x1x6xf32>
    %364 = vector.shape_cast %363 : vector<1x1x1x6xf32> to vector<1x6xf32>
    %365 = vector.broadcast %364 : vector<1x6xf32> to vector<8x6xf32>
    %366 = arith.addf %362, %365 : vector<8x6xf32>
    %cst_354 = arith.constant 0.408248305 : f32
    %367 = vector.broadcast %cst_354 : f32 to vector<8x6xf32>
    %368 = arith.mulf %366, %367 : vector<8x6xf32>
    %c1_355 = arith.constant 1 : index
    %c4_356 = arith.constant 4 : index
    %c0_357 = arith.constant 0 : index
    %c0_358 = arith.constant 0 : index
    %369 = vector.load %arg7[%c1_355, %c4_356, %c0_357, %c0_358] : memref<5x5x30x6xf32, #tpu.memory_space<vmem>>, vector<1x1x30x6xf32>
    %370 = vector.shape_cast %369 : vector<1x1x30x6xf32> to vector<30x6xf32>
    %cst_359 = arith.constant dense<0.000000e+00> : vector<8x6xf32>
    %371 = tpu.matmul %263, %370, %cst_359 {dimension_numbers = #tpu.dot_dimension_numbers<[1], [0], [0], [1], [0, 0, 1, 1], [], []>} : vector<8x30xf32>, vector<30x6xf32>, vector<8x6xf32> -> vector<8x6xf32>
    %c1_360 = arith.constant 1 : index
    %c4_361 = arith.constant 4 : index
    %c0_362 = arith.constant 0 : index
    %c0_363 = arith.constant 0 : index
    %372 = vector.load %arg10[%c1_360, %c4_361, %c0_362, %c0_363] : memref<5x5x1x6xf32, #tpu.memory_space<vmem>>, vector<1x1x1x6xf32>
    %373 = vector.shape_cast %372 : vector<1x1x1x6xf32> to vector<1x6xf32>
    %374 = vector.broadcast %373 : vector<1x6xf32> to vector<8x6xf32>
    %375 = arith.addf %371, %374 : vector<8x6xf32>
    %c1_364 = arith.constant 1 : index
    %c4_365 = arith.constant 4 : index
    %c0_366 = arith.constant 0 : index
    %c0_367 = arith.constant 0 : index
    %376 = vector.load %arg8[%c1_364, %c4_365, %c0_366, %c0_367] : memref<5x5x30x6xf32, #tpu.memory_space<vmem>>, vector<1x1x30x6xf32>
    %377 = vector.shape_cast %376 : vector<1x1x30x6xf32> to vector<30x6xf32>
    %cst_368 = arith.constant dense<0.000000e+00> : vector<8x6xf32>
    %378 = tpu.matmul %263, %377, %cst_368 {dimension_numbers = #tpu.dot_dimension_numbers<[1], [0], [0], [1], [0, 0, 1, 1], [], []>} : vector<8x30xf32>, vector<30x6xf32>, vector<8x6xf32> -> vector<8x6xf32>
    %c1_369 = arith.constant 1 : index
    %c4_370 = arith.constant 4 : index
    %c0_371 = arith.constant 0 : index
    %c0_372 = arith.constant 0 : index
    %379 = vector.load %arg11[%c1_369, %c4_370, %c0_371, %c0_372] : memref<5x5x1x6xf32, #tpu.memory_space<vmem>>, vector<1x1x1x6xf32>
    %380 = vector.shape_cast %379 : vector<1x1x1x6xf32> to vector<1x6xf32>
    %381 = vector.broadcast %380 : vector<1x6xf32> to vector<8x6xf32>
    %382 = arith.addf %378, %381 : vector<8x6xf32>
    %cst_373 = arith.constant dense<0.000000e+00> : vector<8x8xf32>
    %383 = tpu.matmul %368, %375, %cst_373 {dimension_numbers = #tpu.dot_dimension_numbers<[1], [1], [0], [0], [0, 0, 1, 0], [], []>} : vector<8x6xf32>, vector<8x6xf32>, vector<8x8xf32> -> vector<8x8xf32>
    %384 = tpu.concatenate %287, %311, %335, %359, %383 in 0 : vector<8x8xf32>, vector<8x8xf32>, vector<8x8xf32>, vector<8x8xf32>, vector<8x8xf32> -> vector<40x8xf32>
    %cst_374 = arith.constant dense<0xFF800000> : vector<40xf32>
    %385 = vector.multi_reduction <maximumf>, %384, %cst_374 [1] : vector<40x8xf32> to vector<40xf32>
    %386 = vector.shape_cast %385 : vector<40xf32> to vector<40x1xf32>
    %387 = vector.broadcast %386 : vector<40x1xf32> to vector<40x8xf32>
    %388 = arith.subf %384, %387 : vector<40x8xf32>
    %389 = math.exp %388 : vector<40x8xf32>
    %cst_375 = arith.constant dense<0.000000e+00> : vector<40xf32>
    %390 = vector.multi_reduction <add>, %389, %cst_375 [1] : vector<40x8xf32> to vector<40xf32>
    %391 = vector.shape_cast %390 : vector<40xf32> to vector<40x1xf32>
    %392 = vector.broadcast %391 : vector<40x1xf32> to vector<40x8xf32>
    %393 = arith.divf %389, %392 : vector<40x8xf32>
    %394 = vector.extract_strided_slice %393 {offsets = [0, 0], sizes = [8, 8], strides = [1, 1]} : vector<40x8xf32> to vector<8x8xf32>
    %cst_376 = arith.constant dense<0.000000e+00> : vector<8x6xf32>
    %395 = tpu.matmul %394, %286, %cst_376 {dimension_numbers = #tpu.dot_dimension_numbers<[1], [0], [0], [1], [0, 0, 1, 1], [], []>} : vector<8x8xf32>, vector<8x6xf32>, vector<8x6xf32> -> vector<8x6xf32>
    %c1_377 = arith.constant 1 : index
    %c0_378 = arith.constant 0 : index
    %c0_379 = arith.constant 0 : index
    %c0_380 = arith.constant 0 : index
    %396 = vector.load %arg12[%c1_377, %c0_378, %c0_379, %c0_380] : memref<5x5x6x30xf32, #tpu.memory_space<vmem>>, vector<1x1x6x30xf32>
    %397 = vector.shape_cast %396 : vector<1x1x6x30xf32> to vector<6x30xf32>
    %cst_381 = arith.constant dense<0.000000e+00> : vector<8x30xf32>
    %398 = tpu.matmul %395, %397, %cst_381 {dimension_numbers = #tpu.dot_dimension_numbers<[1], [0], [0], [1], [0, 0, 1, 1], [], []>} : vector<8x6xf32>, vector<6x30xf32>, vector<8x30xf32> -> vector<8x30xf32>
    %399 = vector.extract_strided_slice %393 {offsets = [8, 0], sizes = [8, 8], strides = [1, 1]} : vector<40x8xf32> to vector<8x8xf32>
    %cst_382 = arith.constant dense<0.000000e+00> : vector<8x6xf32>
    %400 = tpu.matmul %399, %310, %cst_382 {dimension_numbers = #tpu.dot_dimension_numbers<[1], [0], [0], [1], [0, 0, 1, 1], [], []>} : vector<8x8xf32>, vector<8x6xf32>, vector<8x6xf32> -> vector<8x6xf32>
    %c1_383 = arith.constant 1 : index
    %c1_384 = arith.constant 1 : index
    %c0_385 = arith.constant 0 : index
    %c0_386 = arith.constant 0 : index
    %401 = vector.load %arg12[%c1_383, %c1_384, %c0_385, %c0_386] : memref<5x5x6x30xf32, #tpu.memory_space<vmem>>, vector<1x1x6x30xf32>
    %402 = vector.shape_cast %401 : vector<1x1x6x30xf32> to vector<6x30xf32>
    %cst_387 = arith.constant dense<0.000000e+00> : vector<8x30xf32>
    %403 = tpu.matmul %400, %402, %cst_387 {dimension_numbers = #tpu.dot_dimension_numbers<[1], [0], [0], [1], [0, 0, 1, 1], [], []>} : vector<8x6xf32>, vector<6x30xf32>, vector<8x30xf32> -> vector<8x30xf32>
    %404 = arith.addf %398, %403 : vector<8x30xf32>
    %405 = vector.extract_strided_slice %393 {offsets = [16, 0], sizes = [8, 8], strides = [1, 1]} : vector<40x8xf32> to vector<8x8xf32>
    %cst_388 = arith.constant dense<0.000000e+00> : vector<8x6xf32>
    %406 = tpu.matmul %405, %334, %cst_388 {dimension_numbers = #tpu.dot_dimension_numbers<[1], [0], [0], [1], [0, 0, 1, 1], [], []>} : vector<8x8xf32>, vector<8x6xf32>, vector<8x6xf32> -> vector<8x6xf32>
    %c1_389 = arith.constant 1 : index
    %c2_390 = arith.constant 2 : index
    %c0_391 = arith.constant 0 : index
    %c0_392 = arith.constant 0 : index
    %407 = vector.load %arg12[%c1_389, %c2_390, %c0_391, %c0_392] : memref<5x5x6x30xf32, #tpu.memory_space<vmem>>, vector<1x1x6x30xf32>
    %408 = vector.shape_cast %407 : vector<1x1x6x30xf32> to vector<6x30xf32>
    %cst_393 = arith.constant dense<0.000000e+00> : vector<8x30xf32>
    %409 = tpu.matmul %406, %408, %cst_393 {dimension_numbers = #tpu.dot_dimension_numbers<[1], [0], [0], [1], [0, 0, 1, 1], [], []>} : vector<8x6xf32>, vector<6x30xf32>, vector<8x30xf32> -> vector<8x30xf32>
    %410 = arith.addf %404, %409 : vector<8x30xf32>
    %411 = vector.extract_strided_slice %393 {offsets = [24, 0], sizes = [8, 8], strides = [1, 1]} : vector<40x8xf32> to vector<8x8xf32>
    %cst_394 = arith.constant dense<0.000000e+00> : vector<8x6xf32>
    %412 = tpu.matmul %411, %358, %cst_394 {dimension_numbers = #tpu.dot_dimension_numbers<[1], [0], [0], [1], [0, 0, 1, 1], [], []>} : vector<8x8xf32>, vector<8x6xf32>, vector<8x6xf32> -> vector<8x6xf32>
    %c1_395 = arith.constant 1 : index
    %c3_396 = arith.constant 3 : index
    %c0_397 = arith.constant 0 : index
    %c0_398 = arith.constant 0 : index
    %413 = vector.load %arg12[%c1_395, %c3_396, %c0_397, %c0_398] : memref<5x5x6x30xf32, #tpu.memory_space<vmem>>, vector<1x1x6x30xf32>
    %414 = vector.shape_cast %413 : vector<1x1x6x30xf32> to vector<6x30xf32>
    %cst_399 = arith.constant dense<0.000000e+00> : vector<8x30xf32>
    %415 = tpu.matmul %412, %414, %cst_399 {dimension_numbers = #tpu.dot_dimension_numbers<[1], [0], [0], [1], [0, 0, 1, 1], [], []>} : vector<8x6xf32>, vector<6x30xf32>, vector<8x30xf32> -> vector<8x30xf32>
    %416 = arith.addf %410, %415 : vector<8x30xf32>
    %417 = vector.extract_strided_slice %393 {offsets = [32, 0], sizes = [8, 8], strides = [1, 1]} : vector<40x8xf32> to vector<8x8xf32>
    %cst_400 = arith.constant dense<0.000000e+00> : vector<8x6xf32>
    %418 = tpu.matmul %417, %382, %cst_400 {dimension_numbers = #tpu.dot_dimension_numbers<[1], [0], [0], [1], [0, 0, 1, 1], [], []>} : vector<8x8xf32>, vector<8x6xf32>, vector<8x6xf32> -> vector<8x6xf32>
    %c1_401 = arith.constant 1 : index
    %c4_402 = arith.constant 4 : index
    %c0_403 = arith.constant 0 : index
    %c0_404 = arith.constant 0 : index
    %419 = vector.load %arg12[%c1_401, %c4_402, %c0_403, %c0_404] : memref<5x5x6x30xf32, #tpu.memory_space<vmem>>, vector<1x1x6x30xf32>
    %420 = vector.shape_cast %419 : vector<1x1x6x30xf32> to vector<6x30xf32>
    %cst_405 = arith.constant dense<0.000000e+00> : vector<8x30xf32>
    %421 = tpu.matmul %418, %420, %cst_405 {dimension_numbers = #tpu.dot_dimension_numbers<[1], [0], [0], [1], [0, 0, 1, 1], [], []>} : vector<8x6xf32>, vector<6x30xf32>, vector<8x30xf32> -> vector<8x30xf32>
    %422 = arith.addf %416, %421 : vector<8x30xf32>
    %423 = arith.addf %237, %422 : vector<8x30xf32>
    %c1_406 = arith.constant 1 : index
    %c0_407 = arith.constant 0 : index
    %c0_408 = arith.constant 0 : index
    %424 = vector.load %arg13[%c1_406, %c0_407, %c0_408] : memref<5x1x30xf32, #tpu.memory_space<vmem>>, vector<1x1x30xf32>
    %425 = vector.shape_cast %424 : vector<1x1x30xf32> to vector<1x30xf32>
    %426 = vector.broadcast %425 : vector<1x30xf32> to vector<8x30xf32>
    %427 = arith.addf %423, %426 : vector<8x30xf32>
    %c1_409 = arith.constant 1 : index
    %c0_410 = arith.constant 0 : index
    %c0_411 = arith.constant 0 : index
    %428 = vector.load %arg14[%c1_409, %c0_410, %c0_411] : memref<5x1x30xf32, #tpu.memory_space<vmem>>, vector<1x1x30xf32>
    %429 = vector.shape_cast %428 : vector<1x1x30xf32> to vector<1x30xf32>
    %c1_412 = arith.constant 1 : index
    %c0_413 = arith.constant 0 : index
    %c0_414 = arith.constant 0 : index
    %430 = vector.load %arg15[%c1_412, %c0_413, %c0_414] : memref<5x1x30xf32, #tpu.memory_space<vmem>>, vector<1x1x30xf32>
    %431 = vector.shape_cast %430 : vector<1x1x30xf32> to vector<1x30xf32>
    %cst_415 = arith.constant dense<0.000000e+00> : vector<8xf32>
    %432 = vector.multi_reduction <add>, %427, %cst_415 [1] : vector<8x30xf32> to vector<8xf32>
    %433 = vector.shape_cast %432 : vector<8xf32> to vector<8x1xf32>
    %cst_416 = arith.constant 3.000000e+01 : f32
    %434 = vector.broadcast %cst_416 : f32 to vector<8x1xf32>
    %435 = arith.divf %433, %434 : vector<8x1xf32>
    %436 = vector.broadcast %435 : vector<8x1xf32> to vector<8x30xf32>
    %437 = arith.subf %427, %436 : vector<8x30xf32>
    %438 = arith.mulf %437, %437 : vector<8x30xf32>
    %cst_417 = arith.constant dense<0.000000e+00> : vector<8xf32>
    %439 = vector.multi_reduction <add>, %438, %cst_417 [1] : vector<8x30xf32> to vector<8xf32>
    %440 = vector.shape_cast %439 : vector<8xf32> to vector<8x1xf32>
    %cst_418 = arith.constant 3.000000e+01 : f32
    %441 = vector.broadcast %cst_418 : f32 to vector<8x1xf32>
    %442 = arith.divf %440, %441 : vector<8x1xf32>
    %443 = vector.broadcast %435 : vector<8x1xf32> to vector<8x30xf32>
    %444 = arith.subf %427, %443 : vector<8x30xf32>
    %cst_419 = arith.constant 9.99999974E-6 : f32
    %445 = vector.broadcast %cst_419 : f32 to vector<8x1xf32>
    %446 = arith.addf %442, %445 : vector<8x1xf32>
    %447 = math.rsqrt %446 : vector<8x1xf32>
    %448 = vector.broadcast %447 : vector<8x1xf32> to vector<8x30xf32>
    %449 = arith.mulf %444, %448 : vector<8x30xf32>
    %450 = vector.broadcast %429 : vector<1x30xf32> to vector<8x30xf32>
    %451 = arith.mulf %449, %450 : vector<8x30xf32>
    %452 = vector.broadcast %431 : vector<1x30xf32> to vector<8x30xf32>
    %453 = arith.addf %451, %452 : vector<8x30xf32>
    %c1_420 = arith.constant 1 : index
    %c0_421 = arith.constant 0 : index
    %c0_422 = arith.constant 0 : index
    %454 = vector.load %arg16[%c1_420, %c0_421, %c0_422] : memref<5x30x120xf32, #tpu.memory_space<vmem>>, vector<1x30x120xf32>
    %455 = vector.shape_cast %454 : vector<1x30x120xf32> to vector<30x120xf32>
    %cst_423 = arith.constant dense<0.000000e+00> : vector<8x120xf32>
    %456 = tpu.matmul %453, %455, %cst_423 {dimension_numbers = #tpu.dot_dimension_numbers<[1], [0], [0], [1], [0, 0, 1, 1], [], []>} : vector<8x30xf32>, vector<30x120xf32>, vector<8x120xf32> -> vector<8x120xf32>
    %c1_424 = arith.constant 1 : index
    %c0_425 = arith.constant 0 : index
    %c0_426 = arith.constant 0 : index
    %457 = vector.load %arg17[%c1_424, %c0_425, %c0_426] : memref<5x1x120xf32, #tpu.memory_space<vmem>>, vector<1x1x120xf32>
    %458 = vector.shape_cast %457 : vector<1x1x120xf32> to vector<1x120xf32>
    %459 = vector.broadcast %458 : vector<1x120xf32> to vector<8x120xf32>
    %460 = arith.addf %456, %459 : vector<8x120xf32>
    %cst_427 = arith.constant 0.000000e+00 : f32
    %461 = vector.broadcast %cst_427 : f32 to vector<8x120xf32>
    %462 = arith.maximumf %460, %461 : vector<8x120xf32>
    %c1_428 = arith.constant 1 : index
    %c0_429 = arith.constant 0 : index
    %c0_430 = arith.constant 0 : index
    %463 = vector.load %arg18[%c1_428, %c0_429, %c0_430] : memref<5x120x30xf32, #tpu.memory_space<vmem>>, vector<1x120x30xf32>
    %464 = vector.shape_cast %463 : vector<1x120x30xf32> to vector<120x30xf32>
    %cst_431 = arith.constant dense<0.000000e+00> : vector<8x30xf32>
    %465 = tpu.matmul %462, %464, %cst_431 {dimension_numbers = #tpu.dot_dimension_numbers<[1], [0], [0], [1], [0, 0, 1, 1], [], []>} : vector<8x120xf32>, vector<120x30xf32>, vector<8x30xf32> -> vector<8x30xf32>
    %466 = arith.addf %427, %465 : vector<8x30xf32>
    %c1_432 = arith.constant 1 : index
    %c0_433 = arith.constant 0 : index
    %c0_434 = arith.constant 0 : index
    %467 = vector.load %arg19[%c1_432, %c0_433, %c0_434] : memref<5x1x30xf32, #tpu.memory_space<vmem>>, vector<1x1x30xf32>
    %468 = vector.shape_cast %467 : vector<1x1x30xf32> to vector<1x30xf32>
    %469 = vector.broadcast %468 : vector<1x30xf32> to vector<8x30xf32>
    %470 = arith.addf %466, %469 : vector<8x30xf32>
    %c2_435 = arith.constant 2 : index
    %c0_436 = arith.constant 0 : index
    %c0_437 = arith.constant 0 : index
    %471 = vector.load %arg4[%c2_435, %c0_436, %c0_437] : memref<5x1x30xf32, #tpu.memory_space<vmem>>, vector<1x1x30xf32>
    %472 = vector.shape_cast %471 : vector<1x1x30xf32> to vector<1x30xf32>
    %c2_438 = arith.constant 2 : index
    %c0_439 = arith.constant 0 : index
    %c0_440 = arith.constant 0 : index
    %473 = vector.load %arg5[%c2_438, %c0_439, %c0_440] : memref<5x1x30xf32, #tpu.memory_space<vmem>>, vector<1x1x30xf32>
    %474 = vector.shape_cast %473 : vector<1x1x30xf32> to vector<1x30xf32>
    %cst_441 = arith.constant dense<0.000000e+00> : vector<8xf32>
    %475 = vector.multi_reduction <add>, %470, %cst_441 [1] : vector<8x30xf32> to vector<8xf32>
    %476 = vector.shape_cast %475 : vector<8xf32> to vector<8x1xf32>
    %cst_442 = arith.constant 3.000000e+01 : f32
    %477 = vector.broadcast %cst_442 : f32 to vector<8x1xf32>
    %478 = arith.divf %476, %477 : vector<8x1xf32>
    %479 = vector.broadcast %478 : vector<8x1xf32> to vector<8x30xf32>
    %480 = arith.subf %470, %479 : vector<8x30xf32>
    %481 = arith.mulf %480, %480 : vector<8x30xf32>
    %cst_443 = arith.constant dense<0.000000e+00> : vector<8xf32>
    %482 = vector.multi_reduction <add>, %481, %cst_443 [1] : vector<8x30xf32> to vector<8xf32>
    %483 = vector.shape_cast %482 : vector<8xf32> to vector<8x1xf32>
    %cst_444 = arith.constant 3.000000e+01 : f32
    %484 = vector.broadcast %cst_444 : f32 to vector<8x1xf32>
    %485 = arith.divf %483, %484 : vector<8x1xf32>
    %486 = vector.broadcast %478 : vector<8x1xf32> to vector<8x30xf32>
    %487 = arith.subf %470, %486 : vector<8x30xf32>
    %cst_445 = arith.constant 9.99999974E-6 : f32
    %488 = vector.broadcast %cst_445 : f32 to vector<8x1xf32>
    %489 = arith.addf %485, %488 : vector<8x1xf32>
    %490 = math.rsqrt %489 : vector<8x1xf32>
    %491 = vector.broadcast %490 : vector<8x1xf32> to vector<8x30xf32>
    %492 = arith.mulf %487, %491 : vector<8x30xf32>
    %493 = vector.broadcast %472 : vector<1x30xf32> to vector<8x30xf32>
    %494 = arith.mulf %492, %493 : vector<8x30xf32>
    %495 = vector.broadcast %474 : vector<1x30xf32> to vector<8x30xf32>
    %496 = arith.addf %494, %495 : vector<8x30xf32>
    %c2_446 = arith.constant 2 : index
    %c0_447 = arith.constant 0 : index
    %c0_448 = arith.constant 0 : index
    %c0_449 = arith.constant 0 : index
    %497 = vector.load %arg6[%c2_446, %c0_447, %c0_448, %c0_449] : memref<5x5x30x6xf32, #tpu.memory_space<vmem>>, vector<1x1x30x6xf32>
    %498 = vector.shape_cast %497 : vector<1x1x30x6xf32> to vector<30x6xf32>
    %cst_450 = arith.constant dense<0.000000e+00> : vector<8x6xf32>
    %499 = tpu.matmul %496, %498, %cst_450 {dimension_numbers = #tpu.dot_dimension_numbers<[1], [0], [0], [1], [0, 0, 1, 1], [], []>} : vector<8x30xf32>, vector<30x6xf32>, vector<8x6xf32> -> vector<8x6xf32>
    %c2_451 = arith.constant 2 : index
    %c0_452 = arith.constant 0 : index
    %c0_453 = arith.constant 0 : index
    %c0_454 = arith.constant 0 : index
    %500 = vector.load %arg9[%c2_451, %c0_452, %c0_453, %c0_454] : memref<5x5x1x6xf32, #tpu.memory_space<vmem>>, vector<1x1x1x6xf32>
    %501 = vector.shape_cast %500 : vector<1x1x1x6xf32> to vector<1x6xf32>
    %502 = vector.broadcast %501 : vector<1x6xf32> to vector<8x6xf32>
    %503 = arith.addf %499, %502 : vector<8x6xf32>
    %cst_455 = arith.constant 0.408248305 : f32
    %504 = vector.broadcast %cst_455 : f32 to vector<8x6xf32>
    %505 = arith.mulf %503, %504 : vector<8x6xf32>
    %c2_456 = arith.constant 2 : index
    %c0_457 = arith.constant 0 : index
    %c0_458 = arith.constant 0 : index
    %c0_459 = arith.constant 0 : index
    %506 = vector.load %arg7[%c2_456, %c0_457, %c0_458, %c0_459] : memref<5x5x30x6xf32, #tpu.memory_space<vmem>>, vector<1x1x30x6xf32>
    %507 = vector.shape_cast %506 : vector<1x1x30x6xf32> to vector<30x6xf32>
    %cst_460 = arith.constant dense<0.000000e+00> : vector<8x6xf32>
    %508 = tpu.matmul %496, %507, %cst_460 {dimension_numbers = #tpu.dot_dimension_numbers<[1], [0], [0], [1], [0, 0, 1, 1], [], []>} : vector<8x30xf32>, vector<30x6xf32>, vector<8x6xf32> -> vector<8x6xf32>
    %c2_461 = arith.constant 2 : index
    %c0_462 = arith.constant 0 : index
    %c0_463 = arith.constant 0 : index
    %c0_464 = arith.constant 0 : index
    %509 = vector.load %arg10[%c2_461, %c0_462, %c0_463, %c0_464] : memref<5x5x1x6xf32, #tpu.memory_space<vmem>>, vector<1x1x1x6xf32>
    %510 = vector.shape_cast %509 : vector<1x1x1x6xf32> to vector<1x6xf32>
    %511 = vector.broadcast %510 : vector<1x6xf32> to vector<8x6xf32>
    %512 = arith.addf %508, %511 : vector<8x6xf32>
    %c2_465 = arith.constant 2 : index
    %c0_466 = arith.constant 0 : index
    %c0_467 = arith.constant 0 : index
    %c0_468 = arith.constant 0 : index
    %513 = vector.load %arg8[%c2_465, %c0_466, %c0_467, %c0_468] : memref<5x5x30x6xf32, #tpu.memory_space<vmem>>, vector<1x1x30x6xf32>
    %514 = vector.shape_cast %513 : vector<1x1x30x6xf32> to vector<30x6xf32>
    %cst_469 = arith.constant dense<0.000000e+00> : vector<8x6xf32>
    %515 = tpu.matmul %496, %514, %cst_469 {dimension_numbers = #tpu.dot_dimension_numbers<[1], [0], [0], [1], [0, 0, 1, 1], [], []>} : vector<8x30xf32>, vector<30x6xf32>, vector<8x6xf32> -> vector<8x6xf32>
    %c2_470 = arith.constant 2 : index
    %c0_471 = arith.constant 0 : index
    %c0_472 = arith.constant 0 : index
    %c0_473 = arith.constant 0 : index
    %516 = vector.load %arg11[%c2_470, %c0_471, %c0_472, %c0_473] : memref<5x5x1x6xf32, #tpu.memory_space<vmem>>, vector<1x1x1x6xf32>
    %517 = vector.shape_cast %516 : vector<1x1x1x6xf32> to vector<1x6xf32>
    %518 = vector.broadcast %517 : vector<1x6xf32> to vector<8x6xf32>
    %519 = arith.addf %515, %518 : vector<8x6xf32>
    %cst_474 = arith.constant dense<0.000000e+00> : vector<8x8xf32>
    %520 = tpu.matmul %505, %512, %cst_474 {dimension_numbers = #tpu.dot_dimension_numbers<[1], [1], [0], [0], [0, 0, 1, 0], [], []>} : vector<8x6xf32>, vector<8x6xf32>, vector<8x8xf32> -> vector<8x8xf32>
    %c2_475 = arith.constant 2 : index
    %c1_476 = arith.constant 1 : index
    %c0_477 = arith.constant 0 : index
    %c0_478 = arith.constant 0 : index
    %521 = vector.load %arg6[%c2_475, %c1_476, %c0_477, %c0_478] : memref<5x5x30x6xf32, #tpu.memory_space<vmem>>, vector<1x1x30x6xf32>
    %522 = vector.shape_cast %521 : vector<1x1x30x6xf32> to vector<30x6xf32>
    %cst_479 = arith.constant dense<0.000000e+00> : vector<8x6xf32>
    %523 = tpu.matmul %496, %522, %cst_479 {dimension_numbers = #tpu.dot_dimension_numbers<[1], [0], [0], [1], [0, 0, 1, 1], [], []>} : vector<8x30xf32>, vector<30x6xf32>, vector<8x6xf32> -> vector<8x6xf32>
    %c2_480 = arith.constant 2 : index
    %c1_481 = arith.constant 1 : index
    %c0_482 = arith.constant 0 : index
    %c0_483 = arith.constant 0 : index
    %524 = vector.load %arg9[%c2_480, %c1_481, %c0_482, %c0_483] : memref<5x5x1x6xf32, #tpu.memory_space<vmem>>, vector<1x1x1x6xf32>
    %525 = vector.shape_cast %524 : vector<1x1x1x6xf32> to vector<1x6xf32>
    %526 = vector.broadcast %525 : vector<1x6xf32> to vector<8x6xf32>
    %527 = arith.addf %523, %526 : vector<8x6xf32>
    %cst_484 = arith.constant 0.408248305 : f32
    %528 = vector.broadcast %cst_484 : f32 to vector<8x6xf32>
    %529 = arith.mulf %527, %528 : vector<8x6xf32>
    %c2_485 = arith.constant 2 : index
    %c1_486 = arith.constant 1 : index
    %c0_487 = arith.constant 0 : index
    %c0_488 = arith.constant 0 : index
    %530 = vector.load %arg7[%c2_485, %c1_486, %c0_487, %c0_488] : memref<5x5x30x6xf32, #tpu.memory_space<vmem>>, vector<1x1x30x6xf32>
    %531 = vector.shape_cast %530 : vector<1x1x30x6xf32> to vector<30x6xf32>
    %cst_489 = arith.constant dense<0.000000e+00> : vector<8x6xf32>
    %532 = tpu.matmul %496, %531, %cst_489 {dimension_numbers = #tpu.dot_dimension_numbers<[1], [0], [0], [1], [0, 0, 1, 1], [], []>} : vector<8x30xf32>, vector<30x6xf32>, vector<8x6xf32> -> vector<8x6xf32>
    %c2_490 = arith.constant 2 : index
    %c1_491 = arith.constant 1 : index
    %c0_492 = arith.constant 0 : index
    %c0_493 = arith.constant 0 : index
    %533 = vector.load %arg10[%c2_490, %c1_491, %c0_492, %c0_493] : memref<5x5x1x6xf32, #tpu.memory_space<vmem>>, vector<1x1x1x6xf32>
    %534 = vector.shape_cast %533 : vector<1x1x1x6xf32> to vector<1x6xf32>
    %535 = vector.broadcast %534 : vector<1x6xf32> to vector<8x6xf32>
    %536 = arith.addf %532, %535 : vector<8x6xf32>
    %c2_494 = arith.constant 2 : index
    %c1_495 = arith.constant 1 : index
    %c0_496 = arith.constant 0 : index
    %c0_497 = arith.constant 0 : index
    %537 = vector.load %arg8[%c2_494, %c1_495, %c0_496, %c0_497] : memref<5x5x30x6xf32, #tpu.memory_space<vmem>>, vector<1x1x30x6xf32>
    %538 = vector.shape_cast %537 : vector<1x1x30x6xf32> to vector<30x6xf32>
    %cst_498 = arith.constant dense<0.000000e+00> : vector<8x6xf32>
    %539 = tpu.matmul %496, %538, %cst_498 {dimension_numbers = #tpu.dot_dimension_numbers<[1], [0], [0], [1], [0, 0, 1, 1], [], []>} : vector<8x30xf32>, vector<30x6xf32>, vector<8x6xf32> -> vector<8x6xf32>
    %c2_499 = arith.constant 2 : index
    %c1_500 = arith.constant 1 : index
    %c0_501 = arith.constant 0 : index
    %c0_502 = arith.constant 0 : index
    %540 = vector.load %arg11[%c2_499, %c1_500, %c0_501, %c0_502] : memref<5x5x1x6xf32, #tpu.memory_space<vmem>>, vector<1x1x1x6xf32>
    %541 = vector.shape_cast %540 : vector<1x1x1x6xf32> to vector<1x6xf32>
    %542 = vector.broadcast %541 : vector<1x6xf32> to vector<8x6xf32>
    %543 = arith.addf %539, %542 : vector<8x6xf32>
    %cst_503 = arith.constant dense<0.000000e+00> : vector<8x8xf32>
    %544 = tpu.matmul %529, %536, %cst_503 {dimension_numbers = #tpu.dot_dimension_numbers<[1], [1], [0], [0], [0, 0, 1, 0], [], []>} : vector<8x6xf32>, vector<8x6xf32>, vector<8x8xf32> -> vector<8x8xf32>
    %c2_504 = arith.constant 2 : index
    %c2_505 = arith.constant 2 : index
    %c0_506 = arith.constant 0 : index
    %c0_507 = arith.constant 0 : index
    %545 = vector.load %arg6[%c2_504, %c2_505, %c0_506, %c0_507] : memref<5x5x30x6xf32, #tpu.memory_space<vmem>>, vector<1x1x30x6xf32>
    %546 = vector.shape_cast %545 : vector<1x1x30x6xf32> to vector<30x6xf32>
    %cst_508 = arith.constant dense<0.000000e+00> : vector<8x6xf32>
    %547 = tpu.matmul %496, %546, %cst_508 {dimension_numbers = #tpu.dot_dimension_numbers<[1], [0], [0], [1], [0, 0, 1, 1], [], []>} : vector<8x30xf32>, vector<30x6xf32>, vector<8x6xf32> -> vector<8x6xf32>
    %c2_509 = arith.constant 2 : index
    %c2_510 = arith.constant 2 : index
    %c0_511 = arith.constant 0 : index
    %c0_512 = arith.constant 0 : index
    %548 = vector.load %arg9[%c2_509, %c2_510, %c0_511, %c0_512] : memref<5x5x1x6xf32, #tpu.memory_space<vmem>>, vector<1x1x1x6xf32>
    %549 = vector.shape_cast %548 : vector<1x1x1x6xf32> to vector<1x6xf32>
    %550 = vector.broadcast %549 : vector<1x6xf32> to vector<8x6xf32>
    %551 = arith.addf %547, %550 : vector<8x6xf32>
    %cst_513 = arith.constant 0.408248305 : f32
    %552 = vector.broadcast %cst_513 : f32 to vector<8x6xf32>
    %553 = arith.mulf %551, %552 : vector<8x6xf32>
    %c2_514 = arith.constant 2 : index
    %c2_515 = arith.constant 2 : index
    %c0_516 = arith.constant 0 : index
    %c0_517 = arith.constant 0 : index
    %554 = vector.load %arg7[%c2_514, %c2_515, %c0_516, %c0_517] : memref<5x5x30x6xf32, #tpu.memory_space<vmem>>, vector<1x1x30x6xf32>
    %555 = vector.shape_cast %554 : vector<1x1x30x6xf32> to vector<30x6xf32>
    %cst_518 = arith.constant dense<0.000000e+00> : vector<8x6xf32>
    %556 = tpu.matmul %496, %555, %cst_518 {dimension_numbers = #tpu.dot_dimension_numbers<[1], [0], [0], [1], [0, 0, 1, 1], [], []>} : vector<8x30xf32>, vector<30x6xf32>, vector<8x6xf32> -> vector<8x6xf32>
    %c2_519 = arith.constant 2 : index
    %c2_520 = arith.constant 2 : index
    %c0_521 = arith.constant 0 : index
    %c0_522 = arith.constant 0 : index
    %557 = vector.load %arg10[%c2_519, %c2_520, %c0_521, %c0_522] : memref<5x5x1x6xf32, #tpu.memory_space<vmem>>, vector<1x1x1x6xf32>
    %558 = vector.shape_cast %557 : vector<1x1x1x6xf32> to vector<1x6xf32>
    %559 = vector.broadcast %558 : vector<1x6xf32> to vector<8x6xf32>
    %560 = arith.addf %556, %559 : vector<8x6xf32>
    %c2_523 = arith.constant 2 : index
    %c2_524 = arith.constant 2 : index
    %c0_525 = arith.constant 0 : index
    %c0_526 = arith.constant 0 : index
    %561 = vector.load %arg8[%c2_523, %c2_524, %c0_525, %c0_526] : memref<5x5x30x6xf32, #tpu.memory_space<vmem>>, vector<1x1x30x6xf32>
    %562 = vector.shape_cast %561 : vector<1x1x30x6xf32> to vector<30x6xf32>
    %cst_527 = arith.constant dense<0.000000e+00> : vector<8x6xf32>
    %563 = tpu.matmul %496, %562, %cst_527 {dimension_numbers = #tpu.dot_dimension_numbers<[1], [0], [0], [1], [0, 0, 1, 1], [], []>} : vector<8x30xf32>, vector<30x6xf32>, vector<8x6xf32> -> vector<8x6xf32>
    %c2_528 = arith.constant 2 : index
    %c2_529 = arith.constant 2 : index
    %c0_530 = arith.constant 0 : index
    %c0_531 = arith.constant 0 : index
    %564 = vector.load %arg11[%c2_528, %c2_529, %c0_530, %c0_531] : memref<5x5x1x6xf32, #tpu.memory_space<vmem>>, vector<1x1x1x6xf32>
    %565 = vector.shape_cast %564 : vector<1x1x1x6xf32> to vector<1x6xf32>
    %566 = vector.broadcast %565 : vector<1x6xf32> to vector<8x6xf32>
    %567 = arith.addf %563, %566 : vector<8x6xf32>
    %cst_532 = arith.constant dense<0.000000e+00> : vector<8x8xf32>
    %568 = tpu.matmul %553, %560, %cst_532 {dimension_numbers = #tpu.dot_dimension_numbers<[1], [1], [0], [0], [0, 0, 1, 0], [], []>} : vector<8x6xf32>, vector<8x6xf32>, vector<8x8xf32> -> vector<8x8xf32>
    %c2_533 = arith.constant 2 : index
    %c3_534 = arith.constant 3 : index
    %c0_535 = arith.constant 0 : index
    %c0_536 = arith.constant 0 : index
    %569 = vector.load %arg6[%c2_533, %c3_534, %c0_535, %c0_536] : memref<5x5x30x6xf32, #tpu.memory_space<vmem>>, vector<1x1x30x6xf32>
    %570 = vector.shape_cast %569 : vector<1x1x30x6xf32> to vector<30x6xf32>
    %cst_537 = arith.constant dense<0.000000e+00> : vector<8x6xf32>
    %571 = tpu.matmul %496, %570, %cst_537 {dimension_numbers = #tpu.dot_dimension_numbers<[1], [0], [0], [1], [0, 0, 1, 1], [], []>} : vector<8x30xf32>, vector<30x6xf32>, vector<8x6xf32> -> vector<8x6xf32>
    %c2_538 = arith.constant 2 : index
    %c3_539 = arith.constant 3 : index
    %c0_540 = arith.constant 0 : index
    %c0_541 = arith.constant 0 : index
    %572 = vector.load %arg9[%c2_538, %c3_539, %c0_540, %c0_541] : memref<5x5x1x6xf32, #tpu.memory_space<vmem>>, vector<1x1x1x6xf32>
    %573 = vector.shape_cast %572 : vector<1x1x1x6xf32> to vector<1x6xf32>
    %574 = vector.broadcast %573 : vector<1x6xf32> to vector<8x6xf32>
    %575 = arith.addf %571, %574 : vector<8x6xf32>
    %cst_542 = arith.constant 0.408248305 : f32
    %576 = vector.broadcast %cst_542 : f32 to vector<8x6xf32>
    %577 = arith.mulf %575, %576 : vector<8x6xf32>
    %c2_543 = arith.constant 2 : index
    %c3_544 = arith.constant 3 : index
    %c0_545 = arith.constant 0 : index
    %c0_546 = arith.constant 0 : index
    %578 = vector.load %arg7[%c2_543, %c3_544, %c0_545, %c0_546] : memref<5x5x30x6xf32, #tpu.memory_space<vmem>>, vector<1x1x30x6xf32>
    %579 = vector.shape_cast %578 : vector<1x1x30x6xf32> to vector<30x6xf32>
    %cst_547 = arith.constant dense<0.000000e+00> : vector<8x6xf32>
    %580 = tpu.matmul %496, %579, %cst_547 {dimension_numbers = #tpu.dot_dimension_numbers<[1], [0], [0], [1], [0, 0, 1, 1], [], []>} : vector<8x30xf32>, vector<30x6xf32>, vector<8x6xf32> -> vector<8x6xf32>
    %c2_548 = arith.constant 2 : index
    %c3_549 = arith.constant 3 : index
    %c0_550 = arith.constant 0 : index
    %c0_551 = arith.constant 0 : index
    %581 = vector.load %arg10[%c2_548, %c3_549, %c0_550, %c0_551] : memref<5x5x1x6xf32, #tpu.memory_space<vmem>>, vector<1x1x1x6xf32>
    %582 = vector.shape_cast %581 : vector<1x1x1x6xf32> to vector<1x6xf32>
    %583 = vector.broadcast %582 : vector<1x6xf32> to vector<8x6xf32>
    %584 = arith.addf %580, %583 : vector<8x6xf32>
    %c2_552 = arith.constant 2 : index
    %c3_553 = arith.constant 3 : index
    %c0_554 = arith.constant 0 : index
    %c0_555 = arith.constant 0 : index
    %585 = vector.load %arg8[%c2_552, %c3_553, %c0_554, %c0_555] : memref<5x5x30x6xf32, #tpu.memory_space<vmem>>, vector<1x1x30x6xf32>
    %586 = vector.shape_cast %585 : vector<1x1x30x6xf32> to vector<30x6xf32>
    %cst_556 = arith.constant dense<0.000000e+00> : vector<8x6xf32>
    %587 = tpu.matmul %496, %586, %cst_556 {dimension_numbers = #tpu.dot_dimension_numbers<[1], [0], [0], [1], [0, 0, 1, 1], [], []>} : vector<8x30xf32>, vector<30x6xf32>, vector<8x6xf32> -> vector<8x6xf32>
    %c2_557 = arith.constant 2 : index
    %c3_558 = arith.constant 3 : index
    %c0_559 = arith.constant 0 : index
    %c0_560 = arith.constant 0 : index
    %588 = vector.load %arg11[%c2_557, %c3_558, %c0_559, %c0_560] : memref<5x5x1x6xf32, #tpu.memory_space<vmem>>, vector<1x1x1x6xf32>
    %589 = vector.shape_cast %588 : vector<1x1x1x6xf32> to vector<1x6xf32>
    %590 = vector.broadcast %589 : vector<1x6xf32> to vector<8x6xf32>
    %591 = arith.addf %587, %590 : vector<8x6xf32>
    %cst_561 = arith.constant dense<0.000000e+00> : vector<8x8xf32>
    %592 = tpu.matmul %577, %584, %cst_561 {dimension_numbers = #tpu.dot_dimension_numbers<[1], [1], [0], [0], [0, 0, 1, 0], [], []>} : vector<8x6xf32>, vector<8x6xf32>, vector<8x8xf32> -> vector<8x8xf32>
    %c2_562 = arith.constant 2 : index
    %c4_563 = arith.constant 4 : index
    %c0_564 = arith.constant 0 : index
    %c0_565 = arith.constant 0 : index
    %593 = vector.load %arg6[%c2_562, %c4_563, %c0_564, %c0_565] : memref<5x5x30x6xf32, #tpu.memory_space<vmem>>, vector<1x1x30x6xf32>
    %594 = vector.shape_cast %593 : vector<1x1x30x6xf32> to vector<30x6xf32>
    %cst_566 = arith.constant dense<0.000000e+00> : vector<8x6xf32>
    %595 = tpu.matmul %496, %594, %cst_566 {dimension_numbers = #tpu.dot_dimension_numbers<[1], [0], [0], [1], [0, 0, 1, 1], [], []>} : vector<8x30xf32>, vector<30x6xf32>, vector<8x6xf32> -> vector<8x6xf32>
    %c2_567 = arith.constant 2 : index
    %c4_568 = arith.constant 4 : index
    %c0_569 = arith.constant 0 : index
    %c0_570 = arith.constant 0 : index
    %596 = vector.load %arg9[%c2_567, %c4_568, %c0_569, %c0_570] : memref<5x5x1x6xf32, #tpu.memory_space<vmem>>, vector<1x1x1x6xf32>
    %597 = vector.shape_cast %596 : vector<1x1x1x6xf32> to vector<1x6xf32>
    %598 = vector.broadcast %597 : vector<1x6xf32> to vector<8x6xf32>
    %599 = arith.addf %595, %598 : vector<8x6xf32>
    %cst_571 = arith.constant 0.408248305 : f32
    %600 = vector.broadcast %cst_571 : f32 to vector<8x6xf32>
    %601 = arith.mulf %599, %600 : vector<8x6xf32>
    %c2_572 = arith.constant 2 : index
    %c4_573 = arith.constant 4 : index
    %c0_574 = arith.constant 0 : index
    %c0_575 = arith.constant 0 : index
    %602 = vector.load %arg7[%c2_572, %c4_573, %c0_574, %c0_575] : memref<5x5x30x6xf32, #tpu.memory_space<vmem>>, vector<1x1x30x6xf32>
    %603 = vector.shape_cast %602 : vector<1x1x30x6xf32> to vector<30x6xf32>
    %cst_576 = arith.constant dense<0.000000e+00> : vector<8x6xf32>
    %604 = tpu.matmul %496, %603, %cst_576 {dimension_numbers = #tpu.dot_dimension_numbers<[1], [0], [0], [1], [0, 0, 1, 1], [], []>} : vector<8x30xf32>, vector<30x6xf32>, vector<8x6xf32> -> vector<8x6xf32>
    %c2_577 = arith.constant 2 : index
    %c4_578 = arith.constant 4 : index
    %c0_579 = arith.constant 0 : index
    %c0_580 = arith.constant 0 : index
    %605 = vector.load %arg10[%c2_577, %c4_578, %c0_579, %c0_580] : memref<5x5x1x6xf32, #tpu.memory_space<vmem>>, vector<1x1x1x6xf32>
    %606 = vector.shape_cast %605 : vector<1x1x1x6xf32> to vector<1x6xf32>
    %607 = vector.broadcast %606 : vector<1x6xf32> to vector<8x6xf32>
    %608 = arith.addf %604, %607 : vector<8x6xf32>
    %c2_581 = arith.constant 2 : index
    %c4_582 = arith.constant 4 : index
    %c0_583 = arith.constant 0 : index
    %c0_584 = arith.constant 0 : index
    %609 = vector.load %arg8[%c2_581, %c4_582, %c0_583, %c0_584] : memref<5x5x30x6xf32, #tpu.memory_space<vmem>>, vector<1x1x30x6xf32>
    %610 = vector.shape_cast %609 : vector<1x1x30x6xf32> to vector<30x6xf32>
    %cst_585 = arith.constant dense<0.000000e+00> : vector<8x6xf32>
    %611 = tpu.matmul %496, %610, %cst_585 {dimension_numbers = #tpu.dot_dimension_numbers<[1], [0], [0], [1], [0, 0, 1, 1], [], []>} : vector<8x30xf32>, vector<30x6xf32>, vector<8x6xf32> -> vector<8x6xf32>
    %c2_586 = arith.constant 2 : index
    %c4_587 = arith.constant 4 : index
    %c0_588 = arith.constant 0 : index
    %c0_589 = arith.constant 0 : index
    %612 = vector.load %arg11[%c2_586, %c4_587, %c0_588, %c0_589] : memref<5x5x1x6xf32, #tpu.memory_space<vmem>>, vector<1x1x1x6xf32>
    %613 = vector.shape_cast %612 : vector<1x1x1x6xf32> to vector<1x6xf32>
    %614 = vector.broadcast %613 : vector<1x6xf32> to vector<8x6xf32>
    %615 = arith.addf %611, %614 : vector<8x6xf32>
    %cst_590 = arith.constant dense<0.000000e+00> : vector<8x8xf32>
    %616 = tpu.matmul %601, %608, %cst_590 {dimension_numbers = #tpu.dot_dimension_numbers<[1], [1], [0], [0], [0, 0, 1, 0], [], []>} : vector<8x6xf32>, vector<8x6xf32>, vector<8x8xf32> -> vector<8x8xf32>
    %617 = tpu.concatenate %520, %544, %568, %592, %616 in 0 : vector<8x8xf32>, vector<8x8xf32>, vector<8x8xf32>, vector<8x8xf32>, vector<8x8xf32> -> vector<40x8xf32>
    %cst_591 = arith.constant dense<0xFF800000> : vector<40xf32>
    %618 = vector.multi_reduction <maximumf>, %617, %cst_591 [1] : vector<40x8xf32> to vector<40xf32>
    %619 = vector.shape_cast %618 : vector<40xf32> to vector<40x1xf32>
    %620 = vector.broadcast %619 : vector<40x1xf32> to vector<40x8xf32>
    %621 = arith.subf %617, %620 : vector<40x8xf32>
    %622 = math.exp %621 : vector<40x8xf32>
    %cst_592 = arith.constant dense<0.000000e+00> : vector<40xf32>
    %623 = vector.multi_reduction <add>, %622, %cst_592 [1] : vector<40x8xf32> to vector<40xf32>
    %624 = vector.shape_cast %623 : vector<40xf32> to vector<40x1xf32>
    %625 = vector.broadcast %624 : vector<40x1xf32> to vector<40x8xf32>
    %626 = arith.divf %622, %625 : vector<40x8xf32>
    %627 = vector.extract_strided_slice %626 {offsets = [0, 0], sizes = [8, 8], strides = [1, 1]} : vector<40x8xf32> to vector<8x8xf32>
    %cst_593 = arith.constant dense<0.000000e+00> : vector<8x6xf32>
    %628 = tpu.matmul %627, %519, %cst_593 {dimension_numbers = #tpu.dot_dimension_numbers<[1], [0], [0], [1], [0, 0, 1, 1], [], []>} : vector<8x8xf32>, vector<8x6xf32>, vector<8x6xf32> -> vector<8x6xf32>
    %c2_594 = arith.constant 2 : index
    %c0_595 = arith.constant 0 : index
    %c0_596 = arith.constant 0 : index
    %c0_597 = arith.constant 0 : index
    %629 = vector.load %arg12[%c2_594, %c0_595, %c0_596, %c0_597] : memref<5x5x6x30xf32, #tpu.memory_space<vmem>>, vector<1x1x6x30xf32>
    %630 = vector.shape_cast %629 : vector<1x1x6x30xf32> to vector<6x30xf32>
    %cst_598 = arith.constant dense<0.000000e+00> : vector<8x30xf32>
    %631 = tpu.matmul %628, %630, %cst_598 {dimension_numbers = #tpu.dot_dimension_numbers<[1], [0], [0], [1], [0, 0, 1, 1], [], []>} : vector<8x6xf32>, vector<6x30xf32>, vector<8x30xf32> -> vector<8x30xf32>
    %632 = vector.extract_strided_slice %626 {offsets = [8, 0], sizes = [8, 8], strides = [1, 1]} : vector<40x8xf32> to vector<8x8xf32>
    %cst_599 = arith.constant dense<0.000000e+00> : vector<8x6xf32>
    %633 = tpu.matmul %632, %543, %cst_599 {dimension_numbers = #tpu.dot_dimension_numbers<[1], [0], [0], [1], [0, 0, 1, 1], [], []>} : vector<8x8xf32>, vector<8x6xf32>, vector<8x6xf32> -> vector<8x6xf32>
    %c2_600 = arith.constant 2 : index
    %c1_601 = arith.constant 1 : index
    %c0_602 = arith.constant 0 : index
    %c0_603 = arith.constant 0 : index
    %634 = vector.load %arg12[%c2_600, %c1_601, %c0_602, %c0_603] : memref<5x5x6x30xf32, #tpu.memory_space<vmem>>, vector<1x1x6x30xf32>
    %635 = vector.shape_cast %634 : vector<1x1x6x30xf32> to vector<6x30xf32>
    %cst_604 = arith.constant dense<0.000000e+00> : vector<8x30xf32>
    %636 = tpu.matmul %633, %635, %cst_604 {dimension_numbers = #tpu.dot_dimension_numbers<[1], [0], [0], [1], [0, 0, 1, 1], [], []>} : vector<8x6xf32>, vector<6x30xf32>, vector<8x30xf32> -> vector<8x30xf32>
    %637 = arith.addf %631, %636 : vector<8x30xf32>
    %638 = vector.extract_strided_slice %626 {offsets = [16, 0], sizes = [8, 8], strides = [1, 1]} : vector<40x8xf32> to vector<8x8xf32>
    %cst_605 = arith.constant dense<0.000000e+00> : vector<8x6xf32>
    %639 = tpu.matmul %638, %567, %cst_605 {dimension_numbers = #tpu.dot_dimension_numbers<[1], [0], [0], [1], [0, 0, 1, 1], [], []>} : vector<8x8xf32>, vector<8x6xf32>, vector<8x6xf32> -> vector<8x6xf32>
    %c2_606 = arith.constant 2 : index
    %c2_607 = arith.constant 2 : index
    %c0_608 = arith.constant 0 : index
    %c0_609 = arith.constant 0 : index
    %640 = vector.load %arg12[%c2_606, %c2_607, %c0_608, %c0_609] : memref<5x5x6x30xf32, #tpu.memory_space<vmem>>, vector<1x1x6x30xf32>
    %641 = vector.shape_cast %640 : vector<1x1x6x30xf32> to vector<6x30xf32>
    %cst_610 = arith.constant dense<0.000000e+00> : vector<8x30xf32>
    %642 = tpu.matmul %639, %641, %cst_610 {dimension_numbers = #tpu.dot_dimension_numbers<[1], [0], [0], [1], [0, 0, 1, 1], [], []>} : vector<8x6xf32>, vector<6x30xf32>, vector<8x30xf32> -> vector<8x30xf32>
    %643 = arith.addf %637, %642 : vector<8x30xf32>
    %644 = vector.extract_strided_slice %626 {offsets = [24, 0], sizes = [8, 8], strides = [1, 1]} : vector<40x8xf32> to vector<8x8xf32>
    %cst_611 = arith.constant dense<0.000000e+00> : vector<8x6xf32>
    %645 = tpu.matmul %644, %591, %cst_611 {dimension_numbers = #tpu.dot_dimension_numbers<[1], [0], [0], [1], [0, 0, 1, 1], [], []>} : vector<8x8xf32>, vector<8x6xf32>, vector<8x6xf32> -> vector<8x6xf32>
    %c2_612 = arith.constant 2 : index
    %c3_613 = arith.constant 3 : index
    %c0_614 = arith.constant 0 : index
    %c0_615 = arith.constant 0 : index
    %646 = vector.load %arg12[%c2_612, %c3_613, %c0_614, %c0_615] : memref<5x5x6x30xf32, #tpu.memory_space<vmem>>, vector<1x1x6x30xf32>
    %647 = vector.shape_cast %646 : vector<1x1x6x30xf32> to vector<6x30xf32>
    %cst_616 = arith.constant dense<0.000000e+00> : vector<8x30xf32>
    %648 = tpu.matmul %645, %647, %cst_616 {dimension_numbers = #tpu.dot_dimension_numbers<[1], [0], [0], [1], [0, 0, 1, 1], [], []>} : vector<8x6xf32>, vector<6x30xf32>, vector<8x30xf32> -> vector<8x30xf32>
    %649 = arith.addf %643, %648 : vector<8x30xf32>
    %650 = vector.extract_strided_slice %626 {offsets = [32, 0], sizes = [8, 8], strides = [1, 1]} : vector<40x8xf32> to vector<8x8xf32>
    %cst_617 = arith.constant dense<0.000000e+00> : vector<8x6xf32>
    %651 = tpu.matmul %650, %615, %cst_617 {dimension_numbers = #tpu.dot_dimension_numbers<[1], [0], [0], [1], [0, 0, 1, 1], [], []>} : vector<8x8xf32>, vector<8x6xf32>, vector<8x6xf32> -> vector<8x6xf32>
    %c2_618 = arith.constant 2 : index
    %c4_619 = arith.constant 4 : index
    %c0_620 = arith.constant 0 : index
    %c0_621 = arith.constant 0 : index
    %652 = vector.load %arg12[%c2_618, %c4_619, %c0_620, %c0_621] : memref<5x5x6x30xf32, #tpu.memory_space<vmem>>, vector<1x1x6x30xf32>
    %653 = vector.shape_cast %652 : vector<1x1x6x30xf32> to vector<6x30xf32>
    %cst_622 = arith.constant dense<0.000000e+00> : vector<8x30xf32>
    %654 = tpu.matmul %651, %653, %cst_622 {dimension_numbers = #tpu.dot_dimension_numbers<[1], [0], [0], [1], [0, 0, 1, 1], [], []>} : vector<8x6xf32>, vector<6x30xf32>, vector<8x30xf32> -> vector<8x30xf32>
    %655 = arith.addf %649, %654 : vector<8x30xf32>
    %656 = arith.addf %470, %655 : vector<8x30xf32>
    %c2_623 = arith.constant 2 : index
    %c0_624 = arith.constant 0 : index
    %c0_625 = arith.constant 0 : index
    %657 = vector.load %arg13[%c2_623, %c0_624, %c0_625] : memref<5x1x30xf32, #tpu.memory_space<vmem>>, vector<1x1x30xf32>
    %658 = vector.shape_cast %657 : vector<1x1x30xf32> to vector<1x30xf32>
    %659 = vector.broadcast %658 : vector<1x30xf32> to vector<8x30xf32>
    %660 = arith.addf %656, %659 : vector<8x30xf32>
    %c2_626 = arith.constant 2 : index
    %c0_627 = arith.constant 0 : index
    %c0_628 = arith.constant 0 : index
    %661 = vector.load %arg14[%c2_626, %c0_627, %c0_628] : memref<5x1x30xf32, #tpu.memory_space<vmem>>, vector<1x1x30xf32>
    %662 = vector.shape_cast %661 : vector<1x1x30xf32> to vector<1x30xf32>
    %c2_629 = arith.constant 2 : index
    %c0_630 = arith.constant 0 : index
    %c0_631 = arith.constant 0 : index
    %663 = vector.load %arg15[%c2_629, %c0_630, %c0_631] : memref<5x1x30xf32, #tpu.memory_space<vmem>>, vector<1x1x30xf32>
    %664 = vector.shape_cast %663 : vector<1x1x30xf32> to vector<1x30xf32>
    %cst_632 = arith.constant dense<0.000000e+00> : vector<8xf32>
    %665 = vector.multi_reduction <add>, %660, %cst_632 [1] : vector<8x30xf32> to vector<8xf32>
    %666 = vector.shape_cast %665 : vector<8xf32> to vector<8x1xf32>
    %cst_633 = arith.constant 3.000000e+01 : f32
    %667 = vector.broadcast %cst_633 : f32 to vector<8x1xf32>
    %668 = arith.divf %666, %667 : vector<8x1xf32>
    %669 = vector.broadcast %668 : vector<8x1xf32> to vector<8x30xf32>
    %670 = arith.subf %660, %669 : vector<8x30xf32>
    %671 = arith.mulf %670, %670 : vector<8x30xf32>
    %cst_634 = arith.constant dense<0.000000e+00> : vector<8xf32>
    %672 = vector.multi_reduction <add>, %671, %cst_634 [1] : vector<8x30xf32> to vector<8xf32>
    %673 = vector.shape_cast %672 : vector<8xf32> to vector<8x1xf32>
    %cst_635 = arith.constant 3.000000e+01 : f32
    %674 = vector.broadcast %cst_635 : f32 to vector<8x1xf32>
    %675 = arith.divf %673, %674 : vector<8x1xf32>
    %676 = vector.broadcast %668 : vector<8x1xf32> to vector<8x30xf32>
    %677 = arith.subf %660, %676 : vector<8x30xf32>
    %cst_636 = arith.constant 9.99999974E-6 : f32
    %678 = vector.broadcast %cst_636 : f32 to vector<8x1xf32>
    %679 = arith.addf %675, %678 : vector<8x1xf32>
    %680 = math.rsqrt %679 : vector<8x1xf32>
    %681 = vector.broadcast %680 : vector<8x1xf32> to vector<8x30xf32>
    %682 = arith.mulf %677, %681 : vector<8x30xf32>
    %683 = vector.broadcast %662 : vector<1x30xf32> to vector<8x30xf32>
    %684 = arith.mulf %682, %683 : vector<8x30xf32>
    %685 = vector.broadcast %664 : vector<1x30xf32> to vector<8x30xf32>
    %686 = arith.addf %684, %685 : vector<8x30xf32>
    %c2_637 = arith.constant 2 : index
    %c0_638 = arith.constant 0 : index
    %c0_639 = arith.constant 0 : index
    %687 = vector.load %arg16[%c2_637, %c0_638, %c0_639] : memref<5x30x120xf32, #tpu.memory_space<vmem>>, vector<1x30x120xf32>
    %688 = vector.shape_cast %687 : vector<1x30x120xf32> to vector<30x120xf32>
    %cst_640 = arith.constant dense<0.000000e+00> : vector<8x120xf32>
    %689 = tpu.matmul %686, %688, %cst_640 {dimension_numbers = #tpu.dot_dimension_numbers<[1], [0], [0], [1], [0, 0, 1, 1], [], []>} : vector<8x30xf32>, vector<30x120xf32>, vector<8x120xf32> -> vector<8x120xf32>
    %c2_641 = arith.constant 2 : index
    %c0_642 = arith.constant 0 : index
    %c0_643 = arith.constant 0 : index
    %690 = vector.load %arg17[%c2_641, %c0_642, %c0_643] : memref<5x1x120xf32, #tpu.memory_space<vmem>>, vector<1x1x120xf32>
    %691 = vector.shape_cast %690 : vector<1x1x120xf32> to vector<1x120xf32>
    %692 = vector.broadcast %691 : vector<1x120xf32> to vector<8x120xf32>
    %693 = arith.addf %689, %692 : vector<8x120xf32>
    %cst_644 = arith.constant 0.000000e+00 : f32
    %694 = vector.broadcast %cst_644 : f32 to vector<8x120xf32>
    %695 = arith.maximumf %693, %694 : vector<8x120xf32>
    %c2_645 = arith.constant 2 : index
    %c0_646 = arith.constant 0 : index
    %c0_647 = arith.constant 0 : index
    %696 = vector.load %arg18[%c2_645, %c0_646, %c0_647] : memref<5x120x30xf32, #tpu.memory_space<vmem>>, vector<1x120x30xf32>
    %697 = vector.shape_cast %696 : vector<1x120x30xf32> to vector<120x30xf32>
    %cst_648 = arith.constant dense<0.000000e+00> : vector<8x30xf32>
    %698 = tpu.matmul %695, %697, %cst_648 {dimension_numbers = #tpu.dot_dimension_numbers<[1], [0], [0], [1], [0, 0, 1, 1], [], []>} : vector<8x120xf32>, vector<120x30xf32>, vector<8x30xf32> -> vector<8x30xf32>
    %699 = arith.addf %660, %698 : vector<8x30xf32>
    %c2_649 = arith.constant 2 : index
    %c0_650 = arith.constant 0 : index
    %c0_651 = arith.constant 0 : index
    %700 = vector.load %arg19[%c2_649, %c0_650, %c0_651] : memref<5x1x30xf32, #tpu.memory_space<vmem>>, vector<1x1x30xf32>
    %701 = vector.shape_cast %700 : vector<1x1x30xf32> to vector<1x30xf32>
    %702 = vector.broadcast %701 : vector<1x30xf32> to vector<8x30xf32>
    %703 = arith.addf %699, %702 : vector<8x30xf32>
    %c3_652 = arith.constant 3 : index
    %c0_653 = arith.constant 0 : index
    %c0_654 = arith.constant 0 : index
    %704 = vector.load %arg4[%c3_652, %c0_653, %c0_654] : memref<5x1x30xf32, #tpu.memory_space<vmem>>, vector<1x1x30xf32>
    %705 = vector.shape_cast %704 : vector<1x1x30xf32> to vector<1x30xf32>
    %c3_655 = arith.constant 3 : index
    %c0_656 = arith.constant 0 : index
    %c0_657 = arith.constant 0 : index
    %706 = vector.load %arg5[%c3_655, %c0_656, %c0_657] : memref<5x1x30xf32, #tpu.memory_space<vmem>>, vector<1x1x30xf32>
    %707 = vector.shape_cast %706 : vector<1x1x30xf32> to vector<1x30xf32>
    %cst_658 = arith.constant dense<0.000000e+00> : vector<8xf32>
    %708 = vector.multi_reduction <add>, %703, %cst_658 [1] : vector<8x30xf32> to vector<8xf32>
    %709 = vector.shape_cast %708 : vector<8xf32> to vector<8x1xf32>
    %cst_659 = arith.constant 3.000000e+01 : f32
    %710 = vector.broadcast %cst_659 : f32 to vector<8x1xf32>
    %711 = arith.divf %709, %710 : vector<8x1xf32>
    %712 = vector.broadcast %711 : vector<8x1xf32> to vector<8x30xf32>
    %713 = arith.subf %703, %712 : vector<8x30xf32>
    %714 = arith.mulf %713, %713 : vector<8x30xf32>
    %cst_660 = arith.constant dense<0.000000e+00> : vector<8xf32>
    %715 = vector.multi_reduction <add>, %714, %cst_660 [1] : vector<8x30xf32> to vector<8xf32>
    %716 = vector.shape_cast %715 : vector<8xf32> to vector<8x1xf32>
    %cst_661 = arith.constant 3.000000e+01 : f32
    %717 = vector.broadcast %cst_661 : f32 to vector<8x1xf32>
    %718 = arith.divf %716, %717 : vector<8x1xf32>
    %719 = vector.broadcast %711 : vector<8x1xf32> to vector<8x30xf32>
    %720 = arith.subf %703, %719 : vector<8x30xf32>
    %cst_662 = arith.constant 9.99999974E-6 : f32
    %721 = vector.broadcast %cst_662 : f32 to vector<8x1xf32>
    %722 = arith.addf %718, %721 : vector<8x1xf32>
    %723 = math.rsqrt %722 : vector<8x1xf32>
    %724 = vector.broadcast %723 : vector<8x1xf32> to vector<8x30xf32>
    %725 = arith.mulf %720, %724 : vector<8x30xf32>
    %726 = vector.broadcast %705 : vector<1x30xf32> to vector<8x30xf32>
    %727 = arith.mulf %725, %726 : vector<8x30xf32>
    %728 = vector.broadcast %707 : vector<1x30xf32> to vector<8x30xf32>
    %729 = arith.addf %727, %728 : vector<8x30xf32>
    %c3_663 = arith.constant 3 : index
    %c0_664 = arith.constant 0 : index
    %c0_665 = arith.constant 0 : index
    %c0_666 = arith.constant 0 : index
    %730 = vector.load %arg6[%c3_663, %c0_664, %c0_665, %c0_666] : memref<5x5x30x6xf32, #tpu.memory_space<vmem>>, vector<1x1x30x6xf32>
    %731 = vector.shape_cast %730 : vector<1x1x30x6xf32> to vector<30x6xf32>
    %cst_667 = arith.constant dense<0.000000e+00> : vector<8x6xf32>
    %732 = tpu.matmul %729, %731, %cst_667 {dimension_numbers = #tpu.dot_dimension_numbers<[1], [0], [0], [1], [0, 0, 1, 1], [], []>} : vector<8x30xf32>, vector<30x6xf32>, vector<8x6xf32> -> vector<8x6xf32>
    %c3_668 = arith.constant 3 : index
    %c0_669 = arith.constant 0 : index
    %c0_670 = arith.constant 0 : index
    %c0_671 = arith.constant 0 : index
    %733 = vector.load %arg9[%c3_668, %c0_669, %c0_670, %c0_671] : memref<5x5x1x6xf32, #tpu.memory_space<vmem>>, vector<1x1x1x6xf32>
    %734 = vector.shape_cast %733 : vector<1x1x1x6xf32> to vector<1x6xf32>
    %735 = vector.broadcast %734 : vector<1x6xf32> to vector<8x6xf32>
    %736 = arith.addf %732, %735 : vector<8x6xf32>
    %cst_672 = arith.constant 0.408248305 : f32
    %737 = vector.broadcast %cst_672 : f32 to vector<8x6xf32>
    %738 = arith.mulf %736, %737 : vector<8x6xf32>
    %c3_673 = arith.constant 3 : index
    %c0_674 = arith.constant 0 : index
    %c0_675 = arith.constant 0 : index
    %c0_676 = arith.constant 0 : index
    %739 = vector.load %arg7[%c3_673, %c0_674, %c0_675, %c0_676] : memref<5x5x30x6xf32, #tpu.memory_space<vmem>>, vector<1x1x30x6xf32>
    %740 = vector.shape_cast %739 : vector<1x1x30x6xf32> to vector<30x6xf32>
    %cst_677 = arith.constant dense<0.000000e+00> : vector<8x6xf32>
    %741 = tpu.matmul %729, %740, %cst_677 {dimension_numbers = #tpu.dot_dimension_numbers<[1], [0], [0], [1], [0, 0, 1, 1], [], []>} : vector<8x30xf32>, vector<30x6xf32>, vector<8x6xf32> -> vector<8x6xf32>
    %c3_678 = arith.constant 3 : index
    %c0_679 = arith.constant 0 : index
    %c0_680 = arith.constant 0 : index
    %c0_681 = arith.constant 0 : index
    %742 = vector.load %arg10[%c3_678, %c0_679, %c0_680, %c0_681] : memref<5x5x1x6xf32, #tpu.memory_space<vmem>>, vector<1x1x1x6xf32>
    %743 = vector.shape_cast %742 : vector<1x1x1x6xf32> to vector<1x6xf32>
    %744 = vector.broadcast %743 : vector<1x6xf32> to vector<8x6xf32>
    %745 = arith.addf %741, %744 : vector<8x6xf32>
    %c3_682 = arith.constant 3 : index
    %c0_683 = arith.constant 0 : index
    %c0_684 = arith.constant 0 : index
    %c0_685 = arith.constant 0 : index
    %746 = vector.load %arg8[%c3_682, %c0_683, %c0_684, %c0_685] : memref<5x5x30x6xf32, #tpu.memory_space<vmem>>, vector<1x1x30x6xf32>
    %747 = vector.shape_cast %746 : vector<1x1x30x6xf32> to vector<30x6xf32>
    %cst_686 = arith.constant dense<0.000000e+00> : vector<8x6xf32>
    %748 = tpu.matmul %729, %747, %cst_686 {dimension_numbers = #tpu.dot_dimension_numbers<[1], [0], [0], [1], [0, 0, 1, 1], [], []>} : vector<8x30xf32>, vector<30x6xf32>, vector<8x6xf32> -> vector<8x6xf32>
    %c3_687 = arith.constant 3 : index
    %c0_688 = arith.constant 0 : index
    %c0_689 = arith.constant 0 : index
    %c0_690 = arith.constant 0 : index
    %749 = vector.load %arg11[%c3_687, %c0_688, %c0_689, %c0_690] : memref<5x5x1x6xf32, #tpu.memory_space<vmem>>, vector<1x1x1x6xf32>
    %750 = vector.shape_cast %749 : vector<1x1x1x6xf32> to vector<1x6xf32>
    %751 = vector.broadcast %750 : vector<1x6xf32> to vector<8x6xf32>
    %752 = arith.addf %748, %751 : vector<8x6xf32>
    %cst_691 = arith.constant dense<0.000000e+00> : vector<8x8xf32>
    %753 = tpu.matmul %738, %745, %cst_691 {dimension_numbers = #tpu.dot_dimension_numbers<[1], [1], [0], [0], [0, 0, 1, 0], [], []>} : vector<8x6xf32>, vector<8x6xf32>, vector<8x8xf32> -> vector<8x8xf32>
    %c3_692 = arith.constant 3 : index
    %c1_693 = arith.constant 1 : index
    %c0_694 = arith.constant 0 : index
    %c0_695 = arith.constant 0 : index
    %754 = vector.load %arg6[%c3_692, %c1_693, %c0_694, %c0_695] : memref<5x5x30x6xf32, #tpu.memory_space<vmem>>, vector<1x1x30x6xf32>
    %755 = vector.shape_cast %754 : vector<1x1x30x6xf32> to vector<30x6xf32>
    %cst_696 = arith.constant dense<0.000000e+00> : vector<8x6xf32>
    %756 = tpu.matmul %729, %755, %cst_696 {dimension_numbers = #tpu.dot_dimension_numbers<[1], [0], [0], [1], [0, 0, 1, 1], [], []>} : vector<8x30xf32>, vector<30x6xf32>, vector<8x6xf32> -> vector<8x6xf32>
    %c3_697 = arith.constant 3 : index
    %c1_698 = arith.constant 1 : index
    %c0_699 = arith.constant 0 : index
    %c0_700 = arith.constant 0 : index
    %757 = vector.load %arg9[%c3_697, %c1_698, %c0_699, %c0_700] : memref<5x5x1x6xf32, #tpu.memory_space<vmem>>, vector<1x1x1x6xf32>
    %758 = vector.shape_cast %757 : vector<1x1x1x6xf32> to vector<1x6xf32>
    %759 = vector.broadcast %758 : vector<1x6xf32> to vector<8x6xf32>
    %760 = arith.addf %756, %759 : vector<8x6xf32>
    %cst_701 = arith.constant 0.408248305 : f32
    %761 = vector.broadcast %cst_701 : f32 to vector<8x6xf32>
    %762 = arith.mulf %760, %761 : vector<8x6xf32>
    %c3_702 = arith.constant 3 : index
    %c1_703 = arith.constant 1 : index
    %c0_704 = arith.constant 0 : index
    %c0_705 = arith.constant 0 : index
    %763 = vector.load %arg7[%c3_702, %c1_703, %c0_704, %c0_705] : memref<5x5x30x6xf32, #tpu.memory_space<vmem>>, vector<1x1x30x6xf32>
    %764 = vector.shape_cast %763 : vector<1x1x30x6xf32> to vector<30x6xf32>
    %cst_706 = arith.constant dense<0.000000e+00> : vector<8x6xf32>
    %765 = tpu.matmul %729, %764, %cst_706 {dimension_numbers = #tpu.dot_dimension_numbers<[1], [0], [0], [1], [0, 0, 1, 1], [], []>} : vector<8x30xf32>, vector<30x6xf32>, vector<8x6xf32> -> vector<8x6xf32>
    %c3_707 = arith.constant 3 : index
    %c1_708 = arith.constant 1 : index
    %c0_709 = arith.constant 0 : index
    %c0_710 = arith.constant 0 : index
    %766 = vector.load %arg10[%c3_707, %c1_708, %c0_709, %c0_710] : memref<5x5x1x6xf32, #tpu.memory_space<vmem>>, vector<1x1x1x6xf32>
    %767 = vector.shape_cast %766 : vector<1x1x1x6xf32> to vector<1x6xf32>
    %768 = vector.broadcast %767 : vector<1x6xf32> to vector<8x6xf32>
    %769 = arith.addf %765, %768 : vector<8x6xf32>
    %c3_711 = arith.constant 3 : index
    %c1_712 = arith.constant 1 : index
    %c0_713 = arith.constant 0 : index
    %c0_714 = arith.constant 0 : index
    %770 = vector.load %arg8[%c3_711, %c1_712, %c0_713, %c0_714] : memref<5x5x30x6xf32, #tpu.memory_space<vmem>>, vector<1x1x30x6xf32>
    %771 = vector.shape_cast %770 : vector<1x1x30x6xf32> to vector<30x6xf32>
    %cst_715 = arith.constant dense<0.000000e+00> : vector<8x6xf32>
    %772 = tpu.matmul %729, %771, %cst_715 {dimension_numbers = #tpu.dot_dimension_numbers<[1], [0], [0], [1], [0, 0, 1, 1], [], []>} : vector<8x30xf32>, vector<30x6xf32>, vector<8x6xf32> -> vector<8x6xf32>
    %c3_716 = arith.constant 3 : index
    %c1_717 = arith.constant 1 : index
    %c0_718 = arith.constant 0 : index
    %c0_719 = arith.constant 0 : index
    %773 = vector.load %arg11[%c3_716, %c1_717, %c0_718, %c0_719] : memref<5x5x1x6xf32, #tpu.memory_space<vmem>>, vector<1x1x1x6xf32>
    %774 = vector.shape_cast %773 : vector<1x1x1x6xf32> to vector<1x6xf32>
    %775 = vector.broadcast %774 : vector<1x6xf32> to vector<8x6xf32>
    %776 = arith.addf %772, %775 : vector<8x6xf32>
    %cst_720 = arith.constant dense<0.000000e+00> : vector<8x8xf32>
    %777 = tpu.matmul %762, %769, %cst_720 {dimension_numbers = #tpu.dot_dimension_numbers<[1], [1], [0], [0], [0, 0, 1, 0], [], []>} : vector<8x6xf32>, vector<8x6xf32>, vector<8x8xf32> -> vector<8x8xf32>
    %c3_721 = arith.constant 3 : index
    %c2_722 = arith.constant 2 : index
    %c0_723 = arith.constant 0 : index
    %c0_724 = arith.constant 0 : index
    %778 = vector.load %arg6[%c3_721, %c2_722, %c0_723, %c0_724] : memref<5x5x30x6xf32, #tpu.memory_space<vmem>>, vector<1x1x30x6xf32>
    %779 = vector.shape_cast %778 : vector<1x1x30x6xf32> to vector<30x6xf32>
    %cst_725 = arith.constant dense<0.000000e+00> : vector<8x6xf32>
    %780 = tpu.matmul %729, %779, %cst_725 {dimension_numbers = #tpu.dot_dimension_numbers<[1], [0], [0], [1], [0, 0, 1, 1], [], []>} : vector<8x30xf32>, vector<30x6xf32>, vector<8x6xf32> -> vector<8x6xf32>
    %c3_726 = arith.constant 3 : index
    %c2_727 = arith.constant 2 : index
    %c0_728 = arith.constant 0 : index
    %c0_729 = arith.constant 0 : index
    %781 = vector.load %arg9[%c3_726, %c2_727, %c0_728, %c0_729] : memref<5x5x1x6xf32, #tpu.memory_space<vmem>>, vector<1x1x1x6xf32>
    %782 = vector.shape_cast %781 : vector<1x1x1x6xf32> to vector<1x6xf32>
    %783 = vector.broadcast %782 : vector<1x6xf32> to vector<8x6xf32>
    %784 = arith.addf %780, %783 : vector<8x6xf32>
    %cst_730 = arith.constant 0.408248305 : f32
    %785 = vector.broadcast %cst_730 : f32 to vector<8x6xf32>
    %786 = arith.mulf %784, %785 : vector<8x6xf32>
    %c3_731 = arith.constant 3 : index
    %c2_732 = arith.constant 2 : index
    %c0_733 = arith.constant 0 : index
    %c0_734 = arith.constant 0 : index
    %787 = vector.load %arg7[%c3_731, %c2_732, %c0_733, %c0_734] : memref<5x5x30x6xf32, #tpu.memory_space<vmem>>, vector<1x1x30x6xf32>
    %788 = vector.shape_cast %787 : vector<1x1x30x6xf32> to vector<30x6xf32>
    %cst_735 = arith.constant dense<0.000000e+00> : vector<8x6xf32>
    %789 = tpu.matmul %729, %788, %cst_735 {dimension_numbers = #tpu.dot_dimension_numbers<[1], [0], [0], [1], [0, 0, 1, 1], [], []>} : vector<8x30xf32>, vector<30x6xf32>, vector<8x6xf32> -> vector<8x6xf32>
    %c3_736 = arith.constant 3 : index
    %c2_737 = arith.constant 2 : index
    %c0_738 = arith.constant 0 : index
    %c0_739 = arith.constant 0 : index
    %790 = vector.load %arg10[%c3_736, %c2_737, %c0_738, %c0_739] : memref<5x5x1x6xf32, #tpu.memory_space<vmem>>, vector<1x1x1x6xf32>
    %791 = vector.shape_cast %790 : vector<1x1x1x6xf32> to vector<1x6xf32>
    %792 = vector.broadcast %791 : vector<1x6xf32> to vector<8x6xf32>
    %793 = arith.addf %789, %792 : vector<8x6xf32>
    %c3_740 = arith.constant 3 : index
    %c2_741 = arith.constant 2 : index
    %c0_742 = arith.constant 0 : index
    %c0_743 = arith.constant 0 : index
    %794 = vector.load %arg8[%c3_740, %c2_741, %c0_742, %c0_743] : memref<5x5x30x6xf32, #tpu.memory_space<vmem>>, vector<1x1x30x6xf32>
    %795 = vector.shape_cast %794 : vector<1x1x30x6xf32> to vector<30x6xf32>
    %cst_744 = arith.constant dense<0.000000e+00> : vector<8x6xf32>
    %796 = tpu.matmul %729, %795, %cst_744 {dimension_numbers = #tpu.dot_dimension_numbers<[1], [0], [0], [1], [0, 0, 1, 1], [], []>} : vector<8x30xf32>, vector<30x6xf32>, vector<8x6xf32> -> vector<8x6xf32>
    %c3_745 = arith.constant 3 : index
    %c2_746 = arith.constant 2 : index
    %c0_747 = arith.constant 0 : index
    %c0_748 = arith.constant 0 : index
    %797 = vector.load %arg11[%c3_745, %c2_746, %c0_747, %c0_748] : memref<5x5x1x6xf32, #tpu.memory_space<vmem>>, vector<1x1x1x6xf32>
    %798 = vector.shape_cast %797 : vector<1x1x1x6xf32> to vector<1x6xf32>
    %799 = vector.broadcast %798 : vector<1x6xf32> to vector<8x6xf32>
    %800 = arith.addf %796, %799 : vector<8x6xf32>
    %cst_749 = arith.constant dense<0.000000e+00> : vector<8x8xf32>
    %801 = tpu.matmul %786, %793, %cst_749 {dimension_numbers = #tpu.dot_dimension_numbers<[1], [1], [0], [0], [0, 0, 1, 0], [], []>} : vector<8x6xf32>, vector<8x6xf32>, vector<8x8xf32> -> vector<8x8xf32>
    %c3_750 = arith.constant 3 : index
    %c3_751 = arith.constant 3 : index
    %c0_752 = arith.constant 0 : index
    %c0_753 = arith.constant 0 : index
    %802 = vector.load %arg6[%c3_750, %c3_751, %c0_752, %c0_753] : memref<5x5x30x6xf32, #tpu.memory_space<vmem>>, vector<1x1x30x6xf32>
    %803 = vector.shape_cast %802 : vector<1x1x30x6xf32> to vector<30x6xf32>
    %cst_754 = arith.constant dense<0.000000e+00> : vector<8x6xf32>
    %804 = tpu.matmul %729, %803, %cst_754 {dimension_numbers = #tpu.dot_dimension_numbers<[1], [0], [0], [1], [0, 0, 1, 1], [], []>} : vector<8x30xf32>, vector<30x6xf32>, vector<8x6xf32> -> vector<8x6xf32>
    %c3_755 = arith.constant 3 : index
    %c3_756 = arith.constant 3 : index
    %c0_757 = arith.constant 0 : index
    %c0_758 = arith.constant 0 : index
    %805 = vector.load %arg9[%c3_755, %c3_756, %c0_757, %c0_758] : memref<5x5x1x6xf32, #tpu.memory_space<vmem>>, vector<1x1x1x6xf32>
    %806 = vector.shape_cast %805 : vector<1x1x1x6xf32> to vector<1x6xf32>
    %807 = vector.broadcast %806 : vector<1x6xf32> to vector<8x6xf32>
    %808 = arith.addf %804, %807 : vector<8x6xf32>
    %cst_759 = arith.constant 0.408248305 : f32
    %809 = vector.broadcast %cst_759 : f32 to vector<8x6xf32>
    %810 = arith.mulf %808, %809 : vector<8x6xf32>
    %c3_760 = arith.constant 3 : index
    %c3_761 = arith.constant 3 : index
    %c0_762 = arith.constant 0 : index
    %c0_763 = arith.constant 0 : index
    %811 = vector.load %arg7[%c3_760, %c3_761, %c0_762, %c0_763] : memref<5x5x30x6xf32, #tpu.memory_space<vmem>>, vector<1x1x30x6xf32>
    %812 = vector.shape_cast %811 : vector<1x1x30x6xf32> to vector<30x6xf32>
    %cst_764 = arith.constant dense<0.000000e+00> : vector<8x6xf32>
    %813 = tpu.matmul %729, %812, %cst_764 {dimension_numbers = #tpu.dot_dimension_numbers<[1], [0], [0], [1], [0, 0, 1, 1], [], []>} : vector<8x30xf32>, vector<30x6xf32>, vector<8x6xf32> -> vector<8x6xf32>
    %c3_765 = arith.constant 3 : index
    %c3_766 = arith.constant 3 : index
    %c0_767 = arith.constant 0 : index
    %c0_768 = arith.constant 0 : index
    %814 = vector.load %arg10[%c3_765, %c3_766, %c0_767, %c0_768] : memref<5x5x1x6xf32, #tpu.memory_space<vmem>>, vector<1x1x1x6xf32>
    %815 = vector.shape_cast %814 : vector<1x1x1x6xf32> to vector<1x6xf32>
    %816 = vector.broadcast %815 : vector<1x6xf32> to vector<8x6xf32>
    %817 = arith.addf %813, %816 : vector<8x6xf32>
    %c3_769 = arith.constant 3 : index
    %c3_770 = arith.constant 3 : index
    %c0_771 = arith.constant 0 : index
    %c0_772 = arith.constant 0 : index
    %818 = vector.load %arg8[%c3_769, %c3_770, %c0_771, %c0_772] : memref<5x5x30x6xf32, #tpu.memory_space<vmem>>, vector<1x1x30x6xf32>
    %819 = vector.shape_cast %818 : vector<1x1x30x6xf32> to vector<30x6xf32>
    %cst_773 = arith.constant dense<0.000000e+00> : vector<8x6xf32>
    %820 = tpu.matmul %729, %819, %cst_773 {dimension_numbers = #tpu.dot_dimension_numbers<[1], [0], [0], [1], [0, 0, 1, 1], [], []>} : vector<8x30xf32>, vector<30x6xf32>, vector<8x6xf32> -> vector<8x6xf32>
    %c3_774 = arith.constant 3 : index
    %c3_775 = arith.constant 3 : index
    %c0_776 = arith.constant 0 : index
    %c0_777 = arith.constant 0 : index
    %821 = vector.load %arg11[%c3_774, %c3_775, %c0_776, %c0_777] : memref<5x5x1x6xf32, #tpu.memory_space<vmem>>, vector<1x1x1x6xf32>
    %822 = vector.shape_cast %821 : vector<1x1x1x6xf32> to vector<1x6xf32>
    %823 = vector.broadcast %822 : vector<1x6xf32> to vector<8x6xf32>
    %824 = arith.addf %820, %823 : vector<8x6xf32>
    %cst_778 = arith.constant dense<0.000000e+00> : vector<8x8xf32>
    %825 = tpu.matmul %810, %817, %cst_778 {dimension_numbers = #tpu.dot_dimension_numbers<[1], [1], [0], [0], [0, 0, 1, 0], [], []>} : vector<8x6xf32>, vector<8x6xf32>, vector<8x8xf32> -> vector<8x8xf32>
    %c3_779 = arith.constant 3 : index
    %c4_780 = arith.constant 4 : index
    %c0_781 = arith.constant 0 : index
    %c0_782 = arith.constant 0 : index
    %826 = vector.load %arg6[%c3_779, %c4_780, %c0_781, %c0_782] : memref<5x5x30x6xf32, #tpu.memory_space<vmem>>, vector<1x1x30x6xf32>
    %827 = vector.shape_cast %826 : vector<1x1x30x6xf32> to vector<30x6xf32>
    %cst_783 = arith.constant dense<0.000000e+00> : vector<8x6xf32>
    %828 = tpu.matmul %729, %827, %cst_783 {dimension_numbers = #tpu.dot_dimension_numbers<[1], [0], [0], [1], [0, 0, 1, 1], [], []>} : vector<8x30xf32>, vector<30x6xf32>, vector<8x6xf32> -> vector<8x6xf32>
    %c3_784 = arith.constant 3 : index
    %c4_785 = arith.constant 4 : index
    %c0_786 = arith.constant 0 : index
    %c0_787 = arith.constant 0 : index
    %829 = vector.load %arg9[%c3_784, %c4_785, %c0_786, %c0_787] : memref<5x5x1x6xf32, #tpu.memory_space<vmem>>, vector<1x1x1x6xf32>
    %830 = vector.shape_cast %829 : vector<1x1x1x6xf32> to vector<1x6xf32>
    %831 = vector.broadcast %830 : vector<1x6xf32> to vector<8x6xf32>
    %832 = arith.addf %828, %831 : vector<8x6xf32>
    %cst_788 = arith.constant 0.408248305 : f32
    %833 = vector.broadcast %cst_788 : f32 to vector<8x6xf32>
    %834 = arith.mulf %832, %833 : vector<8x6xf32>
    %c3_789 = arith.constant 3 : index
    %c4_790 = arith.constant 4 : index
    %c0_791 = arith.constant 0 : index
    %c0_792 = arith.constant 0 : index
    %835 = vector.load %arg7[%c3_789, %c4_790, %c0_791, %c0_792] : memref<5x5x30x6xf32, #tpu.memory_space<vmem>>, vector<1x1x30x6xf32>
    %836 = vector.shape_cast %835 : vector<1x1x30x6xf32> to vector<30x6xf32>
    %cst_793 = arith.constant dense<0.000000e+00> : vector<8x6xf32>
    %837 = tpu.matmul %729, %836, %cst_793 {dimension_numbers = #tpu.dot_dimension_numbers<[1], [0], [0], [1], [0, 0, 1, 1], [], []>} : vector<8x30xf32>, vector<30x6xf32>, vector<8x6xf32> -> vector<8x6xf32>
    %c3_794 = arith.constant 3 : index
    %c4_795 = arith.constant 4 : index
    %c0_796 = arith.constant 0 : index
    %c0_797 = arith.constant 0 : index
    %838 = vector.load %arg10[%c3_794, %c4_795, %c0_796, %c0_797] : memref<5x5x1x6xf32, #tpu.memory_space<vmem>>, vector<1x1x1x6xf32>
    %839 = vector.shape_cast %838 : vector<1x1x1x6xf32> to vector<1x6xf32>
    %840 = vector.broadcast %839 : vector<1x6xf32> to vector<8x6xf32>
    %841 = arith.addf %837, %840 : vector<8x6xf32>
    %c3_798 = arith.constant 3 : index
    %c4_799 = arith.constant 4 : index
    %c0_800 = arith.constant 0 : index
    %c0_801 = arith.constant 0 : index
    %842 = vector.load %arg8[%c3_798, %c4_799, %c0_800, %c0_801] : memref<5x5x30x6xf32, #tpu.memory_space<vmem>>, vector<1x1x30x6xf32>
    %843 = vector.shape_cast %842 : vector<1x1x30x6xf32> to vector<30x6xf32>
    %cst_802 = arith.constant dense<0.000000e+00> : vector<8x6xf32>
    %844 = tpu.matmul %729, %843, %cst_802 {dimension_numbers = #tpu.dot_dimension_numbers<[1], [0], [0], [1], [0, 0, 1, 1], [], []>} : vector<8x30xf32>, vector<30x6xf32>, vector<8x6xf32> -> vector<8x6xf32>
    %c3_803 = arith.constant 3 : index
    %c4_804 = arith.constant 4 : index
    %c0_805 = arith.constant 0 : index
    %c0_806 = arith.constant 0 : index
    %845 = vector.load %arg11[%c3_803, %c4_804, %c0_805, %c0_806] : memref<5x5x1x6xf32, #tpu.memory_space<vmem>>, vector<1x1x1x6xf32>
    %846 = vector.shape_cast %845 : vector<1x1x1x6xf32> to vector<1x6xf32>
    %847 = vector.broadcast %846 : vector<1x6xf32> to vector<8x6xf32>
    %848 = arith.addf %844, %847 : vector<8x6xf32>
    %cst_807 = arith.constant dense<0.000000e+00> : vector<8x8xf32>
    %849 = tpu.matmul %834, %841, %cst_807 {dimension_numbers = #tpu.dot_dimension_numbers<[1], [1], [0], [0], [0, 0, 1, 0], [], []>} : vector<8x6xf32>, vector<8x6xf32>, vector<8x8xf32> -> vector<8x8xf32>
    %850 = tpu.concatenate %753, %777, %801, %825, %849 in 0 : vector<8x8xf32>, vector<8x8xf32>, vector<8x8xf32>, vector<8x8xf32>, vector<8x8xf32> -> vector<40x8xf32>
    %cst_808 = arith.constant dense<0xFF800000> : vector<40xf32>
    %851 = vector.multi_reduction <maximumf>, %850, %cst_808 [1] : vector<40x8xf32> to vector<40xf32>
    %852 = vector.shape_cast %851 : vector<40xf32> to vector<40x1xf32>
    %853 = vector.broadcast %852 : vector<40x1xf32> to vector<40x8xf32>
    %854 = arith.subf %850, %853 : vector<40x8xf32>
    %855 = math.exp %854 : vector<40x8xf32>
    %cst_809 = arith.constant dense<0.000000e+00> : vector<40xf32>
    %856 = vector.multi_reduction <add>, %855, %cst_809 [1] : vector<40x8xf32> to vector<40xf32>
    %857 = vector.shape_cast %856 : vector<40xf32> to vector<40x1xf32>
    %858 = vector.broadcast %857 : vector<40x1xf32> to vector<40x8xf32>
    %859 = arith.divf %855, %858 : vector<40x8xf32>
    %860 = vector.extract_strided_slice %859 {offsets = [0, 0], sizes = [8, 8], strides = [1, 1]} : vector<40x8xf32> to vector<8x8xf32>
    %cst_810 = arith.constant dense<0.000000e+00> : vector<8x6xf32>
    %861 = tpu.matmul %860, %752, %cst_810 {dimension_numbers = #tpu.dot_dimension_numbers<[1], [0], [0], [1], [0, 0, 1, 1], [], []>} : vector<8x8xf32>, vector<8x6xf32>, vector<8x6xf32> -> vector<8x6xf32>
    %c3_811 = arith.constant 3 : index
    %c0_812 = arith.constant 0 : index
    %c0_813 = arith.constant 0 : index
    %c0_814 = arith.constant 0 : index
    %862 = vector.load %arg12[%c3_811, %c0_812, %c0_813, %c0_814] : memref<5x5x6x30xf32, #tpu.memory_space<vmem>>, vector<1x1x6x30xf32>
    %863 = vector.shape_cast %862 : vector<1x1x6x30xf32> to vector<6x30xf32>
    %cst_815 = arith.constant dense<0.000000e+00> : vector<8x30xf32>
    %864 = tpu.matmul %861, %863, %cst_815 {dimension_numbers = #tpu.dot_dimension_numbers<[1], [0], [0], [1], [0, 0, 1, 1], [], []>} : vector<8x6xf32>, vector<6x30xf32>, vector<8x30xf32> -> vector<8x30xf32>
    %865 = vector.extract_strided_slice %859 {offsets = [8, 0], sizes = [8, 8], strides = [1, 1]} : vector<40x8xf32> to vector<8x8xf32>
    %cst_816 = arith.constant dense<0.000000e+00> : vector<8x6xf32>
    %866 = tpu.matmul %865, %776, %cst_816 {dimension_numbers = #tpu.dot_dimension_numbers<[1], [0], [0], [1], [0, 0, 1, 1], [], []>} : vector<8x8xf32>, vector<8x6xf32>, vector<8x6xf32> -> vector<8x6xf32>
    %c3_817 = arith.constant 3 : index
    %c1_818 = arith.constant 1 : index
    %c0_819 = arith.constant 0 : index
    %c0_820 = arith.constant 0 : index
    %867 = vector.load %arg12[%c3_817, %c1_818, %c0_819, %c0_820] : memref<5x5x6x30xf32, #tpu.memory_space<vmem>>, vector<1x1x6x30xf32>
    %868 = vector.shape_cast %867 : vector<1x1x6x30xf32> to vector<6x30xf32>
    %cst_821 = arith.constant dense<0.000000e+00> : vector<8x30xf32>
    %869 = tpu.matmul %866, %868, %cst_821 {dimension_numbers = #tpu.dot_dimension_numbers<[1], [0], [0], [1], [0, 0, 1, 1], [], []>} : vector<8x6xf32>, vector<6x30xf32>, vector<8x30xf32> -> vector<8x30xf32>
    %870 = arith.addf %864, %869 : vector<8x30xf32>
    %871 = vector.extract_strided_slice %859 {offsets = [16, 0], sizes = [8, 8], strides = [1, 1]} : vector<40x8xf32> to vector<8x8xf32>
    %cst_822 = arith.constant dense<0.000000e+00> : vector<8x6xf32>
    %872 = tpu.matmul %871, %800, %cst_822 {dimension_numbers = #tpu.dot_dimension_numbers<[1], [0], [0], [1], [0, 0, 1, 1], [], []>} : vector<8x8xf32>, vector<8x6xf32>, vector<8x6xf32> -> vector<8x6xf32>
    %c3_823 = arith.constant 3 : index
    %c2_824 = arith.constant 2 : index
    %c0_825 = arith.constant 0 : index
    %c0_826 = arith.constant 0 : index
    %873 = vector.load %arg12[%c3_823, %c2_824, %c0_825, %c0_826] : memref<5x5x6x30xf32, #tpu.memory_space<vmem>>, vector<1x1x6x30xf32>
    %874 = vector.shape_cast %873 : vector<1x1x6x30xf32> to vector<6x30xf32>
    %cst_827 = arith.constant dense<0.000000e+00> : vector<8x30xf32>
    %875 = tpu.matmul %872, %874, %cst_827 {dimension_numbers = #tpu.dot_dimension_numbers<[1], [0], [0], [1], [0, 0, 1, 1], [], []>} : vector<8x6xf32>, vector<6x30xf32>, vector<8x30xf32> -> vector<8x30xf32>
    %876 = arith.addf %870, %875 : vector<8x30xf32>
    %877 = vector.extract_strided_slice %859 {offsets = [24, 0], sizes = [8, 8], strides = [1, 1]} : vector<40x8xf32> to vector<8x8xf32>
    %cst_828 = arith.constant dense<0.000000e+00> : vector<8x6xf32>
    %878 = tpu.matmul %877, %824, %cst_828 {dimension_numbers = #tpu.dot_dimension_numbers<[1], [0], [0], [1], [0, 0, 1, 1], [], []>} : vector<8x8xf32>, vector<8x6xf32>, vector<8x6xf32> -> vector<8x6xf32>
    %c3_829 = arith.constant 3 : index
    %c3_830 = arith.constant 3 : index
    %c0_831 = arith.constant 0 : index
    %c0_832 = arith.constant 0 : index
    %879 = vector.load %arg12[%c3_829, %c3_830, %c0_831, %c0_832] : memref<5x5x6x30xf32, #tpu.memory_space<vmem>>, vector<1x1x6x30xf32>
    %880 = vector.shape_cast %879 : vector<1x1x6x30xf32> to vector<6x30xf32>
    %cst_833 = arith.constant dense<0.000000e+00> : vector<8x30xf32>
    %881 = tpu.matmul %878, %880, %cst_833 {dimension_numbers = #tpu.dot_dimension_numbers<[1], [0], [0], [1], [0, 0, 1, 1], [], []>} : vector<8x6xf32>, vector<6x30xf32>, vector<8x30xf32> -> vector<8x30xf32>
    %882 = arith.addf %876, %881 : vector<8x30xf32>
    %883 = vector.extract_strided_slice %859 {offsets = [32, 0], sizes = [8, 8], strides = [1, 1]} : vector<40x8xf32> to vector<8x8xf32>
    %cst_834 = arith.constant dense<0.000000e+00> : vector<8x6xf32>
    %884 = tpu.matmul %883, %848, %cst_834 {dimension_numbers = #tpu.dot_dimension_numbers<[1], [0], [0], [1], [0, 0, 1, 1], [], []>} : vector<8x8xf32>, vector<8x6xf32>, vector<8x6xf32> -> vector<8x6xf32>
    %c3_835 = arith.constant 3 : index
    %c4_836 = arith.constant 4 : index
    %c0_837 = arith.constant 0 : index
    %c0_838 = arith.constant 0 : index
    %885 = vector.load %arg12[%c3_835, %c4_836, %c0_837, %c0_838] : memref<5x5x6x30xf32, #tpu.memory_space<vmem>>, vector<1x1x6x30xf32>
    %886 = vector.shape_cast %885 : vector<1x1x6x30xf32> to vector<6x30xf32>
    %cst_839 = arith.constant dense<0.000000e+00> : vector<8x30xf32>
    %887 = tpu.matmul %884, %886, %cst_839 {dimension_numbers = #tpu.dot_dimension_numbers<[1], [0], [0], [1], [0, 0, 1, 1], [], []>} : vector<8x6xf32>, vector<6x30xf32>, vector<8x30xf32> -> vector<8x30xf32>
    %888 = arith.addf %882, %887 : vector<8x30xf32>
    %889 = arith.addf %703, %888 : vector<8x30xf32>
    %c3_840 = arith.constant 3 : index
    %c0_841 = arith.constant 0 : index
    %c0_842 = arith.constant 0 : index
    %890 = vector.load %arg13[%c3_840, %c0_841, %c0_842] : memref<5x1x30xf32, #tpu.memory_space<vmem>>, vector<1x1x30xf32>
    %891 = vector.shape_cast %890 : vector<1x1x30xf32> to vector<1x30xf32>
    %892 = vector.broadcast %891 : vector<1x30xf32> to vector<8x30xf32>
    %893 = arith.addf %889, %892 : vector<8x30xf32>
    %c3_843 = arith.constant 3 : index
    %c0_844 = arith.constant 0 : index
    %c0_845 = arith.constant 0 : index
    %894 = vector.load %arg14[%c3_843, %c0_844, %c0_845] : memref<5x1x30xf32, #tpu.memory_space<vmem>>, vector<1x1x30xf32>
    %895 = vector.shape_cast %894 : vector<1x1x30xf32> to vector<1x30xf32>
    %c3_846 = arith.constant 3 : index
    %c0_847 = arith.constant 0 : index
    %c0_848 = arith.constant 0 : index
    %896 = vector.load %arg15[%c3_846, %c0_847, %c0_848] : memref<5x1x30xf32, #tpu.memory_space<vmem>>, vector<1x1x30xf32>
    %897 = vector.shape_cast %896 : vector<1x1x30xf32> to vector<1x30xf32>
    %cst_849 = arith.constant dense<0.000000e+00> : vector<8xf32>
    %898 = vector.multi_reduction <add>, %893, %cst_849 [1] : vector<8x30xf32> to vector<8xf32>
    %899 = vector.shape_cast %898 : vector<8xf32> to vector<8x1xf32>
    %cst_850 = arith.constant 3.000000e+01 : f32
    %900 = vector.broadcast %cst_850 : f32 to vector<8x1xf32>
    %901 = arith.divf %899, %900 : vector<8x1xf32>
    %902 = vector.broadcast %901 : vector<8x1xf32> to vector<8x30xf32>
    %903 = arith.subf %893, %902 : vector<8x30xf32>
    %904 = arith.mulf %903, %903 : vector<8x30xf32>
    %cst_851 = arith.constant dense<0.000000e+00> : vector<8xf32>
    %905 = vector.multi_reduction <add>, %904, %cst_851 [1] : vector<8x30xf32> to vector<8xf32>
    %906 = vector.shape_cast %905 : vector<8xf32> to vector<8x1xf32>
    %cst_852 = arith.constant 3.000000e+01 : f32
    %907 = vector.broadcast %cst_852 : f32 to vector<8x1xf32>
    %908 = arith.divf %906, %907 : vector<8x1xf32>
    %909 = vector.broadcast %901 : vector<8x1xf32> to vector<8x30xf32>
    %910 = arith.subf %893, %909 : vector<8x30xf32>
    %cst_853 = arith.constant 9.99999974E-6 : f32
    %911 = vector.broadcast %cst_853 : f32 to vector<8x1xf32>
    %912 = arith.addf %908, %911 : vector<8x1xf32>
    %913 = math.rsqrt %912 : vector<8x1xf32>
    %914 = vector.broadcast %913 : vector<8x1xf32> to vector<8x30xf32>
    %915 = arith.mulf %910, %914 : vector<8x30xf32>
    %916 = vector.broadcast %895 : vector<1x30xf32> to vector<8x30xf32>
    %917 = arith.mulf %915, %916 : vector<8x30xf32>
    %918 = vector.broadcast %897 : vector<1x30xf32> to vector<8x30xf32>
    %919 = arith.addf %917, %918 : vector<8x30xf32>
    %c3_854 = arith.constant 3 : index
    %c0_855 = arith.constant 0 : index
    %c0_856 = arith.constant 0 : index
    %920 = vector.load %arg16[%c3_854, %c0_855, %c0_856] : memref<5x30x120xf32, #tpu.memory_space<vmem>>, vector<1x30x120xf32>
    %921 = vector.shape_cast %920 : vector<1x30x120xf32> to vector<30x120xf32>
    %cst_857 = arith.constant dense<0.000000e+00> : vector<8x120xf32>
    %922 = tpu.matmul %919, %921, %cst_857 {dimension_numbers = #tpu.dot_dimension_numbers<[1], [0], [0], [1], [0, 0, 1, 1], [], []>} : vector<8x30xf32>, vector<30x120xf32>, vector<8x120xf32> -> vector<8x120xf32>
    %c3_858 = arith.constant 3 : index
    %c0_859 = arith.constant 0 : index
    %c0_860 = arith.constant 0 : index
    %923 = vector.load %arg17[%c3_858, %c0_859, %c0_860] : memref<5x1x120xf32, #tpu.memory_space<vmem>>, vector<1x1x120xf32>
    %924 = vector.shape_cast %923 : vector<1x1x120xf32> to vector<1x120xf32>
    %925 = vector.broadcast %924 : vector<1x120xf32> to vector<8x120xf32>
    %926 = arith.addf %922, %925 : vector<8x120xf32>
    %cst_861 = arith.constant 0.000000e+00 : f32
    %927 = vector.broadcast %cst_861 : f32 to vector<8x120xf32>
    %928 = arith.maximumf %926, %927 : vector<8x120xf32>
    %c3_862 = arith.constant 3 : index
    %c0_863 = arith.constant 0 : index
    %c0_864 = arith.constant 0 : index
    %929 = vector.load %arg18[%c3_862, %c0_863, %c0_864] : memref<5x120x30xf32, #tpu.memory_space<vmem>>, vector<1x120x30xf32>
    %930 = vector.shape_cast %929 : vector<1x120x30xf32> to vector<120x30xf32>
    %cst_865 = arith.constant dense<0.000000e+00> : vector<8x30xf32>
    %931 = tpu.matmul %928, %930, %cst_865 {dimension_numbers = #tpu.dot_dimension_numbers<[1], [0], [0], [1], [0, 0, 1, 1], [], []>} : vector<8x120xf32>, vector<120x30xf32>, vector<8x30xf32> -> vector<8x30xf32>
    %932 = arith.addf %893, %931 : vector<8x30xf32>
    %c3_866 = arith.constant 3 : index
    %c0_867 = arith.constant 0 : index
    %c0_868 = arith.constant 0 : index
    %933 = vector.load %arg19[%c3_866, %c0_867, %c0_868] : memref<5x1x30xf32, #tpu.memory_space<vmem>>, vector<1x1x30xf32>
    %934 = vector.shape_cast %933 : vector<1x1x30xf32> to vector<1x30xf32>
    %935 = vector.broadcast %934 : vector<1x30xf32> to vector<8x30xf32>
    %936 = arith.addf %932, %935 : vector<8x30xf32>
    %c4_869 = arith.constant 4 : index
    %c0_870 = arith.constant 0 : index
    %c0_871 = arith.constant 0 : index
    %937 = vector.load %arg4[%c4_869, %c0_870, %c0_871] : memref<5x1x30xf32, #tpu.memory_space<vmem>>, vector<1x1x30xf32>
    %938 = vector.shape_cast %937 : vector<1x1x30xf32> to vector<1x30xf32>
    %c4_872 = arith.constant 4 : index
    %c0_873 = arith.constant 0 : index
    %c0_874 = arith.constant 0 : index
    %939 = vector.load %arg5[%c4_872, %c0_873, %c0_874] : memref<5x1x30xf32, #tpu.memory_space<vmem>>, vector<1x1x30xf32>
    %940 = vector.shape_cast %939 : vector<1x1x30xf32> to vector<1x30xf32>
    %cst_875 = arith.constant dense<0.000000e+00> : vector<8xf32>
    %941 = vector.multi_reduction <add>, %936, %cst_875 [1] : vector<8x30xf32> to vector<8xf32>
    %942 = vector.shape_cast %941 : vector<8xf32> to vector<8x1xf32>
    %cst_876 = arith.constant 3.000000e+01 : f32
    %943 = vector.broadcast %cst_876 : f32 to vector<8x1xf32>
    %944 = arith.divf %942, %943 : vector<8x1xf32>
    %945 = vector.broadcast %944 : vector<8x1xf32> to vector<8x30xf32>
    %946 = arith.subf %936, %945 : vector<8x30xf32>
    %947 = arith.mulf %946, %946 : vector<8x30xf32>
    %cst_877 = arith.constant dense<0.000000e+00> : vector<8xf32>
    %948 = vector.multi_reduction <add>, %947, %cst_877 [1] : vector<8x30xf32> to vector<8xf32>
    %949 = vector.shape_cast %948 : vector<8xf32> to vector<8x1xf32>
    %cst_878 = arith.constant 3.000000e+01 : f32
    %950 = vector.broadcast %cst_878 : f32 to vector<8x1xf32>
    %951 = arith.divf %949, %950 : vector<8x1xf32>
    %952 = vector.broadcast %944 : vector<8x1xf32> to vector<8x30xf32>
    %953 = arith.subf %936, %952 : vector<8x30xf32>
    %cst_879 = arith.constant 9.99999974E-6 : f32
    %954 = vector.broadcast %cst_879 : f32 to vector<8x1xf32>
    %955 = arith.addf %951, %954 : vector<8x1xf32>
    %956 = math.rsqrt %955 : vector<8x1xf32>
    %957 = vector.broadcast %956 : vector<8x1xf32> to vector<8x30xf32>
    %958 = arith.mulf %953, %957 : vector<8x30xf32>
    %959 = vector.broadcast %938 : vector<1x30xf32> to vector<8x30xf32>
    %960 = arith.mulf %958, %959 : vector<8x30xf32>
    %961 = vector.broadcast %940 : vector<1x30xf32> to vector<8x30xf32>
    %962 = arith.addf %960, %961 : vector<8x30xf32>
    %c4_880 = arith.constant 4 : index
    %c0_881 = arith.constant 0 : index
    %c0_882 = arith.constant 0 : index
    %c0_883 = arith.constant 0 : index
    %963 = vector.load %arg6[%c4_880, %c0_881, %c0_882, %c0_883] : memref<5x5x30x6xf32, #tpu.memory_space<vmem>>, vector<1x1x30x6xf32>
    %964 = vector.shape_cast %963 : vector<1x1x30x6xf32> to vector<30x6xf32>
    %cst_884 = arith.constant dense<0.000000e+00> : vector<8x6xf32>
    %965 = tpu.matmul %962, %964, %cst_884 {dimension_numbers = #tpu.dot_dimension_numbers<[1], [0], [0], [1], [0, 0, 1, 1], [], []>} : vector<8x30xf32>, vector<30x6xf32>, vector<8x6xf32> -> vector<8x6xf32>
    %c4_885 = arith.constant 4 : index
    %c0_886 = arith.constant 0 : index
    %c0_887 = arith.constant 0 : index
    %c0_888 = arith.constant 0 : index
    %966 = vector.load %arg9[%c4_885, %c0_886, %c0_887, %c0_888] : memref<5x5x1x6xf32, #tpu.memory_space<vmem>>, vector<1x1x1x6xf32>
    %967 = vector.shape_cast %966 : vector<1x1x1x6xf32> to vector<1x6xf32>
    %968 = vector.broadcast %967 : vector<1x6xf32> to vector<8x6xf32>
    %969 = arith.addf %965, %968 : vector<8x6xf32>
    %cst_889 = arith.constant 0.408248305 : f32
    %970 = vector.broadcast %cst_889 : f32 to vector<8x6xf32>
    %971 = arith.mulf %969, %970 : vector<8x6xf32>
    %c4_890 = arith.constant 4 : index
    %c0_891 = arith.constant 0 : index
    %c0_892 = arith.constant 0 : index
    %c0_893 = arith.constant 0 : index
    %972 = vector.load %arg7[%c4_890, %c0_891, %c0_892, %c0_893] : memref<5x5x30x6xf32, #tpu.memory_space<vmem>>, vector<1x1x30x6xf32>
    %973 = vector.shape_cast %972 : vector<1x1x30x6xf32> to vector<30x6xf32>
    %cst_894 = arith.constant dense<0.000000e+00> : vector<8x6xf32>
    %974 = tpu.matmul %962, %973, %cst_894 {dimension_numbers = #tpu.dot_dimension_numbers<[1], [0], [0], [1], [0, 0, 1, 1], [], []>} : vector<8x30xf32>, vector<30x6xf32>, vector<8x6xf32> -> vector<8x6xf32>
    %c4_895 = arith.constant 4 : index
    %c0_896 = arith.constant 0 : index
    %c0_897 = arith.constant 0 : index
    %c0_898 = arith.constant 0 : index
    %975 = vector.load %arg10[%c4_895, %c0_896, %c0_897, %c0_898] : memref<5x5x1x6xf32, #tpu.memory_space<vmem>>, vector<1x1x1x6xf32>
    %976 = vector.shape_cast %975 : vector<1x1x1x6xf32> to vector<1x6xf32>
    %977 = vector.broadcast %976 : vector<1x6xf32> to vector<8x6xf32>
    %978 = arith.addf %974, %977 : vector<8x6xf32>
    %c4_899 = arith.constant 4 : index
    %c0_900 = arith.constant 0 : index
    %c0_901 = arith.constant 0 : index
    %c0_902 = arith.constant 0 : index
    %979 = vector.load %arg8[%c4_899, %c0_900, %c0_901, %c0_902] : memref<5x5x30x6xf32, #tpu.memory_space<vmem>>, vector<1x1x30x6xf32>
    %980 = vector.shape_cast %979 : vector<1x1x30x6xf32> to vector<30x6xf32>
    %cst_903 = arith.constant dense<0.000000e+00> : vector<8x6xf32>
    %981 = tpu.matmul %962, %980, %cst_903 {dimension_numbers = #tpu.dot_dimension_numbers<[1], [0], [0], [1], [0, 0, 1, 1], [], []>} : vector<8x30xf32>, vector<30x6xf32>, vector<8x6xf32> -> vector<8x6xf32>
    %c4_904 = arith.constant 4 : index
    %c0_905 = arith.constant 0 : index
    %c0_906 = arith.constant 0 : index
    %c0_907 = arith.constant 0 : index
    %982 = vector.load %arg11[%c4_904, %c0_905, %c0_906, %c0_907] : memref<5x5x1x6xf32, #tpu.memory_space<vmem>>, vector<1x1x1x6xf32>
    %983 = vector.shape_cast %982 : vector<1x1x1x6xf32> to vector<1x6xf32>
    %984 = vector.broadcast %983 : vector<1x6xf32> to vector<8x6xf32>
    %985 = arith.addf %981, %984 : vector<8x6xf32>
    %cst_908 = arith.constant dense<0.000000e+00> : vector<8x8xf32>
    %986 = tpu.matmul %971, %978, %cst_908 {dimension_numbers = #tpu.dot_dimension_numbers<[1], [1], [0], [0], [0, 0, 1, 0], [], []>} : vector<8x6xf32>, vector<8x6xf32>, vector<8x8xf32> -> vector<8x8xf32>
    %c4_909 = arith.constant 4 : index
    %c1_910 = arith.constant 1 : index
    %c0_911 = arith.constant 0 : index
    %c0_912 = arith.constant 0 : index
    %987 = vector.load %arg6[%c4_909, %c1_910, %c0_911, %c0_912] : memref<5x5x30x6xf32, #tpu.memory_space<vmem>>, vector<1x1x30x6xf32>
    %988 = vector.shape_cast %987 : vector<1x1x30x6xf32> to vector<30x6xf32>
    %cst_913 = arith.constant dense<0.000000e+00> : vector<8x6xf32>
    %989 = tpu.matmul %962, %988, %cst_913 {dimension_numbers = #tpu.dot_dimension_numbers<[1], [0], [0], [1], [0, 0, 1, 1], [], []>} : vector<8x30xf32>, vector<30x6xf32>, vector<8x6xf32> -> vector<8x6xf32>
    %c4_914 = arith.constant 4 : index
    %c1_915 = arith.constant 1 : index
    %c0_916 = arith.constant 0 : index
    %c0_917 = arith.constant 0 : index
    %990 = vector.load %arg9[%c4_914, %c1_915, %c0_916, %c0_917] : memref<5x5x1x6xf32, #tpu.memory_space<vmem>>, vector<1x1x1x6xf32>
    %991 = vector.shape_cast %990 : vector<1x1x1x6xf32> to vector<1x6xf32>
    %992 = vector.broadcast %991 : vector<1x6xf32> to vector<8x6xf32>
    %993 = arith.addf %989, %992 : vector<8x6xf32>
    %cst_918 = arith.constant 0.408248305 : f32
    %994 = vector.broadcast %cst_918 : f32 to vector<8x6xf32>
    %995 = arith.mulf %993, %994 : vector<8x6xf32>
    %c4_919 = arith.constant 4 : index
    %c1_920 = arith.constant 1 : index
    %c0_921 = arith.constant 0 : index
    %c0_922 = arith.constant 0 : index
    %996 = vector.load %arg7[%c4_919, %c1_920, %c0_921, %c0_922] : memref<5x5x30x6xf32, #tpu.memory_space<vmem>>, vector<1x1x30x6xf32>
    %997 = vector.shape_cast %996 : vector<1x1x30x6xf32> to vector<30x6xf32>
    %cst_923 = arith.constant dense<0.000000e+00> : vector<8x6xf32>
    %998 = tpu.matmul %962, %997, %cst_923 {dimension_numbers = #tpu.dot_dimension_numbers<[1], [0], [0], [1], [0, 0, 1, 1], [], []>} : vector<8x30xf32>, vector<30x6xf32>, vector<8x6xf32> -> vector<8x6xf32>
    %c4_924 = arith.constant 4 : index
    %c1_925 = arith.constant 1 : index
    %c0_926 = arith.constant 0 : index
    %c0_927 = arith.constant 0 : index
    %999 = vector.load %arg10[%c4_924, %c1_925, %c0_926, %c0_927] : memref<5x5x1x6xf32, #tpu.memory_space<vmem>>, vector<1x1x1x6xf32>
    %1000 = vector.shape_cast %999 : vector<1x1x1x6xf32> to vector<1x6xf32>
    %1001 = vector.broadcast %1000 : vector<1x6xf32> to vector<8x6xf32>
    %1002 = arith.addf %998, %1001 : vector<8x6xf32>
    %c4_928 = arith.constant 4 : index
    %c1_929 = arith.constant 1 : index
    %c0_930 = arith.constant 0 : index
    %c0_931 = arith.constant 0 : index
    %1003 = vector.load %arg8[%c4_928, %c1_929, %c0_930, %c0_931] : memref<5x5x30x6xf32, #tpu.memory_space<vmem>>, vector<1x1x30x6xf32>
    %1004 = vector.shape_cast %1003 : vector<1x1x30x6xf32> to vector<30x6xf32>
    %cst_932 = arith.constant dense<0.000000e+00> : vector<8x6xf32>
    %1005 = tpu.matmul %962, %1004, %cst_932 {dimension_numbers = #tpu.dot_dimension_numbers<[1], [0], [0], [1], [0, 0, 1, 1], [], []>} : vector<8x30xf32>, vector<30x6xf32>, vector<8x6xf32> -> vector<8x6xf32>
    %c4_933 = arith.constant 4 : index
    %c1_934 = arith.constant 1 : index
    %c0_935 = arith.constant 0 : index
    %c0_936 = arith.constant 0 : index
    %1006 = vector.load %arg11[%c4_933, %c1_934, %c0_935, %c0_936] : memref<5x5x1x6xf32, #tpu.memory_space<vmem>>, vector<1x1x1x6xf32>
    %1007 = vector.shape_cast %1006 : vector<1x1x1x6xf32> to vector<1x6xf32>
    %1008 = vector.broadcast %1007 : vector<1x6xf32> to vector<8x6xf32>
    %1009 = arith.addf %1005, %1008 : vector<8x6xf32>
    %cst_937 = arith.constant dense<0.000000e+00> : vector<8x8xf32>
    %1010 = tpu.matmul %995, %1002, %cst_937 {dimension_numbers = #tpu.dot_dimension_numbers<[1], [1], [0], [0], [0, 0, 1, 0], [], []>} : vector<8x6xf32>, vector<8x6xf32>, vector<8x8xf32> -> vector<8x8xf32>
    %c4_938 = arith.constant 4 : index
    %c2_939 = arith.constant 2 : index
    %c0_940 = arith.constant 0 : index
    %c0_941 = arith.constant 0 : index
    %1011 = vector.load %arg6[%c4_938, %c2_939, %c0_940, %c0_941] : memref<5x5x30x6xf32, #tpu.memory_space<vmem>>, vector<1x1x30x6xf32>
    %1012 = vector.shape_cast %1011 : vector<1x1x30x6xf32> to vector<30x6xf32>
    %cst_942 = arith.constant dense<0.000000e+00> : vector<8x6xf32>
    %1013 = tpu.matmul %962, %1012, %cst_942 {dimension_numbers = #tpu.dot_dimension_numbers<[1], [0], [0], [1], [0, 0, 1, 1], [], []>} : vector<8x30xf32>, vector<30x6xf32>, vector<8x6xf32> -> vector<8x6xf32>
    %c4_943 = arith.constant 4 : index
    %c2_944 = arith.constant 2 : index
    %c0_945 = arith.constant 0 : index
    %c0_946 = arith.constant 0 : index
    %1014 = vector.load %arg9[%c4_943, %c2_944, %c0_945, %c0_946] : memref<5x5x1x6xf32, #tpu.memory_space<vmem>>, vector<1x1x1x6xf32>
    %1015 = vector.shape_cast %1014 : vector<1x1x1x6xf32> to vector<1x6xf32>
    %1016 = vector.broadcast %1015 : vector<1x6xf32> to vector<8x6xf32>
    %1017 = arith.addf %1013, %1016 : vector<8x6xf32>
    %cst_947 = arith.constant 0.408248305 : f32
    %1018 = vector.broadcast %cst_947 : f32 to vector<8x6xf32>
    %1019 = arith.mulf %1017, %1018 : vector<8x6xf32>
    %c4_948 = arith.constant 4 : index
    %c2_949 = arith.constant 2 : index
    %c0_950 = arith.constant 0 : index
    %c0_951 = arith.constant 0 : index
    %1020 = vector.load %arg7[%c4_948, %c2_949, %c0_950, %c0_951] : memref<5x5x30x6xf32, #tpu.memory_space<vmem>>, vector<1x1x30x6xf32>
    %1021 = vector.shape_cast %1020 : vector<1x1x30x6xf32> to vector<30x6xf32>
    %cst_952 = arith.constant dense<0.000000e+00> : vector<8x6xf32>
    %1022 = tpu.matmul %962, %1021, %cst_952 {dimension_numbers = #tpu.dot_dimension_numbers<[1], [0], [0], [1], [0, 0, 1, 1], [], []>} : vector<8x30xf32>, vector<30x6xf32>, vector<8x6xf32> -> vector<8x6xf32>
    %c4_953 = arith.constant 4 : index
    %c2_954 = arith.constant 2 : index
    %c0_955 = arith.constant 0 : index
    %c0_956 = arith.constant 0 : index
    %1023 = vector.load %arg10[%c4_953, %c2_954, %c0_955, %c0_956] : memref<5x5x1x6xf32, #tpu.memory_space<vmem>>, vector<1x1x1x6xf32>
    %1024 = vector.shape_cast %1023 : vector<1x1x1x6xf32> to vector<1x6xf32>
    %1025 = vector.broadcast %1024 : vector<1x6xf32> to vector<8x6xf32>
    %1026 = arith.addf %1022, %1025 : vector<8x6xf32>
    %c4_957 = arith.constant 4 : index
    %c2_958 = arith.constant 2 : index
    %c0_959 = arith.constant 0 : index
    %c0_960 = arith.constant 0 : index
    %1027 = vector.load %arg8[%c4_957, %c2_958, %c0_959, %c0_960] : memref<5x5x30x6xf32, #tpu.memory_space<vmem>>, vector<1x1x30x6xf32>
    %1028 = vector.shape_cast %1027 : vector<1x1x30x6xf32> to vector<30x6xf32>
    %cst_961 = arith.constant dense<0.000000e+00> : vector<8x6xf32>
    %1029 = tpu.matmul %962, %1028, %cst_961 {dimension_numbers = #tpu.dot_dimension_numbers<[1], [0], [0], [1], [0, 0, 1, 1], [], []>} : vector<8x30xf32>, vector<30x6xf32>, vector<8x6xf32> -> vector<8x6xf32>
    %c4_962 = arith.constant 4 : index
    %c2_963 = arith.constant 2 : index
    %c0_964 = arith.constant 0 : index
    %c0_965 = arith.constant 0 : index
    %1030 = vector.load %arg11[%c4_962, %c2_963, %c0_964, %c0_965] : memref<5x5x1x6xf32, #tpu.memory_space<vmem>>, vector<1x1x1x6xf32>
    %1031 = vector.shape_cast %1030 : vector<1x1x1x6xf32> to vector<1x6xf32>
    %1032 = vector.broadcast %1031 : vector<1x6xf32> to vector<8x6xf32>
    %1033 = arith.addf %1029, %1032 : vector<8x6xf32>
    %cst_966 = arith.constant dense<0.000000e+00> : vector<8x8xf32>
    %1034 = tpu.matmul %1019, %1026, %cst_966 {dimension_numbers = #tpu.dot_dimension_numbers<[1], [1], [0], [0], [0, 0, 1, 0], [], []>} : vector<8x6xf32>, vector<8x6xf32>, vector<8x8xf32> -> vector<8x8xf32>
    %c4_967 = arith.constant 4 : index
    %c3_968 = arith.constant 3 : index
    %c0_969 = arith.constant 0 : index
    %c0_970 = arith.constant 0 : index
    %1035 = vector.load %arg6[%c4_967, %c3_968, %c0_969, %c0_970] : memref<5x5x30x6xf32, #tpu.memory_space<vmem>>, vector<1x1x30x6xf32>
    %1036 = vector.shape_cast %1035 : vector<1x1x30x6xf32> to vector<30x6xf32>
    %cst_971 = arith.constant dense<0.000000e+00> : vector<8x6xf32>
    %1037 = tpu.matmul %962, %1036, %cst_971 {dimension_numbers = #tpu.dot_dimension_numbers<[1], [0], [0], [1], [0, 0, 1, 1], [], []>} : vector<8x30xf32>, vector<30x6xf32>, vector<8x6xf32> -> vector<8x6xf32>
    %c4_972 = arith.constant 4 : index
    %c3_973 = arith.constant 3 : index
    %c0_974 = arith.constant 0 : index
    %c0_975 = arith.constant 0 : index
    %1038 = vector.load %arg9[%c4_972, %c3_973, %c0_974, %c0_975] : memref<5x5x1x6xf32, #tpu.memory_space<vmem>>, vector<1x1x1x6xf32>
    %1039 = vector.shape_cast %1038 : vector<1x1x1x6xf32> to vector<1x6xf32>
    %1040 = vector.broadcast %1039 : vector<1x6xf32> to vector<8x6xf32>
    %1041 = arith.addf %1037, %1040 : vector<8x6xf32>
    %cst_976 = arith.constant 0.408248305 : f32
    %1042 = vector.broadcast %cst_976 : f32 to vector<8x6xf32>
    %1043 = arith.mulf %1041, %1042 : vector<8x6xf32>
    %c4_977 = arith.constant 4 : index
    %c3_978 = arith.constant 3 : index
    %c0_979 = arith.constant 0 : index
    %c0_980 = arith.constant 0 : index
    %1044 = vector.load %arg7[%c4_977, %c3_978, %c0_979, %c0_980] : memref<5x5x30x6xf32, #tpu.memory_space<vmem>>, vector<1x1x30x6xf32>
    %1045 = vector.shape_cast %1044 : vector<1x1x30x6xf32> to vector<30x6xf32>
    %cst_981 = arith.constant dense<0.000000e+00> : vector<8x6xf32>
    %1046 = tpu.matmul %962, %1045, %cst_981 {dimension_numbers = #tpu.dot_dimension_numbers<[1], [0], [0], [1], [0, 0, 1, 1], [], []>} : vector<8x30xf32>, vector<30x6xf32>, vector<8x6xf32> -> vector<8x6xf32>
    %c4_982 = arith.constant 4 : index
    %c3_983 = arith.constant 3 : index
    %c0_984 = arith.constant 0 : index
    %c0_985 = arith.constant 0 : index
    %1047 = vector.load %arg10[%c4_982, %c3_983, %c0_984, %c0_985] : memref<5x5x1x6xf32, #tpu.memory_space<vmem>>, vector<1x1x1x6xf32>
    %1048 = vector.shape_cast %1047 : vector<1x1x1x6xf32> to vector<1x6xf32>
    %1049 = vector.broadcast %1048 : vector<1x6xf32> to vector<8x6xf32>
    %1050 = arith.addf %1046, %1049 : vector<8x6xf32>
    %c4_986 = arith.constant 4 : index
    %c3_987 = arith.constant 3 : index
    %c0_988 = arith.constant 0 : index
    %c0_989 = arith.constant 0 : index
    %1051 = vector.load %arg8[%c4_986, %c3_987, %c0_988, %c0_989] : memref<5x5x30x6xf32, #tpu.memory_space<vmem>>, vector<1x1x30x6xf32>
    %1052 = vector.shape_cast %1051 : vector<1x1x30x6xf32> to vector<30x6xf32>
    %cst_990 = arith.constant dense<0.000000e+00> : vector<8x6xf32>
    %1053 = tpu.matmul %962, %1052, %cst_990 {dimension_numbers = #tpu.dot_dimension_numbers<[1], [0], [0], [1], [0, 0, 1, 1], [], []>} : vector<8x30xf32>, vector<30x6xf32>, vector<8x6xf32> -> vector<8x6xf32>
    %c4_991 = arith.constant 4 : index
    %c3_992 = arith.constant 3 : index
    %c0_993 = arith.constant 0 : index
    %c0_994 = arith.constant 0 : index
    %1054 = vector.load %arg11[%c4_991, %c3_992, %c0_993, %c0_994] : memref<5x5x1x6xf32, #tpu.memory_space<vmem>>, vector<1x1x1x6xf32>
    %1055 = vector.shape_cast %1054 : vector<1x1x1x6xf32> to vector<1x6xf32>
    %1056 = vector.broadcast %1055 : vector<1x6xf32> to vector<8x6xf32>
    %1057 = arith.addf %1053, %1056 : vector<8x6xf32>
    %cst_995 = arith.constant dense<0.000000e+00> : vector<8x8xf32>
    %1058 = tpu.matmul %1043, %1050, %cst_995 {dimension_numbers = #tpu.dot_dimension_numbers<[1], [1], [0], [0], [0, 0, 1, 0], [], []>} : vector<8x6xf32>, vector<8x6xf32>, vector<8x8xf32> -> vector<8x8xf32>
    %c4_996 = arith.constant 4 : index
    %c4_997 = arith.constant 4 : index
    %c0_998 = arith.constant 0 : index
    %c0_999 = arith.constant 0 : index
    %1059 = vector.load %arg6[%c4_996, %c4_997, %c0_998, %c0_999] : memref<5x5x30x6xf32, #tpu.memory_space<vmem>>, vector<1x1x30x6xf32>
    %1060 = vector.shape_cast %1059 : vector<1x1x30x6xf32> to vector<30x6xf32>
    %cst_1000 = arith.constant dense<0.000000e+00> : vector<8x6xf32>
    %1061 = tpu.matmul %962, %1060, %cst_1000 {dimension_numbers = #tpu.dot_dimension_numbers<[1], [0], [0], [1], [0, 0, 1, 1], [], []>} : vector<8x30xf32>, vector<30x6xf32>, vector<8x6xf32> -> vector<8x6xf32>
    %c4_1001 = arith.constant 4 : index
    %c4_1002 = arith.constant 4 : index
    %c0_1003 = arith.constant 0 : index
    %c0_1004 = arith.constant 0 : index
    %1062 = vector.load %arg9[%c4_1001, %c4_1002, %c0_1003, %c0_1004] : memref<5x5x1x6xf32, #tpu.memory_space<vmem>>, vector<1x1x1x6xf32>
    %1063 = vector.shape_cast %1062 : vector<1x1x1x6xf32> to vector<1x6xf32>
    %1064 = vector.broadcast %1063 : vector<1x6xf32> to vector<8x6xf32>
    %1065 = arith.addf %1061, %1064 : vector<8x6xf32>
    %cst_1005 = arith.constant 0.408248305 : f32
    %1066 = vector.broadcast %cst_1005 : f32 to vector<8x6xf32>
    %1067 = arith.mulf %1065, %1066 : vector<8x6xf32>
    %c4_1006 = arith.constant 4 : index
    %c4_1007 = arith.constant 4 : index
    %c0_1008 = arith.constant 0 : index
    %c0_1009 = arith.constant 0 : index
    %1068 = vector.load %arg7[%c4_1006, %c4_1007, %c0_1008, %c0_1009] : memref<5x5x30x6xf32, #tpu.memory_space<vmem>>, vector<1x1x30x6xf32>
    %1069 = vector.shape_cast %1068 : vector<1x1x30x6xf32> to vector<30x6xf32>
    %cst_1010 = arith.constant dense<0.000000e+00> : vector<8x6xf32>
    %1070 = tpu.matmul %962, %1069, %cst_1010 {dimension_numbers = #tpu.dot_dimension_numbers<[1], [0], [0], [1], [0, 0, 1, 1], [], []>} : vector<8x30xf32>, vector<30x6xf32>, vector<8x6xf32> -> vector<8x6xf32>
    %c4_1011 = arith.constant 4 : index
    %c4_1012 = arith.constant 4 : index
    %c0_1013 = arith.constant 0 : index
    %c0_1014 = arith.constant 0 : index
    %1071 = vector.load %arg10[%c4_1011, %c4_1012, %c0_1013, %c0_1014] : memref<5x5x1x6xf32, #tpu.memory_space<vmem>>, vector<1x1x1x6xf32>
    %1072 = vector.shape_cast %1071 : vector<1x1x1x6xf32> to vector<1x6xf32>
    %1073 = vector.broadcast %1072 : vector<1x6xf32> to vector<8x6xf32>
    %1074 = arith.addf %1070, %1073 : vector<8x6xf32>
    %c4_1015 = arith.constant 4 : index
    %c4_1016 = arith.constant 4 : index
    %c0_1017 = arith.constant 0 : index
    %c0_1018 = arith.constant 0 : index
    %1075 = vector.load %arg8[%c4_1015, %c4_1016, %c0_1017, %c0_1018] : memref<5x5x30x6xf32, #tpu.memory_space<vmem>>, vector<1x1x30x6xf32>
    %1076 = vector.shape_cast %1075 : vector<1x1x30x6xf32> to vector<30x6xf32>
    %cst_1019 = arith.constant dense<0.000000e+00> : vector<8x6xf32>
    %1077 = tpu.matmul %962, %1076, %cst_1019 {dimension_numbers = #tpu.dot_dimension_numbers<[1], [0], [0], [1], [0, 0, 1, 1], [], []>} : vector<8x30xf32>, vector<30x6xf32>, vector<8x6xf32> -> vector<8x6xf32>
    %c4_1020 = arith.constant 4 : index
    %c4_1021 = arith.constant 4 : index
    %c0_1022 = arith.constant 0 : index
    %c0_1023 = arith.constant 0 : index
    %1078 = vector.load %arg11[%c4_1020, %c4_1021, %c0_1022, %c0_1023] : memref<5x5x1x6xf32, #tpu.memory_space<vmem>>, vector<1x1x1x6xf32>
    %1079 = vector.shape_cast %1078 : vector<1x1x1x6xf32> to vector<1x6xf32>
    %1080 = vector.broadcast %1079 : vector<1x6xf32> to vector<8x6xf32>
    %1081 = arith.addf %1077, %1080 : vector<8x6xf32>
    %cst_1024 = arith.constant dense<0.000000e+00> : vector<8x8xf32>
    %1082 = tpu.matmul %1067, %1074, %cst_1024 {dimension_numbers = #tpu.dot_dimension_numbers<[1], [1], [0], [0], [0, 0, 1, 0], [], []>} : vector<8x6xf32>, vector<8x6xf32>, vector<8x8xf32> -> vector<8x8xf32>
    %1083 = tpu.concatenate %986, %1010, %1034, %1058, %1082 in 0 : vector<8x8xf32>, vector<8x8xf32>, vector<8x8xf32>, vector<8x8xf32>, vector<8x8xf32> -> vector<40x8xf32>
    %cst_1025 = arith.constant dense<0xFF800000> : vector<40xf32>
    %1084 = vector.multi_reduction <maximumf>, %1083, %cst_1025 [1] : vector<40x8xf32> to vector<40xf32>
    %1085 = vector.shape_cast %1084 : vector<40xf32> to vector<40x1xf32>
    %1086 = vector.broadcast %1085 : vector<40x1xf32> to vector<40x8xf32>
    %1087 = arith.subf %1083, %1086 : vector<40x8xf32>
    %1088 = math.exp %1087 : vector<40x8xf32>
    %cst_1026 = arith.constant dense<0.000000e+00> : vector<40xf32>
    %1089 = vector.multi_reduction <add>, %1088, %cst_1026 [1] : vector<40x8xf32> to vector<40xf32>
    %1090 = vector.shape_cast %1089 : vector<40xf32> to vector<40x1xf32>
    %1091 = vector.broadcast %1090 : vector<40x1xf32> to vector<40x8xf32>
    %1092 = arith.divf %1088, %1091 : vector<40x8xf32>
    %1093 = vector.extract_strided_slice %1092 {offsets = [0, 0], sizes = [8, 8], strides = [1, 1]} : vector<40x8xf32> to vector<8x8xf32>
    %cst_1027 = arith.constant dense<0.000000e+00> : vector<8x6xf32>
    %1094 = tpu.matmul %1093, %985, %cst_1027 {dimension_numbers = #tpu.dot_dimension_numbers<[1], [0], [0], [1], [0, 0, 1, 1], [], []>} : vector<8x8xf32>, vector<8x6xf32>, vector<8x6xf32> -> vector<8x6xf32>
    %c4_1028 = arith.constant 4 : index
    %c0_1029 = arith.constant 0 : index
    %c0_1030 = arith.constant 0 : index
    %c0_1031 = arith.constant 0 : index
    %1095 = vector.load %arg12[%c4_1028, %c0_1029, %c0_1030, %c0_1031] : memref<5x5x6x30xf32, #tpu.memory_space<vmem>>, vector<1x1x6x30xf32>
    %1096 = vector.shape_cast %1095 : vector<1x1x6x30xf32> to vector<6x30xf32>
    %cst_1032 = arith.constant dense<0.000000e+00> : vector<8x30xf32>
    %1097 = tpu.matmul %1094, %1096, %cst_1032 {dimension_numbers = #tpu.dot_dimension_numbers<[1], [0], [0], [1], [0, 0, 1, 1], [], []>} : vector<8x6xf32>, vector<6x30xf32>, vector<8x30xf32> -> vector<8x30xf32>
    %1098 = vector.extract_strided_slice %1092 {offsets = [8, 0], sizes = [8, 8], strides = [1, 1]} : vector<40x8xf32> to vector<8x8xf32>
    %cst_1033 = arith.constant dense<0.000000e+00> : vector<8x6xf32>
    %1099 = tpu.matmul %1098, %1009, %cst_1033 {dimension_numbers = #tpu.dot_dimension_numbers<[1], [0], [0], [1], [0, 0, 1, 1], [], []>} : vector<8x8xf32>, vector<8x6xf32>, vector<8x6xf32> -> vector<8x6xf32>
    %c4_1034 = arith.constant 4 : index
    %c1_1035 = arith.constant 1 : index
    %c0_1036 = arith.constant 0 : index
    %c0_1037 = arith.constant 0 : index
    %1100 = vector.load %arg12[%c4_1034, %c1_1035, %c0_1036, %c0_1037] : memref<5x5x6x30xf32, #tpu.memory_space<vmem>>, vector<1x1x6x30xf32>
    %1101 = vector.shape_cast %1100 : vector<1x1x6x30xf32> to vector<6x30xf32>
    %cst_1038 = arith.constant dense<0.000000e+00> : vector<8x30xf32>
    %1102 = tpu.matmul %1099, %1101, %cst_1038 {dimension_numbers = #tpu.dot_dimension_numbers<[1], [0], [0], [1], [0, 0, 1, 1], [], []>} : vector<8x6xf32>, vector<6x30xf32>, vector<8x30xf32> -> vector<8x30xf32>
    %1103 = arith.addf %1097, %1102 : vector<8x30xf32>
    %1104 = vector.extract_strided_slice %1092 {offsets = [16, 0], sizes = [8, 8], strides = [1, 1]} : vector<40x8xf32> to vector<8x8xf32>
    %cst_1039 = arith.constant dense<0.000000e+00> : vector<8x6xf32>
    %1105 = tpu.matmul %1104, %1033, %cst_1039 {dimension_numbers = #tpu.dot_dimension_numbers<[1], [0], [0], [1], [0, 0, 1, 1], [], []>} : vector<8x8xf32>, vector<8x6xf32>, vector<8x6xf32> -> vector<8x6xf32>
    %c4_1040 = arith.constant 4 : index
    %c2_1041 = arith.constant 2 : index
    %c0_1042 = arith.constant 0 : index
    %c0_1043 = arith.constant 0 : index
    %1106 = vector.load %arg12[%c4_1040, %c2_1041, %c0_1042, %c0_1043] : memref<5x5x6x30xf32, #tpu.memory_space<vmem>>, vector<1x1x6x30xf32>
    %1107 = vector.shape_cast %1106 : vector<1x1x6x30xf32> to vector<6x30xf32>
    %cst_1044 = arith.constant dense<0.000000e+00> : vector<8x30xf32>
    %1108 = tpu.matmul %1105, %1107, %cst_1044 {dimension_numbers = #tpu.dot_dimension_numbers<[1], [0], [0], [1], [0, 0, 1, 1], [], []>} : vector<8x6xf32>, vector<6x30xf32>, vector<8x30xf32> -> vector<8x30xf32>
    %1109 = arith.addf %1103, %1108 : vector<8x30xf32>
    %1110 = vector.extract_strided_slice %1092 {offsets = [24, 0], sizes = [8, 8], strides = [1, 1]} : vector<40x8xf32> to vector<8x8xf32>
    %cst_1045 = arith.constant dense<0.000000e+00> : vector<8x6xf32>
    %1111 = tpu.matmul %1110, %1057, %cst_1045 {dimension_numbers = #tpu.dot_dimension_numbers<[1], [0], [0], [1], [0, 0, 1, 1], [], []>} : vector<8x8xf32>, vector<8x6xf32>, vector<8x6xf32> -> vector<8x6xf32>
    %c4_1046 = arith.constant 4 : index
    %c3_1047 = arith.constant 3 : index
    %c0_1048 = arith.constant 0 : index
    %c0_1049 = arith.constant 0 : index
    %1112 = vector.load %arg12[%c4_1046, %c3_1047, %c0_1048, %c0_1049] : memref<5x5x6x30xf32, #tpu.memory_space<vmem>>, vector<1x1x6x30xf32>
    %1113 = vector.shape_cast %1112 : vector<1x1x6x30xf32> to vector<6x30xf32>
    %cst_1050 = arith.constant dense<0.000000e+00> : vector<8x30xf32>
    %1114 = tpu.matmul %1111, %1113, %cst_1050 {dimension_numbers = #tpu.dot_dimension_numbers<[1], [0], [0], [1], [0, 0, 1, 1], [], []>} : vector<8x6xf32>, vector<6x30xf32>, vector<8x30xf32> -> vector<8x30xf32>
    %1115 = arith.addf %1109, %1114 : vector<8x30xf32>
    %1116 = vector.extract_strided_slice %1092 {offsets = [32, 0], sizes = [8, 8], strides = [1, 1]} : vector<40x8xf32> to vector<8x8xf32>
    %cst_1051 = arith.constant dense<0.000000e+00> : vector<8x6xf32>
    %1117 = tpu.matmul %1116, %1081, %cst_1051 {dimension_numbers = #tpu.dot_dimension_numbers<[1], [0], [0], [1], [0, 0, 1, 1], [], []>} : vector<8x8xf32>, vector<8x6xf32>, vector<8x6xf32> -> vector<8x6xf32>
    %c4_1052 = arith.constant 4 : index
    %c4_1053 = arith.constant 4 : index
    %c0_1054 = arith.constant 0 : index
    %c0_1055 = arith.constant 0 : index
    %1118 = vector.load %arg12[%c4_1052, %c4_1053, %c0_1054, %c0_1055] : memref<5x5x6x30xf32, #tpu.memory_space<vmem>>, vector<1x1x6x30xf32>
    %1119 = vector.shape_cast %1118 : vector<1x1x6x30xf32> to vector<6x30xf32>
    %cst_1056 = arith.constant dense<0.000000e+00> : vector<8x30xf32>
    %1120 = tpu.matmul %1117, %1119, %cst_1056 {dimension_numbers = #tpu.dot_dimension_numbers<[1], [0], [0], [1], [0, 0, 1, 1], [], []>} : vector<8x6xf32>, vector<6x30xf32>, vector<8x30xf32> -> vector<8x30xf32>
    %1121 = arith.addf %1115, %1120 : vector<8x30xf32>
    %1122 = arith.addf %936, %1121 : vector<8x30xf32>
    %c4_1057 = arith.constant 4 : index
    %c0_1058 = arith.constant 0 : index
    %c0_1059 = arith.constant 0 : index
    %1123 = vector.load %arg13[%c4_1057, %c0_1058, %c0_1059] : memref<5x1x30xf32, #tpu.memory_space<vmem>>, vector<1x1x30xf32>
    %1124 = vector.shape_cast %1123 : vector<1x1x30xf32> to vector<1x30xf32>
    %1125 = vector.broadcast %1124 : vector<1x30xf32> to vector<8x30xf32>
    %1126 = arith.addf %1122, %1125 : vector<8x30xf32>
    %c4_1060 = arith.constant 4 : index
    %c0_1061 = arith.constant 0 : index
    %c0_1062 = arith.constant 0 : index
    %1127 = vector.load %arg14[%c4_1060, %c0_1061, %c0_1062] : memref<5x1x30xf32, #tpu.memory_space<vmem>>, vector<1x1x30xf32>
    %1128 = vector.shape_cast %1127 : vector<1x1x30xf32> to vector<1x30xf32>
    %c4_1063 = arith.constant 4 : index
    %c0_1064 = arith.constant 0 : index
    %c0_1065 = arith.constant 0 : index
    %1129 = vector.load %arg15[%c4_1063, %c0_1064, %c0_1065] : memref<5x1x30xf32, #tpu.memory_space<vmem>>, vector<1x1x30xf32>
    %1130 = vector.shape_cast %1129 : vector<1x1x30xf32> to vector<1x30xf32>
    %cst_1066 = arith.constant dense<0.000000e+00> : vector<8xf32>
    %1131 = vector.multi_reduction <add>, %1126, %cst_1066 [1] : vector<8x30xf32> to vector<8xf32>
    %1132 = vector.shape_cast %1131 : vector<8xf32> to vector<8x1xf32>
    %cst_1067 = arith.constant 3.000000e+01 : f32
    %1133 = vector.broadcast %cst_1067 : f32 to vector<8x1xf32>
    %1134 = arith.divf %1132, %1133 : vector<8x1xf32>
    %1135 = vector.broadcast %1134 : vector<8x1xf32> to vector<8x30xf32>
    %1136 = arith.subf %1126, %1135 : vector<8x30xf32>
    %1137 = arith.mulf %1136, %1136 : vector<8x30xf32>
    %cst_1068 = arith.constant dense<0.000000e+00> : vector<8xf32>
    %1138 = vector.multi_reduction <add>, %1137, %cst_1068 [1] : vector<8x30xf32> to vector<8xf32>
    %1139 = vector.shape_cast %1138 : vector<8xf32> to vector<8x1xf32>
    %cst_1069 = arith.constant 3.000000e+01 : f32
    %1140 = vector.broadcast %cst_1069 : f32 to vector<8x1xf32>
    %1141 = arith.divf %1139, %1140 : vector<8x1xf32>
    %1142 = vector.broadcast %1134 : vector<8x1xf32> to vector<8x30xf32>
    %1143 = arith.subf %1126, %1142 : vector<8x30xf32>
    %cst_1070 = arith.constant 9.99999974E-6 : f32
    %1144 = vector.broadcast %cst_1070 : f32 to vector<8x1xf32>
    %1145 = arith.addf %1141, %1144 : vector<8x1xf32>
    %1146 = math.rsqrt %1145 : vector<8x1xf32>
    %1147 = vector.broadcast %1146 : vector<8x1xf32> to vector<8x30xf32>
    %1148 = arith.mulf %1143, %1147 : vector<8x30xf32>
    %1149 = vector.broadcast %1128 : vector<1x30xf32> to vector<8x30xf32>
    %1150 = arith.mulf %1148, %1149 : vector<8x30xf32>
    %1151 = vector.broadcast %1130 : vector<1x30xf32> to vector<8x30xf32>
    %1152 = arith.addf %1150, %1151 : vector<8x30xf32>
    %c4_1071 = arith.constant 4 : index
    %c0_1072 = arith.constant 0 : index
    %c0_1073 = arith.constant 0 : index
    %1153 = vector.load %arg16[%c4_1071, %c0_1072, %c0_1073] : memref<5x30x120xf32, #tpu.memory_space<vmem>>, vector<1x30x120xf32>
    %1154 = vector.shape_cast %1153 : vector<1x30x120xf32> to vector<30x120xf32>
    %cst_1074 = arith.constant dense<0.000000e+00> : vector<8x120xf32>
    %1155 = tpu.matmul %1152, %1154, %cst_1074 {dimension_numbers = #tpu.dot_dimension_numbers<[1], [0], [0], [1], [0, 0, 1, 1], [], []>} : vector<8x30xf32>, vector<30x120xf32>, vector<8x120xf32> -> vector<8x120xf32>
    %c4_1075 = arith.constant 4 : index
    %c0_1076 = arith.constant 0 : index
    %c0_1077 = arith.constant 0 : index
    %1156 = vector.load %arg17[%c4_1075, %c0_1076, %c0_1077] : memref<5x1x120xf32, #tpu.memory_space<vmem>>, vector<1x1x120xf32>
    %1157 = vector.shape_cast %1156 : vector<1x1x120xf32> to vector<1x120xf32>
    %1158 = vector.broadcast %1157 : vector<1x120xf32> to vector<8x120xf32>
    %1159 = arith.addf %1155, %1158 : vector<8x120xf32>
    %cst_1078 = arith.constant 0.000000e+00 : f32
    %1160 = vector.broadcast %cst_1078 : f32 to vector<8x120xf32>
    %1161 = arith.maximumf %1159, %1160 : vector<8x120xf32>
    %c4_1079 = arith.constant 4 : index
    %c0_1080 = arith.constant 0 : index
    %c0_1081 = arith.constant 0 : index
    %1162 = vector.load %arg18[%c4_1079, %c0_1080, %c0_1081] : memref<5x120x30xf32, #tpu.memory_space<vmem>>, vector<1x120x30xf32>
    %1163 = vector.shape_cast %1162 : vector<1x120x30xf32> to vector<120x30xf32>
    %cst_1082 = arith.constant dense<0.000000e+00> : vector<8x30xf32>
    %1164 = tpu.matmul %1161, %1163, %cst_1082 {dimension_numbers = #tpu.dot_dimension_numbers<[1], [0], [0], [1], [0, 0, 1, 1], [], []>} : vector<8x120xf32>, vector<120x30xf32>, vector<8x30xf32> -> vector<8x30xf32>
    %1165 = arith.addf %1126, %1164 : vector<8x30xf32>
    %c4_1083 = arith.constant 4 : index
    %c0_1084 = arith.constant 0 : index
    %c0_1085 = arith.constant 0 : index
    %1166 = vector.load %arg19[%c4_1083, %c0_1084, %c0_1085] : memref<5x1x30xf32, #tpu.memory_space<vmem>>, vector<1x1x30xf32>
    %1167 = vector.shape_cast %1166 : vector<1x1x30xf32> to vector<1x30xf32>
    %1168 = vector.broadcast %1167 : vector<1x30xf32> to vector<8x30xf32>
    %1169 = arith.addf %1165, %1168 : vector<8x30xf32>
    %1170 = vector.extract_strided_slice %1169 {offsets = [7, 0], sizes = [1, 30], strides = [1, 1]} : vector<8x30xf32> to vector<1x30xf32>
    %c0_1086 = arith.constant 0 : index
    %c0_1087 = arith.constant 0 : index
    %1171 = vector.load %arg20[%c0_1086, %c0_1087] : memref<1x30xf32, #tpu.memory_space<vmem>>, vector<1x30xf32>
    %c0_1088 = arith.constant 0 : index
    %c0_1089 = arith.constant 0 : index
    %1172 = vector.load %arg21[%c0_1088, %c0_1089] : memref<1x30xf32, #tpu.memory_space<vmem>>, vector<1x30xf32>
    %cst_1090 = arith.constant dense<0.000000e+00> : vector<1xf32>
    %1173 = vector.multi_reduction <add>, %1170, %cst_1090 [1] : vector<1x30xf32> to vector<1xf32>
    %1174 = vector.shape_cast %1173 : vector<1xf32> to vector<1x1xf32>
    %cst_1091 = arith.constant 3.000000e+01 : f32
    %1175 = vector.broadcast %cst_1091 : f32 to vector<1x1xf32>
    %1176 = arith.divf %1174, %1175 : vector<1x1xf32>
    %1177 = vector.broadcast %1176 : vector<1x1xf32> to vector<1x30xf32>
    %1178 = arith.subf %1170, %1177 : vector<1x30xf32>
    %1179 = arith.mulf %1178, %1178 : vector<1x30xf32>
    %cst_1092 = arith.constant dense<0.000000e+00> : vector<1xf32>
    %1180 = vector.multi_reduction <add>, %1179, %cst_1092 [1] : vector<1x30xf32> to vector<1xf32>
    %1181 = vector.shape_cast %1180 : vector<1xf32> to vector<1x1xf32>
    %cst_1093 = arith.constant 3.000000e+01 : f32
    %1182 = vector.broadcast %cst_1093 : f32 to vector<1x1xf32>
    %1183 = arith.divf %1181, %1182 : vector<1x1xf32>
    %1184 = vector.broadcast %1176 : vector<1x1xf32> to vector<1x30xf32>
    %1185 = arith.subf %1170, %1184 : vector<1x30xf32>
    %cst_1094 = arith.constant 9.99999974E-6 : f32
    %1186 = vector.broadcast %cst_1094 : f32 to vector<1x1xf32>
    %1187 = arith.addf %1183, %1186 : vector<1x1xf32>
    %1188 = math.rsqrt %1187 : vector<1x1xf32>
    %1189 = vector.broadcast %1188 : vector<1x1xf32> to vector<1x30xf32>
    %1190 = arith.mulf %1185, %1189 : vector<1x30xf32>
    %1191 = arith.mulf %1190, %1171 : vector<1x30xf32>
    %1192 = arith.addf %1191, %1172 : vector<1x30xf32>
    %c0_1095 = arith.constant 0 : index
    %c0_1096 = arith.constant 0 : index
    %1193 = vector.load %arg22[%c0_1095, %c0_1096] : memref<30x30xf32, #tpu.memory_space<vmem>>, vector<30x30xf32>
    %cst_1097 = arith.constant dense<0.000000e+00> : vector<1x30xf32>
    %1194 = tpu.matmul %1192, %1193, %cst_1097 {dimension_numbers = #tpu.dot_dimension_numbers<[1], [0], [0], [1], [0, 0, 1, 1], [], []>} : vector<1x30xf32>, vector<30x30xf32>, vector<1x30xf32> -> vector<1x30xf32>
    %c0_1098 = arith.constant 0 : index
    %c0_1099 = arith.constant 0 : index
    %1195 = vector.load %arg23[%c0_1098, %c0_1099] : memref<1x30xf32, #tpu.memory_space<vmem>>, vector<1x30xf32>
    %1196 = arith.addf %1194, %1195 : vector<1x30xf32>
    %cst_1100 = arith.constant 0.000000e+00 : f32
    %1197 = vector.broadcast %cst_1100 : f32 to vector<1x30xf32>
    %1198 = arith.maximumf %1196, %1197 : vector<1x30xf32>
    %c0_1101 = arith.constant 0 : index
    %c0_1102 = arith.constant 0 : index
    %1199 = vector.load %arg24[%c0_1101, %c0_1102] : memref<30x30xf32, #tpu.memory_space<vmem>>, vector<30x30xf32>
    %cst_1103 = arith.constant dense<0.000000e+00> : vector<1x30xf32>
    %1200 = tpu.matmul %1198, %1199, %cst_1103 {dimension_numbers = #tpu.dot_dimension_numbers<[1], [0], [0], [1], [0, 0, 1, 1], [], []>} : vector<1x30xf32>, vector<30x30xf32>, vector<1x30xf32> -> vector<1x30xf32>
    %c0_1104 = arith.constant 0 : index
    %c0_1105 = arith.constant 0 : index
    %1201 = vector.load %arg25[%c0_1104, %c0_1105] : memref<1x30xf32, #tpu.memory_space<vmem>>, vector<1x30xf32>
    %1202 = arith.addf %1200, %1201 : vector<1x30xf32>
    %c0_1106 = arith.constant 0 : index
    %c0_1107 = arith.constant 0 : index
    %c0_1108 = arith.constant 0 : index
    %1203 = vector.load %arg29[%c0_1106, %c0_1107, %c0_1108] : memref<1x1x30xf32, #tpu.memory_space<vmem>>, vector<1x1x30xf32>
    %1204 = vector.shape_cast %1203 : vector<1x1x30xf32> to vector<1x30xf32>
    %c0_1109 = arith.constant 0 : index
    %c0_1110 = arith.constant 0 : index
    %1205 = vector.load %arg26[%c0_1109, %c0_1110] : memref<30x4xf32, #tpu.memory_space<vmem>>, vector<30x4xf32>
    %cst_1111 = arith.constant dense<0.000000e+00> : vector<1x4xf32>
    %1206 = tpu.matmul %1202, %1205, %cst_1111 {dimension_numbers = #tpu.dot_dimension_numbers<[1], [0], [0], [1], [0, 0, 1, 1], [], []>} : vector<1x30xf32>, vector<30x4xf32>, vector<1x4xf32> -> vector<1x4xf32>
    %c0_1112 = arith.constant 0 : index
    %c0_1113 = arith.constant 0 : index
    %1207 = vector.load %arg27[%c0_1112, %c0_1113] : memref<30x4xf32, #tpu.memory_space<vmem>>, vector<30x4xf32>
    %cst_1114 = arith.constant dense<0.000000e+00> : vector<1x4xf32>
    %1208 = tpu.matmul %1204, %1207, %cst_1114 {dimension_numbers = #tpu.dot_dimension_numbers<[1], [0], [0], [1], [0, 0, 1, 1], [], []>} : vector<1x30xf32>, vector<30x4xf32>, vector<1x4xf32> -> vector<1x4xf32>
    %1209 = arith.addf %1206, %1208 : vector<1x4xf32>
    %c0_1115 = arith.constant 0 : index
    %c0_1116 = arith.constant 0 : index
    %1210 = vector.load %arg28[%c0_1115, %c0_1116] : memref<1x4xf32, #tpu.memory_space<vmem>>, vector<1x4xf32>
    %1211 = arith.addf %1209, %1210 : vector<1x4xf32>
    %1212 = vector.shape_cast %1211 : vector<1x4xf32> to vector<1x1x4xf32>
    %c0_1117 = arith.constant 0 : index
    %c0_1118 = arith.constant 0 : index
    %c0_1119 = arith.constant 0 : index
    %1213 = vector.load %arg30[%c0_1117, %c0_1118, %c0_1119] : memref<1x1x4xf32, #tpu.memory_space<vmem>>, vector<1x1x4xf32>
    tpu.vector_store %arg30[%c0_1117, %c0_1118, %c0_1119], %1212 {strides = array<i32>} : memref<1x1x4xf32, #tpu.memory_space<vmem>>, vector<1x1x4xf32>,
    return
  }
  func.func @transform_0(%arg0: i32) -> (i32, i32) {
    %c0_i32 = arith.constant 0 : i32
    %c0_i32_0 = arith.constant 0 : i32
    return %arg0, %c0_i32 : i32, i32
  }
  func.func @transform_1(%arg0: i32) -> (i32, i32) {
    %c0_i32 = arith.constant 0 : i32
    %c0_i32_0 = arith.constant 0 : i32
    return %arg0, %c0_i32 : i32, i32
  }
  func.func @transform_2(%arg0: i32) -> (i32, i32) {
    %c0_i32 = arith.constant 0 : i32
    %c0_i32_0 = arith.constant 0 : i32
    %c0_i32_1 = arith.constant 0 : i32
    return %c0_i32, %c0_i32_0 : i32, i32
  }
  func.func @transform_3(%arg0: i32) -> (i32, i32, i32) {
    %c0_i32 = arith.constant 0 : i32
    %c0_i32_0 = arith.constant 0 : i32
    %c0_i32_1 = arith.constant 0 : i32
    %c0_i32_2 = arith.constant 0 : i32
    return %c0_i32, %c0_i32_0, %c0_i32_1 : i32, i32, i32
  }
  func.func @transform_4(%arg0: i32) -> (i32, i32, i32) {
    %c0_i32 = arith.constant 0 : i32
    %c0_i32_0 = arith.constant 0 : i32
    %c0_i32_1 = arith.constant 0 : i32
    %c0_i32_2 = arith.constant 0 : i32
    return %c0_i32, %c0_i32_0, %c0_i32_1 : i32, i32, i32
  }
  func.func @transform_5(%arg0: i32) -> (i32, i32, i32, i32) {
    %c0_i32 = arith.constant 0 : i32
    %c0_i32_0 = arith.constant 0 : i32
    %c0_i32_1 = arith.constant 0 : i32
    %c0_i32_2 = arith.constant 0 : i32
    %c0_i32_3 = arith.constant 0 : i32
    return %c0_i32, %c0_i32_0, %c0_i32_1, %c0_i32_2 : i32, i32, i32, i32
  }
  func.func @transform_6(%arg0: i32) -> (i32, i32, i32, i32) {
    %c0_i32 = arith.constant 0 : i32
    %c0_i32_0 = arith.constant 0 : i32
    %c0_i32_1 = arith.constant 0 : i32
    %c0_i32_2 = arith.constant 0 : i32
    %c0_i32_3 = arith.constant 0 : i32
    return %c0_i32, %c0_i32_0, %c0_i32_1, %c0_i32_2 : i32, i32, i32, i32
  }
  func.func @transform_7(%arg0: i32) -> (i32, i32, i32, i32) {
    %c0_i32 = arith.constant 0 : i32
    %c0_i32_0 = arith.constant 0 : i32
    %c0_i32_1 = arith.constant 0 : i32
    %c0_i32_2 = arith.constant 0 : i32
    %c0_i32_3 = arith.constant 0 : i32
    return %c0_i32, %c0_i32_0, %c0_i32_1, %c0_i32_2 : i32, i32, i32, i32
  }
  func.func @transform_8(%arg0: i32) -> (i32, i32, i32, i32) {
    %c0_i32 = arith.constant 0 : i32
    %c0_i32_0 = arith.constant 0 : i32
    %c0_i32_1 = arith.constant 0 : i32
    %c0_i32_2 = arith.constant 0 : i32
    %c0_i32_3 = arith.constant 0 : i32
    return %c0_i32, %c0_i32_0, %c0_i32_1, %c0_i32_2 : i32, i32, i32, i32
  }
  func.func @transform_9(%arg0: i32) -> (i32, i32, i32, i32) {
    %c0_i32 = arith.constant 0 : i32
    %c0_i32_0 = arith.constant 0 : i32
    %c0_i32_1 = arith.constant 0 : i32
    %c0_i32_2 = arith.constant 0 : i32
    %c0_i32_3 = arith.constant 0 : i32
    return %c0_i32, %c0_i32_0, %c0_i32_1, %c0_i32_2 : i32, i32, i32, i32
  }
  func.func @transform_10(%arg0: i32) -> (i32, i32, i32, i32) {
    %c0_i32 = arith.constant 0 : i32
    %c0_i32_0 = arith.constant 0 : i32
    %c0_i32_1 = arith.constant 0 : i32
    %c0_i32_2 = arith.constant 0 : i32
    %c0_i32_3 = arith.constant 0 : i32
    return %c0_i32, %c0_i32_0, %c0_i32_1, %c0_i32_2 : i32, i32, i32, i32
  }
  func.func @transform_11(%arg0: i32) -> (i32, i32, i32, i32) {
    %c0_i32 = arith.constant 0 : i32
    %c0_i32_0 = arith.constant 0 : i32
    %c0_i32_1 = arith.constant 0 : i32
    %c0_i32_2 = arith.constant 0 : i32
    %c0_i32_3 = arith.constant 0 : i32
    return %c0_i32, %c0_i32_0, %c0_i32_1, %c0_i32_2 : i32, i32, i32, i32
  }
  func.func @transform_12(%arg0: i32) -> (i32, i32, i32) {
    %c0_i32 = arith.constant 0 : i32
    %c0_i32_0 = arith.constant 0 : i32
    %c0_i32_1 = arith.constant 0 : i32
    %c0_i32_2 = arith.constant 0 : i32
    return %c0_i32, %c0_i32_0, %c0_i32_1 : i32, i32, i32
  }
  func.func @transform_13(%arg0: i32) -> (i32, i32, i32) {
    %c0_i32 = arith.constant 0 : i32
    %c0_i32_0 = arith.constant 0 : i32
    %c0_i32_1 = arith.constant 0 : i32
    %c0_i32_2 = arith.constant 0 : i32
    return %c0_i32, %c0_i32_0, %c0_i32_1 : i32, i32, i32
  }
  func.func @transform_14(%arg0: i32) -> (i32, i32, i32) {
    %c0_i32 = arith.constant 0 : i32
    %c0_i32_0 = arith.constant 0 : i32
    %c0_i32_1 = arith.constant 0 : i32
    %c0_i32_2 = arith.constant 0 : i32
    return %c0_i32, %c0_i32_0, %c0_i32_1 : i32, i32, i32
  }
  func.func @transform_15(%arg0: i32) -> (i32, i32, i32) {
    %c0_i32 = arith.constant 0 : i32
    %c0_i32_0 = arith.constant 0 : i32
    %c0_i32_1 = arith.constant 0 : i32
    %c0_i32_2 = arith.constant 0 : i32
    return %c0_i32, %c0_i32_0, %c0_i32_1 : i32, i32, i32
  }
  func.func @transform_16(%arg0: i32) -> (i32, i32, i32) {
    %c0_i32 = arith.constant 0 : i32
    %c0_i32_0 = arith.constant 0 : i32
    %c0_i32_1 = arith.constant 0 : i32
    %c0_i32_2 = arith.constant 0 : i32
    return %c0_i32, %c0_i32_0, %c0_i32_1 : i32, i32, i32
  }
  func.func @transform_17(%arg0: i32) -> (i32, i32, i32) {
    %c0_i32 = arith.constant 0 : i32
    %c0_i32_0 = arith.constant 0 : i32
    %c0_i32_1 = arith.constant 0 : i32
    %c0_i32_2 = arith.constant 0 : i32
    return %c0_i32, %c0_i32_0, %c0_i32_1 : i32, i32, i32
  }
  func.func @transform_18(%arg0: i32) -> (i32, i32, i32) {
    %c0_i32 = arith.constant 0 : i32
    %c0_i32_0 = arith.constant 0 : i32
    %c0_i32_1 = arith.constant 0 : i32
    %c0_i32_2 = arith.constant 0 : i32
    return %c0_i32, %c0_i32_0, %c0_i32_1 : i32, i32, i32
  }
  func.func @transform_19(%arg0: i32) -> (i32, i32) {
    %c0_i32 = arith.constant 0 : i32
    %c0_i32_0 = arith.constant 0 : i32
    %c0_i32_1 = arith.constant 0 : i32
    return %c0_i32, %c0_i32_0 : i32, i32
  }
  func.func @transform_20(%arg0: i32) -> (i32, i32) {
    %c0_i32 = arith.constant 0 : i32
    %c0_i32_0 = arith.constant 0 : i32
    %c0_i32_1 = arith.constant 0 : i32
    return %c0_i32, %c0_i32_0 : i32, i32
  }
  func.func @transform_21(%arg0: i32) -> (i32, i32) {
    %c0_i32 = arith.constant 0 : i32
    %c0_i32_0 = arith.constant 0 : i32
    %c0_i32_1 = arith.constant 0 : i32
    return %c0_i32, %c0_i32_0 : i32, i32
  }
  func.func @transform_22(%arg0: i32) -> (i32, i32) {
    %c0_i32 = arith.constant 0 : i32
    %c0_i32_0 = arith.constant 0 : i32
    %c0_i32_1 = arith.constant 0 : i32
    return %c0_i32, %c0_i32_0 : i32, i32
  }
  func.func @transform_23(%arg0: i32) -> (i32, i32) {
    %c0_i32 = arith.constant 0 : i32
    %c0_i32_0 = arith.constant 0 : i32
    %c0_i32_1 = arith.constant 0 : i32
    return %c0_i32, %c0_i32_0 : i32, i32
  }
  func.func @transform_24(%arg0: i32) -> (i32, i32) {
    %c0_i32 = arith.constant 0 : i32
    %c0_i32_0 = arith.constant 0 : i32
    %c0_i32_1 = arith.constant 0 : i32
    return %c0_i32, %c0_i32_0 : i32, i32
  }
  func.func @transform_25(%arg0: i32) -> (i32, i32) {
    %c0_i32 = arith.constant 0 : i32
    %c0_i32_0 = arith.constant 0 : i32
    %c0_i32_1 = arith.constant 0 : i32
    return %c0_i32, %c0_i32_0 : i32, i32
  }
  func.func @transform_26(%arg0: i32) -> (i32, i32) {
    %c0_i32 = arith.constant 0 : i32
    %c0_i32_0 = arith.constant 0 : i32
    %c0_i32_1 = arith.constant 0 : i32
    return %c0_i32, %c0_i32_0 : i32, i32
  }
  func.func @transform_27(%arg0: i32) -> (i32, i32) {
    %c0_i32 = arith.constant 0 : i32
    %c0_i32_0 = arith.constant 0 : i32
    %c0_i32_1 = arith.constant 0 : i32
    return %c0_i32, %c0_i32_0 : i32, i32
  }
  func.func @transform_28(%arg0: i32) -> (i32, i32, i32) {
    %c0_i32 = arith.constant 0 : i32
    %c0_i32_0 = arith.constant 0 : i32
    %c0_i32_1 = arith.constant 0 : i32
    return %arg0, %c0_i32, %c0_i32_0 : i32, i32, i32
  }
  func.func @transform_29(%arg0: i32) -> (i32, i32, i32) {
    %c0_i32 = arith.constant 0 : i32
    %c0_i32_0 = arith.constant 0 : i32
    %c0_i32_1 = arith.constant 0 : i32
    return %arg0, %c0_i32, %c0_i32_0 : i32, i32, i32
  }
}

</mosaic_0001>

<bundles_post_ra>
// kernel: manual_a_forward.1
= control target key start
LH: loop header
LB: loop body
LE: loop exit
PB: predicated region body
PF: predicated region fallthrough
CT: control target
= control target key end

     0   :  { %s18519_s6 = smov 1   ;;  %s18520_s10 = smov 2   ;;  %s20796_s0 = inlined_call_operand.smem [shape: u32[30], index: -1, kind: input, shape index: {}] }
   0x1   :  { %s18559_s5 = sld [smem:[%s20796_s0]]   ;;  %s18521_s14 = smov 3  }
   0x2   :  { %s18564_s9 = sld [smem:[%s20796_s0 + %s18519_s6]]   ;;  %s18522_s18 = smov 4  }
   0x3   :  { %s18569_s13 = sld [smem:[%s20796_s0 + %s18520_s10]]   ;;  %s18523_s22 = smov 5  }
   0x4   :  { %s18574_s17 = sld [smem:[%s20796_s0 + %s18521_s14]]   ;;  %s18524_s26 = smov 6  }
   0x5   :  { %s18579_s21 = sld [smem:[%s20796_s0 + %s18522_s18]]   ;;  %s18525_s30 = smov 7  }
   0x6   :  { %s18584_s25 = sld [smem:[%s20796_s0 + %s18523_s22]]   ;;  %s18526_s4 = smov 8  }
   0x7   :  { %20816 = sst [smem:[#allocation5_spill]] %s18559_s5  ;;  %s18527_s10 = smov 9  }
   0x8   :  { %20817 = sst [smem:[#allocation6_spill]] %s18564_s9  ;;  %s18528_s15 = smov 10  }
   0x9   :  { %20818 = sst [smem:[#allocation7_spill]] %s18569_s13  ;;  %s18529_s20 = smov 11  }
   0xa   :  { %s18589_s29 = sld [smem:[%s20796_s0 + %s18524_s26]]   ;;  %s18530_s26 = smov 12  }
   0xb   :  { %s18594_s3 = sld [smem:[%s20796_s0 + %s18525_s30]]   ;;  %s18531_s1 = smov 13  }
   0xc   :  { %s18599_s8 = sld [smem:[%s20796_s0 + %s18526_s4]]   ;;  %s18532_s7 = smov 14  }
   0xd   :  { %s18604_s14 = sld [smem:[%s20796_s0 + %s18527_s10]]   ;;  %s18534_s22 = smov 16  }
   0xe   :  { %s18609_s19 = sld [smem:[%s20796_s0 + %s18528_s15]]   ;;  %s18533_s15 = smov 15  }
   0xf   :  { %s18614_s24 = sld [smem:[%s20796_s0 + %s18529_s20]]   ;;  %s18535_s28 = smov 17  }
  0x10   :  { %s18619_s30 = sld [smem:[%s20796_s0 + %s18530_s26]]  }
  0x11   :  { %20819 = sst [smem:[#allocation8_spill]] %s18594_s3 }
  0x12   :  { %20820 = sst [smem:[#allocation9_spill]] %s18599_s8 }
  0x13   :  { %20821 = sst [smem:[#allocation10_spill]] %s18604_s14 }
  0x14   :  { %s18624_s6 = sld [smem:[%s20796_s0 + %s18531_s1]]  }
  0x15   :  { %s18629_s12 = sld [smem:[%s20796_s0 + %s18532_s7]]   ;;  %s18536_s7 = smov 18  }
  0x16   :  { %s18634_s20 = sld [smem:[%s20796_s0 + %s18533_s15]]   ;;  %s18537_s15 = smov 19  }
  0x17   :  { %s18639_s27 = sld [smem:[%s20796_s0 + %s18534_s22]]   ;;  %s18538_s22 = smov 20  }
  0x18   :  { %s18644_s4 = sld [smem:[%s20796_s0 + %s18535_s28]]   ;;  %s18539_s28 = smov 21  }
  0x1a   :  { %20822 = sst [smem:[#allocation11_spill]] %s18624_s6 }
  0x1b   :  { %20823 = sst [smem:[#allocation12_spill]] %s18629_s12 }
  0x1c   :  { %s18649_s12 = sld [smem:[%s20796_s0 + %s18536_s7]]   ;;  %s18540_s7 = smov 22  }
  0x1d   :  { %20824 = sst [smem:[#allocation13_spill]] %s18639_s27 }
  0x1e   :  { %20825 = sst [smem:[#allocation14_spill]] %s18644_s4 }
  0x1f   :  { %s18654_s6 = sld [smem:[%s20796_s0 + %s18537_s15]]   ;;  %s18541_s15 = smov 23  }
  0x20   :  { %s18659_s27 = sld [smem:[%s20796_s0 + %s18538_s22]]   ;;  %s18542_s22 = smov 24  }
  0x21   :  { %s18664_s4 = sld [smem:[%s20796_s0 + %s18539_s28]]   ;;  %s18543_s28 = smov 25  }
  0x22   :  { %20826 = sst [smem:[#allocation15_spill]] %s18649_s12 }
  0x23   :  { %s18669_s12 = sld [smem:[%s20796_s0 + %s18540_s7]]   ;;  %s18544_s7 = smov 26  }
  0x25   :  { %20827 = sst [smem:[#allocation16_spill]] %s18654_s6 }
  0x26   :  { %20828 = sst [smem:[#allocation17_spill]] %s18659_s27 }
  0x27   :  { %20829 = sst [smem:[#allocation18_spill]] %s18664_s4 }
  0x28   :  { %s18674_s6 = sld [smem:[%s20796_s0 + %s18541_s15]]   ;;  %s18545_s15 = smov 27  }
  0x29   :  { %20830 = sst [smem:[#allocation19_spill]] %s18669_s12 }
  0x2a   :  { %s18679_s27 = sld [smem:[%s20796_s0 + %s18542_s22]]   ;;  %s18546_s22 = smov 28  }
  0x2b   :  { %s18684_s4 = sld [smem:[%s20796_s0 + %s18543_s28]]   ;;  %s18547_s28 = smov 29  }
  0x2c   :  { %s18689_s12 = sld [smem:[%s20796_s0 + %s18544_s7]]  }
  0x2e   :  { %20831 = sst [smem:[#allocation20_spill]] %s18674_s6 }
  0x2f   :  { %s18694_s6 = sld [smem:[%s20796_s0 + %s18545_s15]]  }
  0x30   :  { %20832 = sst [smem:[#allocation21_spill]] %s18679_s27 }
  0x31   :  { %20833 = sst [smem:[#allocation22_spill]] %s18684_s4 }
  0x32   :  { %20834 = sst [smem:[#allocation23_spill]] %s18689_s12 }
  0x33   :  { %s18699_s27 = sld [smem:[%s20796_s0 + %s18546_s22]]  }
  0x34   :  { %s18704_s4 = sld [smem:[%s20796_s0 + %s18547_s28]]  }
  0x35   :  { %20835 = sst [smem:[#allocation24_spill]] %s18694_s6 }
  0x36   :  { %64 = vsyncpa [#allocation3], 0 }
  0x37   :  { %66 = vsyncpa [#allocation3 + $0x1], 0  ;;  %s18706_s7 = smov 0   ;;  %s18708_s10 = smov 0  }
  0x38   :  { %s18710_s11 = smov 0   ;;  %s18712_s15 = smov 0  }
  0x39 LB: > { %s20836_s14 = sld [smem:[#allocation10_spill]]  ;;  %s18727_s0 = sadd.s32 4294967295, %s18517_s15   ;;  %s18505_s7 = sphi %s18706_s7, %s20858_s7   ;;  %s18517_s15 = sphi %s18712_s15, %s20861_s15   ;;  %s18513_s11 = sphi %s18710_s11, %s20860_s11   ;;  %s18509_s10 = sphi %s18708_s10, %s20859_s10  }
  0x3a   : > { %s20837_s13 = sld [smem:[#allocation7_spill]]  ;;  %s15233_s16 = sadd.s32 4294967294, %s18517_s15  }
  0x3b   : > { %s20838_s12 = sld [smem:[#allocation23_spill]]  ;;  %s18731_s18 = sadd.s32 1, %s18517_s15  }
  0x3c   : > { %s20839_s8 = sld [smem:[#allocation9_spill]]  ;;  %s703_s22 = sadd.s32 1, %s18513_s11 }
  0x3d   : > { %s20840_s3 = sld [smem:[#allocation8_spill]]  ;;  %s700_s23 = ssub.s32 %s18517_s15, %s18731_s18 }
  0x3e   : > { %p713_p0 = scmp.ne.s32.totalorder %s18513_s11, %s18509_s10  ;;  %p701_p1 = scmp.eq.s32.totalorder %s700_s23, 0 }
  0x3f   : > { %p714_p2 = scmp.eq.s32.totalorder %s18727_s0, 1  ;;  %p719_p3 = scmp.ne.s32.totalorder %s18509_s10, %s18505_s7 }
  0x40   : > { %p720_p4 = scmp.eq.s32.totalorder %s15233_s16, 1  ;;  %p15236_p7 = scmp.ge.s32.totalorder %s18517_s15, 1 }
  0x41   : > { %s18742_s26 = scalar_select %p701_p1, %s18513_s11, %s703_s22  }
  0x42   : > { %p18744_p5 = por %p714_p2, %p713_p0  ;;  %p18748_p6 = por %p720_p4, %p719_p3 }
  0x43   : > { %p836_p8 = scmp.lt.s32.totalorder %s18517_s15, 3 }
  0x45   : > { %p837_p9 = pnand %p15236_p7, %p836_p8 }
  0x46   : > { %s20843_s5 = sld [smem:[#allocation5_spill]] (!%p837_p9)  ;;  %p917_p10 = scmp.lt.s32.totalorder (!%p837_p9), %s18727_s0, 1 }
  0x47   : > { %840 = sbr.rel (%p837_p9) target bundleno = 15853 (0x3ded), region = 136  ;;  %s20844_s9 = sld [smem:[#allocation6_spill]] (!%p837_p9) }
  0x48   : > { %s20857_s6 = sld [smem:[#allocation24_spill]] (!%p837_p9) }
  0x4c   : > { %v930_v0 = vld [vmem:[%s20837_s13 + $0x8] sm:$0xff]  ;;  %v18548_v1 = vmov 0.0   ;;  %v929_v2 = vld [vmem:[%s20837_s13] sm:$0xff]  ;;  %vm18549_vm0 = vmmov 0   ;;  %s18761_s2 = scalar_select %p917_p10, %s18727_s0, 1  ;;  %vm932_vm1 = vcmask 130048  }
  0x4d   : > { %16794 = vmatprep.subr.mxu0 %v18548_v1  ;;  %16798 = vmatprep.mubr.msk.f32.mxu0 %vm18549_vm0, %v18548_v1  ;;  %vm1008_vm2 = vcmask 244736   ;;  %v1040_v14 = vld [vmem:[%s18584_s25 + $0x18] sm:$0x3f]  ;;  %vm1051_vm3 = vcmask 1045504   ;;  %v1039_v16 = vld [vmem:[%s18584_s25 + $0x10] sm:$0xff]  ;;  %v1038_v18 = vld [vmem:[%s18584_s25 + $0x8] sm:$0xff] }
  0x4e   : > { %16795 = vmatpush3.msra.mxu0 %v930_v0  ;;  %16801 = vmatprep.subr.mxu1 %v18548_v1  ;;  %s15237_s16 = sshll.u32 %s18761_s2, 3  ;;  %v1129_v15 = vld [vmem:[%s18589_s29 + $0x18] sm:$0x3f]  ;;  %v1128_v17 = vld [vmem:[%s18589_s29 + $0x10] sm:$0xff]  ;;  %v1127_v19 = vld [vmem:[%s18589_s29 + $0x8] sm:$0xff]  ;;  %vm1294_vm4 = vcmask 48128  }
  0x4f   : > { %16796 = vmatprep.subr.mxu0 %v18548_v1  ;;  %16809 = vmatprep.mubr.msk.f32.mxu1 %vm18549_vm0, %v18548_v1  ;;  %s920_s22 = scalar_lea.vmem %s20843_s5, %s15237_s16  ;;  %s924_s23 = scalar_lea.vmem %s20844_s9, %s15237_s16  ;;  %v1037_v20 = vld [vmem:[%s18584_s25] sm:$0xff]  ;;  %v1213_v31 = vld [vmem:[%s20840_s3 + $0x18] sm:$0x3f]  ;;  %v1212_v32 = vld [vmem:[%s20840_s3 + $0x10] sm:$0xff]  ;;  %vm2711_vm5 = vcmask 64512   ;;  %vm3665_vm6 = vcmask 982016  }
  0x50   : > { %16797 = vmatpush3.msra.mxu0 %v929_v2  ;;  %v928_v3 = vld [vmem:[%s920_s22] sm:$0xff]  ;;  %16802 = vmatpush3.msk.msra.mxu1 %vm1051_vm3, %v1040_v14  ;;  %v1211_v33 = vld [vmem:[%s20840_s3 + $0x8] sm:$0xff]  ;;  %v15264_v35 = vld [vmem:[%s18589_s29 + $0x38] sm:$0x3f]  ;;  %s20845_s16 = sld [smem:[#allocation14_spill]]  ;;  %vm14758_vm7 = vcmask 244743  }
  0x51   : > { %16812 = vmatprep.subr.mxu0 %v18548_v1  ;;  %16799 = vmatmul.mubr.msk.f32.vlgmr.msra.gmra.mxu0 %vm932_vm1, %v928_v3  ;;  %v931_v4 = vld [vmem:[%s924_s23] sm:$0xff]  ;;  %v15263_v36 = vld [vmem:[%s18589_s29 + $0x30] sm:$0xff]  ;;  %v15262_v37 = vld [vmem:[%s18589_s29 + $0x28] sm:$0xff]  ;;  %s20846_s22 = sld [smem:[#allocation11_spill]]  ;;  %vm15113_vm8 = vcmask 24576  }
  0x52   : > { %16820 = vmatprep.mubr.msk.f32.mxu0 %vm18549_vm0, %v18548_v1  ;;  %16803 = vmatprep.subr.mxu1 %v18548_v1  ;;  %v1126_v21 = vld [vmem:[%s18589_s29] sm:$0xff]  ;;  %v15282_v39 = vld [vmem:[%s18584_s25 + $0x58] sm:$0x3f]  ;;  %v15281_v40 = vld [vmem:[%s18584_s25 + $0x50] sm:$0xff]  ;;  %s20847_s23 = sld [smem:[#allocation12_spill]] }
  0x53   : > { %16813 = vmatpush3.msk.msra.mxu0 %vm1051_vm3, %v1129_v15  ;;  %16804 = vmatpush3.msra.mxu1 %v1039_v16  ;;  %v15240_v26 = vld [vmem:[%s18574_s17] ss:$0 sm:$0xff]  ;;  %v15280_v41 = vld [vmem:[%s18584_s25 + $0x48] sm:$0xff]  ;;  %v15298_v43 = vld [vmem:[%s20840_s3 + $0x58] sm:$0x3f]  ;;  %s20848_s5 = sld [smem:[#allocation13_spill]] }
  0x54   : > { %16814 = vmatprep.subr.mxu0 %v18548_v1  ;;  %16805 = vmatprep.subr.mxu1 %v18548_v1  ;;  %v15241_v28 = vld [vmem:[%s18579_s21] ss:$0 sm:$0xff]  ;;  %v15297_v44 = vld [vmem:[%s20840_s3 + $0x50] sm:$0xff]  ;;  %v15296_v45 = vld [vmem:[%s20840_s3 + $0x48] sm:$0xff]  ;;  %s20849_s9 = sld [smem:[#allocation15_spill]] }
  0x55   : > { %16815 = vmatpush3.msra.mxu0 %v1128_v17  ;;  %16806 = vmatpush3.msra.mxu1 %v1038_v18  ;;  %v1210_v34 = vld [vmem:[%s20840_s3] sm:$0xff]  ;;  %v15316_v47 = vld [vmem:[%s18589_s29 + $0x78] sm:$0x3f]  ;;  %v15315_v48 = vld [vmem:[%s18589_s29 + $0x70] sm:$0xff] }
  0x56   : > { %16816 = vmatprep.subr.mxu0 %v18548_v1  ;;  %16807 = vmatprep.subr.mxu1 %v18548_v1  ;;  %v15261_v38 = vld [vmem:[%s18589_s29 + $0x20] sm:$0xff]  ;;  %v15314_v49 = vld [vmem:[%s18589_s29 + $0x68] sm:$0xff]  ;;  %v15256_v60 = vld [vmem:[%s18584_s25 + $0x38] sm:$0x3f] }
  0x57   : > { %16817 = vmatpush3.msra.mxu0 %v1127_v19  ;;  %16808 = vmatpush3.msra.mxu1 %v1037_v20  ;;  %v15279_v42 = vld [vmem:[%s18584_s25 + $0x40] sm:$0xff]  ;;  %v15255_v61 = vld [vmem:[%s18584_s25 + $0x30] sm:$0xff]  ;;  %v15254_v63 = vld [vmem:[%s18584_s25 + $0x28] sm:$0xff] }
  0x58   : > { %16818 = vmatprep.subr.mxu0 %v18548_v1  ;;  %16823 = vmatprep.subr.mxu1 %v18548_v1  ;;  %v15295_v46 = vld [vmem:[%s20840_s3 + $0x40] sm:$0xff]  ;;  %v15272_v3 = vld [vmem:[%s20840_s3 + $0x38] sm:$0x3f] }
  0x59   : > { %16819 = vmatpush3.msra.mxu0 %v1126_v21  ;;  %v15313_v50 = vld [vmem:[%s18589_s29 + $0x60] sm:$0xff] }
  0x5a   : > { %16834 = vmatprep.subr.mxu0 %v18548_v1  ;;  %v15242_v51 = vld [vmem:[%s20839_s8] ss:$0 sm:$0xff]  ;;  %v15318_v16 = vld [vmem:[%s20836_s14 + $0x3] ss:$0 sm:$0xff] }
  0x5b   : > { %v15245_v52 = vld [vmem:[%s20836_s14] ss:$0 sm:$0xff] }
  0x5c   : > { %v15253_v2 = vld [vmem:[%s18584_s25 + $0x20] sm:$0xff] }
 0x111   : > { %v1002_v5 = vpop.f32.mrf.mxu0 }
 0x112   : > { %v18773_v6 = vadd.f32 %v1002_v5, %v931_v4  ;;  %v15271_v4 = vld [vmem:[%s20840_s3 + $0x30] sm:$0xff] }
 0x113   : > { %v16800_v7 = vpop.f32.mrf.mxu0 }
 0x114   : > { %v1009_v8 = vsel %vm1008_vm2, %v18773_v6, 0.0  ;;  %v15270_v7 = vld [vmem:[%s20840_s3 + $0x28] sm:$0xff] }
 0x115   : > { %1010 = vadd.xlane.f32.xlu0 %v1009_v8  ;;  %v15266_v8 = vld [vmem:[%s20836_s14 + $0x1] ss:$0 sm:$0xff] }
 0x19e   : > { %v1011_v9 = vpop.xlane.xlu0 %1010 }
 0x19f   : > { %v1013_v10 = vmul.f32 0.033333335, %v1011_v9 }
 0x1a1   : > { %v1014_v11 = vsub.f32 %v18773_v6, %v1013_v10  ;;  %v15269_v10 = vld [vmem:[%s20840_s3 + $0x20] sm:$0xff] }
 0x1a3   : > { %v1015_v12 = vmul.f32 %v1014_v11, %v1014_v11 }
 0x1a5   : > { %v1016_v13 = vsel %vm1008_vm2, %v1015_v12, 0.0 }
 0x1a6   : > { %1017 = vadd.xlane.f32.xlu0 %v1016_v13 }
 0x22f   : > { %v1018_v22 = vpop.xlane.xlu0 %1017 }
 0x230   : > { %v1019_v23 = vmul.f32 0.033333335, %v1018_v22 }
 0x232   : > { %v1020_v24 = vadd.f32 1e-05, %v1019_v23  ;;  %v15258_v23 = vld [vmem:[%s20839_s8 + $0x1] ss:$0 sm:$0xff] }
 0x234   : > { %18335 = vrsqrt.f32 %v1020_v24 }
 0x241   : > { %v18336_v25 = vpop.eup %18335 }
 0x242   : > { %v1022_v27 = vmul.f32 %v18336_v25, %v1014_v11 }
 0x244   : > { %v1029_v29 = vmul.f32 %v15240_v26, %v1022_v27 }
 0x246   : > { %v18799_v30 = vadd.f32 %v15241_v28, %v1029_v29  ;;  %v15290_v28 = vld [vmem:[%s18589_s29 + $0x58] sm:$0x3f]  ;;  %v15289_v29 = vld [vmem:[%s18589_s29 + $0x50] sm:$0xff] }
 0x248   : > { %16810 = vmatmul.mubr.msk.f32.vlgmr.msra.gmra.mxu1 %vm1008_vm2, %v18799_v30  ;;  %16821 = vmatmul.mubr.msk.f32.vlgmr.msra.gmra.mxu0 %vm1008_vm2, %v18799_v30 }
 0x249   : > { %16824 = vmatpush3.msk.msra.mxu1 %vm1051_vm3, %v1213_v31  ;;  %16831 = vmatprep.mubr.msk.f32.mxu1 %vm18549_vm0, %v18548_v1  ;;  %v15288_v31 = vld [vmem:[%s18589_s29 + $0x48] sm:$0xff] }
 0x24a   : > { %16825 = vmatprep.subr.mxu1 %v18548_v1  ;;  %16836 = vmatprep.mubr.msk.f32.mxu0 %vm18549_vm0, %v18548_v1 }
 0x24b   : > { %16826 = vmatpush3.msra.mxu1 %v1212_v32 }
 0x24c   : > { %16827 = vmatprep.subr.mxu1 %v18548_v1 }
 0x24d   : > { %16828 = vmatpush3.msra.mxu1 %v1211_v33  ;;  %v15287_v33 = vld [vmem:[%s18589_s29 + $0x40] sm:$0xff] }
 0x24e   : > { %16829 = vmatprep.subr.mxu1 %v18548_v1 }
 0x24f   : > { %16830 = vmatpush3.msra.mxu1 %v1210_v34 }
 0x250   : > { %16832 = vmatmul.mubr.msk.f32.vlgmr.msra.gmra.mxu1 %vm1008_vm2, %v18799_v30  ;;  %16850 = vmatprep.subr.mxu1 %v18548_v1 }
 0x251   : > { %16851 = vmatpush3.msk.msra.mxu1 %vm1051_vm3, %v15264_v35  ;;  %16858 = vmatprep.mubr.msk.f32.mxu1 %vm18549_vm0, %v18548_v1 }
 0x252   : > { %16852 = vmatprep.subr.mxu1 %v18548_v1 }
 0x253   : > { %16853 = vmatpush3.msra.mxu1 %v15263_v36 }
 0x254   : > { %16854 = vmatprep.subr.mxu1 %v18548_v1 }
 0x255   : > { %16855 = vmatpush3.msra.mxu1 %v15262_v37 }
 0x256   : > { %16856 = vmatprep.subr.mxu1 %v18548_v1 }
 0x257   : > { %16857 = vmatpush3.msra.mxu1 %v15261_v38  ;;  %v15284_v38 = vld [vmem:[%s20839_s8 + $0x2] ss:$0 sm:$0xff] }
 0x258   : > { %16859 = vmatmul.mubr.msk.f32.vlgmr.msra.gmra.mxu1 %vm1008_vm2, %v18799_v30  ;;  %16877 = vmatprep.subr.mxu1 %v18548_v1 }
 0x259   : > { %16878 = vmatpush3.msk.msra.mxu1 %vm1051_vm3, %v15282_v39  ;;  %16885 = vmatprep.mubr.msk.f32.mxu1 %vm18549_vm0, %v18548_v1  ;;  %v15292_v39 = vld [vmem:[%s20836_s14 + $0x2] ss:$0 sm:$0xff] }
 0x25a   : > { %16879 = vmatprep.subr.mxu1 %v18548_v1 }
 0x25b   : > { %16880 = vmatpush3.msra.mxu1 %v15281_v40 }
 0x25c   : > { %16881 = vmatprep.subr.mxu1 %v18548_v1 }
 0x25d   : > { %16882 = vmatpush3.msra.mxu1 %v15280_v41 }
 0x25e   : > { %16883 = vmatprep.subr.mxu1 %v18548_v1 }
 0x25f   : > { %16884 = vmatpush3.msra.mxu1 %v15279_v42 }
 0x260   : > { %16886 = vmatmul.mubr.msk.f32.vlgmr.msra.gmra.mxu1 %vm1008_vm2, %v18799_v30  ;;  %16899 = vmatprep.subr.mxu1 %v18548_v1 }
 0x261   : > { %16900 = vmatpush3.msk.msra.mxu1 %vm1051_vm3, %v15298_v43  ;;  %16907 = vmatprep.mubr.msk.f32.mxu1 %vm18549_vm0, %v18548_v1 }
 0x262   : > { %16901 = vmatprep.subr.mxu1 %v18548_v1 }
 0x263   : > { %16902 = vmatpush3.msra.mxu1 %v15297_v44 }
 0x264   : > { %16903 = vmatprep.subr.mxu1 %v18548_v1 }
 0x265   : > { %16904 = vmatpush3.msra.mxu1 %v15296_v45  ;;  %v15308_v45 = vld [vmem:[%s18584_s25 + $0x78] sm:$0x3f] }
 0x266   : > { %16905 = vmatprep.subr.mxu1 %v18548_v1 }
 0x267   : > { %16906 = vmatpush3.msra.mxu1 %v15295_v46  ;;  %v15307_v46 = vld [vmem:[%s18584_s25 + $0x70] sm:$0xff] }
 0x268   : > { %16908 = vmatmul.mubr.msk.f32.vlgmr.msra.gmra.mxu1 %vm1008_vm2, %v18799_v30  ;;  %16926 = vmatprep.subr.mxu1 %v18548_v1 }
 0x269   : > { %16927 = vmatpush3.msk.msra.mxu1 %vm1051_vm3, %v15316_v47  ;;  %16934 = vmatprep.mubr.msk.f32.mxu1 %vm18549_vm0, %v18548_v1  ;;  %v15306_v47 = vld [vmem:[%s18584_s25 + $0x68] sm:$0xff] }
 0x26a   : > { %16928 = vmatprep.subr.mxu1 %v18548_v1 }
 0x26b   : > { %16929 = vmatpush3.msra.mxu1 %v15315_v48  ;;  %v15305_v48 = vld [vmem:[%s18584_s25 + $0x60] sm:$0xff] }
 0x26c   : > { %16930 = vmatprep.subr.mxu1 %v18548_v1 }
 0x26d   : > { %16931 = vmatpush3.msra.mxu1 %v15314_v49  ;;  %v15324_v49 = vld [vmem:[%s20840_s3 + $0x78] sm:$0x3f] }
 0x26e   : > { %16932 = vmatprep.subr.mxu1 %v18548_v1 }
 0x26f   : > { %16933 = vmatpush3.msra.mxu1 %v15313_v50  ;;  %v15323_v50 = vld [vmem:[%s20840_s3 + $0x70] sm:$0xff] }
 0x270   : > { %16935 = vmatmul.mubr.msk.f32.vlgmr.msra.gmra.mxu1 %vm1008_vm2, %v18799_v30  ;;  %16948 = vmatprep.subr.mxu1 %v18548_v1 }
 0x271   : > { %16950 = vmatprep.mubr.msk.f32.mxu1 %vm18549_vm0, %v18548_v1 }
 0x308   : > { %v1121_v53 = vpop.f32.mrf.mxu1  ;;  %v1206_v54 = vpop.f32.mrf.mxu0 }
 0x309   : > { %v1122_v55 = vadd.f32 %v15242_v51, %v1121_v53  ;;  %v1207_v56 = vadd.f32 %v15245_v52, %v1206_v54  ;;  %v15322_v51 = vld [vmem:[%s20840_s3 + $0x68] sm:$0xff]  ;;  %v15321_v52 = vld [vmem:[%s20840_s3 + $0x60] sm:$0xff]  ;;  %v15342_v53 = vld [vmem:[%s18589_s29 + $0x98] sm:$0x3f] }
 0x30a   : > { %v16811_v57 = vpop.f32.mrf.mxu1  ;;  %v16822_v58 = vpop.f32.mrf.mxu0  ;;  %v15341_v54 = vld [vmem:[%s18589_s29 + $0x90] sm:$0xff] }
 0x30b   : > { %v1125_v59 = vmul.f32 0.4082483, %v1122_v55  ;;  %16835 = vmatpush3.xpose.msk.msra.mxu0 %vm1294_vm4, %v1207_v56  ;;  %v15340_v55 = vld [vmem:[%s18589_s29 + $0x88] sm:$0xff]  ;;  %v15339_v56 = vld [vmem:[%s18589_s29 + $0x80] sm:$0xff] }
 0x30c   : > { %16839 = vmatprep.subr.mxu0 %v18548_v1 }
 0x30e   : > { %16837 = vmatmul.mubr.msk.f32.vlgmr.msra.gmra.mxu0 %vm1294_vm4, %v1125_v59 }
 0x30f   : > { %16840 = vmatpush3.msk.msra.mxu0 %vm1051_vm3, %v15256_v60  ;;  %16847 = vmatprep.mubr.msk.f32.mxu0 %vm18549_vm0, %v18548_v1 }
 0x310   : > { %v18884_v62 = vpop.f32.mrf.mxu1  ;;  %16841 = vmatprep.subr.mxu0 %v18548_v1 }
 0x311   : > { %16842 = vmatpush3.msra.mxu0 %v15255_v61 }
 0x312   : > { %v16833_v0 = vpop.f32.mrf.mxu1  ;;  %16843 = vmatprep.subr.mxu0 %v18548_v1 }
 0x313   : > { %16844 = vmatpush3.msra.mxu0 %v15254_v63 }
 0x314   : > { %16845 = vmatprep.subr.mxu0 %v18548_v1 }
 0x315   : > { %16846 = vmatpush3.msra.mxu0 %v15253_v2 }
 0x316   : > { %16848 = vmatmul.mubr.msk.f32.vlgmr.msra.gmra.mxu0 %vm1008_vm2, %v18799_v30  ;;  %16861 = vmatprep.subr.mxu0 %v18548_v1 }
 0x317   : > { %16862 = vmatpush3.msk.msra.mxu0 %vm1051_vm3, %v15272_v3  ;;  %16869 = vmatprep.mubr.msk.f32.mxu0 %vm18549_vm0, %v18548_v1  ;;  %v15310_v3 = vld [vmem:[%s20839_s8 + $0x3] ss:$0 sm:$0xff] }
 0x318   : > { %v1540_v5 = vpop.f32.mrf.mxu1  ;;  %16863 = vmatprep.subr.mxu0 %v18548_v1 }
 0x319   : > { %16864 = vmatpush3.msra.mxu0 %v15271_v4  ;;  %v1541_v11 = vadd.f32 %v15266_v8, %v1540_v5 }
 0x31a   : > { %v16860_v9 = vpop.f32.mrf.mxu1  ;;  %16865 = vmatprep.subr.mxu0 %v18548_v1 }
 0x31b   : > { %16866 = vmatpush3.msra.mxu0 %v15270_v7  ;;  %v15334_v9 = vld [vmem:[%s18584_s25 + $0x98] sm:$0x3f] }
 0x31c   : > { %16867 = vmatprep.subr.mxu0 %v18548_v1 }
 0x31d   : > { %16868 = vmatpush3.msra.mxu0 %v15269_v10  ;;  %v15333_v10 = vld [vmem:[%s18584_s25 + $0x90] sm:$0xff] }
 0x31e   : > { %16870 = vmatmul.mubr.msk.f32.vlgmr.msra.gmra.mxu0 %vm1008_vm2, %v18799_v30  ;;  %16872 = vmatprep.subr.mxu0 %v18548_v1 }
 0x31f   : > { %16873 = vmatpush3.xpose.msk.msra.mxu0 %vm1294_vm4, %v1541_v11  ;;  %16874 = vmatprep.mubr.msk.f32.mxu0 %vm18549_vm0, %v18548_v1  ;;  %v15332_v11 = vld [vmem:[%s18584_s25 + $0x88] sm:$0xff] }
 0x320   : > { %v1788_v12 = vpop.f32.mrf.mxu1  ;;  %16888 = vmatprep.subr.mxu0 %v18548_v1 }
 0x321   : > { %v1789_v40 = vadd.f32 %v15284_v38, %v1788_v12  ;;  %v15336_v38 = vld [vmem:[%s20839_s8 + $0x4] ss:$0 sm:$0xff] }
 0x322   : > { %v16887_v13 = vpop.f32.mrf.mxu1 }
 0x323   : > { %v1792_v44 = vmul.f32 0.4082483, %v1789_v40  ;;  %v15331_v13 = vld [vmem:[%s18584_s25 + $0x80] sm:$0xff] }
 0x324   : > { %v15248_v40 = vld [vmem:[%s18609_s19] ss:$0 sm:$0xff] }
 0x328   : > { %v18912_v14 = vpop.f32.mrf.mxu1 }
 0x32a   : > { %v16909_v15 = vpop.f32.mrf.mxu1 }
 0x330   : > { %v2210_v17 = vpop.f32.mrf.mxu1 }
 0x331   : > { %v2211_v18 = vadd.f32 %v15318_v16, %v2210_v17  ;;  %v15350_v16 = vld [vmem:[%s20840_s3 + $0x98] sm:$0x3f]  ;;  %v15349_v17 = vld [vmem:[%s20840_s3 + $0x90] sm:$0xff] }
 0x332   : > { %v16936_v19 = vpop.f32.mrf.mxu1 }
 0x333   : > { %16949 = vmatpush3.xpose.msk.msra.mxu1 %vm1294_vm4, %v2211_v18  ;;  %v15344_v18 = vld [vmem:[%s20836_s14 + $0x4] ss:$0 sm:$0xff]  ;;  %v15348_v19 = vld [vmem:[%s20840_s3 + $0x88] sm:$0xff] }
 0x334   : > { %16953 = vmatprep.subr.mxu1 %v18548_v1 }
 0x3ce   : > { %v18917_v20 = vpop.f32.mrf.mxu0 }
 0x3cf   : > { %v2712_v21 = vsel %vm2711_vm5, %v18917_v20, -inf }
 0x3d0   : > { %2713 = vmax.xlane.f32.xlu0 %v2712_v21  ;;  %v16838_v22 = vpop.f32.mrf.mxu0 }
 0x3d1   : > { %v15274_v22 = vld [vmem:[%s18609_s19 + $0x1] ss:$0 sm:$0xff] }
 0x3d6   : > { %v1453_v24 = vpop.f32.mrf.mxu0 }
 0x3d7   : > { %v1454_v25 = vadd.f32 %v15258_v23, %v1453_v24  ;;  %v15347_v24 = vld [vmem:[%s20840_s3 + $0x80] sm:$0xff] }
 0x3d8   : > { %v16849_v26 = vpop.f32.mrf.mxu0 }
 0x3d9   : > { %v1457_v27 = vmul.f32 0.4082483, %v1454_v25 }
 0x3db   : > { %16875 = vmatmul.mubr.msk.f32.vlgmr.msra.gmra.mxu0 %vm1294_vm4, %v1457_v27 }
 0x3dc   : > { %16889 = vmatpush3.msk.msra.mxu0 %vm1051_vm3, %v15290_v28  ;;  %16896 = vmatprep.mubr.msk.f32.mxu0 %vm18549_vm0, %v18548_v1 }
 0x3dd   : > { %16890 = vmatprep.subr.mxu0 %v18548_v1 }
 0x3de   : > { %16891 = vmatpush3.msra.mxu0 %v15289_v29  ;;  %v18930_v32 = vpop.f32.mrf.mxu0 }
 0x3df   : > { %16892 = vmatprep.subr.mxu0 %v18548_v1  ;;  %v1627_v26 = vadd.f32 %v15274_v22, %v18930_v32 }
 0x3e0   : > { %16893 = vmatpush3.msra.mxu0 %v15288_v31  ;;  %v16871_v34 = vpop.f32.mrf.mxu0 }
 0x3e1   : > { %16894 = vmatprep.subr.mxu0 %v18548_v1 }
 0x3e2   : > { %16895 = vmatpush3.msra.mxu0 %v15287_v33 }
 0x3e3   : > { %16897 = vmatmul.mubr.msk.f32.vlgmr.msra.gmra.mxu0 %vm1008_vm2, %v18799_v30  ;;  %16910 = vmatprep.subr.mxu0 %v18548_v1 }
 0x3e4   : > { %16912 = vmatprep.mubr.msk.f32.mxu0 %vm18549_vm0, %v18548_v1 }
 0x49b   : > { %v1702_v35 = vpop.f32.mrf.mxu0 }
 0x49c   : > { %v2715_v36 = vsel %vm2711_vm5, %v1702_v35, -inf }
 0x49d   : > { %2716 = vmax.xlane.f32.xlu1 %v2715_v36  ;;  %v16876_v37 = vpop.f32.mrf.mxu0 }
 0x4a3   : > { %v1875_v41 = vpop.f32.mrf.mxu0 }
 0x4a4   : > { %v1876_v42 = vadd.f32 %v15292_v39, %v1875_v41 }
 0x4a5   : > { %v16898_v43 = vpop.f32.mrf.mxu0 }
 0x4a6   : > { %16911 = vmatpush3.xpose.msk.msra.mxu0 %vm1294_vm4, %v1876_v42 }
 0x4a7   : > { %16915 = vmatprep.subr.mxu0 %v18548_v1 }
 0x4a9   : > { %16913 = vmatmul.mubr.msk.f32.vlgmr.msra.gmra.mxu0 %vm1294_vm4, %v1792_v44  ;;  %v1291_v44 = vadd.f32 %v15248_v40, %v18884_v62 }
 0x4aa   : > { %16916 = vmatpush3.msk.msra.mxu0 %vm1051_vm3, %v15308_v45  ;;  %16923 = vmatprep.mubr.msk.f32.mxu0 %vm18549_vm0, %v18548_v1 }
 0x4ab   : > { %16917 = vmatprep.subr.mxu0 %v18548_v1 }
 0x4ac   : > { %16918 = vmatpush3.msra.mxu0 %v15307_v46 }
 0x4ad   : > { %16919 = vmatprep.subr.mxu0 %v18548_v1 }
 0x4ae   : > { %16920 = vmatpush3.msra.mxu0 %v15306_v47 }
 0x4af   : > { %16921 = vmatprep.subr.mxu0 %v18548_v1 }
 0x4b0   : > { %16922 = vmatpush3.msra.mxu0 %v15305_v48 }
 0x4b1   : > { %16924 = vmatmul.mubr.msk.f32.vlgmr.msra.gmra.mxu0 %vm1008_vm2, %v18799_v30  ;;  %16937 = vmatprep.subr.mxu0 %v18548_v1 }
 0x4b2   : > { %16938 = vmatpush3.msk.msra.mxu0 %vm1051_vm3, %v15324_v49  ;;  %16945 = vmatprep.mubr.msk.f32.mxu0 %vm18549_vm0, %v18548_v1 }
 0x4b3   : > { %16939 = vmatprep.subr.mxu0 %v18548_v1 }
 0x4b4   : > { %16940 = vmatpush3.msra.mxu0 %v15323_v50 }
 0x4b5   : > { %16941 = vmatprep.subr.mxu0 %v18548_v1 }
 0x4b6   : > { %16942 = vmatpush3.msra.mxu0 %v15322_v51 }
 0x4b7   : > { %16943 = vmatprep.subr.mxu0 %v18548_v1 }
 0x4b8   : > { %16944 = vmatpush3.msra.mxu0 %v15321_v52 }
 0x4b9   : > { %16946 = vmatmul.mubr.msk.f32.vlgmr.msra.gmra.mxu0 %vm1008_vm2, %v18799_v30  ;;  %16964 = vmatprep.subr.mxu0 %v18548_v1 }
 0x4ba   : > { %16965 = vmatpush3.msk.msra.mxu0 %vm1051_vm3, %v15342_v53  ;;  %16972 = vmatprep.mubr.msk.f32.mxu0 %vm18549_vm0, %v18548_v1 }
 0x4bb   : > { %16966 = vmatprep.subr.mxu0 %v18548_v1 }
 0x4bc   : > { %16967 = vmatpush3.msra.mxu0 %v15341_v54 }
 0x4bd   : > { %16968 = vmatprep.subr.mxu0 %v18548_v1 }
 0x4be   : > { %16969 = vmatpush3.msra.mxu0 %v15340_v55  ;;  %v15359_v55 = vld [vmem:[%s18614_s24 + $0x8] sm:$0x3f] }
 0x4bf   : > { %16970 = vmatprep.subr.mxu0 %v18548_v1 }
 0x4c0   : > { %16971 = vmatpush3.msra.mxu0 %v15339_v56  ;;  %v15300_v56 = vld [vmem:[%s18609_s19 + $0x2] ss:$0 sm:$0xff] }
 0x4c1   : > { %16973 = vmatmul.mubr.msk.f32.vlgmr.msra.gmra.mxu0 %vm1008_vm2, %v18799_v30  ;;  %16986 = vmatprep.subr.mxu0 %v18548_v1 }
 0x4c2   : > { %16988 = vmatprep.mubr.msk.f32.mxu0 %vm18549_vm0, %v18548_v1 }
 0x526   : > { %v2717_v57 = vpop.xlane.xlu1 %2716 }
 0x527   : > { %v2728_v58 = vsub.f32 %v1702_v35, %v2717_v57  ;;  %v1962_v57 = vadd.f32 %v15300_v56, %v18912_v14 }
 0x529   : > { %v2734_v59 = vmul.f32 1.442695, %v2728_v58 }
 0x52b   : > { %18337 = vpow2.f32 %v2734_v59 }
 0x538   : > { %v18338_v60 = vpop.eup %18337 }
 0x539   : > { %v2745_v61 = vsel %vm2711_vm5, %v18338_v60, 0.0 }
 0x53a   : > { %2746 = vadd.xlane.f32.xlu1 %v2745_v61 }
 0x569   : > { %v18988_v63 = vpop.f32.mrf.mxu0 }
 0x56a   : > { %v2718_v0 = vsel %vm2711_vm5, %v18988_v63, -inf }
 0x56b   : > { %2719 = vmax.xlane.f32.xlu1 %v2718_v0  ;;  %v16914_v2 = vpop.f32.mrf.mxu0 }
 0x571   : > { %v2123_v4 = vpop.f32.mrf.mxu0 }
 0x572   : > { %v2124_v5 = vadd.f32 %v15310_v3, %v2123_v4  ;;  %v2840_v4 = vld [vmem:[%s18614_s24] sm:$0x3f] }
 0x573   : > { %v16925_v7 = vpop.f32.mrf.mxu0 }
 0x574   : > { %v2127_v8 = vmul.f32 0.4082483, %v2124_v5 }
 0x576   : > { %16951 = vmatmul.mubr.msk.f32.vlgmr.msra.gmra.mxu1 %vm1294_vm4, %v2127_v8 }
 0x577   : > { %16954 = vmatpush3.msk.msra.mxu1 %vm1051_vm3, %v15334_v9  ;;  %16961 = vmatprep.mubr.msk.f32.mxu1 %vm18549_vm0, %v18548_v1 }
 0x578   : > { %16955 = vmatprep.subr.mxu1 %v18548_v1 }
 0x579   : > { %16956 = vmatpush3.msra.mxu1 %v15333_v10  ;;  %v19001_v12 = vpop.f32.mrf.mxu0 }
 0x57a   : > { %16957 = vmatprep.subr.mxu1 %v18548_v1 }
 0x57b   : > { %16958 = vmatpush3.msra.mxu1 %v15332_v11  ;;  %v16947_v15 = vpop.f32.mrf.mxu0 }
 0x57c   : > { %16959 = vmatprep.subr.mxu1 %v18548_v1 }
 0x57d   : > { %16960 = vmatpush3.msra.mxu1 %v15331_v13 }
 0x57e   : > { %16962 = vmatmul.mubr.msk.f32.vlgmr.msra.gmra.mxu1 %vm1008_vm2, %v18799_v30  ;;  %16975 = vmatprep.subr.mxu1 %v18548_v1 }
 0x57f   : > { %16976 = vmatpush3.msk.msra.mxu1 %vm1051_vm3, %v15350_v16  ;;  %16983 = vmatprep.mubr.msk.f32.mxu1 %vm18549_vm0, %v18548_v1 }
 0x580   : > { %16977 = vmatprep.subr.mxu1 %v18548_v1 }
 0x581   : > { %16978 = vmatpush3.msra.mxu1 %v15349_v17  ;;  %v2545_v21 = vpop.f32.mrf.mxu0  ;;  %v15326_v17 = vld [vmem:[%s18609_s19 + $0x3] ss:$0 sm:$0xff] }
 0x582   : > { %v2546_v23 = vadd.f32 %v15344_v18, %v2545_v21  ;;  %16979 = vmatprep.subr.mxu1 %v18548_v1 }
 0x583   : > { %16980 = vmatpush3.msra.mxu1 %v15348_v19  ;;  %v16974_v25 = vpop.f32.mrf.mxu0 }
 0x584   : > { %16981 = vmatprep.subr.mxu1 %v18548_v1  ;;  %16987 = vmatpush3.xpose.msk.msra.mxu0 %vm1294_vm4, %v2546_v23  ;;  %v2297_v23 = vadd.f32 %v15326_v17, %v19001_v12  ;;  %v15365_v12 = vld [vmem:[%s18614_s24 + $0x10] sm:$0x3f] }
 0x585   : > { %16982 = vmatpush3.msra.mxu1 %v15347_v24  ;;  %16991 = vmatprep.subr.mxu0 %v18548_v1  ;;  %v15352_v24 = vld [vmem:[%s18609_s19 + $0x4] ss:$0 sm:$0xff] }
 0x586   : > { %16984 = vmatmul.mubr.msk.f32.vlgmr.msra.gmra.mxu1 %vm1008_vm2, %v18799_v30  ;;  %16996 = vmatprep.subr.mxu1 %v18548_v1  ;;  %v2714_v30 = vpop.xlane.xlu0 %2713 }
 0x587   : > { %16997 = vmatpush3.msra.mxu1 %v1627_v26  ;;  %16998 = vmatprep.mubr.msk.f32.mxu1 %vm18549_vm0, %v18548_v1  ;;  %v2727_v31 = vsub.f32 %v18917_v20, %v2714_v30 }
 0x588   : > { %17006 = vmatprep.subr.mxu1 %v18548_v1 }
 0x589   : > { %v2732_v32 = vmul.f32 1.442695, %v2727_v31 }
 0x5c3   : > { %v2747_v27 = vpop.xlane.xlu1 %2746 }
 0x5c4   : > { %18339 = vrcp.f32 %v2747_v27 }
 0x5c5   : > { %18341 = vpow2.f32 %v2732_v32  ;;  %v15369_v32 = vld [vmem:[%s18614_s24 + $0x18] sm:$0x3f] }
 0x5d1   : > { %v18340_v28 = vpop.eup %18339 }
 0x5d2   : > { %v2760_v29 = vmul.f32 %v18340_v28, %v18338_v60  ;;  %v18342_v35 = vpop.eup %18341 }
 0x5d3   : > { %v2742_v37 = vsel %vm2711_vm5, %v18342_v35, 0.0 }
 0x5d4   : > { %16999 = vmatmul.mubr.msk.f32.vlgmr.msra.gmra.mxu1 %vm2711_vm5, %v2760_v29 }
 0x5d5   : > { %17008 = vmatprep.mubr.msk.f32.mxu1 %vm18549_vm0, %v18548_v1  ;;  %17007 = vmatpush3.msk.msra.mxu1 %vm1051_vm3, %v2840_v4  ;;  %v3658_v4 = vld [vmem:[%s20845_s16 + $0x40] sm:$0xff] }
 0x5d6   : > { %17016 = vmatprep.subr.mxu1 %v18548_v1 }
 0x5f4   : > { %v2720_v58 = vpop.xlane.xlu1 %2719 }
 0x5f5   : > { %v2729_v59 = vsub.f32 %v18988_v63, %v2720_v58  ;;  %v3563_v58 = vld [vmem:[%s18634_s20 + $0x8] sm:$0xff] }
 0x5f7   : > { %v2736_v60 = vmul.f32 1.442695, %v2729_v59  ;;  %v3562_v59 = vld [vmem:[%s18634_s20] sm:$0xff] }
 0x636   : > { %v2372_v33 = vpop.f32.mrf.mxu1 }
 0x637   : > { %v2721_v34 = vsel %vm2711_vm5, %v2372_v33, -inf }
 0x638   : > { %2722 = vmax.xlane.f32.xlu0 %v2721_v34  ;;  %v16952_v36 = vpop.f32.mrf.mxu1 }
 0x63c   : > { %2743 = vadd.xlane.f32.xlu0 %v2742_v37 }
 0x63e   : > { %v2458_v39 = vpop.f32.mrf.mxu1 }
 0x63f   : > { %v2459_v41 = vadd.f32 %v15336_v38, %v2458_v39 }
 0x640   : > { %v16963_v42 = vpop.f32.mrf.mxu1 }
 0x641   : > { %v2462_v43 = vmul.f32 0.4082483, %v2459_v41 }
 0x643   : > { %16989 = vmatmul.mubr.msk.f32.vlgmr.msra.gmra.mxu0 %vm1294_vm4, %v2462_v43 }
 0x644   : > { %16992 = vmatpush3.msra.mxu0 %v1291_v44  ;;  %16993 = vmatprep.mubr.msk.f32.mxu0 %vm18549_vm0, %v18548_v1 }
 0x645   : > { %17001 = vmatprep.subr.mxu0 %v18548_v1 }
 0x646   : > { %v19043_v20 = vpop.f32.mrf.mxu1 }
 0x647   : > { %v2632_v26 = vadd.f32 %v15352_v24, %v19043_v20  ;;  %v3650_v24 = vld [vmem:[%s20845_s16] sm:$0xff] }
 0x648   : > { %v16985_v45 = vpop.f32.mrf.mxu1 }
 0x694   : > { %v2910_v46 = vpop.f32.mrf.mxu1 }
 0x696   : > { %v17000_v47 = vpop.f32.mrf.mxu1 }
 0x6c1   : > { %v2723_v48 = vpop.xlane.xlu0 %2722 }
 0x6c2   : > { %v2730_v49 = vsub.f32 %v2372_v33, %v2723_v48  ;;  %v15376_v48 = vld [vmem:[%s18619_s30] ss:$0 sm:$0xff] }
 0x6c4   : > { %v2738_v50 = vmul.f32 1.442695, %v2730_v49 }
 0x6c5   : > { %v2744_v51 = vpop.xlane.xlu0 %2743 }
 0x6c6   : > { %18343 = vpow2.f32 %v2738_v50 }
 0x6c7   : > { %18345 = vrcp.f32 %v2744_v51 }
 0x6c8   : > { %18347 = vpow2.f32 %v2736_v60  ;;  %v3664_v60 = vld [vmem:[%s20845_s16 + $0x70] sm:$0xff] }
 0x6d3   : > { %v18344_v62 = vpop.eup %18343 }
 0x6d4   : > { %v18346_v52 = vpop.eup %18345  ;;  %v2751_v53 = vsel %vm2711_vm5, %v18344_v62, 0.0 }
 0x6d5   : > { %2752 = vadd.xlane.f32.xlu0 %v2751_v53  ;;  %v2758_v54 = vmul.f32 %v18346_v52, %v18342_v35  ;;  %v18348_v2 = vpop.eup %18347  ;;  %v15373_v35 = vld [vmem:[%s18614_s24 + $0x20] sm:$0x3f] }
 0x6d6   : > { %v2748_v3 = vsel %vm2711_vm5, %v18348_v2, 0.0 }
 0x6d7   : > { %16994 = vmatmul.mubr.msk.f32.vlgmr.msra.gmra.mxu0 %vm2711_vm5, %v2758_v54 }
 0x6d8   : > { %17002 = vmatpush3.msk.msra.mxu0 %vm1051_vm3, %v15359_v55  ;;  %17003 = vmatprep.mubr.msk.f32.mxu0 %vm18549_vm0, %v18548_v1 }
 0x6d9   : > { %17011 = vmatprep.subr.mxu0 %v18548_v1 }
 0x6db   : > { %17004 = vmatmul.mubr.msk.f32.vlgmr.msra.gmra.mxu0 %vm1294_vm4, %v2910_v46 }
 0x6dc   : > { %17012 = vmatpush3.msra.mxu0 %v1962_v57  ;;  %17013 = vmatprep.mubr.msk.f32.mxu0 %vm18549_vm0, %v18548_v1  ;;  %v3565_v57 = vld [vmem:[%s18634_s20 + $0x18] sm:$0x3f] }
 0x6dd   : > { %17021 = vmatprep.subr.mxu0 %v18548_v1 }
 0x703   : > { %v2707_v61 = vpop.f32.mrf.mxu0 }
 0x704   : > { %v2724_v0 = vsel %vm2711_vm5, %v2707_v61, -inf }
 0x705   : > { %2725 = vmax.xlane.f32.xlu1 %v2724_v0  ;;  %v16990_v14 = vpop.f32.mrf.mxu0  ;;  %v3662_v0 = vld [vmem:[%s20845_s16 + $0x60] sm:$0xff] }
 0x706   : > { %v3660_v14 = vld [vmem:[%s20845_s16 + $0x50] sm:$0xff] }
 0x709   : > { %2749 = vadd.xlane.f32.xlu1 %v2748_v3  ;;  %v3659_v3 = vld [vmem:[%s20845_s16 + $0x48] sm:$0xff] }
 0x75e   : > { %v2753_v9 = vpop.xlane.xlu0 %2752 }
 0x78e   : > { %v2726_v5 = vpop.xlane.xlu1 %2725 }
 0x78f   : > { %v2731_v7 = vsub.f32 %v2707_v61, %v2726_v5  ;;  %v3663_v61 = vld [vmem:[%s20845_s16 + $0x68] sm:$0xff]  ;;  %v3657_v5 = vld [vmem:[%s20845_s16 + $0x38] sm:$0xff] }
 0x791   : > { %v2740_v63 = vmul.f32 1.442695, %v2731_v7  ;;  %v3656_v7 = vld [vmem:[%s20845_s16 + $0x30] sm:$0xff] }
 0x792   : > { %v2750_v8 = vpop.xlane.xlu1 %2749 }
 0x793   : > { %18349 = vpow2.f32 %v2740_v63  ;;  %v3655_v63 = vld [vmem:[%s20845_s16 + $0x28] sm:$0xff] }
 0x794   : > { %18351 = vrcp.f32 %v2750_v8  ;;  %v3654_v8 = vld [vmem:[%s20845_s16 + $0x20] sm:$0xff] }
 0x795   : > { %18353 = vrcp.f32 %v2753_v9  ;;  %v3653_v9 = vld [vmem:[%s20845_s16 + $0x18] sm:$0xff] }
 0x797   : > { %v2836_v10 = vpop.f32.mrf.mxu0 }
 0x798   : > { %17009 = vmatmul.mubr.msk.f32.vlgmr.msra.gmra.mxu1 %vm1294_vm4, %v2836_v10 }
 0x799   : > { %v16995_v11 = vpop.f32.mrf.mxu0  ;;  %17018 = vmatprep.mubr.msk.f32.mxu1 %vm18549_vm0, %v18548_v1  ;;  %17017 = vmatpush3.msk.msra.mxu1 %vm1051_vm3, %v15365_v12 }
 0x79a   : > { %17026 = vmatprep.subr.mxu1 %v18548_v1 }
 0x79b   : > { %v2988_v13 = vpop.f32.mrf.mxu0 }
 0x79d   : > { %v17005_v15 = vpop.f32.mrf.mxu0 }
 0x7a0   : > { %v18350_v16 = vpop.eup %18349 }
 0x7a1   : > { %v18352_v18 = vpop.eup %18351  ;;  %v2754_v19 = vsel %vm2711_vm5, %v18350_v16, 0.0 }
 0x7a2   : > { %2755 = vadd.xlane.f32.xlu1 %v2754_v19  ;;  %v2762_v21 = vmul.f32 %v18352_v18, %v18348_v2  ;;  %v18354_v22 = vpop.eup %18353  ;;  %v3661_v2 = vld [vmem:[%s20845_s16 + $0x58] sm:$0xff]  ;;  %v15378_v18 = vld [vmem:[%s20847_s23] ss:$0 sm:$0xff] }
 0x7a3   : > { %v2764_v25 = vmul.f32 %v18354_v22, %v18344_v62  ;;  %v3652_v22 = vld [vmem:[%s20845_s16 + $0x10] sm:$0xff] }
 0x7a4   : > { %17014 = vmatmul.mubr.msk.f32.vlgmr.msra.gmra.mxu0 %vm2711_vm5, %v2762_v21 }
 0x7a5   : > { %17022 = vmatpush3.msra.mxu0 %v2297_v23  ;;  %17023 = vmatprep.mubr.msk.f32.mxu0 %vm18549_vm0, %v18548_v1  ;;  %v3651_v23 = vld [vmem:[%s20845_s16 + $0x8] sm:$0xff] }
 0x7a6   : > { %17031 = vmatprep.subr.mxu0 %v18548_v1 }
 0x7a8   : > { %17024 = vmatmul.mubr.msk.f32.vlgmr.msra.gmra.mxu0 %vm2711_vm5, %v2764_v25  ;;  %v15379_v25 = vld [vmem:[%s20848_s5] ss:$0 sm:$0xff] }
 0x7a9   : > { %17032 = vmatpush3.msra.mxu0 %v2632_v26  ;;  %17033 = vmatprep.mubr.msk.f32.mxu0 %vm18549_vm0, %v18548_v1 }
 0x7aa   : > { %17041 = vmatprep.subr.mxu0 %v18548_v1 }
 0x82b   : > { %v2756_v27 = vpop.xlane.xlu1 %2755 }
 0x82c   : > { %18355 = vrcp.f32 %v2756_v27 }
 0x839   : > { %v18356_v28 = vpop.eup %18355 }
 0x83a   : > { %v2766_v29 = vmul.f32 %v18356_v28, %v18350_v16  ;;  %v15377_v16 = vld [vmem:[%s20846_s22] ss:$0 sm:$0xff] }
 0x83c   : > { %17034 = vmatmul.mubr.msk.f32.vlgmr.msra.gmra.mxu0 %vm2711_vm5, %v2766_v29 }
 0x83d   : > { %17049 = vmatprep.mubr.msk.f32.mxu0 %vm18549_vm0, %v18548_v1  ;;  %17042 = vmatpush3.msk.msra.mxu0 %vm1051_vm3, %v3565_v57  ;;  %v15405_v57 = vld [vmem:[%s20840_s3 + $0xa8] sm:$0xff] }
 0x83e   : > { %17043 = vmatprep.subr.mxu0 %v18548_v1 }
 0x858   : > { %v3064_v30 = vpop.f32.mrf.mxu1 }
 0x859   : > { %v3065_v40 = vadd.f32 %v3064_v30, %v2988_v13  ;;  %v15383_v30 = vld [vmem:[%s20849_s9] ss:$0 sm:$0xff] }
 0x85a   : > { %v17010_v31 = vpop.f32.mrf.mxu1 }
 0x864   : > { %v3137_v33 = vpop.f32.mrf.mxu0 }
 0x865   : > { %17019 = vmatmul.mubr.msk.f32.vlgmr.msra.gmra.mxu1 %vm1294_vm4, %v3137_v33 }
 0x866   : > { %v17015_v34 = vpop.f32.mrf.mxu0  ;;  %17027 = vmatpush3.msk.msra.mxu1 %vm1051_vm3, %v15369_v32  ;;  %17028 = vmatprep.mubr.msk.f32.mxu1 %vm18549_vm0, %v18548_v1 }
 0x867   : > { %17036 = vmatprep.subr.mxu1 %v18548_v1 }
 0x868   : > { %v3289_v36 = vpop.f32.mrf.mxu0 }
 0x869   : > { %17029 = vmatmul.mubr.msk.f32.vlgmr.msra.gmra.mxu1 %vm1294_vm4, %v3289_v36 }
 0x86a   : > { %v17025_v37 = vpop.f32.mrf.mxu0  ;;  %17037 = vmatpush3.msk.msra.mxu1 %vm1051_vm3, %v15373_v35  ;;  %17038 = vmatprep.mubr.msk.f32.mxu1 %vm18549_vm0, %v18548_v1 }
 0x86b   : > { %17052 = vmatprep.subr.mxu1 %v18548_v1 }
 0x8fc   : > { %v3441_v38 = vpop.f32.mrf.mxu0 }
 0x8fd   : > { %17039 = vmatmul.mubr.msk.f32.vlgmr.msra.gmra.mxu1 %vm1294_vm4, %v3441_v38 }
 0x8fe   : > { %v17035_v39 = vpop.f32.mrf.mxu0  ;;  %17082 = vmatprep.mubr.msk.f32.mxu1 %vm18549_vm0, %v18548_v1  ;;  %17053 = vmatpush3.msra.mxu1 %v3664_v60  ;;  %v15415_v60 = vld [vmem:[%s18584_s25 + $0xc8] sm:$0xff] }
 0x8ff   : > { %17054 = vmatprep.subr.mxu1 %v18548_v1 }
 0x900   : > { %17055 = vmatpush3.msra.mxu1 %v3663_v61  ;;  %v15414_v61 = vld [vmem:[%s18584_s25 + $0xc0] sm:$0xff] }
 0x901   : > { %17056 = vmatprep.subr.mxu1 %v18548_v1 }
 0x902   : > { %17057 = vmatpush3.msra.mxu1 %v3662_v0  ;;  %v15433_v0 = vld [vmem:[%s20840_s3 + $0xd8] sm:$0x3f] }
 0x903   : > { %17058 = vmatprep.subr.mxu1 %v18548_v1 }
 0x904   : > { %17059 = vmatpush3.msra.mxu1 %v3661_v2  ;;  %v15432_v2 = vld [vmem:[%s20840_s3 + $0xd0] sm:$0xff] }
 0x905   : > { %17060 = vmatprep.subr.mxu1 %v18548_v1 }
 0x906   : > { %17061 = vmatpush3.msra.mxu1 %v3660_v14  ;;  %v15431_v14 = vld [vmem:[%s20840_s3 + $0xc8] sm:$0xff] }
 0x907   : > { %17062 = vmatprep.subr.mxu1 %v18548_v1 }
 0x908   : > { %17063 = vmatpush3.msra.mxu1 %v3659_v3  ;;  %v15430_v3 = vld [vmem:[%s20840_s3 + $0xc0] sm:$0xff] }
 0x909   : > { %17064 = vmatprep.subr.mxu1 %v18548_v1 }
 0x90a   : > { %17065 = vmatpush3.msra.mxu1 %v3658_v4  ;;  %v15451_v4 = vld [vmem:[%s18589_s29 + $0xf8] sm:$0x3f] }
 0x90b   : > { %17066 = vmatprep.subr.mxu1 %v18548_v1 }
 0x90c   : > { %17067 = vmatpush3.msra.mxu1 %v3657_v5  ;;  %v15450_v5 = vld [vmem:[%s18589_s29 + $0xf0] sm:$0xff] }
 0x90d   : > { %17068 = vmatprep.subr.mxu1 %v18548_v1 }
 0x90e   : > { %17069 = vmatpush3.msra.mxu1 %v3656_v7  ;;  %v15449_v7 = vld [vmem:[%s18589_s29 + $0xe8] sm:$0xff] }
 0x90f   : > { %17070 = vmatprep.subr.mxu1 %v18548_v1 }
 0x910   : > { %17071 = vmatpush3.msra.mxu1 %v3655_v63  ;;  %v15448_v63 = vld [vmem:[%s18589_s29 + $0xe0] sm:$0xff] }
 0x911   : > { %17072 = vmatprep.subr.mxu1 %v18548_v1 }
 0x912   : > { %17073 = vmatpush3.msra.mxu1 %v3654_v8 }
 0x913   : > { %17074 = vmatprep.subr.mxu1 %v18548_v1 }
 0x914   : > { %17075 = vmatpush3.msra.mxu1 %v3653_v9 }
 0x915   : > { %17076 = vmatprep.subr.mxu1 %v18548_v1 }
 0x916   : > { %17077 = vmatpush3.msra.mxu1 %v3652_v22 }
 0x917   : > { %17078 = vmatprep.subr.mxu1 %v18548_v1 }
 0x918   : > { %17079 = vmatpush3.msra.mxu1 %v3651_v23  ;;  %v15423_v23 = vld [vmem:[%s18589_s29 + $0xc8] sm:$0xff] }
 0x919   : > { %17080 = vmatprep.subr.mxu1 %v18548_v1 }
 0x91a   : > { %17081 = vmatpush3.msra.mxu1 %v3650_v24 }
 0x91b   : > { %17118 = vmatprep.subr.mxu1 %v18548_v1 }
 0x925   : > { %v3215_v41 = vpop.f32.mrf.mxu1 }
 0x926   : > { %v3219_v42 = vadd.f32 %v3215_v41, %v3065_v40  ;;  %v15391_v40 = vld [vmem:[%s18584_s25 + $0xb8] sm:$0x3f]  ;;  %v15390_v41 = vld [vmem:[%s18584_s25 + $0xb0] sm:$0xff] }
 0x927   : > { %v17020_v43 = vpop.f32.mrf.mxu1 }
 0x928   : > { %v15388_v43 = vld [vmem:[%s18584_s25 + $0xa0] sm:$0xff] }
 0x929   : > { %v3367_v44 = vpop.f32.mrf.mxu1 }
 0x92a   : > { %v3371_v20 = vadd.f32 %v3367_v44, %v3219_v42  ;;  %v15389_v42 = vld [vmem:[%s18584_s25 + $0xa8] sm:$0xff] }
 0x92b   : > { %v17030_v45 = vpop.f32.mrf.mxu1 }
 0x9bd   : > { %v3519_v46 = vpop.f32.mrf.mxu1 }
 0x9be   : > { %v3523_v47 = vadd.f32 %v3519_v46, %v3371_v20 }
 0x9bf   : > { %v17040_v49 = vpop.f32.mrf.mxu1 }
 0x9c0   : > { %v3524_v50 = vadd.f32 %v3523_v47, %v18773_v6  ;;  %v3564_v6 = vld [vmem:[%s18634_s20 + $0x10] sm:$0xff]  ;;  %v15386_v47 = vld [vmem:[%s18574_s17 + $0x1] ss:$0 sm:$0xff] }
 0x9c1   : > { %17044 = vmatpush3.msra.mxu0 %v3564_v6  ;;  %v15387_v49 = vld [vmem:[%s18579_s21 + $0x1] ss:$0 sm:$0xff] }
 0x9c2   : > { %v19103_v51 = vadd.f32 %v15376_v48, %v3524_v50  ;;  %17045 = vmatprep.subr.mxu0 %v18548_v1  ;;  %v15404_v6 = vld [vmem:[%s20840_s3 + $0xa0] sm:$0xff] }
 0x9c3   : > { %17046 = vmatpush3.msra.mxu0 %v3563_v58  ;;  %v15417_v58 = vld [vmem:[%s18584_s25 + $0xd8] sm:$0x3f] }
 0x9c4   : > { %v3535_v62 = vsel %vm1008_vm2, %v19103_v51, 0.0  ;;  %17047 = vmatprep.subr.mxu0 %v18548_v1 }
 0x9c5   : > { %3536 = vadd.xlane.f32.xlu0 %v3535_v62  ;;  %17048 = vmatpush3.msra.mxu0 %v3562_v59  ;;  %v15399_v62 = vld [vmem:[%s18589_s29 + $0xb8] sm:$0x3f]  ;;  %v15416_v59 = vld [vmem:[%s18584_s25 + $0xd0] sm:$0xff] }
 0x9c6   : > { %17085 = vmatprep.subr.mxu0 %v18548_v1 }
 0xa4e   : > { %v3537_v52 = vpop.xlane.xlu0 %3536 }
 0xa4f   : > { %v3538_v53 = vmul.f32 0.033333335, %v3537_v52  ;;  %v15398_v52 = vld [vmem:[%s18589_s29 + $0xb0] sm:$0xff] }
 0xa51   : > { %v3539_v54 = vsub.f32 %v19103_v51, %v3538_v53  ;;  %v15397_v53 = vld [vmem:[%s18589_s29 + $0xa8] sm:$0xff] }
 0xa53   : > { %v3540_v55 = vmul.f32 %v3539_v54, %v3539_v54 }
 0xa55   : > { %v3541_v56 = vsel %vm1008_vm2, %v3540_v55, 0.0  ;;  %v15407_v55 = vld [vmem:[%s20840_s3 + $0xb8] sm:$0x3f] }
 0xa56   : > { %3542 = vadd.xlane.f32.xlu1 %v3541_v56  ;;  %v15406_v56 = vld [vmem:[%s20840_s3 + $0xb0] sm:$0xff] }
 0xadf   : > { %v3543_v10 = vpop.xlane.xlu1 %3542 }
 0xae0   : > { %v3544_v11 = vmul.f32 0.033333335, %v3543_v10  ;;  %v15393_v10 = vld [vmem:[%s20839_s8 + $0x5] ss:$0 sm:$0xff] }
 0xae2   : > { %v3545_v13 = vadd.f32 1e-05, %v3544_v11  ;;  %v15401_v11 = vld [vmem:[%s20836_s14 + $0x5] ss:$0 sm:$0xff] }
 0xae4   : > { %18357 = vrsqrt.f32 %v3545_v13 }
 0xaf1   : > { %v18358_v15 = vpop.eup %18357 }
 0xaf2   : > { %v3547_v17 = vmul.f32 %v18358_v15, %v3539_v54  ;;  %v15396_v54 = vld [vmem:[%s18589_s29 + $0xa0] sm:$0xff] }
 0xaf4   : > { %v3554_v19 = vmul.f32 %v15377_v16, %v3547_v17 }
 0xaf6   : > { %v3561_v21 = vadd.f32 %v15378_v18, %v3554_v19  ;;  %v15425_v19 = vld [vmem:[%s18589_s29 + $0xd8] sm:$0x3f] }
 0xaf8   : > { %17050 = vmatmul.mubr.msk.f32.vlgmr.msra.gmra.mxu0 %vm1008_vm2, %v3561_v21  ;;  %v15424_v21 = vld [vmem:[%s18589_s29 + $0xd0] sm:$0xff] }
 0xaf9   : > { %17093 = vmatprep.mubr.msk.f32.mxu0 %vm18549_vm0, %v18548_v1  ;;  %17086 = vmatpush3.msk.msra.mxu0 %vm1051_vm3, %v15391_v40 }
 0xafa   : > { %17087 = vmatprep.subr.mxu0 %v18548_v1 }
 0xafb   : > { %17088 = vmatpush3.msra.mxu0 %v15390_v41 }
 0xafc   : > { %17089 = vmatprep.subr.mxu0 %v18548_v1 }
 0xafd   : > { %17090 = vmatpush3.msra.mxu0 %v15389_v42 }
 0xafe   : > { %17091 = vmatprep.subr.mxu0 %v18548_v1 }
 0xaff   : > { %17092 = vmatpush3.msra.mxu0 %v15388_v43  ;;  %v15443_v43 = vld [vmem:[%s18584_s25 + $0xf8] sm:$0x3f] }
 0xb00   : > { %17096 = vmatprep.subr.mxu0 %v18548_v1 }
 0xbb8   : > { %v3645_v26 = vpop.f32.mrf.mxu0 }
 0xbb9   : > { %v3646_v12 = vadd.f32 %v15379_v25, %v3645_v26  ;;  %v15422_v25 = vld [vmem:[%s18589_s29 + $0xc0] sm:$0xff] }
 0xbba   : > { %v17051_v27 = vpop.f32.mrf.mxu0 }
 0xbbb   : > { %v3649_v28 = vmax.f32 %v3646_v12, 0.0 }
 0xbbd   : > { %17083 = vmatmul.mubr.msk.f32.vlgmr.msra.gmra.mxu1 %vm3665_vm6, %v3649_v28 }
 0xbbe   : > { %17120 = vmatprep.mubr.msk.f32.mxu1 %vm18549_vm0, %v18548_v1 }
 0xc7d   : > { %v3735_v29 = vpop.f32.mrf.mxu1 }
 0xc7e   : > { %v3739_v31 = vadd.f32 %v3735_v29, %v19103_v51  ;;  %v15453_v29 = vld [vmem:[%s20836_s14 + $0x7] ss:$0 sm:$0xff] }
 0xc7f   : > { %v17084_v32 = vpop.f32.mrf.mxu1 }
 0xc80   : > { %v19159_v33 = vadd.f32 %v15383_v30, %v3739_v31 }
 0xc82   : > { %v3752_v34 = vsel %vm1008_vm2, %v19159_v33, 0.0 }
 0xc83   : > { %3753 = vadd.xlane.f32.xlu0 %v3752_v34 }
 0xd0c   : > { %v3754_v35 = vpop.xlane.xlu0 %3753 }
 0xd0d   : > { %v3755_v36 = vmul.f32 0.033333335, %v3754_v35 }
 0xd0f   : > { %v3756_v37 = vsub.f32 %v19159_v33, %v3755_v36  ;;  %v15419_v36 = vld [vmem:[%s20839_s8 + $0x6] ss:$0 sm:$0xff] }
 0xd11   : > { %v3757_v38 = vmul.f32 %v3756_v37, %v3756_v37 }
 0xd13   : > { %v3758_v39 = vsel %vm1008_vm2, %v3757_v38, 0.0 }
 0xd14   : > { %3759 = vadd.xlane.f32.xlu1 %v3758_v39 }
 0xd9d   : > { %v3760_v44 = vpop.xlane.xlu1 %3759 }
 0xd9e   : > { %v3761_v20 = vmul.f32 0.033333335, %v3760_v44  ;;  %v15442_v44 = vld [vmem:[%s18584_s25 + $0xf0] sm:$0xff] }
 0xda0   : > { %v3762_v45 = vadd.f32 1e-05, %v3761_v20  ;;  %v15441_v20 = vld [vmem:[%s18584_s25 + $0xe8] sm:$0xff] }
 0xda2   : > { %18359 = vrsqrt.f32 %v3762_v45  ;;  %v15440_v45 = vld [vmem:[%s18584_s25 + $0xe0] sm:$0xff] }
 0xdaf   : > { %v18360_v46 = vpop.eup %18359 }
 0xdb0   : > { %v3764_v48 = vmul.f32 %v18360_v46, %v3756_v37  ;;  %v15427_v37 = vld [vmem:[%s20836_s14 + $0x6] ss:$0 sm:$0xff]  ;;  %v15459_v46 = vld [vmem:[%s20840_s3 + $0xf8] sm:$0x3f] }
 0xdb2   : > { %v3771_v50 = vmul.f32 %v15386_v47, %v3764_v48  ;;  %v15458_v47 = vld [vmem:[%s20840_s3 + $0xf0] sm:$0xff]  ;;  %v15457_v48 = vld [vmem:[%s20840_s3 + $0xe8] sm:$0xff] }
 0xdb4   : > { %v19176_v51 = vadd.f32 %v15387_v49, %v3771_v50  ;;  %v15456_v49 = vld [vmem:[%s20840_s3 + $0xe0] sm:$0xff]  ;;  %v15477_v50 = vld [vmem:[%s18589_s29 + $0x118] sm:$0x3f] }
 0xdb6   : > { %17094 = vmatmul.mubr.msk.f32.vlgmr.msra.gmra.mxu0 %vm1008_vm2, %v19176_v51 }
 0xdb7   : > { %17097 = vmatpush3.msk.msra.mxu0 %vm1051_vm3, %v15399_v62  ;;  %17104 = vmatprep.mubr.msk.f32.mxu0 %vm18549_vm0, %v18548_v1  ;;  %v15476_v62 = vld [vmem:[%s18589_s29 + $0x110] sm:$0xff] }
 0xdb8   : > { %17098 = vmatprep.subr.mxu0 %v18548_v1 }
 0xdb9   : > { %17099 = vmatpush3.msra.mxu0 %v15398_v52  ;;  %v15475_v52 = vld [vmem:[%s18589_s29 + $0x108] sm:$0xff] }
 0xdba   : > { %17100 = vmatprep.subr.mxu0 %v18548_v1 }
 0xdbb   : > { %17101 = vmatpush3.msra.mxu0 %v15397_v53  ;;  %v15474_v53 = vld [vmem:[%s18589_s29 + $0x100] sm:$0xff] }
 0xdbc   : > { %17102 = vmatprep.subr.mxu0 %v18548_v1 }
 0xdbd   : > { %17103 = vmatpush3.msra.mxu0 %v15396_v54 }
 0xdbe   : > { %17105 = vmatmul.mubr.msk.f32.vlgmr.msra.gmra.mxu0 %vm1008_vm2, %v19176_v51  ;;  %17107 = vmatprep.subr.mxu0 %v18548_v1 }
 0xdbf   : > { %17108 = vmatpush3.msk.msra.mxu0 %vm1051_vm3, %v15407_v55  ;;  %17115 = vmatprep.mubr.msk.f32.mxu0 %vm18549_vm0, %v18548_v1 }
 0xdc0   : > { %17109 = vmatprep.subr.mxu0 %v18548_v1 }
 0xdc1   : > { %17110 = vmatpush3.msra.mxu0 %v15406_v56 }
 0xdc2   : > { %17111 = vmatprep.subr.mxu0 %v18548_v1 }
 0xdc3   : > { %17112 = vmatpush3.msra.mxu0 %v15405_v57 }
 0xdc4   : > { %17113 = vmatprep.subr.mxu0 %v18548_v1 }
 0xdc5   : > { %17114 = vmatpush3.msra.mxu0 %v15404_v6  ;;  %v15445_v6 = vld [vmem:[%s20839_s8 + $0x7] ss:$0 sm:$0xff] }
 0xdc6   : > { %17116 = vmatmul.mubr.msk.f32.vlgmr.msra.gmra.mxu0 %vm1008_vm2, %v19176_v51  ;;  %17123 = vmatprep.subr.mxu0 %v18548_v1 }
 0xdc7   : > { %17124 = vmatpush3.msk.msra.mxu0 %vm1051_vm3, %v15417_v58  ;;  %17131 = vmatprep.mubr.msk.f32.mxu0 %vm18549_vm0, %v18548_v1 }
 0xdc8   : > { %17125 = vmatprep.subr.mxu0 %v18548_v1 }
 0xdc9   : > { %17126 = vmatpush3.msra.mxu0 %v15416_v59 }
 0xdca   : > { %17127 = vmatprep.subr.mxu0 %v18548_v1 }
 0xdcb   : > { %17128 = vmatpush3.msra.mxu0 %v15415_v60 }
 0xdcc   : > { %17129 = vmatprep.subr.mxu0 %v18548_v1 }
 0xdcd   : > { %17130 = vmatpush3.msra.mxu0 %v15414_v61 }
 0xdce   : > { %17132 = vmatmul.mubr.msk.f32.vlgmr.msra.gmra.mxu0 %vm1008_vm2, %v19176_v51  ;;  %17145 = vmatprep.subr.mxu0 %v18548_v1 }
 0xdcf   : > { %17146 = vmatpush3.msk.msra.mxu0 %vm1051_vm3, %v15433_v0  ;;  %17153 = vmatprep.mubr.msk.f32.mxu0 %vm18549_vm0, %v18548_v1  ;;  %v15469_v0 = vld [vmem:[%s18584_s25 + $0x118] sm:$0x3f] }
 0xdd0   : > { %17147 = vmatprep.subr.mxu0 %v18548_v1 }
 0xdd1   : > { %17148 = vmatpush3.msra.mxu0 %v15432_v2  ;;  %v15468_v2 = vld [vmem:[%s18584_s25 + $0x110] sm:$0xff] }
 0xdd2   : > { %17149 = vmatprep.subr.mxu0 %v18548_v1 }
 0xdd3   : > { %17150 = vmatpush3.msra.mxu0 %v15431_v14  ;;  %v15467_v14 = vld [vmem:[%s18584_s25 + $0x108] sm:$0xff] }
 0xdd4   : > { %17151 = vmatprep.subr.mxu0 %v18548_v1 }
 0xdd5   : > { %17152 = vmatpush3.msra.mxu0 %v15430_v3 }
 0xdd6   : > { %17154 = vmatmul.mubr.msk.f32.vlgmr.msra.gmra.mxu0 %vm1008_vm2, %v19176_v51  ;;  %17172 = vmatprep.subr.mxu0 %v18548_v1 }
 0xdd7   : > { %17173 = vmatpush3.msk.msra.mxu0 %vm1051_vm3, %v15451_v4  ;;  %17180 = vmatprep.mubr.msk.f32.mxu0 %vm18549_vm0, %v18548_v1  ;;  %v15466_v4 = vld [vmem:[%s18584_s25 + $0x100] sm:$0xff] }
 0xdd8   : > { %17174 = vmatprep.subr.mxu0 %v18548_v1 }
 0xdd9   : > { %17175 = vmatpush3.msra.mxu0 %v15450_v5 }
 0xdda   : > { %17176 = vmatprep.subr.mxu0 %v18548_v1 }
 0xddb   : > { %17177 = vmatpush3.msra.mxu0 %v15449_v7  ;;  %v15485_v7 = vld [vmem:[%s20840_s3 + $0x118] sm:$0x3f] }
 0xddc   : > { %17178 = vmatprep.subr.mxu0 %v18548_v1 }
 0xddd   : > { %17179 = vmatpush3.msra.mxu0 %v15448_v63  ;;  %v15484_v63 = vld [vmem:[%s20840_s3 + $0x110] sm:$0xff] }
 0xdde   : > { %17181 = vmatmul.mubr.msk.f32.vlgmr.msra.gmra.mxu0 %vm1008_vm2, %v19176_v51  ;;  %17194 = vmatprep.subr.mxu0 %v18548_v1 }
 0xddf   : > { %17196 = vmatprep.mubr.msk.f32.mxu0 %vm18549_vm0, %v18548_v1 }
 0xe76   : > { %v3864_v8 = vpop.f32.mrf.mxu0 }
 0xe77   : > { %v3865_v13 = vadd.f32 %v15393_v10, %v3864_v8  ;;  %v15479_v8 = vld [vmem:[%s20836_s14 + $0x8] ss:$0 sm:$0xff] }
 0xe78   : > { %v17095_v9 = vpop.f32.mrf.mxu0 }
 0xe79   : > { %v3868_v18 = vmul.f32 0.4082483, %v3865_v13  ;;  %v15483_v9 = vld [vmem:[%s20840_s3 + $0x108] sm:$0xff]  ;;  %v15482_v13 = vld [vmem:[%s20840_s3 + $0x100] sm:$0xff] }
 0xe7e   : > { %v3951_v15 = vpop.f32.mrf.mxu0 }
 0xe7f   : > { %v3952_v16 = vadd.f32 %v15401_v11, %v3951_v15 }
 0xe80   : > { %v17106_v17 = vpop.f32.mrf.mxu0 }
 0xe81   : > { %17119 = vmatpush3.xpose.msk.msra.mxu1 %vm1294_vm4, %v3952_v16  ;;  %v15503_v16 = vld [vmem:[%s18589_s29 + $0x138] sm:$0x3f]  ;;  %v15502_v17 = vld [vmem:[%s18589_s29 + $0x130] sm:$0xff] }
 0xe82   : > { %17134 = vmatprep.subr.mxu1 %v18548_v1 }
 0xe84   : > { %17121 = vmatmul.mubr.msk.f32.vlgmr.msra.gmra.mxu1 %vm1294_vm4, %v3868_v18  ;;  %v15501_v18 = vld [vmem:[%s18589_s29 + $0x128] sm:$0xff] }
 0xe85   : > { %17135 = vmatpush3.msk.msra.mxu1 %vm1051_vm3, %v15425_v19  ;;  %17142 = vmatprep.mubr.msk.f32.mxu1 %vm18549_vm0, %v18548_v1  ;;  %v15500_v19 = vld [vmem:[%s18589_s29 + $0x120] sm:$0xff] }
 0xe86   : > { %v19257_v22 = vpop.f32.mrf.mxu0  ;;  %17136 = vmatprep.subr.mxu1 %v18548_v1 }
 0xe87   : > { %17137 = vmatpush3.msra.mxu1 %v15424_v21 }
 0xe88   : > { %v17117_v24 = vpop.f32.mrf.mxu0  ;;  %17138 = vmatprep.subr.mxu1 %v18548_v1 }
 0xe89   : > { %17139 = vmatpush3.msra.mxu1 %v15423_v23 }
 0xe8a   : > { %17140 = vmatprep.subr.mxu1 %v18548_v1 }
 0xe8b   : > { %17141 = vmatpush3.msra.mxu1 %v15422_v25 }
 0xe8c   : > { %17143 = vmatmul.mubr.msk.f32.vlgmr.msra.gmra.mxu1 %vm1008_vm2, %v19176_v51  ;;  %17156 = vmatprep.subr.mxu1 %v18548_v1 }
 0xe8d   : > { %17158 = vmatprep.mubr.msk.f32.mxu1 %vm18549_vm0, %v18548_v1 }
 0xe8e   : > { %v4199_v26 = vpop.f32.mrf.mxu0 }
 0xe8f   : > { %v4200_v38 = vadd.f32 %v15419_v36, %v4199_v26 }
 0xe90   : > { %v17133_v12 = vpop.f32.mrf.mxu0 }
 0xe91   : > { %v4203_v42 = vmul.f32 0.4082483, %v4200_v38  ;;  %v15494_v38 = vld [vmem:[%s18584_s25 + $0x130] sm:$0xff] }
 0xe96   : > { %v19269_v27 = vpop.f32.mrf.mxu0 }
 0xe98   : > { %v17155_v28 = vpop.f32.mrf.mxu0 }
 0xe9e   : > { %v4621_v30 = vpop.f32.mrf.mxu0 }
 0xe9f   : > { %v4622_v31 = vadd.f32 %v15453_v29, %v4621_v30  ;;  %v15471_v30 = vld [vmem:[%s20839_s8 + $0x8] ss:$0 sm:$0xff] }
 0xea0   : > { %v17182_v32 = vpop.f32.mrf.mxu0 }
 0xea1   : > { %17195 = vmatpush3.xpose.msk.msra.mxu0 %vm1294_vm4, %v4622_v31 }
 0xea2   : > { %17199 = vmatprep.subr.mxu0 %v18548_v1 }
 0xf44   : > { %v19274_v34 = vpop.f32.mrf.mxu1 }
 0xf45   : > { %v5457_v57 = vsel %vm2711_vm5, %v19274_v34, -inf }
 0xf46   : > { %v17122_v35 = vpop.f32.mrf.mxu1 }
 0xf4c   : > { %v4286_v39 = vpop.f32.mrf.mxu1 }
 0xf4d   : > { %v4287_v40 = vadd.f32 %v15427_v37, %v4286_v39  ;;  %v15495_v37 = vld [vmem:[%s18584_s25 + $0x138] sm:$0x3f]  ;;  %v15493_v39 = vld [vmem:[%s18584_s25 + $0x128] sm:$0xff] }
 0xf4e   : > { %v17144_v41 = vpop.f32.mrf.mxu1 }
 0xf4f   : > { %17157 = vmatpush3.xpose.msk.msra.mxu1 %vm1294_vm4, %v4287_v40  ;;  %v15492_v41 = vld [vmem:[%s18584_s25 + $0x120] sm:$0xff] }
 0xf50   : > { %17161 = vmatprep.subr.mxu1 %v18548_v1 }
 0xf52   : > { %17159 = vmatmul.mubr.msk.f32.vlgmr.msra.gmra.mxu1 %vm1294_vm4, %v4203_v42 }
 0xf53   : > { %17162 = vmatpush3.msk.msra.mxu1 %vm1051_vm3, %v15443_v43  ;;  %17169 = vmatprep.mubr.msk.f32.mxu1 %vm18549_vm0, %v18548_v1  ;;  %v15511_v43 = vld [vmem:[%s20840_s3 + $0x138] sm:$0x3f] }
 0xf54   : > { %17163 = vmatprep.subr.mxu1 %v18548_v1 }
 0xf55   : > { %17164 = vmatpush3.msra.mxu1 %v15442_v44  ;;  %v15510_v44 = vld [vmem:[%s20840_s3 + $0x130] sm:$0xff] }
 0xf56   : > { %17165 = vmatprep.subr.mxu1 %v18548_v1 }
 0xf57   : > { %17166 = vmatpush3.msra.mxu1 %v15441_v20  ;;  %v15505_v20 = vld [vmem:[%s20836_s14 + $0x9] ss:$0 sm:$0xff] }
 0xf58   : > { %17167 = vmatprep.subr.mxu1 %v18548_v1 }
 0xf59   : > { %17168 = vmatpush3.msra.mxu1 %v15440_v45  ;;  %v15509_v45 = vld [vmem:[%s20840_s3 + $0x128] sm:$0xff] }
 0xf5a   : > { %17170 = vmatmul.mubr.msk.f32.vlgmr.msra.gmra.mxu1 %vm1008_vm2, %v19176_v51  ;;  %17183 = vmatprep.subr.mxu1 %v18548_v1 }
 0xf5b   : > { %17184 = vmatpush3.msk.msra.mxu1 %vm1051_vm3, %v15459_v46  ;;  %17191 = vmatprep.mubr.msk.f32.mxu1 %vm18549_vm0, %v18548_v1 }
 0xf5c   : > { %17185 = vmatprep.subr.mxu1 %v18548_v1 }
 0xf5d   : > { %17186 = vmatpush3.msra.mxu1 %v15458_v47  ;;  %v15435_v47 = vld [vmem:[%s18609_s19 + $0x6] ss:$0 sm:$0xff] }
 0xf5e   : > { %17187 = vmatprep.subr.mxu1 %v18548_v1 }
 0xf5f   : > { %17188 = vmatpush3.msra.mxu1 %v15457_v48 }
 0xf60   : > { %17189 = vmatprep.subr.mxu1 %v18548_v1 }
 0xf61   : > { %17190 = vmatpush3.msra.mxu1 %v15456_v49  ;;  %v15508_v49 = vld [vmem:[%s20840_s3 + $0x120] sm:$0xff] }
 0xf62   : > { %17192 = vmatmul.mubr.msk.f32.vlgmr.msra.gmra.mxu1 %vm1008_vm2, %v19176_v51  ;;  %17210 = vmatprep.subr.mxu1 %v18548_v1 }
 0xf63   : > { %17211 = vmatpush3.msk.msra.mxu1 %vm1051_vm3, %v15477_v50  ;;  %17218 = vmatprep.mubr.msk.f32.mxu1 %vm18549_vm0, %v18548_v1 }
 0xf64   : > { %17212 = vmatprep.subr.mxu1 %v18548_v1 }
 0xf65   : > { %17213 = vmatpush3.msra.mxu1 %v15476_v62  ;;  %v4373_v62 = vadd.f32 %v15435_v47, %v19269_v27 }
 0xf66   : > { %17214 = vmatprep.subr.mxu1 %v18548_v1 }
 0xf67   : > { %17215 = vmatpush3.msra.mxu1 %v15475_v52 }
 0xf68   : > { %17216 = vmatprep.subr.mxu1 %v18548_v1 }
 0xf69   : > { %17217 = vmatpush3.msra.mxu1 %v15474_v53 }
 0xf6a   : > { %17219 = vmatmul.mubr.msk.f32.vlgmr.msra.gmra.mxu1 %vm1008_vm2, %v19176_v51  ;;  %17232 = vmatprep.subr.mxu1 %v18548_v1 }
 0xf6b   : > { %17234 = vmatprep.mubr.msk.f32.mxu1 %vm18549_vm0, %v18548_v1 }
0x1012   : > { %v19322_v54 = vpop.f32.mrf.mxu1 }
0x1013   : > { %v5460_v55 = vsel %vm2711_vm5, %v19322_v54, -inf }
0x1014   : > { %5461 = vmax.xlane.f32.xlu0 %v5460_v55  ;;  %v17160_v56 = vpop.f32.mrf.mxu1 }
0x1018   : > { %5458 = vmax.xlane.f32.xlu0 %v5457_v57 }
0x101a   : > { %v4534_v58 = vpop.f32.mrf.mxu1 }
0x101b   : > { %v4535_v59 = vadd.f32 %v15445_v6, %v4534_v58 }
0x101c   : > { %v17171_v60 = vpop.f32.mrf.mxu1 }
0x101d   : > { %v4538_v61 = vmul.f32 0.4082483, %v4535_v59  ;;  %v15497_v60 = vld [vmem:[%s20839_s8 + $0x9] ss:$0 sm:$0xff] }
0x101f   : > { %17197 = vmatmul.mubr.msk.f32.vlgmr.msra.gmra.mxu0 %vm1294_vm4, %v4538_v61 }
0x1020   : > { %17200 = vmatpush3.msk.msra.mxu0 %vm1051_vm3, %v15469_v0  ;;  %17207 = vmatprep.mubr.msk.f32.mxu0 %vm18549_vm0, %v18548_v1  ;;  %v15409_v0 = vld [vmem:[%s18609_s19 + $0x5] ss:$0 sm:$0xff] }
0x1021   : > { %17201 = vmatprep.subr.mxu0 %v18548_v1 }
0x1022   : > { %17202 = vmatpush3.msra.mxu0 %v15468_v2  ;;  %v19337_v3 = vpop.f32.mrf.mxu1 }
0x1023   : > { %17203 = vmatprep.subr.mxu0 %v18548_v1 }
0x1024   : > { %17204 = vmatpush3.msra.mxu0 %v15467_v14  ;;  %v17193_v5 = vpop.f32.mrf.mxu1 }
0x1025   : > { %17205 = vmatprep.subr.mxu0 %v18548_v1  ;;  %v4038_v5 = vadd.f32 %v15409_v0, %v19257_v22 }
0x1026   : > { %17206 = vmatpush3.msra.mxu0 %v15466_v4 }
0x1027   : > { %17208 = vmatmul.mubr.msk.f32.vlgmr.msra.gmra.mxu0 %vm1008_vm2, %v19176_v51  ;;  %17221 = vmatprep.subr.mxu0 %v18548_v1 }
0x1028   : > { %17222 = vmatpush3.msk.msra.mxu0 %vm1051_vm3, %v15485_v7  ;;  %17229 = vmatprep.mubr.msk.f32.mxu0 %vm18549_vm0, %v18548_v1 }
0x1029   : > { %17223 = vmatprep.subr.mxu0 %v18548_v1 }
0x102a   : > { %17224 = vmatpush3.msra.mxu0 %v15484_v63  ;;  %v4956_v10 = vpop.f32.mrf.mxu1 }
0x102b   : > { %v4957_v11 = vadd.f32 %v15479_v8, %v4956_v10  ;;  %17225 = vmatprep.subr.mxu0 %v18548_v1 }
0x102c   : > { %17226 = vmatpush3.msra.mxu0 %v15483_v9  ;;  %v17220_v15 = vpop.f32.mrf.mxu1 }
0x102d   : > { %17227 = vmatprep.subr.mxu0 %v18548_v1  ;;  %17233 = vmatpush3.xpose.msk.msra.mxu1 %vm1294_vm4, %v4957_v11 }
0x102e   : > { %17228 = vmatpush3.msra.mxu0 %v15482_v13  ;;  %17237 = vmatprep.subr.mxu1 %v18548_v1 }
0x102f   : > { %17230 = vmatmul.mubr.msk.f32.vlgmr.msra.gmra.mxu0 %vm1008_vm2, %v19176_v51  ;;  %17248 = vmatprep.subr.mxu0 %v18548_v1 }
0x1030   : > { %17249 = vmatpush3.msk.msra.mxu0 %vm1051_vm3, %v15503_v16  ;;  %17256 = vmatprep.mubr.msk.f32.mxu0 %vm18549_vm0, %v18548_v1 }
0x1031   : > { %17250 = vmatprep.subr.mxu0 %v18548_v1 }
0x1032   : > { %17251 = vmatpush3.msra.mxu0 %v15502_v17 }
0x1033   : > { %17252 = vmatprep.subr.mxu0 %v18548_v1 }
0x1034   : > { %17253 = vmatpush3.msra.mxu0 %v15501_v18  ;;  %v15521_v18 = vld [vmem:[%s18614_s24 + $0x30] sm:$0x3f] }
0x1035   : > { %17254 = vmatprep.subr.mxu0 %v18548_v1 }
0x1036   : > { %17255 = vmatpush3.msra.mxu0 %v15500_v19  ;;  %v15461_v19 = vld [vmem:[%s18609_s19 + $0x7] ss:$0 sm:$0xff] }
0x1037   : > { %17257 = vmatmul.mubr.msk.f32.vlgmr.msra.gmra.mxu0 %vm1008_vm2, %v19176_v51  ;;  %17270 = vmatprep.subr.mxu0 %v18548_v1 }
0x1038   : > { %17272 = vmatprep.mubr.msk.f32.mxu0 %vm18549_vm0, %v18548_v1 }
0x109d   : > { %v5462_v21 = vpop.xlane.xlu0 %5461 }
0x109e   : > { %v5473_v23 = vsub.f32 %v19322_v54, %v5462_v21  ;;  %v4708_v21 = vadd.f32 %v15461_v19, %v19337_v3 }
0x10a0   : > { %v5479_v24 = vmul.f32 1.442695, %v5473_v23 }
0x10a2   : > { %18361 = vpow2.f32 %v5479_v24 }
0x10af   : > { %v18362_v25 = vpop.eup %18361 }
0x10b0   : > { %v5490_v26 = vsel %vm2711_vm5, %v18362_v25, 0.0 }
0x10b1   : > { %5491 = vadd.xlane.f32.xlu1 %v5490_v26 }
0x10df   : > { %v19378_v12 = vpop.f32.mrf.mxu0 }
0x10e0   : > { %v5463_v28 = vsel %vm2711_vm5, %v19378_v12, -inf }
0x10e1   : > { %5464 = vmax.xlane.f32.xlu1 %v5463_v28  ;;  %v17198_v29 = vpop.f32.mrf.mxu0 }
0x10e7   : > { %v4869_v31 = vpop.f32.mrf.mxu0 }
0x10e8   : > { %v4870_v32 = vadd.f32 %v15471_v30, %v4869_v31  ;;  %v15519_v31 = vld [vmem:[%s18614_s24 + $0x28] sm:$0x3f] }
0x10e9   : > { %v17209_v35 = vpop.f32.mrf.mxu0 }
0x10ea   : > { %v4873_v36 = vmul.f32 0.4082483, %v4870_v32 }
0x10ec   : > { %17235 = vmatmul.mubr.msk.f32.vlgmr.msra.gmra.mxu1 %vm1294_vm4, %v4873_v36 }
0x10ed   : > { %17238 = vmatpush3.msk.msra.mxu1 %vm1051_vm3, %v15495_v37  ;;  %17245 = vmatprep.mubr.msk.f32.mxu1 %vm18549_vm0, %v18548_v1 }
0x10ee   : > { %17239 = vmatprep.subr.mxu1 %v18548_v1 }
0x10ef   : > { %17240 = vmatpush3.msra.mxu1 %v15494_v38  ;;  %v19391_v40 = vpop.f32.mrf.mxu0 }
0x10f0   : > { %17241 = vmatprep.subr.mxu1 %v18548_v1 }
0x10f1   : > { %17242 = vmatpush3.msra.mxu1 %v15493_v39  ;;  %v17231_v42 = vpop.f32.mrf.mxu0 }
0x10f2   : > { %17243 = vmatprep.subr.mxu1 %v18548_v1 }
0x10f3   : > { %17244 = vmatpush3.msra.mxu1 %v15492_v41 }
0x10f4   : > { %17246 = vmatmul.mubr.msk.f32.vlgmr.msra.gmra.mxu1 %vm1008_vm2, %v19176_v51  ;;  %17259 = vmatprep.subr.mxu1 %v18548_v1 }
0x10f5   : > { %17260 = vmatpush3.msk.msra.mxu1 %vm1051_vm3, %v15511_v43  ;;  %17267 = vmatprep.mubr.msk.f32.mxu1 %vm18549_vm0, %v18548_v1 }
0x10f6   : > { %17261 = vmatprep.subr.mxu1 %v18548_v1 }
0x10f7   : > { %17262 = vmatpush3.msra.mxu1 %v15510_v44  ;;  %v5291_v46 = vpop.f32.mrf.mxu0  ;;  %v15487_v44 = vld [vmem:[%s18609_s19 + $0x8] ss:$0 sm:$0xff] }
0x10f8   : > { %v5292_v48 = vadd.f32 %v15505_v20, %v5291_v46  ;;  %17263 = vmatprep.subr.mxu1 %v18548_v1 }
0x10f9   : > { %17264 = vmatpush3.msra.mxu1 %v15509_v45  ;;  %v17258_v50 = vpop.f32.mrf.mxu0 }
0x10fa   : > { %17265 = vmatprep.subr.mxu1 %v18548_v1  ;;  %17271 = vmatpush3.xpose.msk.msra.mxu0 %vm1294_vm4, %v5292_v48  ;;  %v5043_v48 = vadd.f32 %v15487_v44, %v19391_v40  ;;  %v15527_v40 = vld [vmem:[%s18614_s24 + $0x38] sm:$0x3f] }
0x10fb   : > { %17266 = vmatpush3.msra.mxu1 %v15508_v49  ;;  %17275 = vmatprep.subr.mxu0 %v18548_v1  ;;  %v15513_v49 = vld [vmem:[%s18609_s19 + $0x9] ss:$0 sm:$0xff] }
0x10fc   : > { %17268 = vmatmul.mubr.msk.f32.vlgmr.msra.gmra.mxu1 %vm1008_vm2, %v19176_v51  ;;  %17280 = vmatprep.subr.mxu1 %v18548_v1  ;;  %v5459_v51 = vpop.xlane.xlu0 %5458 }
0x10fd   : > { %17281 = vmatpush3.msra.mxu1 %v4373_v62  ;;  %17282 = vmatprep.mubr.msk.f32.mxu1 %vm18549_vm0, %v18548_v1  ;;  %v5472_v27 = vsub.f32 %v19274_v34, %v5459_v51 }
0x10fe   : > { %17290 = vmatprep.subr.mxu1 %v18548_v1 }
0x10ff   : > { %v5477_v55 = vmul.f32 1.442695, %v5472_v27 }
0x113a   : > { %v5492_v52 = vpop.xlane.xlu1 %5491 }
0x113b   : > { %18363 = vrcp.f32 %v5492_v52 }
0x113c   : > { %18365 = vpow2.f32 %v5477_v55  ;;  %v15531_v55 = vld [vmem:[%s18614_s24 + $0x40] sm:$0x3f] }
0x1148   : > { %v18364_v53 = vpop.eup %18363 }
0x1149   : > { %v5505_v54 = vmul.f32 %v18364_v53, %v18362_v25  ;;  %v18366_v6 = vpop.eup %18365 }
0x114a   : > { %v5487_v59 = vsel %vm2711_vm5, %v18366_v6, 0.0 }
0x114b   : > { %17283 = vmatmul.mubr.msk.f32.vlgmr.msra.gmra.mxu1 %vm2711_vm5, %v5505_v54 }
0x114c   : > { %17292 = vmatprep.mubr.msk.f32.mxu1 %vm18549_vm0, %v18548_v1  ;;  %17291 = vmatpush3.msk.msra.mxu1 %vm1051_vm3, %v15519_v31  ;;  %v15560_v31 = vld [vmem:[%s20845_s16 + $0xb8] sm:$0xff] }
0x114d   : > { %17300 = vmatprep.subr.mxu1 %v18548_v1 }
0x116a   : > { %v5465_v23 = vpop.xlane.xlu1 %5464 }
0x116b   : > { %v5474_v24 = vsub.f32 %v19378_v12, %v5465_v23  ;;  %v15545_v23 = vld [vmem:[%s18634_s20 + $0x28] sm:$0xff] }
0x116d   : > { %v5481_v25 = vmul.f32 1.442695, %v5474_v24  ;;  %v15544_v24 = vld [vmem:[%s18634_s20 + $0x20] sm:$0xff] }
0x11ac   : > { %v5118_v56 = vpop.f32.mrf.mxu1 }
0x11ad   : > { %v5466_v57 = vsel %vm2711_vm5, %v5118_v56, -inf }
0x11ae   : > { %5467 = vmax.xlane.f32.xlu0 %v5466_v57  ;;  %v17236_v58 = vpop.f32.mrf.mxu1 }
0x11b2   : > { %5488 = vadd.xlane.f32.xlu0 %v5487_v59 }
0x11b4   : > { %v5204_v61 = vpop.f32.mrf.mxu1 }
0x11b5   : > { %v5205_v2 = vadd.f32 %v15497_v60, %v5204_v61 }
0x11b6   : > { %v17247_v14 = vpop.f32.mrf.mxu1 }
0x11b7   : > { %v5208_v4 = vmul.f32 0.4082483, %v5205_v2 }
0x11b9   : > { %17273 = vmatmul.mubr.msk.f32.vlgmr.msra.gmra.mxu0 %vm1294_vm4, %v5208_v4 }
0x11ba   : > { %17276 = vmatpush3.msra.mxu0 %v4038_v5  ;;  %17277 = vmatprep.mubr.msk.f32.mxu0 %vm18549_vm0, %v18548_v1 }
0x11bb   : > { %17285 = vmatprep.subr.mxu0 %v18548_v1 }
0x11bc   : > { %v19433_v34 = vpop.f32.mrf.mxu1 }
0x11bd   : > { %v5378_v62 = vadd.f32 %v15513_v49, %v19433_v34  ;;  %v15552_v49 = vld [vmem:[%s20845_s16 + $0x78] sm:$0xff] }
0x11be   : > { %v17269_v7 = vpop.f32.mrf.mxu1 }
0x120b   : > { %v5656_v63 = vpop.f32.mrf.mxu1 }
0x120d   : > { %v17284_v8 = vpop.f32.mrf.mxu1 }
0x1237   : > { %v5468_v9 = vpop.xlane.xlu0 %5467 }
0x1238   : > { %v5475_v10 = vsub.f32 %v5118_v56, %v5468_v9  ;;  %v15539_v9 = vld [vmem:[%s18619_s30 + $0x1] ss:$0 sm:$0xff] }
0x123a   : > { %v5483_v11 = vmul.f32 1.442695, %v5475_v10 }
0x123b   : > { %v5489_v13 = vpop.xlane.xlu0 %5488 }
0x123c   : > { %18367 = vpow2.f32 %v5483_v11 }
0x123d   : > { %18369 = vrcp.f32 %v5489_v13 }
0x123e   : > { %18371 = vpow2.f32 %v5481_v25  ;;  %v15566_v25 = vld [vmem:[%s20845_s16 + $0xe8] sm:$0xff] }
0x1249   : > { %v18368_v22 = vpop.eup %18367 }
0x124a   : > { %v18370_v15 = vpop.eup %18369  ;;  %v5496_v16 = vsel %vm2711_vm5, %v18368_v22, 0.0 }
0x124b   : > { %5497 = vadd.xlane.f32.xlu0 %v5496_v16  ;;  %v5503_v17 = vmul.f32 %v18370_v15, %v18366_v6  ;;  %v18372_v29 = vpop.eup %18371  ;;  %v15535_v6 = vld [vmem:[%s18614_s24 + $0x48] sm:$0x3f] }
0x124c   : > { %v5493_v30 = vsel %vm2711_vm5, %v18372_v29, 0.0 }
0x124d   : > { %17278 = vmatmul.mubr.msk.f32.vlgmr.msra.gmra.mxu0 %vm2711_vm5, %v5503_v17 }
0x124e   : > { %17286 = vmatpush3.msk.msra.mxu0 %vm1051_vm3, %v15521_v18  ;;  %17287 = vmatprep.mubr.msk.f32.mxu0 %vm18549_vm0, %v18548_v1 }
0x124f   : > { %17295 = vmatprep.subr.mxu0 %v18548_v1 }
0x1251   : > { %17288 = vmatmul.mubr.msk.f32.vlgmr.msra.gmra.mxu0 %vm1294_vm4, %v5656_v63 }
0x1252   : > { %17296 = vmatpush3.msra.mxu0 %v4708_v21  ;;  %17297 = vmatprep.mubr.msk.f32.mxu0 %vm18549_vm0, %v18548_v1  ;;  %v15547_v21 = vld [vmem:[%s18634_s20 + $0x38] sm:$0x3f] }
0x1253   : > { %17305 = vmatprep.subr.mxu0 %v18548_v1 }
0x1279   : > { %v5453_v26 = vpop.f32.mrf.mxu0 }
0x127a   : > { %v5469_v28 = vsel %vm2711_vm5, %v5453_v26, -inf }
0x127b   : > { %5470 = vmax.xlane.f32.xlu1 %v5469_v28  ;;  %v17274_v3 = vpop.f32.mrf.mxu0  ;;  %v15564_v28 = vld [vmem:[%s20845_s16 + $0xd8] sm:$0xff] }
0x127c   : > { %v15562_v3 = vld [vmem:[%s20845_s16 + $0xc8] sm:$0xff] }
0x127f   : > { %5494 = vadd.xlane.f32.xlu1 %v5493_v30  ;;  %v15561_v30 = vld [vmem:[%s20845_s16 + $0xc0] sm:$0xff] }
0x12d4   : > { %v5498_v37 = vpop.xlane.xlu0 %5497 }
0x1304   : > { %v5471_v32 = vpop.xlane.xlu1 %5470 }
0x1305   : > { %v5476_v35 = vsub.f32 %v5453_v26, %v5471_v32  ;;  %v15565_v26 = vld [vmem:[%s20845_s16 + $0xe0] sm:$0xff]  ;;  %v15559_v32 = vld [vmem:[%s20845_s16 + $0xb0] sm:$0xff] }
0x1307   : > { %v5485_v12 = vmul.f32 1.442695, %v5476_v35  ;;  %v15558_v35 = vld [vmem:[%s20845_s16 + $0xa8] sm:$0xff] }
0x1308   : > { %v5495_v36 = vpop.xlane.xlu1 %5494 }
0x1309   : > { %18373 = vpow2.f32 %v5485_v12  ;;  %v15557_v12 = vld [vmem:[%s20845_s16 + $0xa0] sm:$0xff] }
0x130a   : > { %18375 = vrcp.f32 %v5495_v36  ;;  %v15556_v36 = vld [vmem:[%s20845_s16 + $0x98] sm:$0xff] }
0x130b   : > { %18377 = vrcp.f32 %v5498_v37  ;;  %v15555_v37 = vld [vmem:[%s20845_s16 + $0x90] sm:$0xff] }
0x130d   : > { %v5581_v38 = vpop.f32.mrf.mxu0 }
0x130e   : > { %17293 = vmatmul.mubr.msk.f32.vlgmr.msra.gmra.mxu1 %vm1294_vm4, %v5581_v38 }
0x130f   : > { %v17279_v39 = vpop.f32.mrf.mxu0  ;;  %17302 = vmatprep.mubr.msk.f32.mxu1 %vm18549_vm0, %v18548_v1  ;;  %17301 = vmatpush3.msk.msra.mxu1 %vm1051_vm3, %v15527_v40 }
0x1310   : > { %17310 = vmatprep.subr.mxu1 %v18548_v1 }
0x1311   : > { %v5734_v41 = vpop.f32.mrf.mxu0 }
0x1313   : > { %v17289_v42 = vpop.f32.mrf.mxu0 }
0x1316   : > { %v18374_v43 = vpop.eup %18373 }
0x1317   : > { %v18376_v20 = vpop.eup %18375  ;;  %v5499_v45 = vsel %vm2711_vm5, %v18374_v43, 0.0 }
0x1318   : > { %5500 = vadd.xlane.f32.xlu1 %v5499_v45  ;;  %v5507_v46 = vmul.f32 %v18376_v20, %v18372_v29  ;;  %v18378_v47 = vpop.eup %18377  ;;  %v15563_v29 = vld [vmem:[%s20845_s16 + $0xd0] sm:$0xff]  ;;  %v15543_v20 = vld [vmem:[%s20847_s23 + $0x1] ss:$0 sm:$0xff] }
0x1319   : > { %v5509_v50 = vmul.f32 %v18378_v47, %v18368_v22  ;;  %v15554_v47 = vld [vmem:[%s20845_s16 + $0x88] sm:$0xff] }
0x131a   : > { %17298 = vmatmul.mubr.msk.f32.vlgmr.msra.gmra.mxu0 %vm2711_vm5, %v5507_v46 }
0x131b   : > { %17306 = vmatpush3.msra.mxu0 %v5043_v48  ;;  %17307 = vmatprep.mubr.msk.f32.mxu0 %vm18549_vm0, %v18548_v1  ;;  %v15553_v48 = vld [vmem:[%s20845_s16 + $0x80] sm:$0xff] }
0x131c   : > { %17315 = vmatprep.subr.mxu0 %v18548_v1 }
0x131e   : > { %17308 = vmatmul.mubr.msk.f32.vlgmr.msra.gmra.mxu0 %vm2711_vm5, %v5509_v50  ;;  %v15549_v50 = vld [vmem:[%s20848_s5 + $0x1] ss:$0 sm:$0xff] }
0x131f   : > { %17316 = vmatpush3.msra.mxu0 %v5378_v62  ;;  %17317 = vmatprep.mubr.msk.f32.mxu0 %vm18549_vm0, %v18548_v1 }
0x1320   : > { %17325 = vmatprep.subr.mxu0 %v18548_v1 }
0x13a1   : > { %v5501_v52 = vpop.xlane.xlu1 %5500 }
0x13a2   : > { %18379 = vrcp.f32 %v5501_v52 }
0x13af   : > { %v18380_v53 = vpop.eup %18379 }
0x13b0   : > { %v5511_v54 = vmul.f32 %v18380_v53, %v18374_v43  ;;  %v15542_v43 = vld [vmem:[%s20846_s22 + $0x1] ss:$0 sm:$0xff] }
0x13b2   : > { %17318 = vmatmul.mubr.msk.f32.vlgmr.msra.gmra.mxu0 %vm2711_vm5, %v5511_v54 }
0x13b3   : > { %17333 = vmatprep.mubr.msk.f32.mxu0 %vm18549_vm0, %v18548_v1  ;;  %17326 = vmatpush3.msk.msra.mxu0 %vm1051_vm3, %v15547_v21  ;;  %v15584_v21 = vld [vmem:[%s18589_s29 + $0x150] sm:$0xff] }
0x13b4   : > { %17327 = vmatprep.subr.mxu0 %v18548_v1 }
0x13ce   : > { %v5810_v51 = vpop.f32.mrf.mxu1 }
0x13cf   : > { %v5811_v0 = vadd.f32 %v5810_v51, %v5734_v41  ;;  %v15569_v51 = vld [vmem:[%s20849_s9 + $0x1] ss:$0 sm:$0xff] }
0x13d0   : > { %v17294_v27 = vpop.f32.mrf.mxu1 }
0x13da   : > { %v5883_v56 = vpop.f32.mrf.mxu0 }
0x13db   : > { %17303 = vmatmul.mubr.msk.f32.vlgmr.msra.gmra.mxu1 %vm1294_vm4, %v5883_v56 }
0x13dc   : > { %v17299_v57 = vpop.f32.mrf.mxu0  ;;  %17311 = vmatpush3.msk.msra.mxu1 %vm1051_vm3, %v15531_v55  ;;  %17312 = vmatprep.mubr.msk.f32.mxu1 %vm18549_vm0, %v18548_v1 }
0x13dd   : > { %17320 = vmatprep.subr.mxu1 %v18548_v1 }
0x13de   : > { %v6035_v58 = vpop.f32.mrf.mxu0 }
0x13df   : > { %17313 = vmatmul.mubr.msk.f32.vlgmr.msra.gmra.mxu1 %vm1294_vm4, %v6035_v58 }
0x13e0   : > { %v17309_v59 = vpop.f32.mrf.mxu0  ;;  %17321 = vmatpush3.msk.msra.mxu1 %vm1051_vm3, %v15535_v6  ;;  %17322 = vmatprep.mubr.msk.f32.mxu1 %vm18549_vm0, %v18548_v1 }
0x13e1   : > { %17336 = vmatprep.subr.mxu1 %v18548_v1 }
0x1472   : > { %v6187_v60 = vpop.f32.mrf.mxu0 }
0x1473   : > { %17323 = vmatmul.mubr.msk.f32.vlgmr.msra.gmra.mxu1 %vm1294_vm4, %v6187_v60 }
0x1474   : > { %v17319_v61 = vpop.f32.mrf.mxu0  ;;  %17366 = vmatprep.mubr.msk.f32.mxu1 %vm18549_vm0, %v18548_v1  ;;  %17337 = vmatpush3.msra.mxu1 %v15566_v25  ;;  %v15582_v25 = vld [vmem:[%s18589_s29 + $0x140] sm:$0xff] }
0x1475   : > { %17338 = vmatprep.subr.mxu1 %v18548_v1 }
0x1476   : > { %17339 = vmatpush3.msra.mxu1 %v15565_v26  ;;  %v15616_v26 = vld [vmem:[%s20840_s3 + $0x160] sm:$0xff] }
0x1477   : > { %17340 = vmatprep.subr.mxu1 %v18548_v1 }
0x1478   : > { %17341 = vmatpush3.msra.mxu1 %v15564_v28  ;;  %v15593_v28 = vld [vmem:[%s20840_s3 + $0x158] sm:$0x3f] }
0x1479   : > { %17342 = vmatprep.subr.mxu1 %v18548_v1 }
0x147a   : > { %17343 = vmatpush3.msra.mxu1 %v15563_v29  ;;  %v15637_v29 = vld [vmem:[%s18589_s29 + $0x198] sm:$0x3f] }
0x147b   : > { %17344 = vmatprep.subr.mxu1 %v18548_v1 }
0x147c   : > { %17345 = vmatpush3.msra.mxu1 %v15562_v3  ;;  %v15592_v3 = vld [vmem:[%s20840_s3 + $0x150] sm:$0xff] }
0x147d   : > { %17346 = vmatprep.subr.mxu1 %v18548_v1 }
0x147e   : > { %17347 = vmatpush3.msra.mxu1 %v15561_v30  ;;  %v15636_v30 = vld [vmem:[%s18589_s29 + $0x190] sm:$0xff] }
0x147f   : > { %17348 = vmatprep.subr.mxu1 %v18548_v1 }
0x1480   : > { %17349 = vmatpush3.msra.mxu1 %v15560_v31  ;;  %v15591_v31 = vld [vmem:[%s20840_s3 + $0x148] sm:$0xff] }
0x1481   : > { %17350 = vmatprep.subr.mxu1 %v18548_v1 }
0x1482   : > { %17351 = vmatpush3.msra.mxu1 %v15559_v32  ;;  %v15635_v32 = vld [vmem:[%s18589_s29 + $0x188] sm:$0xff] }
0x1483   : > { %17352 = vmatprep.subr.mxu1 %v18548_v1 }
0x1484   : > { %17353 = vmatpush3.msra.mxu1 %v15558_v35  ;;  %v15590_v35 = vld [vmem:[%s20840_s3 + $0x140] sm:$0xff] }
0x1485   : > { %17354 = vmatprep.subr.mxu1 %v18548_v1 }
0x1486   : > { %17355 = vmatpush3.msra.mxu1 %v15557_v12  ;;  %v15634_v12 = vld [vmem:[%s18589_s29 + $0x180] sm:$0xff] }
0x1487   : > { %17356 = vmatprep.subr.mxu1 %v18548_v1 }
0x1488   : > { %17357 = vmatpush3.msra.mxu1 %v15556_v36 }
0x1489   : > { %17358 = vmatprep.subr.mxu1 %v18548_v1 }
0x148a   : > { %17359 = vmatpush3.msra.mxu1 %v15555_v37 }
0x148b   : > { %17360 = vmatprep.subr.mxu1 %v18548_v1 }
0x148c   : > { %17361 = vmatpush3.msra.mxu1 %v15554_v47 }
0x148d   : > { %17362 = vmatprep.subr.mxu1 %v18548_v1 }
0x148e   : > { %17363 = vmatpush3.msra.mxu1 %v15553_v48 }
0x148f   : > { %17364 = vmatprep.subr.mxu1 %v18548_v1 }
0x1490   : > { %17365 = vmatpush3.msra.mxu1 %v15552_v49  ;;  %v15611_v49 = vld [vmem:[%s18589_s29 + $0x178] sm:$0x3f] }
0x1491   : > { %17407 = vmatprep.subr.mxu1 %v18548_v1 }
0x149b   : > { %v5961_v2 = vpop.f32.mrf.mxu1 }
0x149c   : > { %v5965_v14 = vadd.f32 %v5961_v2, %v5811_v0  ;;  %v15577_v0 = vld [vmem:[%s18584_s25 + $0x158] sm:$0x3f] }
0x149d   : > { %v17304_v4 = vpop.f32.mrf.mxu1  ;;  %v15603_v2 = vld [vmem:[%s18584_s25 + $0x178] sm:$0x3f] }
0x149e   : > { %v15602_v4 = vld [vmem:[%s18584_s25 + $0x170] sm:$0xff] }
0x149f   : > { %v6113_v5 = vpop.f32.mrf.mxu1 }
0x14a0   : > { %v6117_v34 = vadd.f32 %v6113_v5, %v5965_v14  ;;  %v15576_v14 = vld [vmem:[%s18584_s25 + $0x150] sm:$0xff]  ;;  %v15575_v5 = vld [vmem:[%s18584_s25 + $0x148] sm:$0xff] }
0x14a1   : > { %v17314_v7 = vpop.f32.mrf.mxu1 }
0x14a2   : > { %v15574_v7 = vld [vmem:[%s18584_s25 + $0x140] sm:$0xff] }
0x1533   : > { %v6265_v63 = vpop.f32.mrf.mxu1 }
0x1534   : > { %v6269_v8 = vadd.f32 %v6265_v63, %v6117_v34  ;;  %v15601_v34 = vld [vmem:[%s18584_s25 + $0x168] sm:$0xff]  ;;  %v15600_v63 = vld [vmem:[%s18584_s25 + $0x160] sm:$0xff] }
0x1535   : > { %v17324_v10 = vpop.f32.mrf.mxu1 }
0x1536   : > { %v6270_v11 = vadd.f32 %v6269_v8, %v19159_v33  ;;  %v15546_v33 = vld [vmem:[%s18634_s20 + $0x30] sm:$0xff] }
0x1537   : > { %17328 = vmatpush3.msra.mxu0 %v15546_v33  ;;  %v15618_v33 = vld [vmem:[%s20840_s3 + $0x170] sm:$0xff] }
0x1538   : > { %v19493_v13 = vadd.f32 %v15539_v9, %v6270_v11  ;;  %17329 = vmatprep.subr.mxu0 %v18548_v1 }
0x1539   : > { %17330 = vmatpush3.msra.mxu0 %v15545_v23  ;;  %v15583_v23 = vld [vmem:[%s18589_s29 + $0x148] sm:$0xff] }
0x153a   : > { %v6284_v22 = vsel %vm1008_vm2, %v19493_v13, 0.0  ;;  %17331 = vmatprep.subr.mxu0 %v18548_v1 }
0x153b   : > { %6285 = vadd.xlane.f32.xlu0 %v6284_v22  ;;  %17332 = vmatpush3.msra.mxu0 %v15544_v24  ;;  %v15617_v24 = vld [vmem:[%s20840_s3 + $0x168] sm:$0xff] }
0x153c   : > { %17369 = vmatprep.subr.mxu0 %v18548_v1 }
0x15c4   : > { %v6286_v15 = vpop.xlane.xlu0 %6285 }
0x15c5   : > { %v6287_v16 = vmul.f32 0.033333335, %v6286_v15  ;;  %v15573_v15 = vld [vmem:[%s18579_s21 + $0x2] ss:$0 sm:$0xff] }
0x15c7   : > { %v6288_v17 = vsub.f32 %v19493_v13, %v6287_v16 }
0x15c9   : > { %v6289_v18 = vmul.f32 %v6288_v17, %v6288_v17 }
0x15cb   : > { %v6290_v19 = vsel %vm1008_vm2, %v6289_v18, 0.0  ;;  %v15585_v18 = vld [vmem:[%s18589_s29 + $0x158] sm:$0x3f] }
0x15cc   : > { %6291 = vadd.xlane.f32.xlu1 %v6290_v19  ;;  %v15619_v19 = vld [vmem:[%s20840_s3 + $0x178] sm:$0x3f] }
0x1655   : > { %v6292_v38 = vpop.xlane.xlu1 %6291 }
0x1656   : > { %v6293_v39 = vmul.f32 0.033333335, %v6292_v38 }
0x1658   : > { %v6294_v41 = vadd.f32 1e-05, %v6293_v39 }
0x165a   : > { %18381 = vrsqrt.f32 %v6294_v41  ;;  %v15579_v41 = vld [vmem:[%s20839_s8 + $0xa] ss:$0 sm:$0xff] }
0x1667   : > { %v18382_v42 = vpop.eup %18381 }
0x1668   : > { %v6296_v44 = vmul.f32 %v18382_v42, %v6288_v17  ;;  %v15587_v42 = vld [vmem:[%s20836_s14 + $0xa] ss:$0 sm:$0xff] }
0x166a   : > { %v6303_v45 = vmul.f32 %v15542_v43, %v6296_v44 }
0x166c   : > { %v6310_v46 = vadd.f32 %v15543_v20, %v6303_v45 }
0x166e   : > { %17334 = vmatmul.mubr.msk.f32.vlgmr.msra.gmra.mxu0 %vm1008_vm2, %v6310_v46 }
0x166f   : > { %17377 = vmatprep.mubr.msk.f32.mxu0 %vm18549_vm0, %v18548_v1  ;;  %17370 = vmatpush3.msk.msra.mxu0 %vm1051_vm3, %v15577_v0 }
0x1670   : > { %17371 = vmatprep.subr.mxu0 %v18548_v1 }
0x1671   : > { %17372 = vmatpush3.msra.mxu0 %v15576_v14 }
0x1672   : > { %17373 = vmatprep.subr.mxu0 %v18548_v1 }
0x1673   : > { %17374 = vmatpush3.msra.mxu0 %v15575_v5  ;;  %v15628_v5 = vld [vmem:[%s18584_s25 + $0x190] sm:$0xff] }
0x1674   : > { %17375 = vmatprep.subr.mxu0 %v18548_v1 }
0x1675   : > { %17376 = vmatpush3.msra.mxu0 %v15574_v7  ;;  %v15626_v7 = vld [vmem:[%s18584_s25 + $0x180] sm:$0xff] }
0x1676   : > { %17380 = vmatprep.subr.mxu0 %v18548_v1 }
0x172e   : > { %v6396_v62 = vpop.f32.mrf.mxu0 }
0x172f   : > { %v6397_v40 = vadd.f32 %v15549_v50, %v6396_v62  ;;  %v15610_v50 = vld [vmem:[%s18589_s29 + $0x170] sm:$0xff]  ;;  %v15639_v62 = vld [vmem:[%s20836_s14 + $0xc] ss:$0 sm:$0xff] }
0x1730   : > { %v17335_v52 = vpop.f32.mrf.mxu0 }
0x1731   : > { %v6400_v53 = vmax.f32 %v6397_v40, 0.0  ;;  %v15609_v40 = vld [vmem:[%s18589_s29 + $0x168] sm:$0xff] }
0x1733   : > { %17367 = vmatmul.mubr.msk.f32.vlgmr.msra.gmra.mxu1 %vm3665_vm6, %v6400_v53 }
0x1734   : > { %17415 = vmatprep.mubr.msk.f32.mxu1 %vm18549_vm0, %v18548_v1  ;;  %17408 = vmatpush3.msk.msra.mxu1 %vm1051_vm3, %v15603_v2 }
0x1735   : > { %17409 = vmatprep.subr.mxu1 %v18548_v1 }
0x1736   : > { %17410 = vmatpush3.msra.mxu1 %v15602_v4  ;;  %v15629_v4 = vld [vmem:[%s18584_s25 + $0x198] sm:$0x3f] }
0x1737   : > { %17411 = vmatprep.subr.mxu1 %v18548_v1 }
0x1738   : > { %17412 = vmatpush3.msra.mxu1 %v15601_v34  ;;  %v15627_v34 = vld [vmem:[%s18584_s25 + $0x188] sm:$0xff] }
0x1739   : > { %17413 = vmatprep.subr.mxu1 %v18548_v1 }
0x173a   : > { %17414 = vmatpush3.msra.mxu1 %v15600_v63  ;;  %v15645_v63 = vld [vmem:[%s20840_s3 + $0x198] sm:$0x3f] }
0x173b   : > { %17429 = vmatprep.subr.mxu1 %v18548_v1 }
0x17f3   : > { %v6486_v54 = vpop.f32.mrf.mxu1 }
0x17f4   : > { %v6490_v27 = vadd.f32 %v6486_v54, %v19493_v13  ;;  %v15572_v13 = vld [vmem:[%s18574_s17 + $0x2] ss:$0 sm:$0xff] }
0x17f5   : > { %v17368_v55 = vpop.f32.mrf.mxu1  ;;  %v15608_v54 = vld [vmem:[%s18589_s29 + $0x160] sm:$0xff] }
0x17f6   : > { %v19549_v56 = vadd.f32 %v15569_v51, %v6490_v27 }
0x17f8   : > { %v6504_v57 = vsel %vm1008_vm2, %v19549_v56, 0.0 }
0x17f9   : > { %6505 = vadd.xlane.f32.xlu0 %v6504_v57 }
0x1882   : > { %v6506_v6 = vpop.xlane.xlu0 %6505 }
0x1883   : > { %v6507_v58 = vmul.f32 0.033333335, %v6506_v6 }
0x1885   : > { %v6508_v59 = vsub.f32 %v19549_v56, %v6507_v58  ;;  %v15605_v58 = vld [vmem:[%s20839_s8 + $0xb] ss:$0 sm:$0xff] }
0x1887   : > { %v6509_v60 = vmul.f32 %v6508_v59, %v6508_v59 }
0x1889   : > { %v6510_v61 = vsel %vm1008_vm2, %v6509_v60, 0.0 }
0x188a   : > { %6511 = vadd.xlane.f32.xlu1 %v6510_v61 }
0x1913   : > { %v6512_v8 = vpop.xlane.xlu1 %6511 }
0x1914   : > { %v6513_v9 = vmul.f32 0.033333335, %v6512_v8  ;;  %v15644_v8 = vld [vmem:[%s20840_s3 + $0x190] sm:$0xff] }
0x1916   : > { %v6514_v10 = vadd.f32 1e-05, %v6513_v9  ;;  %v15643_v9 = vld [vmem:[%s20840_s3 + $0x188] sm:$0xff] }
0x1918   : > { %18383 = vrsqrt.f32 %v6514_v10  ;;  %v15642_v10 = vld [vmem:[%s20840_s3 + $0x180] sm:$0xff] }
0x1925   : > { %v18384_v11 = vpop.eup %18383 }
0x1926   : > { %v6516_v22 = vmul.f32 %v18384_v11, %v6508_v59  ;;  %v15613_v59 = vld [vmem:[%s20836_s14 + $0xb] ss:$0 sm:$0xff]  ;;  %v15663_v11 = vld [vmem:[%s18589_s29 + $0x1b8] sm:$0x3f] }
0x1928   : > { %v6523_v16 = vmul.f32 %v15572_v13, %v6516_v22  ;;  %v15662_v13 = vld [vmem:[%s18589_s29 + $0x1b0] sm:$0xff]  ;;  %v15661_v22 = vld [vmem:[%s18589_s29 + $0x1a8] sm:$0xff] }
0x192a   : > { %v19575_v17 = vadd.f32 %v15573_v15, %v6523_v16  ;;  %v15660_v15 = vld [vmem:[%s18589_s29 + $0x1a0] sm:$0xff] }
0x192c   : > { %17378 = vmatmul.mubr.msk.f32.vlgmr.msra.gmra.mxu0 %vm1008_vm2, %v19575_v17  ;;  %17416 = vmatmul.mubr.msk.f32.vlgmr.msra.gmra.mxu1 %vm1008_vm2, %v19575_v17 }
0x192d   : > { %17381 = vmatpush3.msk.msra.mxu0 %vm1051_vm3, %v15585_v18  ;;  %17430 = vmatpush3.msk.msra.mxu1 %vm1051_vm3, %v15619_v19 }
0x192e   : > { %17382 = vmatprep.subr.mxu0 %v18548_v1  ;;  %17431 = vmatprep.subr.mxu1 %v18548_v1 }
0x192f   : > { %17383 = vmatpush3.msra.mxu0 %v15584_v21  ;;  %17432 = vmatpush3.msra.mxu1 %v15618_v33  ;;  %v15631_v33 = vld [vmem:[%s20839_s8 + $0xc] ss:$0 sm:$0xff] }
0x1930   : > { %17384 = vmatprep.subr.mxu0 %v18548_v1  ;;  %17433 = vmatprep.subr.mxu1 %v18548_v1 }
0x1931   : > { %17385 = vmatpush3.msra.mxu0 %v15583_v23  ;;  %17434 = vmatpush3.msra.mxu1 %v15617_v24 }
0x1932   : > { %17386 = vmatprep.subr.mxu0 %v18548_v1  ;;  %17435 = vmatprep.subr.mxu1 %v18548_v1 }
0x1933   : > { %17387 = vmatpush3.msra.mxu0 %v15582_v25  ;;  %17388 = vmatprep.mubr.msk.f32.mxu0 %vm18549_vm0, %v18548_v1 }
0x1934   : > { %17436 = vmatpush3.msra.mxu1 %v15616_v26  ;;  %17437 = vmatprep.mubr.msk.f32.mxu1 %vm18549_vm0, %v18548_v1 }
0x1935   : > { %17389 = vmatmul.mubr.msk.f32.vlgmr.msra.gmra.mxu0 %vm1008_vm2, %v19575_v17  ;;  %17391 = vmatprep.subr.mxu0 %v18548_v1 }
0x1936   : > { %17438 = vmatmul.mubr.msk.f32.vlgmr.msra.gmra.mxu1 %vm1008_vm2, %v19575_v17  ;;  %17456 = vmatprep.subr.mxu1 %v18548_v1 }
0x1937   : > { %17392 = vmatpush3.msk.msra.mxu0 %vm1051_vm3, %v15593_v28  ;;  %17457 = vmatpush3.msk.msra.mxu1 %vm1051_vm3, %v15637_v29  ;;  %v15655_v28 = vld [vmem:[%s18584_s25 + $0x1b8] sm:$0x3f]  ;;  %v15654_v29 = vld [vmem:[%s18584_s25 + $0x1b0] sm:$0xff] }
0x1938   : > { %17393 = vmatprep.subr.mxu0 %v18548_v1  ;;  %17458 = vmatprep.subr.mxu1 %v18548_v1 }
0x1939   : > { %17394 = vmatpush3.msra.mxu0 %v15592_v3  ;;  %17459 = vmatpush3.msra.mxu1 %v15636_v30  ;;  %v15653_v3 = vld [vmem:[%s18584_s25 + $0x1a8] sm:$0xff] }
0x193a   : > { %17395 = vmatprep.subr.mxu0 %v18548_v1  ;;  %17460 = vmatprep.subr.mxu1 %v18548_v1 }
0x193b   : > { %17396 = vmatpush3.msra.mxu0 %v15591_v31  ;;  %17461 = vmatpush3.msra.mxu1 %v15635_v32  ;;  %v15652_v31 = vld [vmem:[%s18584_s25 + $0x1a0] sm:$0xff] }
0x193c   : > { %17397 = vmatprep.subr.mxu0 %v18548_v1  ;;  %17462 = vmatprep.subr.mxu1 %v18548_v1 }
0x193d   : > { %17398 = vmatpush3.msra.mxu0 %v15590_v35  ;;  %17399 = vmatprep.mubr.msk.f32.mxu0 %vm18549_vm0, %v18548_v1  ;;  %v15671_v35 = vld [vmem:[%s20840_s3 + $0x1b8] sm:$0x3f] }
0x193e   : > { %17463 = vmatpush3.msra.mxu1 %v15634_v12  ;;  %17464 = vmatprep.mubr.msk.f32.mxu1 %vm18549_vm0, %v18548_v1  ;;  %v15670_v12 = vld [vmem:[%s20840_s3 + $0x1b0] sm:$0xff] }
0x193f   : > { %17400 = vmatmul.mubr.msk.f32.vlgmr.msra.gmra.mxu0 %vm1008_vm2, %v19575_v17  ;;  %17465 = vmatmul.mubr.msk.f32.vlgmr.msra.gmra.mxu1 %vm1008_vm2, %v19575_v17 }
0x1940   : > { %17402 = vmatprep.subr.mxu0 %v18548_v1  ;;  %17404 = vmatprep.mubr.msk.f32.mxu0 %vm18549_vm0, %v18548_v1 }
0x1941   : > { %17478 = vmatprep.subr.mxu1 %v18548_v1  ;;  %17480 = vmatprep.mubr.msk.f32.mxu1 %vm18549_vm0, %v18548_v1 }
0x19ec   : > { %v6616_v36 = vpop.f32.mrf.mxu0  ;;  %v6951_v37 = vpop.f32.mrf.mxu1 }
0x19ed   : > { %v6617_v43 = vadd.f32 %v15579_v41, %v6616_v36  ;;  %v6952_v60 = vadd.f32 %v15605_v58, %v6951_v37  ;;  %v15665_v36 = vld [vmem:[%s20836_s14 + $0xd] ss:$0 sm:$0xff]  ;;  %v15668_v41 = vld [vmem:[%s20840_s3 + $0x1a0] sm:$0xff] }
0x19ee   : > { %v17379_v38 = vpop.f32.mrf.mxu0  ;;  %v17417_v39 = vpop.f32.mrf.mxu1  ;;  %v15669_v37 = vld [vmem:[%s20840_s3 + $0x1a8] sm:$0xff] }
0x19ef   : > { %v6620_v48 = vmul.f32 0.4082483, %v6617_v43  ;;  %v6955_v14 = vmul.f32 0.4082483, %v6952_v60  ;;  %v15689_v43 = vld [vmem:[%s18589_s29 + $0x1d8] sm:$0x3f] }
0x19f0   : > { %v15680_v60 = vld [vmem:[%s18584_s25 + $0x1d0] sm:$0xff] }
0x19f5   : > { %v6703_v44 = vpop.f32.mrf.mxu0 }
0x19f6   : > { %v6704_v20 = vadd.f32 %v15587_v42, %v6703_v44  ;;  %v19639_v45 = vpop.f32.mrf.mxu1  ;;  %v15688_v44 = vld [vmem:[%s18589_s29 + $0x1d0] sm:$0xff] }
0x19f7   : > { %v17390_v46 = vpop.f32.mrf.mxu0 }
0x19f8   : > { %v17439_v47 = vpop.f32.mrf.mxu1  ;;  %17403 = vmatpush3.xpose.msk.msra.mxu0 %vm1294_vm4, %v6704_v20  ;;  %v15687_v20 = vld [vmem:[%s18589_s29 + $0x1c8] sm:$0xff]  ;;  %v15686_v46 = vld [vmem:[%s18589_s29 + $0x1c0] sm:$0xff] }
0x19f9   : > { %17418 = vmatprep.subr.mxu0 %v18548_v1 }
0x19fb   : > { %17405 = vmatmul.mubr.msk.f32.vlgmr.msra.gmra.mxu0 %vm1294_vm4, %v6620_v48 }
0x19fc   : > { %17419 = vmatpush3.msk.msra.mxu0 %vm1051_vm3, %v15611_v49  ;;  %17426 = vmatprep.mubr.msk.f32.mxu0 %vm18549_vm0, %v18548_v1 }
0x19fd   : > { %17420 = vmatprep.subr.mxu0 %v18548_v1 }
0x19fe   : > { %17421 = vmatpush3.msra.mxu0 %v15610_v50 }
0x19ff   : > { %v19652_v52 = vpop.f32.mrf.mxu0  ;;  %v7373_v53 = vpop.f32.mrf.mxu1  ;;  %17422 = vmatprep.subr.mxu0 %v18548_v1 }
0x1a00   : > { %v7374_v51 = vadd.f32 %v15639_v62, %v7373_v53  ;;  %17423 = vmatpush3.msra.mxu0 %v15609_v40 }
0x1a01   : > { %v17401_v27 = vpop.f32.mrf.mxu0  ;;  %v17466_v55 = vpop.f32.mrf.mxu1  ;;  %17424 = vmatprep.subr.mxu0 %v18548_v1 }
0x1a02   : > { %17479 = vmatpush3.xpose.msk.msra.mxu1 %vm1294_vm4, %v7374_v51  ;;  %17425 = vmatpush3.msra.mxu0 %v15608_v54  ;;  %v15657_v51 = vld [vmem:[%s20839_s8 + $0xd] ss:$0 sm:$0xff] }
0x1a03   : > { %17427 = vmatmul.mubr.msk.f32.vlgmr.msra.gmra.mxu0 %vm1008_vm2, %v19575_v17  ;;  %17440 = vmatprep.subr.mxu0 %v18548_v1 }
0x1a04   : > { %17442 = vmatprep.mubr.msk.f32.mxu0 %vm18549_vm0, %v18548_v1  ;;  %17483 = vmatprep.subr.mxu1 %v18548_v1 }
0x1abb   : > { %v19664_v57 = vpop.f32.mrf.mxu0 }
0x1abc   : > { %v8209_v21 = vsel %vm2711_vm5, %v19664_v57, -inf }
0x1abd   : > { %v17406_v6 = vpop.f32.mrf.mxu0 }
0x1ac3   : > { %v7038_v61 = vpop.f32.mrf.mxu0 }
0x1ac4   : > { %v7039_v0 = vadd.f32 %v15613_v59, %v7038_v61  ;;  %v15681_v59 = vld [vmem:[%s18584_s25 + $0x1d8] sm:$0x3f]  ;;  %v15679_v61 = vld [vmem:[%s18584_s25 + $0x1c8] sm:$0xff] }
0x1ac5   : > { %v17428_v2 = vpop.f32.mrf.mxu0 }
0x1ac6   : > { %17441 = vmatpush3.xpose.msk.msra.mxu0 %vm1294_vm4, %v7039_v0  ;;  %v15678_v2 = vld [vmem:[%s18584_s25 + $0x1c0] sm:$0xff] }
0x1ac7   : > { %17445 = vmatprep.subr.mxu0 %v18548_v1 }
0x1ac9   : > { %17443 = vmatmul.mubr.msk.f32.vlgmr.msra.gmra.mxu0 %vm1294_vm4, %v6955_v14 }
0x1aca   : > { %17446 = vmatpush3.msk.msra.mxu0 %vm1051_vm3, %v15629_v4  ;;  %17453 = vmatprep.mubr.msk.f32.mxu0 %vm18549_vm0, %v18548_v1  ;;  %v15697_v4 = vld [vmem:[%s20840_s3 + $0x1d8] sm:$0x3f] }
0x1acb   : > { %17447 = vmatprep.subr.mxu0 %v18548_v1 }
0x1acc   : > { %17448 = vmatpush3.msra.mxu0 %v15628_v5  ;;  %v15696_v5 = vld [vmem:[%s20840_s3 + $0x1d0] sm:$0xff] }
0x1acd   : > { %17449 = vmatprep.subr.mxu0 %v18548_v1 }
0x1ace   : > { %17450 = vmatpush3.msra.mxu0 %v15627_v34  ;;  %v15691_v34 = vld [vmem:[%s20836_s14 + $0xe] ss:$0 sm:$0xff] }
0x1acf   : > { %17451 = vmatprep.subr.mxu0 %v18548_v1 }
0x1ad0   : > { %17452 = vmatpush3.msra.mxu0 %v15626_v7  ;;  %v15695_v7 = vld [vmem:[%s20840_s3 + $0x1c8] sm:$0xff] }
0x1ad1   : > { %17454 = vmatmul.mubr.msk.f32.vlgmr.msra.gmra.mxu0 %vm1008_vm2, %v19575_v17  ;;  %17467 = vmatprep.subr.mxu0 %v18548_v1 }
0x1ad2   : > { %17468 = vmatpush3.msk.msra.mxu0 %vm1051_vm3, %v15645_v63  ;;  %17475 = vmatprep.mubr.msk.f32.mxu0 %vm18549_vm0, %v18548_v1 }
0x1ad3   : > { %17469 = vmatprep.subr.mxu0 %v18548_v1 }
0x1ad4   : > { %17470 = vmatpush3.msra.mxu0 %v15644_v8  ;;  %v15621_v8 = vld [vmem:[%s18609_s19 + $0xb] ss:$0 sm:$0xff] }
0x1ad5   : > { %17471 = vmatprep.subr.mxu0 %v18548_v1 }
0x1ad6   : > { %17472 = vmatpush3.msra.mxu0 %v15643_v9 }
0x1ad7   : > { %17473 = vmatprep.subr.mxu0 %v18548_v1 }
0x1ad8   : > { %17474 = vmatpush3.msra.mxu0 %v15642_v10  ;;  %v15694_v10 = vld [vmem:[%s20840_s3 + $0x1c0] sm:$0xff] }
0x1ad9   : > { %17476 = vmatmul.mubr.msk.f32.vlgmr.msra.gmra.mxu0 %vm1008_vm2, %v19575_v17  ;;  %17494 = vmatprep.subr.mxu0 %v18548_v1 }
0x1ada   : > { %17495 = vmatpush3.msk.msra.mxu0 %vm1051_vm3, %v15663_v11  ;;  %17502 = vmatprep.mubr.msk.f32.mxu0 %vm18549_vm0, %v18548_v1 }
0x1adb   : > { %17496 = vmatprep.subr.mxu0 %v18548_v1 }
0x1adc   : > { %17497 = vmatpush3.msra.mxu0 %v15662_v13  ;;  %v7125_v13 = vadd.f32 %v15621_v8, %v19639_v45 }
0x1add   : > { %17498 = vmatprep.subr.mxu0 %v18548_v1 }
0x1ade   : > { %17499 = vmatpush3.msra.mxu0 %v15661_v22 }
0x1adf   : > { %17500 = vmatprep.subr.mxu0 %v18548_v1 }
0x1ae0   : > { %17501 = vmatpush3.msra.mxu0 %v15660_v15 }
0x1ae1   : > { %17503 = vmatmul.mubr.msk.f32.vlgmr.msra.gmra.mxu0 %vm1008_vm2, %v19575_v17  ;;  %17516 = vmatprep.subr.mxu0 %v18548_v1 }
0x1ae2   : > { %17518 = vmatprep.mubr.msk.f32.mxu0 %vm18549_vm0, %v18548_v1 }
0x1b89   : > { %v19712_v16 = vpop.f32.mrf.mxu0 }
0x1b8a   : > { %v8212_v18 = vsel %vm2711_vm5, %v19712_v16, -inf }
0x1b8b   : > { %8213 = vmax.xlane.f32.xlu0 %v8212_v18  ;;  %v17444_v19 = vpop.f32.mrf.mxu0 }
0x1b8f   : > { %8210 = vmax.xlane.f32.xlu0 %v8209_v21 }
0x1b91   : > { %v7286_v23 = vpop.f32.mrf.mxu0 }
0x1b92   : > { %v7287_v24 = vadd.f32 %v15631_v33, %v7286_v23 }
0x1b93   : > { %v17455_v25 = vpop.f32.mrf.mxu0 }
0x1b94   : > { %v7290_v26 = vmul.f32 0.4082483, %v7287_v24  ;;  %v15683_v25 = vld [vmem:[%s20839_s8 + $0xe] ss:$0 sm:$0xff] }
0x1b96   : > { %17481 = vmatmul.mubr.msk.f32.vlgmr.msra.gmra.mxu1 %vm1294_vm4, %v7290_v26 }
0x1b97   : > { %17484 = vmatpush3.msk.msra.mxu1 %vm1051_vm3, %v15655_v28  ;;  %17491 = vmatprep.mubr.msk.f32.mxu1 %vm18549_vm0, %v18548_v1  ;;  %v15595_v28 = vld [vmem:[%s18609_s19 + $0xa] ss:$0 sm:$0xff] }
0x1b98   : > { %17485 = vmatprep.subr.mxu1 %v18548_v1 }
0x1b99   : > { %17486 = vmatpush3.msra.mxu1 %v15654_v29  ;;  %v19727_v30 = vpop.f32.mrf.mxu0 }
0x1b9a   : > { %17487 = vmatprep.subr.mxu1 %v18548_v1 }
0x1b9b   : > { %17488 = vmatpush3.msra.mxu1 %v15653_v3  ;;  %v17477_v32 = vpop.f32.mrf.mxu0 }
0x1b9c   : > { %17489 = vmatprep.subr.mxu1 %v18548_v1  ;;  %v6790_v32 = vadd.f32 %v15595_v28, %v19652_v52 }
0x1b9d   : > { %17490 = vmatpush3.msra.mxu1 %v15652_v31 }
0x1b9e   : > { %17492 = vmatmul.mubr.msk.f32.vlgmr.msra.gmra.mxu1 %vm1008_vm2, %v19575_v17  ;;  %17505 = vmatprep.subr.mxu1 %v18548_v1 }
0x1b9f   : > { %17506 = vmatpush3.msk.msra.mxu1 %vm1051_vm3, %v15671_v35  ;;  %17513 = vmatprep.mubr.msk.f32.mxu1 %vm18549_vm0, %v18548_v1 }
0x1ba0   : > { %17507 = vmatprep.subr.mxu1 %v18548_v1 }
0x1ba1   : > { %17508 = vmatpush3.msra.mxu1 %v15670_v12  ;;  %v7708_v38 = vpop.f32.mrf.mxu0 }
0x1ba2   : > { %v7709_v39 = vadd.f32 %v15665_v36, %v7708_v38  ;;  %17509 = vmatprep.subr.mxu1 %v18548_v1 }
0x1ba3   : > { %17510 = vmatpush3.msra.mxu1 %v15669_v37  ;;  %v17504_v42 = vpop.f32.mrf.mxu0 }
0x1ba4   : > { %17511 = vmatprep.subr.mxu1 %v18548_v1  ;;  %17517 = vmatpush3.xpose.msk.msra.mxu0 %vm1294_vm4, %v7709_v39 }
0x1ba5   : > { %17512 = vmatpush3.msra.mxu1 %v15668_v41  ;;  %17521 = vmatprep.subr.mxu0 %v18548_v1 }
0x1ba6   : > { %17514 = vmatmul.mubr.msk.f32.vlgmr.msra.gmra.mxu1 %vm1008_vm2, %v19575_v17  ;;  %17532 = vmatprep.subr.mxu1 %v18548_v1 }
0x1ba7   : > { %17533 = vmatpush3.msk.msra.mxu1 %vm1051_vm3, %v15689_v43  ;;  %17540 = vmatprep.mubr.msk.f32.mxu1 %vm18549_vm0, %v18548_v1 }
0x1ba8   : > { %17534 = vmatprep.subr.mxu1 %v18548_v1 }
0x1ba9   : > { %17535 = vmatpush3.msra.mxu1 %v15688_v44 }
0x1baa   : > { %17536 = vmatprep.subr.mxu1 %v18548_v1 }
0x1bab   : > { %17537 = vmatpush3.msra.mxu1 %v15687_v20  ;;  %v15707_v20 = vld [vmem:[%s18614_s24 + $0x58] sm:$0x3f] }
0x1bac   : > { %17538 = vmatprep.subr.mxu1 %v18548_v1 }
0x1bad   : > { %17539 = vmatpush3.msra.mxu1 %v15686_v46  ;;  %v15647_v46 = vld [vmem:[%s18609_s19 + $0xc] ss:$0 sm:$0xff] }
0x1bae   : > { %17541 = vmatmul.mubr.msk.f32.vlgmr.msra.gmra.mxu1 %vm1008_vm2, %v19575_v17  ;;  %17554 = vmatprep.subr.mxu1 %v18548_v1 }
0x1baf   : > { %17556 = vmatprep.mubr.msk.f32.mxu1 %vm18549_vm0, %v18548_v1 }
0x1c14   : > { %v8214_v47 = vpop.xlane.xlu0 %8213 }
0x1c15   : > { %v8225_v48 = vsub.f32 %v19712_v16, %v8214_v47  ;;  %v7460_v47 = vadd.f32 %v15647_v46, %v19727_v30 }
0x1c17   : > { %v8231_v49 = vmul.f32 1.442695, %v8225_v48 }
0x1c19   : > { %18385 = vpow2.f32 %v8231_v49 }
0x1c26   : > { %v18386_v50 = vpop.eup %18385 }
0x1c27   : > { %v8242_v62 = vsel %vm2711_vm5, %v18386_v50, 0.0 }
0x1c28   : > { %8243 = vadd.xlane.f32.xlu1 %v8242_v62 }
0x1c56   : > { %v19768_v40 = vpop.f32.mrf.mxu1 }
0x1c57   : > { %v8215_v53 = vsel %vm2711_vm5, %v19768_v40, -inf }
0x1c58   : > { %8216 = vmax.xlane.f32.xlu1 %v8215_v53  ;;  %v17482_v54 = vpop.f32.mrf.mxu1 }
0x1c5e   : > { %v7621_v27 = vpop.f32.mrf.mxu1 }
0x1c5f   : > { %v7622_v55 = vadd.f32 %v15657_v51, %v7621_v27  ;;  %v15705_v27 = vld [vmem:[%s18614_s24 + $0x50] sm:$0x3f] }
0x1c60   : > { %v17493_v6 = vpop.f32.mrf.mxu1 }
0x1c61   : > { %v7625_v58 = vmul.f32 0.4082483, %v7622_v55 }
0x1c63   : > { %17519 = vmatmul.mubr.msk.f32.vlgmr.msra.gmra.mxu0 %vm1294_vm4, %v7625_v58 }
0x1c64   : > { %17522 = vmatpush3.msk.msra.mxu0 %vm1051_vm3, %v15681_v59  ;;  %17529 = vmatprep.mubr.msk.f32.mxu0 %vm18549_vm0, %v18548_v1 }
0x1c65   : > { %17523 = vmatprep.subr.mxu0 %v18548_v1 }
0x1c66   : > { %17524 = vmatpush3.msra.mxu0 %v15680_v60  ;;  %v19781_v0 = vpop.f32.mrf.mxu1 }
0x1c67   : > { %17525 = vmatprep.subr.mxu0 %v18548_v1 }
0x1c68   : > { %17526 = vmatpush3.msra.mxu0 %v15679_v61  ;;  %v17515_v14 = vpop.f32.mrf.mxu1 }
0x1c69   : > { %17527 = vmatprep.subr.mxu0 %v18548_v1 }
0x1c6a   : > { %17528 = vmatpush3.msra.mxu0 %v15678_v2 }
0x1c6b   : > { %17530 = vmatmul.mubr.msk.f32.vlgmr.msra.gmra.mxu0 %vm1008_vm2, %v19575_v17  ;;  %17543 = vmatprep.subr.mxu0 %v18548_v1 }
0x1c6c   : > { %17544 = vmatpush3.msk.msra.mxu0 %vm1051_vm3, %v15697_v4  ;;  %17551 = vmatprep.mubr.msk.f32.mxu0 %vm18549_vm0, %v18548_v1 }
0x1c6d   : > { %17545 = vmatprep.subr.mxu0 %v18548_v1 }
0x1c6e   : > { %17546 = vmatpush3.msra.mxu0 %v15696_v5  ;;  %v8043_v63 = vpop.f32.mrf.mxu1  ;;  %v15673_v5 = vld [vmem:[%s18609_s19 + $0xd] ss:$0 sm:$0xff] }
0x1c6f   : > { %v8044_v9 = vadd.f32 %v15691_v34, %v8043_v63  ;;  %17547 = vmatprep.subr.mxu0 %v18548_v1 }
0x1c70   : > { %17548 = vmatpush3.msra.mxu0 %v15695_v7  ;;  %v17542_v11 = vpop.f32.mrf.mxu1 }
0x1c71   : > { %17549 = vmatprep.subr.mxu0 %v18548_v1  ;;  %17555 = vmatpush3.xpose.msk.msra.mxu1 %vm1294_vm4, %v8044_v9  ;;  %v7795_v9 = vadd.f32 %v15673_v5, %v19781_v0  ;;  %v15713_v0 = vld [vmem:[%s18614_s24 + $0x60] sm:$0x3f] }
0x1c72   : > { %17550 = vmatpush3.msra.mxu0 %v15694_v10  ;;  %17559 = vmatprep.subr.mxu1 %v18548_v1  ;;  %v15699_v10 = vld [vmem:[%s18609_s19 + $0xe] ss:$0 sm:$0xff] }
0x1c73   : > { %17552 = vmatmul.mubr.msk.f32.vlgmr.msra.gmra.mxu0 %vm1008_vm2, %v19575_v17  ;;  %17564 = vmatprep.subr.mxu0 %v18548_v1  ;;  %v8211_v17 = vpop.xlane.xlu0 %8210 }
0x1c74   : > { %17565 = vmatpush3.msra.mxu0 %v7125_v13  ;;  %17566 = vmatprep.mubr.msk.f32.mxu0 %vm18549_vm0, %v18548_v1  ;;  %v8224_v45 = vsub.f32 %v19664_v57, %v8211_v17 }
0x1c75   : > { %17574 = vmatprep.subr.mxu0 %v18548_v1 }
0x1c76   : > { %v8229_v18 = vmul.f32 1.442695, %v8224_v45 }
0x1cb1   : > { %v8244_v22 = vpop.xlane.xlu1 %8243 }
0x1cb2   : > { %18387 = vrcp.f32 %v8244_v22 }
0x1cb3   : > { %18389 = vpow2.f32 %v8229_v18  ;;  %v15717_v18 = vld [vmem:[%s18614_s24 + $0x68] sm:$0x3f] }
0x1cbf   : > { %v18388_v15 = vpop.eup %18387 }
0x1cc0   : > { %v8257_v16 = vmul.f32 %v18388_v15, %v18386_v50  ;;  %v18390_v33 = vpop.eup %18389 }
0x1cc1   : > { %v8239_v24 = vsel %vm2711_vm5, %v18390_v33, 0.0 }
0x1cc2   : > { %17567 = vmatmul.mubr.msk.f32.vlgmr.msra.gmra.mxu0 %vm2711_vm5, %v8257_v16 }
0x1cc3   : > { %17576 = vmatprep.mubr.msk.f32.mxu0 %vm18549_vm0, %v18548_v1  ;;  %17575 = vmatpush3.msk.msra.mxu0 %vm1051_vm3, %v15705_v27  ;;  %v15746_v27 = vld [vmem:[%s20845_s16 + $0x130] sm:$0xff] }
0x1cc4   : > { %17584 = vmatprep.subr.mxu0 %v18548_v1 }
0x1ce1   : > { %v8217_v48 = vpop.xlane.xlu1 %8216 }
0x1ce2   : > { %v8226_v49 = vsub.f32 %v19768_v40, %v8217_v48  ;;  %v15731_v48 = vld [vmem:[%s18634_s20 + $0x48] sm:$0xff] }
0x1ce4   : > { %v8233_v50 = vmul.f32 1.442695, %v8226_v49  ;;  %v15730_v49 = vld [vmem:[%s18634_s20 + $0x40] sm:$0xff] }
0x1d23   : > { %v7870_v19 = vpop.f32.mrf.mxu0 }
0x1d24   : > { %v8218_v21 = vsel %vm2711_vm5, %v7870_v19, -inf }
0x1d25   : > { %8219 = vmax.xlane.f32.xlu0 %v8218_v21  ;;  %v17520_v23 = vpop.f32.mrf.mxu0 }
0x1d29   : > { %8240 = vadd.xlane.f32.xlu0 %v8239_v24 }
0x1d2b   : > { %v7956_v26 = vpop.f32.mrf.mxu0 }
0x1d2c   : > { %v7957_v29 = vadd.f32 %v15683_v25, %v7956_v26 }
0x1d2d   : > { %v17531_v3 = vpop.f32.mrf.mxu0 }
0x1d2e   : > { %v7960_v31 = vmul.f32 0.4082483, %v7957_v29 }
0x1d30   : > { %17557 = vmatmul.mubr.msk.f32.vlgmr.msra.gmra.mxu1 %vm1294_vm4, %v7960_v31 }
0x1d31   : > { %17560 = vmatpush3.msra.mxu1 %v6790_v32  ;;  %17561 = vmatprep.mubr.msk.f32.mxu1 %vm18549_vm0, %v18548_v1 }
0x1d32   : > { %17569 = vmatprep.subr.mxu1 %v18548_v1 }
0x1d33   : > { %v19823_v57 = vpop.f32.mrf.mxu0 }
0x1d34   : > { %v8130_v13 = vadd.f32 %v15699_v10, %v19823_v57  ;;  %v15738_v10 = vld [vmem:[%s20845_s16 + $0xf0] sm:$0xff] }
0x1d35   : > { %v17553_v35 = vpop.f32.mrf.mxu0 }
0x1d82   : > { %v8408_v12 = vpop.f32.mrf.mxu0 }
0x1d84   : > { %v17568_v36 = vpop.f32.mrf.mxu0 }
0x1dae   : > { %v8220_v37 = vpop.xlane.xlu0 %8219 }
0x1daf   : > { %v8227_v38 = vsub.f32 %v7870_v19, %v8220_v37  ;;  %v15725_v37 = vld [vmem:[%s18619_s30 + $0x2] ss:$0 sm:$0xff] }
0x1db1   : > { %v8235_v39 = vmul.f32 1.442695, %v8227_v38 }
0x1db2   : > { %v8241_v41 = vpop.xlane.xlu0 %8240 }
0x1db3   : > { %18391 = vpow2.f32 %v8235_v39 }
0x1db4   : > { %18393 = vrcp.f32 %v8241_v41 }
0x1db5   : > { %18395 = vpow2.f32 %v8233_v50  ;;  %v15752_v50 = vld [vmem:[%s20845_s16 + $0x160] sm:$0xff] }
0x1dc0   : > { %v18392_v52 = vpop.eup %18391 }
0x1dc1   : > { %v18394_v42 = vpop.eup %18393  ;;  %v8248_v43 = vsel %vm2711_vm5, %v18392_v52, 0.0 }
0x1dc2   : > { %8249 = vadd.xlane.f32.xlu0 %v8248_v43  ;;  %v8255_v44 = vmul.f32 %v18394_v42, %v18390_v33  ;;  %v18396_v54 = vpop.eup %18395  ;;  %v15721_v33 = vld [vmem:[%s18614_s24 + $0x70] sm:$0x3f] }
0x1dc3   : > { %v8245_v51 = vsel %vm2711_vm5, %v18396_v54, 0.0 }
0x1dc4   : > { %17562 = vmatmul.mubr.msk.f32.vlgmr.msra.gmra.mxu1 %vm2711_vm5, %v8255_v44 }
0x1dc5   : > { %17570 = vmatpush3.msk.msra.mxu1 %vm1051_vm3, %v15707_v20  ;;  %17571 = vmatprep.mubr.msk.f32.mxu1 %vm18549_vm0, %v18548_v1 }
0x1dc6   : > { %17579 = vmatprep.subr.mxu1 %v18548_v1 }
0x1dc8   : > { %17572 = vmatmul.mubr.msk.f32.vlgmr.msra.gmra.mxu1 %vm1294_vm4, %v8408_v12 }
0x1dc9   : > { %17580 = vmatpush3.msra.mxu1 %v7460_v47  ;;  %17581 = vmatprep.mubr.msk.f32.mxu1 %vm18549_vm0, %v18548_v1  ;;  %v15733_v47 = vld [vmem:[%s18634_s20 + $0x58] sm:$0x3f] }
0x1dca   : > { %17589 = vmatprep.subr.mxu1 %v18548_v1 }
0x1df0   : > { %v8205_v62 = vpop.f32.mrf.mxu1 }
0x1df1   : > { %v8221_v53 = vsel %vm2711_vm5, %v8205_v62, -inf }
0x1df2   : > { %8222 = vmax.xlane.f32.xlu1 %v8221_v53  ;;  %v17558_v30 = vpop.f32.mrf.mxu1  ;;  %v15750_v53 = vld [vmem:[%s20845_s16 + $0x150] sm:$0xff] }
0x1df3   : > { %v15748_v30 = vld [vmem:[%s20845_s16 + $0x140] sm:$0xff] }
0x1df6   : > { %8246 = vadd.xlane.f32.xlu1 %v8245_v51  ;;  %v15747_v51 = vld [vmem:[%s20845_s16 + $0x138] sm:$0xff] }
0x1e4b   : > { %v8250_v59 = vpop.xlane.xlu0 %8249 }
0x1e7b   : > { %v8223_v55 = vpop.xlane.xlu1 %8222 }
0x1e7c   : > { %v8228_v6 = vsub.f32 %v8205_v62, %v8223_v55  ;;  %v15751_v62 = vld [vmem:[%s20845_s16 + $0x158] sm:$0xff]  ;;  %v15745_v55 = vld [vmem:[%s20845_s16 + $0x128] sm:$0xff] }
0x1e7e   : > { %v8237_v40 = vmul.f32 1.442695, %v8228_v6  ;;  %v15744_v6 = vld [vmem:[%s20845_s16 + $0x120] sm:$0xff] }
0x1e7f   : > { %v8247_v58 = vpop.xlane.xlu1 %8246 }
0x1e80   : > { %18397 = vpow2.f32 %v8237_v40  ;;  %v15743_v40 = vld [vmem:[%s20845_s16 + $0x118] sm:$0xff] }
0x1e81   : > { %18399 = vrcp.f32 %v8247_v58  ;;  %v15742_v58 = vld [vmem:[%s20845_s16 + $0x110] sm:$0xff] }
0x1e82   : > { %18401 = vrcp.f32 %v8250_v59  ;;  %v15741_v59 = vld [vmem:[%s20845_s16 + $0x108] sm:$0xff] }
0x1e84   : > { %v8333_v60 = vpop.f32.mrf.mxu1 }
0x1e85   : > { %17577 = vmatmul.mubr.msk.f32.vlgmr.msra.gmra.mxu0 %vm1294_vm4, %v8333_v60 }
0x1e86   : > { %v17563_v61 = vpop.f32.mrf.mxu1  ;;  %17586 = vmatprep.mubr.msk.f32.mxu0 %vm18549_vm0, %v18548_v1  ;;  %17585 = vmatpush3.msk.msra.mxu0 %vm1051_vm3, %v15713_v0 }
0x1e87   : > { %17594 = vmatprep.subr.mxu0 %v18548_v1 }
0x1e88   : > { %v8486_v2 = vpop.f32.mrf.mxu1 }
0x1e8a   : > { %v17573_v14 = vpop.f32.mrf.mxu1 }
0x1e8d   : > { %v18398_v4 = vpop.eup %18397 }
0x1e8e   : > { %v18400_v34 = vpop.eup %18399  ;;  %v8251_v7 = vsel %vm2711_vm5, %v18398_v4, 0.0 }
0x1e8f   : > { %8252 = vadd.xlane.f32.xlu1 %v8251_v7  ;;  %v8259_v63 = vmul.f32 %v18400_v34, %v18396_v54  ;;  %v18402_v8 = vpop.eup %18401  ;;  %v15749_v54 = vld [vmem:[%s20845_s16 + $0x148] sm:$0xff]  ;;  %v15729_v34 = vld [vmem:[%s20847_s23 + $0x2] ss:$0 sm:$0xff] }
0x1e90   : > { %v8261_v11 = vmul.f32 %v18402_v8, %v18392_v52  ;;  %v15740_v8 = vld [vmem:[%s20845_s16 + $0x100] sm:$0xff] }
0x1e91   : > { %17582 = vmatmul.mubr.msk.f32.vlgmr.msra.gmra.mxu1 %vm2711_vm5, %v8259_v63 }
0x1e92   : > { %17590 = vmatpush3.msra.mxu1 %v7795_v9  ;;  %17591 = vmatprep.mubr.msk.f32.mxu1 %vm18549_vm0, %v18548_v1  ;;  %v15739_v9 = vld [vmem:[%s20845_s16 + $0xf8] sm:$0xff] }
0x1e93   : > { %17599 = vmatprep.subr.mxu1 %v18548_v1 }
0x1e95   : > { %17592 = vmatmul.mubr.msk.f32.vlgmr.msra.gmra.mxu1 %vm2711_vm5, %v8261_v11  ;;  %v15735_v11 = vld [vmem:[%s20848_s5 + $0x2] ss:$0 sm:$0xff] }
0x1e96   : > { %17600 = vmatpush3.msra.mxu1 %v8130_v13  ;;  %17601 = vmatprep.mubr.msk.f32.mxu1 %vm18549_vm0, %v18548_v1 }
0x1e97   : > { %17609 = vmatprep.subr.mxu1 %v18548_v1 }
0x1f18   : > { %v8253_v22 = vpop.xlane.xlu1 %8252 }
0x1f19   : > { %18403 = vrcp.f32 %v8253_v22 }
0x1f26   : > { %v18404_v15 = vpop.eup %18403 }
0x1f27   : > { %v8263_v16 = vmul.f32 %v18404_v15, %v18398_v4  ;;  %v15728_v4 = vld [vmem:[%s20846_s22 + $0x2] ss:$0 sm:$0xff] }
0x1f29   : > { %17602 = vmatmul.mubr.msk.f32.vlgmr.msra.gmra.mxu1 %vm2711_vm5, %v8263_v16 }
0x1f2a   : > { %17617 = vmatprep.mubr.msk.f32.mxu1 %vm18549_vm0, %v18548_v1  ;;  %17610 = vmatpush3.msk.msra.mxu1 %vm1051_vm3, %v15733_v47  ;;  %v15770_v47 = vld [vmem:[%s18589_s29 + $0x1f0] sm:$0xff] }
0x1f2b   : > { %17611 = vmatprep.subr.mxu1 %v18548_v1 }
0x1f45   : > { %v8562_v17 = vpop.f32.mrf.mxu0 }
0x1f46   : > { %v8563_v28 = vadd.f32 %v8562_v17, %v8486_v2  ;;  %v15755_v17 = vld [vmem:[%s20849_s9 + $0x2] ss:$0 sm:$0xff] }
0x1f47   : > { %v17578_v45 = vpop.f32.mrf.mxu0 }
0x1f51   : > { %v8635_v19 = vpop.f32.mrf.mxu1 }
0x1f52   : > { %17587 = vmatmul.mubr.msk.f32.vlgmr.msra.gmra.mxu0 %vm1294_vm4, %v8635_v19 }
0x1f53   : > { %v17583_v21 = vpop.f32.mrf.mxu1  ;;  %17595 = vmatpush3.msk.msra.mxu0 %vm1051_vm3, %v15717_v18  ;;  %17596 = vmatprep.mubr.msk.f32.mxu0 %vm18549_vm0, %v18548_v1 }
0x1f54   : > { %17604 = vmatprep.subr.mxu0 %v18548_v1 }
0x1f55   : > { %v8787_v23 = vpop.f32.mrf.mxu1 }
0x1f56   : > { %17597 = vmatmul.mubr.msk.f32.vlgmr.msra.gmra.mxu0 %vm1294_vm4, %v8787_v23 }
0x1f57   : > { %v17593_v24 = vpop.f32.mrf.mxu1  ;;  %17605 = vmatpush3.msk.msra.mxu0 %vm1051_vm3, %v15721_v33  ;;  %17606 = vmatprep.mubr.msk.f32.mxu0 %vm18549_vm0, %v18548_v1 }
0x1f58   : > { %17620 = vmatprep.subr.mxu0 %v18548_v1 }
0x1fe9   : > { %v8939_v25 = vpop.f32.mrf.mxu1 }
0x1fea   : > { %17607 = vmatmul.mubr.msk.f32.vlgmr.msra.gmra.mxu0 %vm1294_vm4, %v8939_v25 }
0x1feb   : > { %v17603_v26 = vpop.f32.mrf.mxu1  ;;  %17650 = vmatprep.mubr.msk.f32.mxu0 %vm18549_vm0, %v18548_v1  ;;  %17621 = vmatpush3.msra.mxu0 %v15752_v50  ;;  %v15768_v50 = vld [vmem:[%s18589_s29 + $0x1e0] sm:$0xff] }
0x1fec   : > { %17622 = vmatprep.subr.mxu0 %v18548_v1 }
0x1fed   : > { %17623 = vmatpush3.msra.mxu0 %v15751_v62  ;;  %v15802_v62 = vld [vmem:[%s20840_s3 + $0x200] sm:$0xff] }
0x1fee   : > { %17624 = vmatprep.subr.mxu0 %v18548_v1 }
0x1fef   : > { %17625 = vmatpush3.msra.mxu0 %v15750_v53  ;;  %v15779_v53 = vld [vmem:[%s20840_s3 + $0x1f8] sm:$0x3f] }
0x1ff0   : > { %17626 = vmatprep.subr.mxu0 %v18548_v1 }
0x1ff1   : > { %17627 = vmatpush3.msra.mxu0 %v15749_v54  ;;  %v15823_v54 = vld [vmem:[%s18589_s29 + $0x238] sm:$0x3f] }
0x1ff2   : > { %17628 = vmatprep.subr.mxu0 %v18548_v1 }
0x1ff3   : > { %17629 = vmatpush3.msra.mxu0 %v15748_v30  ;;  %v15778_v30 = vld [vmem:[%s20840_s3 + $0x1f0] sm:$0xff] }
0x1ff4   : > { %17630 = vmatprep.subr.mxu0 %v18548_v1 }
0x1ff5   : > { %17631 = vmatpush3.msra.mxu0 %v15747_v51  ;;  %v15822_v51 = vld [vmem:[%s18589_s29 + $0x230] sm:$0xff] }
0x1ff6   : > { %17632 = vmatprep.subr.mxu0 %v18548_v1 }
0x1ff7   : > { %17633 = vmatpush3.msra.mxu0 %v15746_v27  ;;  %v15777_v27 = vld [vmem:[%s20840_s3 + $0x1e8] sm:$0xff] }
0x1ff8   : > { %17634 = vmatprep.subr.mxu0 %v18548_v1 }
0x1ff9   : > { %17635 = vmatpush3.msra.mxu0 %v15745_v55  ;;  %v15821_v55 = vld [vmem:[%s18589_s29 + $0x228] sm:$0xff] }
0x1ffa   : > { %17636 = vmatprep.subr.mxu0 %v18548_v1 }
0x1ffb   : > { %17637 = vmatpush3.msra.mxu0 %v15744_v6  ;;  %v15776_v6 = vld [vmem:[%s20840_s3 + $0x1e0] sm:$0xff] }
0x1ffc   : > { %17638 = vmatprep.subr.mxu0 %v18548_v1 }
0x1ffd   : > { %17639 = vmatpush3.msra.mxu0 %v15743_v40  ;;  %v15820_v40 = vld [vmem:[%s18589_s29 + $0x220] sm:$0xff] }
0x1ffe   : > { %17640 = vmatprep.subr.mxu0 %v18548_v1 }
0x1fff   : > { %17641 = vmatpush3.msra.mxu0 %v15742_v58 }
0x2000   : > { %17642 = vmatprep.subr.mxu0 %v18548_v1 }
0x2001   : > { %17643 = vmatpush3.msra.mxu0 %v15741_v59 }
0x2002   : > { %17644 = vmatprep.subr.mxu0 %v18548_v1 }
0x2003   : > { %17645 = vmatpush3.msra.mxu0 %v15740_v8 }
0x2004   : > { %17646 = vmatprep.subr.mxu0 %v18548_v1 }
0x2005   : > { %17647 = vmatpush3.msra.mxu0 %v15739_v9 }
0x2006   : > { %17648 = vmatprep.subr.mxu0 %v18548_v1 }
0x2007   : > { %17649 = vmatpush3.msra.mxu0 %v15738_v10  ;;  %v15797_v10 = vld [vmem:[%s18589_s29 + $0x218] sm:$0x3f] }
0x2008   : > { %17691 = vmatprep.subr.mxu0 %v18548_v1 }
0x2012   : > { %v8713_v29 = vpop.f32.mrf.mxu0 }
0x2013   : > { %v8717_v3 = vadd.f32 %v8713_v29, %v8563_v28  ;;  %v15763_v28 = vld [vmem:[%s18584_s25 + $0x1f8] sm:$0x3f] }
0x2014   : > { %v17588_v31 = vpop.f32.mrf.mxu0  ;;  %v15789_v29 = vld [vmem:[%s18584_s25 + $0x218] sm:$0x3f] }
0x2015   : > { %v15788_v31 = vld [vmem:[%s18584_s25 + $0x210] sm:$0xff] }
0x2016   : > { %v8865_v32 = vpop.f32.mrf.mxu0 }
0x2017   : > { %v8869_v57 = vadd.f32 %v8865_v32, %v8717_v3  ;;  %v15762_v3 = vld [vmem:[%s18584_s25 + $0x1f0] sm:$0xff]  ;;  %v15761_v32 = vld [vmem:[%s18584_s25 + $0x1e8] sm:$0xff] }
0x2018   : > { %v17598_v35 = vpop.f32.mrf.mxu0 }
0x2019   : > { %v15760_v35 = vld [vmem:[%s18584_s25 + $0x1e0] sm:$0xff] }
0x20aa   : > { %v9017_v12 = vpop.f32.mrf.mxu0 }
0x20ab   : > { %v9021_v36 = vadd.f32 %v9017_v12, %v8869_v57  ;;  %v15787_v57 = vld [vmem:[%s18584_s25 + $0x208] sm:$0xff]  ;;  %v15786_v12 = vld [vmem:[%s18584_s25 + $0x200] sm:$0xff] }
0x20ac   : > { %v17608_v38 = vpop.f32.mrf.mxu0 }
0x20ad   : > { %v9022_v39 = vadd.f32 %v9021_v36, %v19549_v56  ;;  %v15732_v56 = vld [vmem:[%s18634_s20 + $0x50] sm:$0xff] }
0x20ae   : > { %17612 = vmatpush3.msra.mxu1 %v15732_v56  ;;  %v15804_v56 = vld [vmem:[%s20840_s3 + $0x210] sm:$0xff] }
0x20af   : > { %v19883_v41 = vadd.f32 %v15725_v37, %v9022_v39  ;;  %17613 = vmatprep.subr.mxu1 %v18548_v1 }
0x20b0   : > { %17614 = vmatpush3.msra.mxu1 %v15731_v48  ;;  %v15769_v48 = vld [vmem:[%s18589_s29 + $0x1e8] sm:$0xff] }
0x20b1   : > { %v9036_v52 = vsel %vm1008_vm2, %v19883_v41, 0.0  ;;  %17615 = vmatprep.subr.mxu1 %v18548_v1 }
0x20b2   : > { %9037 = vadd.xlane.f32.xlu0 %v9036_v52  ;;  %17616 = vmatpush3.msra.mxu1 %v15730_v49  ;;  %v15803_v49 = vld [vmem:[%s20840_s3 + $0x208] sm:$0xff] }
0x20b3   : > { %17653 = vmatprep.subr.mxu1 %v18548_v1 }
0x213b   : > { %v9038_v42 = vpop.xlane.xlu0 %9037 }
0x213c   : > { %v9039_v43 = vmul.f32 0.033333335, %v9038_v42  ;;  %v15759_v42 = vld [vmem:[%s18579_s21 + $0x3] ss:$0 sm:$0xff] }
0x213e   : > { %v9040_v44 = vsub.f32 %v19883_v41, %v9039_v43 }
0x2140   : > { %v9041_v20 = vmul.f32 %v9040_v44, %v9040_v44 }
0x2142   : > { %v9042_v46 = vsel %vm1008_vm2, %v9041_v20, 0.0  ;;  %v15771_v20 = vld [vmem:[%s18589_s29 + $0x1f8] sm:$0x3f] }
0x2143   : > { %9043 = vadd.xlane.f32.xlu1 %v9042_v46  ;;  %v15805_v46 = vld [vmem:[%s20840_s3 + $0x218] sm:$0x3f] }
0x21cc   : > { %v9044_v60 = vpop.xlane.xlu1 %9043 }
0x21cd   : > { %v9045_v61 = vmul.f32 0.033333335, %v9044_v60 }
0x21cf   : > { %v9046_v2 = vadd.f32 1e-05, %v9045_v61 }
0x21d1   : > { %18405 = vrsqrt.f32 %v9046_v2  ;;  %v15765_v2 = vld [vmem:[%s20839_s8 + $0xf] ss:$0 sm:$0xff] }
0x21de   : > { %v18406_v14 = vpop.eup %18405 }
0x21df   : > { %v9048_v5 = vmul.f32 %v18406_v14, %v9040_v44  ;;  %v15773_v14 = vld [vmem:[%s20836_s14 + $0xf] ss:$0 sm:$0xff] }
0x21e1   : > { %v9055_v7 = vmul.f32 %v15728_v4, %v9048_v5 }
0x21e3   : > { %v9062_v63 = vadd.f32 %v15729_v34, %v9055_v7 }
0x21e5   : > { %17618 = vmatmul.mubr.msk.f32.vlgmr.msra.gmra.mxu1 %vm1008_vm2, %v9062_v63 }
0x21e6   : > { %17661 = vmatprep.mubr.msk.f32.mxu1 %vm18549_vm0, %v18548_v1  ;;  %17654 = vmatpush3.msk.msra.mxu1 %vm1051_vm3, %v15763_v28 }
0x21e7   : > { %17655 = vmatprep.subr.mxu1 %v18548_v1 }
0x21e8   : > { %17656 = vmatpush3.msra.mxu1 %v15762_v3 }
0x21e9   : > { %17657 = vmatprep.subr.mxu1 %v18548_v1 }
0x21ea   : > { %17658 = vmatpush3.msra.mxu1 %v15761_v32  ;;  %v15814_v32 = vld [vmem:[%s18584_s25 + $0x230] sm:$0xff] }
0x21eb   : > { %17659 = vmatprep.subr.mxu1 %v18548_v1 }
0x21ec   : > { %17660 = vmatpush3.msra.mxu1 %v15760_v35  ;;  %v15812_v35 = vld [vmem:[%s18584_s25 + $0x220] sm:$0xff] }
0x21ed   : > { %17664 = vmatprep.subr.mxu1 %v18548_v1 }
0x22a5   : > { %v9148_v13 = vpop.f32.mrf.mxu1 }
0x22a6   : > { %v9149_v0 = vadd.f32 %v15735_v11, %v9148_v13  ;;  %v15796_v11 = vld [vmem:[%s18589_s29 + $0x210] sm:$0xff] }
0x22a7   : > { %v17619_v22 = vpop.f32.mrf.mxu1  ;;  %v15825_v13 = vld [vmem:[%s20836_s14 + $0x11] ss:$0 sm:$0xff] }
0x22a8   : > { %v9152_v15 = vmax.f32 %v9149_v0, 0.0  ;;  %v15795_v0 = vld [vmem:[%s18589_s29 + $0x208] sm:$0xff] }
0x22aa   : > { %17651 = vmatmul.mubr.msk.f32.vlgmr.msra.gmra.mxu0 %vm3665_vm6, %v9152_v15 }
0x22ab   : > { %17699 = vmatprep.mubr.msk.f32.mxu0 %vm18549_vm0, %v18548_v1  ;;  %17692 = vmatpush3.msk.msra.mxu0 %vm1051_vm3, %v15789_v29 }
0x22ac   : > { %17693 = vmatprep.subr.mxu0 %v18548_v1 }
0x22ad   : > { %17694 = vmatpush3.msra.mxu0 %v15788_v31  ;;  %v15815_v31 = vld [vmem:[%s18584_s25 + $0x238] sm:$0x3f] }
0x22ae   : > { %17695 = vmatprep.subr.mxu0 %v18548_v1 }
0x22af   : > { %17696 = vmatpush3.msra.mxu0 %v15787_v57  ;;  %v15813_v57 = vld [vmem:[%s18584_s25 + $0x228] sm:$0xff] }
0x22b0   : > { %17697 = vmatprep.subr.mxu0 %v18548_v1 }
0x22b1   : > { %17698 = vmatpush3.msra.mxu0 %v15786_v12  ;;  %v15831_v12 = vld [vmem:[%s20840_s3 + $0x238] sm:$0x3f] }
0x22b2   : > { %17713 = vmatprep.subr.mxu0 %v18548_v1 }
0x236a   : > { %v9238_v16 = vpop.f32.mrf.mxu0 }
0x236b   : > { %v9242_v45 = vadd.f32 %v9238_v16, %v19883_v41  ;;  %v15758_v41 = vld [vmem:[%s18574_s17 + $0x3] ss:$0 sm:$0xff] }
0x236c   : > { %v17652_v18 = vpop.f32.mrf.mxu0  ;;  %v15794_v16 = vld [vmem:[%s18589_s29 + $0x200] sm:$0xff] }
0x236d   : > { %v19939_v19 = vadd.f32 %v15755_v17, %v9242_v45 }
0x236f   : > { %v9256_v21 = vsel %vm1008_vm2, %v19939_v19, 0.0 }
0x2370   : > { %9257 = vadd.xlane.f32.xlu0 %v9256_v21 }
0x23f9   : > { %v9258_v33 = vpop.xlane.xlu0 %9257 }
0x23fa   : > { %v9259_v23 = vmul.f32 0.033333335, %v9258_v33 }
0x23fc   : > { %v9260_v24 = vsub.f32 %v19939_v19, %v9259_v23  ;;  %v15791_v23 = vld [vmem:[%s20839_s8 + $0x10] ss:$0 sm:$0xff] }
0x23fe   : > { %v9261_v25 = vmul.f32 %v9260_v24, %v9260_v24 }
0x2400   : > { %v9262_v26 = vsel %vm1008_vm2, %v9261_v25, 0.0 }
0x2401   : > { %9263 = vadd.xlane.f32.xlu1 %v9262_v26 }
0x248a   : > { %v9264_v36 = vpop.xlane.xlu1 %9263 }
0x248b   : > { %v9265_v37 = vmul.f32 0.033333335, %v9264_v36  ;;  %v15830_v36 = vld [vmem:[%s20840_s3 + $0x230] sm:$0xff] }
0x248d   : > { %v9266_v38 = vadd.f32 1e-05, %v9265_v37  ;;  %v15829_v37 = vld [vmem:[%s20840_s3 + $0x228] sm:$0xff] }
0x248f   : > { %18407 = vrsqrt.f32 %v9266_v38  ;;  %v15828_v38 = vld [vmem:[%s20840_s3 + $0x220] sm:$0xff] }
0x249c   : > { %v18408_v39 = vpop.eup %18407 }
0x249d   : > { %v9268_v52 = vmul.f32 %v18408_v39, %v9260_v24  ;;  %v15799_v24 = vld [vmem:[%s20836_s14 + $0x10] ss:$0 sm:$0xff]  ;;  %v15849_v39 = vld [vmem:[%s18589_s29 + $0x258] sm:$0x3f] }
0x249f   : > { %v9275_v43 = vmul.f32 %v15758_v41, %v9268_v52  ;;  %v15848_v41 = vld [vmem:[%s18589_s29 + $0x250] sm:$0xff]  ;;  %v15847_v52 = vld [vmem:[%s18589_s29 + $0x248] sm:$0xff] }
0x24a1   : > { %v19965_v44 = vadd.f32 %v15759_v42, %v9275_v43  ;;  %v15846_v42 = vld [vmem:[%s18589_s29 + $0x240] sm:$0xff] }
0x24a3   : > { %17662 = vmatmul.mubr.msk.f32.vlgmr.msra.gmra.mxu1 %vm1008_vm2, %v19965_v44  ;;  %17700 = vmatmul.mubr.msk.f32.vlgmr.msra.gmra.mxu0 %vm1008_vm2, %v19965_v44 }
0x24a4   : > { %17665 = vmatpush3.msk.msra.mxu1 %vm1051_vm3, %v15771_v20  ;;  %17714 = vmatpush3.msk.msra.mxu0 %vm1051_vm3, %v15805_v46 }
0x24a5   : > { %17666 = vmatprep.subr.mxu1 %v18548_v1  ;;  %17715 = vmatprep.subr.mxu0 %v18548_v1 }
0x24a6   : > { %17667 = vmatpush3.msra.mxu1 %v15770_v47  ;;  %17716 = vmatpush3.msra.mxu0 %v15804_v56  ;;  %v15817_v56 = vld [vmem:[%s20839_s8 + $0x11] ss:$0 sm:$0xff] }
0x24a7   : > { %17668 = vmatprep.subr.mxu1 %v18548_v1  ;;  %17717 = vmatprep.subr.mxu0 %v18548_v1 }
0x24a8   : > { %17669 = vmatpush3.msra.mxu1 %v15769_v48  ;;  %17718 = vmatpush3.msra.mxu0 %v15803_v49 }
0x24a9   : > { %17670 = vmatprep.subr.mxu1 %v18548_v1  ;;  %17719 = vmatprep.subr.mxu0 %v18548_v1 }
0x24aa   : > { %17671 = vmatpush3.msra.mxu1 %v15768_v50  ;;  %17672 = vmatprep.mubr.msk.f32.mxu1 %vm18549_vm0, %v18548_v1 }
0x24ab   : > { %17720 = vmatpush3.msra.mxu0 %v15802_v62  ;;  %17721 = vmatprep.mubr.msk.f32.mxu0 %vm18549_vm0, %v18548_v1 }
0x24ac   : > { %17673 = vmatmul.mubr.msk.f32.vlgmr.msra.gmra.mxu1 %vm1008_vm2, %v19965_v44  ;;  %17675 = vmatprep.subr.mxu1 %v18548_v1 }
0x24ad   : > { %17722 = vmatmul.mubr.msk.f32.vlgmr.msra.gmra.mxu0 %vm1008_vm2, %v19965_v44  ;;  %17740 = vmatprep.subr.mxu0 %v18548_v1 }
0x24ae   : > { %17676 = vmatpush3.msk.msra.mxu1 %vm1051_vm3, %v15779_v53  ;;  %17741 = vmatpush3.msk.msra.mxu0 %vm1051_vm3, %v15823_v54  ;;  %v15841_v53 = vld [vmem:[%s18584_s25 + $0x258] sm:$0x3f]  ;;  %v15840_v54 = vld [vmem:[%s18584_s25 + $0x250] sm:$0xff] }
0x24af   : > { %17677 = vmatprep.subr.mxu1 %v18548_v1  ;;  %17742 = vmatprep.subr.mxu0 %v18548_v1 }
0x24b0   : > { %17678 = vmatpush3.msra.mxu1 %v15778_v30  ;;  %17743 = vmatpush3.msra.mxu0 %v15822_v51  ;;  %v15839_v30 = vld [vmem:[%s18584_s25 + $0x248] sm:$0xff] }
0x24b1   : > { %17679 = vmatprep.subr.mxu1 %v18548_v1  ;;  %17744 = vmatprep.subr.mxu0 %v18548_v1 }
0x24b2   : > { %17680 = vmatpush3.msra.mxu1 %v15777_v27  ;;  %17745 = vmatpush3.msra.mxu0 %v15821_v55  ;;  %v15838_v27 = vld [vmem:[%s18584_s25 + $0x240] sm:$0xff] }
0x24b3   : > { %17681 = vmatprep.subr.mxu1 %v18548_v1  ;;  %17746 = vmatprep.subr.mxu0 %v18548_v1 }
0x24b4   : > { %17682 = vmatpush3.msra.mxu1 %v15776_v6  ;;  %17683 = vmatprep.mubr.msk.f32.mxu1 %vm18549_vm0, %v18548_v1  ;;  %v15857_v6 = vld [vmem:[%s20840_s3 + $0x258] sm:$0x3f] }
0x24b5   : > { %17747 = vmatpush3.msra.mxu0 %v15820_v40  ;;  %17748 = vmatprep.mubr.msk.f32.mxu0 %vm18549_vm0, %v18548_v1  ;;  %v15856_v40 = vld [vmem:[%s20840_s3 + $0x250] sm:$0xff] }
0x24b6   : > { %17684 = vmatmul.mubr.msk.f32.vlgmr.msra.gmra.mxu1 %vm1008_vm2, %v19965_v44  ;;  %17749 = vmatmul.mubr.msk.f32.vlgmr.msra.gmra.mxu0 %vm1008_vm2, %v19965_v44 }
0x24b7   : > { %17686 = vmatprep.subr.mxu1 %v18548_v1  ;;  %17688 = vmatprep.mubr.msk.f32.mxu1 %vm18549_vm0, %v18548_v1 }
0x24b8   : > { %17762 = vmatprep.subr.mxu0 %v18548_v1  ;;  %17764 = vmatprep.mubr.msk.f32.mxu0 %vm18549_vm0, %v18548_v1 }
0x2563   : > { %v9368_v58 = vpop.f32.mrf.mxu1  ;;  %v9703_v59 = vpop.f32.mrf.mxu0 }
0x2564   : > { %v9369_v4 = vadd.f32 %v15765_v2, %v9368_v58  ;;  %v9704_v25 = vadd.f32 %v15791_v23, %v9703_v59  ;;  %v15851_v58 = vld [vmem:[%s20836_s14 + $0x12] ss:$0 sm:$0xff]  ;;  %v15855_v59 = vld [vmem:[%s20840_s3 + $0x248] sm:$0xff]  ;;  %v15854_v2 = vld [vmem:[%s20840_s3 + $0x240] sm:$0xff] }
0x2565   : > { %v17663_v60 = vpop.f32.mrf.mxu1  ;;  %v17701_v61 = vpop.f32.mrf.mxu0 }
0x2566   : > { %v9372_v9 = vmul.f32 0.4082483, %v9369_v4  ;;  %v9707_v3 = vmul.f32 0.4082483, %v9704_v25  ;;  %v15875_v4 = vld [vmem:[%s18589_s29 + $0x278] sm:$0x3f] }
0x2567   : > { %v15866_v25 = vld [vmem:[%s18584_s25 + $0x270] sm:$0xff] }
0x256c   : > { %v9455_v5 = vpop.f32.mrf.mxu1 }
0x256d   : > { %v9456_v34 = vadd.f32 %v15773_v14, %v9455_v5  ;;  %v20029_v7 = vpop.f32.mrf.mxu0  ;;  %v15874_v5 = vld [vmem:[%s18589_s29 + $0x270] sm:$0xff] }
0x256e   : > { %v17674_v63 = vpop.f32.mrf.mxu1 }
0x256f   : > { %v17723_v8 = vpop.f32.mrf.mxu0  ;;  %17687 = vmatpush3.xpose.msk.msra.mxu1 %vm1294_vm4, %v9456_v34  ;;  %v15873_v34 = vld [vmem:[%s18589_s29 + $0x268] sm:$0xff]  ;;  %v15872_v63 = vld [vmem:[%s18589_s29 + $0x260] sm:$0xff] }
0x2570   : > { %17702 = vmatprep.subr.mxu1 %v18548_v1 }
0x2572   : > { %17689 = vmatmul.mubr.msk.f32.vlgmr.msra.gmra.mxu1 %vm1294_vm4, %v9372_v9 }
0x2573   : > { %17703 = vmatpush3.msk.msra.mxu1 %vm1051_vm3, %v15797_v10  ;;  %17710 = vmatprep.mubr.msk.f32.mxu1 %vm18549_vm0, %v18548_v1 }
0x2574   : > { %17704 = vmatprep.subr.mxu1 %v18548_v1 }
0x2575   : > { %17705 = vmatpush3.msra.mxu1 %v15796_v11 }
0x2576   : > { %v20042_v22 = vpop.f32.mrf.mxu1  ;;  %v10125_v15 = vpop.f32.mrf.mxu0  ;;  %17706 = vmatprep.subr.mxu1 %v18548_v1 }
0x2577   : > { %v10126_v17 = vadd.f32 %v15825_v13, %v10125_v15  ;;  %17707 = vmatpush3.msra.mxu1 %v15795_v0 }
0x2578   : > { %v17685_v45 = vpop.f32.mrf.mxu1  ;;  %v17750_v18 = vpop.f32.mrf.mxu0  ;;  %17708 = vmatprep.subr.mxu1 %v18548_v1 }
0x2579   : > { %17763 = vmatpush3.xpose.msk.msra.mxu0 %vm1294_vm4, %v10126_v17  ;;  %17709 = vmatpush3.msra.mxu1 %v15794_v16  ;;  %v15843_v17 = vld [vmem:[%s20839_s8 + $0x12] ss:$0 sm:$0xff] }
0x257a   : > { %17711 = vmatmul.mubr.msk.f32.vlgmr.msra.gmra.mxu1 %vm1008_vm2, %v19965_v44  ;;  %17724 = vmatprep.subr.mxu1 %v18548_v1 }
0x257b   : > { %17726 = vmatprep.mubr.msk.f32.mxu1 %vm18549_vm0, %v18548_v1  ;;  %17767 = vmatprep.subr.mxu0 %v18548_v1 }
0x2632   : > { %v20054_v21 = vpop.f32.mrf.mxu1 }
0x2633   : > { %v10961_v47 = vsel %vm2711_vm5, %v20054_v21, -inf }
0x2634   : > { %v17690_v33 = vpop.f32.mrf.mxu1 }
0x263a   : > { %v9790_v26 = vpop.f32.mrf.mxu1 }
0x263b   : > { %v9791_v28 = vadd.f32 %v15799_v24, %v9790_v26  ;;  %v15867_v24 = vld [vmem:[%s18584_s25 + $0x278] sm:$0x3f]  ;;  %v15865_v26 = vld [vmem:[%s18584_s25 + $0x268] sm:$0xff] }
0x263c   : > { %v17712_v29 = vpop.f32.mrf.mxu1 }
0x263d   : > { %17725 = vmatpush3.xpose.msk.msra.mxu1 %vm1294_vm4, %v9791_v28  ;;  %v15864_v29 = vld [vmem:[%s18584_s25 + $0x260] sm:$0xff] }
0x263e   : > { %17729 = vmatprep.subr.mxu1 %v18548_v1 }
0x2640   : > { %17727 = vmatmul.mubr.msk.f32.vlgmr.msra.gmra.mxu1 %vm1294_vm4, %v9707_v3 }
0x2641   : > { %17730 = vmatpush3.msk.msra.mxu1 %vm1051_vm3, %v15815_v31  ;;  %17737 = vmatprep.mubr.msk.f32.mxu1 %vm18549_vm0, %v18548_v1  ;;  %v15883_v31 = vld [vmem:[%s20840_s3 + $0x278] sm:$0x3f] }
0x2642   : > { %17731 = vmatprep.subr.mxu1 %v18548_v1 }
0x2643   : > { %17732 = vmatpush3.msra.mxu1 %v15814_v32  ;;  %v15882_v32 = vld [vmem:[%s20840_s3 + $0x270] sm:$0xff] }
0x2644   : > { %17733 = vmatprep.subr.mxu1 %v18548_v1 }
0x2645   : > { %17734 = vmatpush3.msra.mxu1 %v15813_v57  ;;  %v15877_v57 = vld [vmem:[%s20836_s14 + $0x13] ss:$0 sm:$0xff] }
0x2646   : > { %17735 = vmatprep.subr.mxu1 %v18548_v1 }
0x2647   : > { %17736 = vmatpush3.msra.mxu1 %v15812_v35  ;;  %v15881_v35 = vld [vmem:[%s20840_s3 + $0x268] sm:$0xff] }
0x2648   : > { %17738 = vmatmul.mubr.msk.f32.vlgmr.msra.gmra.mxu1 %vm1008_vm2, %v19965_v44  ;;  %17751 = vmatprep.subr.mxu1 %v18548_v1 }
0x2649   : > { %17752 = vmatpush3.msk.msra.mxu1 %vm1051_vm3, %v15831_v12  ;;  %17759 = vmatprep.mubr.msk.f32.mxu1 %vm18549_vm0, %v18548_v1 }
0x264a   : > { %17753 = vmatprep.subr.mxu1 %v18548_v1 }
0x264b   : > { %17754 = vmatpush3.msra.mxu1 %v15830_v36  ;;  %v15807_v36 = vld [vmem:[%s18609_s19 + $0x10] ss:$0 sm:$0xff] }
0x264c   : > { %17755 = vmatprep.subr.mxu1 %v18548_v1 }
0x264d   : > { %17756 = vmatpush3.msra.mxu1 %v15829_v37 }
0x264e   : > { %17757 = vmatprep.subr.mxu1 %v18548_v1 }
0x264f   : > { %17758 = vmatpush3.msra.mxu1 %v15828_v38  ;;  %v15880_v38 = vld [vmem:[%s20840_s3 + $0x260] sm:$0xff] }
0x2650   : > { %17760 = vmatmul.mubr.msk.f32.vlgmr.msra.gmra.mxu1 %vm1008_vm2, %v19965_v44  ;;  %17778 = vmatprep.subr.mxu1 %v18548_v1 }
0x2651   : > { %17779 = vmatpush3.msk.msra.mxu1 %vm1051_vm3, %v15849_v39  ;;  %17786 = vmatprep.mubr.msk.f32.mxu1 %vm18549_vm0, %v18548_v1 }
0x2652   : > { %17780 = vmatprep.subr.mxu1 %v18548_v1 }
0x2653   : > { %17781 = vmatpush3.msra.mxu1 %v15848_v41  ;;  %v9877_v41 = vadd.f32 %v15807_v36, %v20029_v7 }
0x2654   : > { %17782 = vmatprep.subr.mxu1 %v18548_v1 }
0x2655   : > { %17783 = vmatpush3.msra.mxu1 %v15847_v52 }
0x2656   : > { %17784 = vmatprep.subr.mxu1 %v18548_v1 }
0x2657   : > { %17785 = vmatpush3.msra.mxu1 %v15846_v42 }
0x2658   : > { %17787 = vmatmul.mubr.msk.f32.vlgmr.msra.gmra.mxu1 %vm1008_vm2, %v19965_v44  ;;  %17800 = vmatprep.subr.mxu1 %v18548_v1 }
0x2659   : > { %17802 = vmatprep.mubr.msk.f32.mxu1 %vm18549_vm0, %v18548_v1 }
0x2700   : > { %v20102_v43 = vpop.f32.mrf.mxu1 }
0x2701   : > { %v10964_v20 = vsel %vm2711_vm5, %v20102_v43, -inf }
0x2702   : > { %10965 = vmax.xlane.f32.xlu0 %v10964_v20  ;;  %v17728_v46 = vpop.f32.mrf.mxu1 }
0x2706   : > { %10962 = vmax.xlane.f32.xlu0 %v10961_v47 }
0x2708   : > { %v10038_v48 = vpop.f32.mrf.mxu1 }
0x2709   : > { %v10039_v49 = vadd.f32 %v15817_v56, %v10038_v48 }
0x270a   : > { %v17739_v50 = vpop.f32.mrf.mxu1 }
0x270b   : > { %v10042_v62 = vmul.f32 0.4082483, %v10039_v49  ;;  %v15869_v50 = vld [vmem:[%s20839_s8 + $0x13] ss:$0 sm:$0xff] }
0x270d   : > { %17765 = vmatmul.mubr.msk.f32.vlgmr.msra.gmra.mxu0 %vm1294_vm4, %v10042_v62 }
0x270e   : > { %17768 = vmatpush3.msk.msra.mxu0 %vm1051_vm3, %v15841_v53  ;;  %17775 = vmatprep.mubr.msk.f32.mxu0 %vm18549_vm0, %v18548_v1  ;;  %v15781_v53 = vld [vmem:[%s18609_s19 + $0xf] ss:$0 sm:$0xff] }
0x270f   : > { %17769 = vmatprep.subr.mxu0 %v18548_v1 }
0x2710   : > { %17770 = vmatpush3.msra.mxu0 %v15840_v54  ;;  %v20117_v51 = vpop.f32.mrf.mxu1 }
0x2711   : > { %17771 = vmatprep.subr.mxu0 %v18548_v1 }
0x2712   : > { %17772 = vmatpush3.msra.mxu0 %v15839_v30  ;;  %v17761_v55 = vpop.f32.mrf.mxu1 }
0x2713   : > { %17773 = vmatprep.subr.mxu0 %v18548_v1  ;;  %v9542_v55 = vadd.f32 %v15781_v53, %v20042_v22 }
0x2714   : > { %17774 = vmatpush3.msra.mxu0 %v15838_v27 }
0x2715   : > { %17776 = vmatmul.mubr.msk.f32.vlgmr.msra.gmra.mxu0 %vm1008_vm2, %v19965_v44  ;;  %17789 = vmatprep.subr.mxu0 %v18548_v1 }
0x2716   : > { %17790 = vmatpush3.msk.msra.mxu0 %vm1051_vm3, %v15857_v6  ;;  %17797 = vmatprep.mubr.msk.f32.mxu0 %vm18549_vm0, %v18548_v1 }
0x2717   : > { %17791 = vmatprep.subr.mxu0 %v18548_v1 }
0x2718   : > { %17792 = vmatpush3.msra.mxu0 %v15856_v40  ;;  %v10460_v60 = vpop.f32.mrf.mxu1 }
0x2719   : > { %v10461_v61 = vadd.f32 %v15851_v58, %v10460_v60  ;;  %17793 = vmatprep.subr.mxu0 %v18548_v1 }
0x271a   : > { %17794 = vmatpush3.msra.mxu0 %v15855_v59  ;;  %v17788_v14 = vpop.f32.mrf.mxu1 }
0x271b   : > { %17795 = vmatprep.subr.mxu0 %v18548_v1  ;;  %17801 = vmatpush3.xpose.msk.msra.mxu1 %vm1294_vm4, %v10461_v61 }
0x271c   : > { %17796 = vmatpush3.msra.mxu0 %v15854_v2  ;;  %17805 = vmatprep.subr.mxu1 %v18548_v1 }
0x271d   : > { %17798 = vmatmul.mubr.msk.f32.vlgmr.msra.gmra.mxu0 %vm1008_vm2, %v19965_v44  ;;  %17816 = vmatprep.subr.mxu0 %v18548_v1 }
0x271e   : > { %17817 = vmatpush3.msk.msra.mxu0 %vm1051_vm3, %v15875_v4  ;;  %17824 = vmatprep.mubr.msk.f32.mxu0 %vm18549_vm0, %v18548_v1 }
0x271f   : > { %17818 = vmatprep.subr.mxu0 %v18548_v1 }
0x2720   : > { %17819 = vmatpush3.msra.mxu0 %v15874_v5 }
0x2721   : > { %17820 = vmatprep.subr.mxu0 %v18548_v1 }
0x2722   : > { %17821 = vmatpush3.msra.mxu0 %v15873_v34  ;;  %v15893_v34 = vld [vmem:[%s18614_s24 + $0x80] sm:$0x3f] }
0x2723   : > { %17822 = vmatprep.subr.mxu0 %v18548_v1 }
0x2724   : > { %17823 = vmatpush3.msra.mxu0 %v15872_v63  ;;  %v15833_v63 = vld [vmem:[%s18609_s19 + $0x11] ss:$0 sm:$0xff] }
0x2725   : > { %17825 = vmatmul.mubr.msk.f32.vlgmr.msra.gmra.mxu0 %vm1008_vm2, %v19965_v44  ;;  %17838 = vmatprep.subr.mxu0 %v18548_v1 }
0x2726   : > { %17840 = vmatprep.mubr.msk.f32.mxu0 %vm18549_vm0, %v18548_v1 }
0x278b   : > { %v10966_v8 = vpop.xlane.xlu0 %10965 }
0x278c   : > { %v10977_v9 = vsub.f32 %v20102_v43, %v10966_v8  ;;  %v10212_v8 = vadd.f32 %v15833_v63, %v20117_v51 }
0x278e   : > { %v10983_v10 = vmul.f32 1.442695, %v10977_v9 }
0x2790   : > { %18409 = vpow2.f32 %v10983_v10 }
0x279d   : > { %v18410_v11 = vpop.eup %18409 }
0x279e   : > { %v10994_v13 = vsel %vm2711_vm5, %v18410_v11, 0.0 }
0x279f   : > { %10995 = vadd.xlane.f32.xlu1 %v10994_v13 }
0x27cd   : > { %v20158_v0 = vpop.f32.mrf.mxu0 }
0x27ce   : > { %v10967_v15 = vsel %vm2711_vm5, %v20158_v0, -inf }
0x27cf   : > { %10968 = vmax.xlane.f32.xlu1 %v10967_v15  ;;  %v17766_v16 = vpop.f32.mrf.mxu0 }
0x27d5   : > { %v10373_v45 = vpop.f32.mrf.mxu0 }
0x27d6   : > { %v10374_v18 = vadd.f32 %v15843_v17, %v10373_v45  ;;  %v15891_v45 = vld [vmem:[%s18614_s24 + $0x78] sm:$0x3f] }
0x27d7   : > { %v17777_v33 = vpop.f32.mrf.mxu0 }
0x27d8   : > { %v10377_v23 = vmul.f32 0.4082483, %v10374_v18 }
0x27da   : > { %17803 = vmatmul.mubr.msk.f32.vlgmr.msra.gmra.mxu1 %vm1294_vm4, %v10377_v23 }
0x27db   : > { %17806 = vmatpush3.msk.msra.mxu1 %vm1051_vm3, %v15867_v24  ;;  %17813 = vmatprep.mubr.msk.f32.mxu1 %vm18549_vm0, %v18548_v1 }
0x27dc   : > { %17807 = vmatprep.subr.mxu1 %v18548_v1 }
0x27dd   : > { %17808 = vmatpush3.msra.mxu1 %v15866_v25  ;;  %v20171_v28 = vpop.f32.mrf.mxu0 }
0x27de   : > { %17809 = vmatprep.subr.mxu1 %v18548_v1 }
0x27df   : > { %17810 = vmatpush3.msra.mxu1 %v15865_v26  ;;  %v17799_v3 = vpop.f32.mrf.mxu0 }
0x27e0   : > { %17811 = vmatprep.subr.mxu1 %v18548_v1 }
0x27e1   : > { %17812 = vmatpush3.msra.mxu1 %v15864_v29 }
0x27e2   : > { %17814 = vmatmul.mubr.msk.f32.vlgmr.msra.gmra.mxu1 %vm1008_vm2, %v19965_v44  ;;  %17827 = vmatprep.subr.mxu1 %v18548_v1 }
0x27e3   : > { %17828 = vmatpush3.msk.msra.mxu1 %vm1051_vm3, %v15883_v31  ;;  %17835 = vmatprep.mubr.msk.f32.mxu1 %vm18549_vm0, %v18548_v1 }
0x27e4   : > { %17829 = vmatprep.subr.mxu1 %v18548_v1 }
0x27e5   : > { %17830 = vmatpush3.msra.mxu1 %v15882_v32  ;;  %v10795_v12 = vpop.f32.mrf.mxu0  ;;  %v15859_v32 = vld [vmem:[%s18609_s19 + $0x12] ss:$0 sm:$0xff] }
0x27e6   : > { %v10796_v37 = vadd.f32 %v15877_v57, %v10795_v12  ;;  %17831 = vmatprep.subr.mxu1 %v18548_v1 }
0x27e7   : > { %17832 = vmatpush3.msra.mxu1 %v15881_v35  ;;  %v17826_v39 = vpop.f32.mrf.mxu0 }
0x27e8   : > { %17833 = vmatprep.subr.mxu1 %v18548_v1  ;;  %17839 = vmatpush3.xpose.msk.msra.mxu0 %vm1294_vm4, %v10796_v37  ;;  %v10547_v37 = vadd.f32 %v15859_v32, %v20171_v28  ;;  %v15899_v28 = vld [vmem:[%s18614_s24 + $0x88] sm:$0x3f] }
0x27e9   : > { %17834 = vmatpush3.msra.mxu1 %v15880_v38  ;;  %17843 = vmatprep.subr.mxu0 %v18548_v1  ;;  %v15885_v38 = vld [vmem:[%s18609_s19 + $0x13] ss:$0 sm:$0xff] }
0x27ea   : > { %17836 = vmatmul.mubr.msk.f32.vlgmr.msra.gmra.mxu1 %vm1008_vm2, %v19965_v44  ;;  %17848 = vmatprep.subr.mxu1 %v18548_v1  ;;  %v10963_v44 = vpop.xlane.xlu0 %10962 }
0x27eb   : > { %17849 = vmatpush3.msra.mxu1 %v9877_v41  ;;  %17850 = vmatprep.mubr.msk.f32.mxu1 %vm18549_vm0, %v18548_v1  ;;  %v10976_v7 = vsub.f32 %v20054_v21, %v10963_v44 }
0x27ec   : > { %17858 = vmatprep.subr.mxu1 %v18548_v1 }
0x27ed   : > { %v10981_v20 = vmul.f32 1.442695, %v10976_v7 }
0x2828   : > { %v10996_v52 = vpop.xlane.xlu1 %10995 }
0x2829   : > { %18411 = vrcp.f32 %v10996_v52 }
0x282a   : > { %18413 = vpow2.f32 %v10981_v20  ;;  %v15903_v20 = vld [vmem:[%s18614_s24 + $0x90] sm:$0x3f] }
0x2836   : > { %v18412_v42 = vpop.eup %18411 }
0x2837   : > { %v11009_v43 = vmul.f32 %v18412_v42, %v18410_v11  ;;  %v18414_v56 = vpop.eup %18413 }
0x2838   : > { %v10991_v49 = vsel %vm2711_vm5, %v18414_v56, 0.0 }
0x2839   : > { %17851 = vmatmul.mubr.msk.f32.vlgmr.msra.gmra.mxu1 %vm2711_vm5, %v11009_v43 }
0x283a   : > { %17860 = vmatprep.mubr.msk.f32.mxu1 %vm18549_vm0, %v18548_v1  ;;  %17859 = vmatpush3.msk.msra.mxu1 %vm1051_vm3, %v15891_v45  ;;  %v15932_v45 = vld [vmem:[%s20845_s16 + $0x1a8] sm:$0xff] }
0x283b   : > { %17868 = vmatprep.subr.mxu1 %v18548_v1 }
0x2858   : > { %v10969_v9 = vpop.xlane.xlu1 %10968 }
0x2859   : > { %v10978_v10 = vsub.f32 %v20158_v0, %v10969_v9  ;;  %v15917_v9 = vld [vmem:[%s18634_s20 + $0x68] sm:$0xff] }
0x285b   : > { %v10985_v11 = vmul.f32 1.442695, %v10978_v10  ;;  %v15916_v10 = vld [vmem:[%s18634_s20 + $0x60] sm:$0xff] }
0x289a   : > { %v10622_v46 = vpop.f32.mrf.mxu1 }
0x289b   : > { %v10970_v47 = vsel %vm2711_vm5, %v10622_v46, -inf }
0x289c   : > { %10971 = vmax.xlane.f32.xlu0 %v10970_v47  ;;  %v17804_v48 = vpop.f32.mrf.mxu1 }
0x28a0   : > { %10992 = vadd.xlane.f32.xlu0 %v10991_v49 }
0x28a2   : > { %v10708_v62 = vpop.f32.mrf.mxu1 }
0x28a3   : > { %v10709_v54 = vadd.f32 %v15869_v50, %v10708_v62 }
0x28a4   : > { %v17815_v30 = vpop.f32.mrf.mxu1 }
0x28a5   : > { %v10712_v27 = vmul.f32 0.4082483, %v10709_v54 }
0x28a7   : > { %17841 = vmatmul.mubr.msk.f32.vlgmr.msra.gmra.mxu0 %vm1294_vm4, %v10712_v27 }
0x28a8   : > { %17844 = vmatpush3.msra.mxu0 %v9542_v55  ;;  %17845 = vmatprep.mubr.msk.f32.mxu0 %vm18549_vm0, %v18548_v1 }
0x28a9   : > { %17853 = vmatprep.subr.mxu0 %v18548_v1 }
0x28aa   : > { %v20213_v21 = vpop.f32.mrf.mxu1 }
0x28ab   : > { %v10882_v41 = vadd.f32 %v15885_v38, %v20213_v21  ;;  %v15924_v38 = vld [vmem:[%s20845_s16 + $0x168] sm:$0xff] }
0x28ac   : > { %v17837_v6 = vpop.f32.mrf.mxu1 }
0x28f9   : > { %v11160_v40 = vpop.f32.mrf.mxu1 }
0x28fb   : > { %v17852_v58 = vpop.f32.mrf.mxu1 }
0x2925   : > { %v10972_v59 = vpop.xlane.xlu0 %10971 }
0x2926   : > { %v10979_v60 = vsub.f32 %v10622_v46, %v10972_v59  ;;  %v15911_v59 = vld [vmem:[%s18619_s30 + $0x3] ss:$0 sm:$0xff] }
0x2928   : > { %v10987_v61 = vmul.f32 1.442695, %v10979_v60 }
0x2929   : > { %v10993_v2 = vpop.xlane.xlu0 %10992 }
0x292a   : > { %18415 = vpow2.f32 %v10987_v61 }
0x292b   : > { %18417 = vrcp.f32 %v10993_v2 }
0x292c   : > { %18419 = vpow2.f32 %v10985_v11  ;;  %v15938_v11 = vld [vmem:[%s20845_s16 + $0x1d8] sm:$0xff] }
0x2937   : > { %v18416_v22 = vpop.eup %18415 }
0x2938   : > { %v18418_v14 = vpop.eup %18417  ;;  %v11000_v4 = vsel %vm2711_vm5, %v18416_v22, 0.0 }
0x2939   : > { %v11007_v5 = vmul.f32 %v18418_v14, %v18414_v56  ;;  %11001 = vadd.xlane.f32.xlu0 %v11000_v4  ;;  %v18420_v16 = vpop.eup %18419  ;;  %v15907_v56 = vld [vmem:[%s18614_s24 + $0x98] sm:$0x3f] }
0x293a   : > { %v10997_v17 = vsel %vm2711_vm5, %v18420_v16, 0.0 }
0x293b   : > { %17846 = vmatmul.mubr.msk.f32.vlgmr.msra.gmra.mxu0 %vm2711_vm5, %v11007_v5 }
0x293c   : > { %17854 = vmatpush3.msk.msra.mxu0 %vm1051_vm3, %v15893_v34  ;;  %17855 = vmatprep.mubr.msk.f32.mxu0 %vm18549_vm0, %v18548_v1 }
0x293d   : > { %17863 = vmatprep.subr.mxu0 %v18548_v1 }
0x293f   : > { %17856 = vmatmul.mubr.msk.f32.vlgmr.msra.gmra.mxu0 %vm1294_vm4, %v11160_v40 }
0x2940   : > { %17864 = vmatpush3.msra.mxu0 %v10212_v8  ;;  %17865 = vmatprep.mubr.msk.f32.mxu0 %vm18549_vm0, %v18548_v1  ;;  %v15919_v8 = vld [vmem:[%s18634_s20 + $0x78] sm:$0x3f] }
0x2941   : > { %17873 = vmatprep.subr.mxu0 %v18548_v1 }
0x2967   : > { %v10957_v13 = vpop.f32.mrf.mxu0 }
0x2968   : > { %v10973_v15 = vsel %vm2711_vm5, %v10957_v13, -inf }
0x2969   : > { %10974 = vmax.xlane.f32.xlu1 %v10973_v15  ;;  %v17842_v51 = vpop.f32.mrf.mxu0  ;;  %v15936_v15 = vld [vmem:[%s20845_s16 + $0x1c8] sm:$0xff] }
0x296a   : > { %v15934_v51 = vld [vmem:[%s20845_s16 + $0x1b8] sm:$0xff] }
0x296d   : > { %10998 = vadd.xlane.f32.xlu1 %v10997_v17  ;;  %v15933_v17 = vld [vmem:[%s20845_s16 + $0x1b0] sm:$0xff] }
0x29c2   : > { %v11002_v24 = vpop.xlane.xlu0 %11001 }
0x29f2   : > { %v10975_v18 = vpop.xlane.xlu1 %10974 }
0x29f3   : > { %v10980_v33 = vsub.f32 %v10957_v13, %v10975_v18  ;;  %v15937_v13 = vld [vmem:[%s20845_s16 + $0x1d0] sm:$0xff]  ;;  %v15931_v18 = vld [vmem:[%s20845_s16 + $0x1a0] sm:$0xff] }
0x29f5   : > { %v10989_v0 = vmul.f32 1.442695, %v10980_v33  ;;  %v15930_v33 = vld [vmem:[%s20845_s16 + $0x198] sm:$0xff] }
0x29f6   : > { %v10999_v23 = vpop.xlane.xlu1 %10998 }
0x29f7   : > { %18421 = vpow2.f32 %v10989_v0  ;;  %v15929_v0 = vld [vmem:[%s20845_s16 + $0x190] sm:$0xff] }
0x29f8   : > { %18423 = vrcp.f32 %v10999_v23  ;;  %v15928_v23 = vld [vmem:[%s20845_s16 + $0x188] sm:$0xff] }
0x29f9   : > { %18425 = vrcp.f32 %v11002_v24  ;;  %v15927_v24 = vld [vmem:[%s20845_s16 + $0x180] sm:$0xff] }
0x29fb   : > { %v11085_v25 = vpop.f32.mrf.mxu0 }
0x29fc   : > { %17861 = vmatmul.mubr.msk.f32.vlgmr.msra.gmra.mxu1 %vm1294_vm4, %v11085_v25 }
0x29fd   : > { %v17847_v26 = vpop.f32.mrf.mxu0  ;;  %17870 = vmatprep.mubr.msk.f32.mxu1 %vm18549_vm0, %v18548_v1  ;;  %17869 = vmatpush3.msk.msra.mxu1 %vm1051_vm3, %v15899_v28 }
0x29fe   : > { %17878 = vmatprep.subr.mxu1 %v18548_v1 }
0x29ff   : > { %v11238_v29 = vpop.f32.mrf.mxu0 }
0x2a01   : > { %v17857_v3 = vpop.f32.mrf.mxu0 }
0x2a04   : > { %v18422_v31 = vpop.eup %18421 }
0x2a05   : > { %v18424_v57 = vpop.eup %18423  ;;  %v11003_v35 = vsel %vm2711_vm5, %v18422_v31, 0.0 }
0x2a06   : > { %v11011_v12 = vmul.f32 %v18424_v57, %v18420_v16  ;;  %11004 = vadd.xlane.f32.xlu1 %v11003_v35  ;;  %v18426_v36 = vpop.eup %18425  ;;  %v15935_v16 = vld [vmem:[%s20845_s16 + $0x1c0] sm:$0xff] }
0x2a07   : > { %v11013_v39 = vmul.f32 %v18426_v36, %v18416_v22  ;;  %v15915_v57 = vld [vmem:[%s20847_s23 + $0x3] ss:$0 sm:$0xff]  ;;  %v15926_v36 = vld [vmem:[%s20845_s16 + $0x178] sm:$0xff] }
0x2a08   : > { %17866 = vmatmul.mubr.msk.f32.vlgmr.msra.gmra.mxu0 %vm2711_vm5, %v11011_v12 }
0x2a09   : > { %17874 = vmatpush3.msra.mxu0 %v10547_v37  ;;  %17875 = vmatprep.mubr.msk.f32.mxu0 %vm18549_vm0, %v18548_v1  ;;  %v15925_v37 = vld [vmem:[%s20845_s16 + $0x170] sm:$0xff] }
0x2a0a   : > { %17883 = vmatprep.subr.mxu0 %v18548_v1 }
0x2a0c   : > { %17876 = vmatmul.mubr.msk.f32.vlgmr.msra.gmra.mxu0 %vm2711_vm5, %v11013_v39  ;;  %v15921_v39 = vld [vmem:[%s20848_s5 + $0x3] ss:$0 sm:$0xff] }
0x2a0d   : > { %17884 = vmatpush3.msra.mxu0 %v10882_v41  ;;  %17885 = vmatprep.mubr.msk.f32.mxu0 %vm18549_vm0, %v18548_v1 }
0x2a0e   : > { %17893 = vmatprep.subr.mxu0 %v18548_v1 }
0x2a8f   : > { %v11005_v52 = vpop.xlane.xlu1 %11004 }
0x2a90   : > { %18427 = vrcp.f32 %v11005_v52 }
0x2a9d   : > { %v18428_v42 = vpop.eup %18427 }
0x2a9e   : > { %v11015_v43 = vmul.f32 %v18428_v42, %v18422_v31  ;;  %v15914_v31 = vld [vmem:[%s20846_s22 + $0x3] ss:$0 sm:$0xff] }
0x2aa0   : > { %17886 = vmatmul.mubr.msk.f32.vlgmr.msra.gmra.mxu0 %vm2711_vm5, %v11015_v43 }
0x2aa1   : > { %17901 = vmatprep.mubr.msk.f32.mxu0 %vm18549_vm0, %v18548_v1  ;;  %17894 = vmatpush3.msk.msra.mxu0 %vm1051_vm3, %v15919_v8  ;;  %v15956_v8 = vld [vmem:[%s18589_s29 + $0x290] sm:$0xff] }
0x2aa2   : > { %17895 = vmatprep.subr.mxu0 %v18548_v1 }
0x2abc   : > { %v11314_v44 = vpop.f32.mrf.mxu1 }
0x2abd   : > { %v11315_v53 = vadd.f32 %v11314_v44, %v11238_v29  ;;  %v15941_v44 = vld [vmem:[%s20849_s9 + $0x3] ss:$0 sm:$0xff] }
0x2abe   : > { %v17862_v7 = vpop.f32.mrf.mxu1 }
0x2ac8   : > { %v11387_v46 = vpop.f32.mrf.mxu0 }
0x2ac9   : > { %17871 = vmatmul.mubr.msk.f32.vlgmr.msra.gmra.mxu1 %vm1294_vm4, %v11387_v46 }
0x2aca   : > { %v17867_v47 = vpop.f32.mrf.mxu0  ;;  %17879 = vmatpush3.msk.msra.mxu1 %vm1051_vm3, %v15903_v20  ;;  %17880 = vmatprep.mubr.msk.f32.mxu1 %vm18549_vm0, %v18548_v1 }
0x2acb   : > { %17888 = vmatprep.subr.mxu1 %v18548_v1 }
0x2acc   : > { %v11539_v48 = vpop.f32.mrf.mxu0 }
0x2acd   : > { %17881 = vmatmul.mubr.msk.f32.vlgmr.msra.gmra.mxu1 %vm1294_vm4, %v11539_v48 }
0x2ace   : > { %v17877_v49 = vpop.f32.mrf.mxu0  ;;  %17889 = vmatpush3.msk.msra.mxu1 %vm1051_vm3, %v15907_v56  ;;  %17890 = vmatprep.mubr.msk.f32.mxu1 %vm18549_vm0, %v18548_v1 }
0x2acf   : > { %17904 = vmatprep.subr.mxu1 %v18548_v1 }
0x2b60   : > { %v11691_v50 = vpop.f32.mrf.mxu0 }
0x2b61   : > { %17891 = vmatmul.mubr.msk.f32.vlgmr.msra.gmra.mxu1 %vm1294_vm4, %v11691_v50 }
0x2b62   : > { %v17887_v62 = vpop.f32.mrf.mxu0  ;;  %17934 = vmatprep.mubr.msk.f32.mxu1 %vm18549_vm0, %v18548_v1  ;;  %17905 = vmatpush3.msra.mxu1 %v15938_v11  ;;  %v15954_v11 = vld [vmem:[%s18589_s29 + $0x280] sm:$0xff] }
0x2b63   : > { %17906 = vmatprep.subr.mxu1 %v18548_v1 }
0x2b64   : > { %17907 = vmatpush3.msra.mxu1 %v15937_v13  ;;  %v15988_v13 = vld [vmem:[%s20840_s3 + $0x2a0] sm:$0xff] }
0x2b65   : > { %17908 = vmatprep.subr.mxu1 %v18548_v1 }
0x2b66   : > { %17909 = vmatpush3.msra.mxu1 %v15936_v15  ;;  %v15965_v15 = vld [vmem:[%s20840_s3 + $0x298] sm:$0x3f] }
0x2b67   : > { %17910 = vmatprep.subr.mxu1 %v18548_v1 }
0x2b68   : > { %17911 = vmatpush3.msra.mxu1 %v15935_v16  ;;  %v16009_v16 = vld [vmem:[%s18589_s29 + $0x2d8] sm:$0x3f] }
0x2b69   : > { %17912 = vmatprep.subr.mxu1 %v18548_v1 }
0x2b6a   : > { %17913 = vmatpush3.msra.mxu1 %v15934_v51  ;;  %v15964_v51 = vld [vmem:[%s20840_s3 + $0x290] sm:$0xff] }
0x2b6b   : > { %17914 = vmatprep.subr.mxu1 %v18548_v1 }
0x2b6c   : > { %17915 = vmatpush3.msra.mxu1 %v15933_v17  ;;  %v16008_v17 = vld [vmem:[%s18589_s29 + $0x2d0] sm:$0xff] }
0x2b6d   : > { %17916 = vmatprep.subr.mxu1 %v18548_v1 }
0x2b6e   : > { %17917 = vmatpush3.msra.mxu1 %v15932_v45  ;;  %v15963_v45 = vld [vmem:[%s20840_s3 + $0x288] sm:$0xff] }
0x2b6f   : > { %17918 = vmatprep.subr.mxu1 %v18548_v1 }
0x2b70   : > { %17919 = vmatpush3.msra.mxu1 %v15931_v18  ;;  %v16007_v18 = vld [vmem:[%s18589_s29 + $0x2c8] sm:$0xff] }
0x2b71   : > { %17920 = vmatprep.subr.mxu1 %v18548_v1 }
0x2b72   : > { %17921 = vmatpush3.msra.mxu1 %v15930_v33  ;;  %v15962_v33 = vld [vmem:[%s20840_s3 + $0x280] sm:$0xff] }
0x2b73   : > { %17922 = vmatprep.subr.mxu1 %v18548_v1 }
0x2b74   : > { %17923 = vmatpush3.msra.mxu1 %v15929_v0  ;;  %v16006_v0 = vld [vmem:[%s18589_s29 + $0x2c0] sm:$0xff] }
0x2b75   : > { %17924 = vmatprep.subr.mxu1 %v18548_v1 }
0x2b76   : > { %17925 = vmatpush3.msra.mxu1 %v15928_v23 }
0x2b77   : > { %17926 = vmatprep.subr.mxu1 %v18548_v1 }
0x2b78   : > { %17927 = vmatpush3.msra.mxu1 %v15927_v24 }
0x2b79   : > { %17928 = vmatprep.subr.mxu1 %v18548_v1 }
0x2b7a   : > { %17929 = vmatpush3.msra.mxu1 %v15926_v36 }
0x2b7b   : > { %17930 = vmatprep.subr.mxu1 %v18548_v1 }
0x2b7c   : > { %17931 = vmatpush3.msra.mxu1 %v15925_v37 }
0x2b7d   : > { %17932 = vmatprep.subr.mxu1 %v18548_v1 }
0x2b7e   : > { %17933 = vmatpush3.msra.mxu1 %v15924_v38  ;;  %v15983_v38 = vld [vmem:[%s18589_s29 + $0x2b8] sm:$0x3f] }
0x2b7f   : > { %17975 = vmatprep.subr.mxu1 %v18548_v1 }
0x2b89   : > { %v11465_v54 = vpop.f32.mrf.mxu1 }
0x2b8a   : > { %v11469_v30 = vadd.f32 %v11465_v54, %v11315_v53  ;;  %v15949_v53 = vld [vmem:[%s18584_s25 + $0x298] sm:$0x3f] }
0x2b8b   : > { %v17872_v27 = vpop.f32.mrf.mxu1  ;;  %v15975_v54 = vld [vmem:[%s18584_s25 + $0x2b8] sm:$0x3f] }
0x2b8c   : > { %v15974_v27 = vld [vmem:[%s18584_s25 + $0x2b0] sm:$0xff] }
0x2b8d   : > { %v11617_v55 = vpop.f32.mrf.mxu1 }
0x2b8e   : > { %v11621_v21 = vadd.f32 %v11617_v55, %v11469_v30  ;;  %v15948_v30 = vld [vmem:[%s18584_s25 + $0x290] sm:$0xff]  ;;  %v15947_v55 = vld [vmem:[%s18584_s25 + $0x288] sm:$0xff] }
0x2b8f   : > { %v17882_v6 = vpop.f32.mrf.mxu1 }
0x2b90   : > { %v15946_v6 = vld [vmem:[%s18584_s25 + $0x280] sm:$0xff] }
0x2c21   : > { %v11769_v40 = vpop.f32.mrf.mxu1 }
0x2c22   : > { %v11773_v58 = vadd.f32 %v11769_v40, %v11621_v21  ;;  %v15973_v21 = vld [vmem:[%s18584_s25 + $0x2a8] sm:$0xff]  ;;  %v15972_v40 = vld [vmem:[%s18584_s25 + $0x2a0] sm:$0xff] }
0x2c23   : > { %v17892_v60 = vpop.f32.mrf.mxu1 }
0x2c24   : > { %v11774_v61 = vadd.f32 %v11773_v58, %v19939_v19  ;;  %v15918_v19 = vld [vmem:[%s18634_s20 + $0x70] sm:$0xff] }
0x2c25   : > { %17896 = vmatpush3.msra.mxu0 %v15918_v19  ;;  %v15990_v19 = vld [vmem:[%s20840_s3 + $0x2b0] sm:$0xff] }
0x2c26   : > { %v20273_v2 = vadd.f32 %v15911_v59, %v11774_v61  ;;  %17897 = vmatprep.subr.mxu0 %v18548_v1 }
0x2c27   : > { %17898 = vmatpush3.msra.mxu0 %v15917_v9  ;;  %v15955_v9 = vld [vmem:[%s18589_s29 + $0x288] sm:$0xff] }
0x2c28   : > { %v11788_v22 = vsel %vm1008_vm2, %v20273_v2, 0.0  ;;  %17899 = vmatprep.subr.mxu0 %v18548_v1 }
0x2c29   : > { %11789 = vadd.xlane.f32.xlu0 %v11788_v22  ;;  %17900 = vmatpush3.msra.mxu0 %v15916_v10  ;;  %v15989_v10 = vld [vmem:[%s20840_s3 + $0x2a8] sm:$0xff] }
0x2c2a   : > { %17937 = vmatprep.subr.mxu0 %v18548_v1 }
0x2cb2   : > { %v11790_v14 = vpop.xlane.xlu0 %11789 }
0x2cb3   : > { %v11791_v4 = vmul.f32 0.033333335, %v11790_v14  ;;  %v15945_v14 = vld [vmem:[%s18579_s21 + $0x4] ss:$0 sm:$0xff] }
0x2cb5   : > { %v11792_v5 = vsub.f32 %v20273_v2, %v11791_v4 }
0x2cb7   : > { %v11793_v34 = vmul.f32 %v11792_v5, %v11792_v5 }
0x2cb9   : > { %v11794_v63 = vsel %vm1008_vm2, %v11793_v34, 0.0  ;;  %v15957_v34 = vld [vmem:[%s18589_s29 + $0x298] sm:$0x3f] }
0x2cba   : > { %11795 = vadd.xlane.f32.xlu1 %v11794_v63  ;;  %v15991_v63 = vld [vmem:[%s20840_s3 + $0x2b8] sm:$0x3f] }
0x2d43   : > { %v11796_v25 = vpop.xlane.xlu1 %11795 }
0x2d44   : > { %v11797_v26 = vmul.f32 0.033333335, %v11796_v25 }
0x2d46   : > { %v11798_v29 = vadd.f32 1e-05, %v11797_v26 }
0x2d48   : > { %18429 = vrsqrt.f32 %v11798_v29  ;;  %v15951_v29 = vld [vmem:[%s20839_s8 + $0x14] ss:$0 sm:$0xff] }
0x2d55   : > { %v18430_v3 = vpop.eup %18429 }
0x2d56   : > { %v11800_v32 = vmul.f32 %v18430_v3, %v11792_v5  ;;  %v15959_v3 = vld [vmem:[%s20836_s14 + $0x14] ss:$0 sm:$0xff] }
0x2d58   : > { %v11807_v35 = vmul.f32 %v15914_v31, %v11800_v32 }
0x2d5a   : > { %v11814_v12 = vadd.f32 %v15915_v57, %v11807_v35 }
0x2d5c   : > { %17902 = vmatmul.mubr.msk.f32.vlgmr.msra.gmra.mxu0 %vm1008_vm2, %v11814_v12 }
0x2d5d   : > { %17945 = vmatprep.mubr.msk.f32.mxu0 %vm18549_vm0, %v18548_v1  ;;  %17938 = vmatpush3.msk.msra.mxu0 %vm1051_vm3, %v15949_v53 }
0x2d5e   : > { %17939 = vmatprep.subr.mxu0 %v18548_v1 }
0x2d5f   : > { %17940 = vmatpush3.msra.mxu0 %v15948_v30 }
0x2d60   : > { %17941 = vmatprep.subr.mxu0 %v18548_v1 }
0x2d61   : > { %17942 = vmatpush3.msra.mxu0 %v15947_v55  ;;  %v16000_v55 = vld [vmem:[%s18584_s25 + $0x2d0] sm:$0xff] }
0x2d62   : > { %17943 = vmatprep.subr.mxu0 %v18548_v1 }
0x2d63   : > { %17944 = vmatpush3.msra.mxu0 %v15946_v6  ;;  %v15998_v6 = vld [vmem:[%s18584_s25 + $0x2c0] sm:$0xff] }
0x2d64   : > { %17948 = vmatprep.subr.mxu0 %v18548_v1 }
0x2e1c   : > { %v11900_v41 = vpop.f32.mrf.mxu0 }
0x2e1d   : > { %v11901_v28 = vadd.f32 %v15921_v39, %v11900_v41  ;;  %v15982_v39 = vld [vmem:[%s18589_s29 + $0x2b0] sm:$0xff] }
0x2e1e   : > { %v17903_v52 = vpop.f32.mrf.mxu0  ;;  %v16011_v41 = vld [vmem:[%s20836_s14 + $0x16] ss:$0 sm:$0xff] }
0x2e1f   : > { %v11904_v42 = vmax.f32 %v11901_v28, 0.0  ;;  %v15981_v28 = vld [vmem:[%s18589_s29 + $0x2a8] sm:$0xff] }
0x2e21   : > { %17935 = vmatmul.mubr.msk.f32.vlgmr.msra.gmra.mxu1 %vm3665_vm6, %v11904_v42 }
0x2e22   : > { %17983 = vmatprep.mubr.msk.f32.mxu1 %vm18549_vm0, %v18548_v1  ;;  %17976 = vmatpush3.msk.msra.mxu1 %vm1051_vm3, %v15975_v54 }
0x2e23   : > { %17977 = vmatprep.subr.mxu1 %v18548_v1 }
0x2e24   : > { %17978 = vmatpush3.msra.mxu1 %v15974_v27  ;;  %v16001_v27 = vld [vmem:[%s18584_s25 + $0x2d8] sm:$0x3f] }
0x2e25   : > { %17979 = vmatprep.subr.mxu1 %v18548_v1 }
0x2e26   : > { %17980 = vmatpush3.msra.mxu1 %v15973_v21  ;;  %v15999_v21 = vld [vmem:[%s18584_s25 + $0x2c8] sm:$0xff] }
0x2e27   : > { %17981 = vmatprep.subr.mxu1 %v18548_v1 }
0x2e28   : > { %17982 = vmatpush3.msra.mxu1 %v15972_v40  ;;  %v16017_v40 = vld [vmem:[%s20840_s3 + $0x2d8] sm:$0x3f] }
0x2e29   : > { %17997 = vmatprep.subr.mxu1 %v18548_v1 }
0x2ee1   : > { %v11990_v43 = vpop.f32.mrf.mxu1 }
0x2ee2   : > { %v11994_v7 = vadd.f32 %v11990_v43, %v20273_v2  ;;  %v15944_v2 = vld [vmem:[%s18574_s17 + $0x4] ss:$0 sm:$0xff] }
0x2ee3   : > { %v17936_v20 = vpop.f32.mrf.mxu1  ;;  %v15980_v43 = vld [vmem:[%s18589_s29 + $0x2a0] sm:$0xff] }
0x2ee4   : > { %v20329_v46 = vadd.f32 %v15941_v44, %v11994_v7 }
0x2ee6   : > { %v12008_v47 = vsel %vm1008_vm2, %v20329_v46, 0.0 }
0x2ee7   : > { %12009 = vadd.xlane.f32.xlu0 %v12008_v47 }
0x2f70   : > { %v12010_v56 = vpop.xlane.xlu0 %12009 }
0x2f71   : > { %v12011_v48 = vmul.f32 0.033333335, %v12010_v56 }
0x2f73   : > { %v12012_v49 = vsub.f32 %v20329_v46, %v12011_v48  ;;  %v15977_v48 = vld [vmem:[%s20839_s8 + $0x15] ss:$0 sm:$0xff] }
0x2f75   : > { %v12013_v50 = vmul.f32 %v12012_v49, %v12012_v49 }
0x2f77   : > { %v12014_v62 = vsel %vm1008_vm2, %v12013_v50, 0.0 }
0x2f78   : > { %12015 = vadd.xlane.f32.xlu1 %v12014_v62 }
0x3001   : > { %v12016_v58 = vpop.xlane.xlu1 %12015 }
0x3002   : > { %v12017_v59 = vmul.f32 0.033333335, %v12016_v58  ;;  %v16016_v58 = vld [vmem:[%s20840_s3 + $0x2d0] sm:$0xff] }
0x3004   : > { %v12018_v60 = vadd.f32 1e-05, %v12017_v59  ;;  %v16015_v59 = vld [vmem:[%s20840_s3 + $0x2c8] sm:$0xff] }
0x3006   : > { %18431 = vrsqrt.f32 %v12018_v60  ;;  %v16014_v60 = vld [vmem:[%s20840_s3 + $0x2c0] sm:$0xff] }
0x3013   : > { %v18432_v61 = vpop.eup %18431 }
0x3014   : > { %v12020_v22 = vmul.f32 %v18432_v61, %v12012_v49  ;;  %v15985_v49 = vld [vmem:[%s20836_s14 + $0x15] ss:$0 sm:$0xff]  ;;  %v16035_v61 = vld [vmem:[%s18589_s29 + $0x2f8] sm:$0x3f] }
0x3016   : > { %v12027_v4 = vmul.f32 %v15944_v2, %v12020_v22  ;;  %v16034_v2 = vld [vmem:[%s18589_s29 + $0x2f0] sm:$0xff]  ;;  %v16033_v22 = vld [vmem:[%s18589_s29 + $0x2e8] sm:$0xff] }
0x3018   : > { %v20355_v5 = vadd.f32 %v15945_v14, %v12027_v4  ;;  %v16032_v14 = vld [vmem:[%s18589_s29 + $0x2e0] sm:$0xff] }
0x301a   : > { %17946 = vmatmul.mubr.msk.f32.vlgmr.msra.gmra.mxu0 %vm1008_vm2, %v20355_v5  ;;  %17984 = vmatmul.mubr.msk.f32.vlgmr.msra.gmra.mxu1 %vm1008_vm2, %v20355_v5 }
0x301b   : > { %17949 = vmatpush3.msk.msra.mxu0 %vm1051_vm3, %v15957_v34  ;;  %17998 = vmatpush3.msk.msra.mxu1 %vm1051_vm3, %v15991_v63 }
0x301c   : > { %17950 = vmatprep.subr.mxu0 %v18548_v1  ;;  %17999 = vmatprep.subr.mxu1 %v18548_v1 }
0x301d   : > { %17951 = vmatpush3.msra.mxu0 %v15956_v8  ;;  %18000 = vmatpush3.msra.mxu1 %v15990_v19  ;;  %v16003_v19 = vld [vmem:[%s20839_s8 + $0x16] ss:$0 sm:$0xff] }
0x301e   : > { %17952 = vmatprep.subr.mxu0 %v18548_v1  ;;  %18001 = vmatprep.subr.mxu1 %v18548_v1 }
0x301f   : > { %17953 = vmatpush3.msra.mxu0 %v15955_v9  ;;  %18002 = vmatpush3.msra.mxu1 %v15989_v10 }
0x3020   : > { %17954 = vmatprep.subr.mxu0 %v18548_v1  ;;  %18003 = vmatprep.subr.mxu1 %v18548_v1 }
0x3021   : > { %17955 = vmatpush3.msra.mxu0 %v15954_v11  ;;  %17956 = vmatprep.mubr.msk.f32.mxu0 %vm18549_vm0, %v18548_v1 }
0x3022   : > { %18004 = vmatpush3.msra.mxu1 %v15988_v13  ;;  %18005 = vmatprep.mubr.msk.f32.mxu1 %vm18549_vm0, %v18548_v1 }
0x3023   : > { %17957 = vmatmul.mubr.msk.f32.vlgmr.msra.gmra.mxu0 %vm1008_vm2, %v20355_v5  ;;  %17959 = vmatprep.subr.mxu0 %v18548_v1 }
0x3024   : > { %18006 = vmatmul.mubr.msk.f32.vlgmr.msra.gmra.mxu1 %vm1008_vm2, %v20355_v5  ;;  %18024 = vmatprep.subr.mxu1 %v18548_v1 }
0x3025   : > { %17960 = vmatpush3.msk.msra.mxu0 %vm1051_vm3, %v15965_v15  ;;  %18025 = vmatpush3.msk.msra.mxu1 %vm1051_vm3, %v16009_v16  ;;  %v16027_v15 = vld [vmem:[%s18584_s25 + $0x2f8] sm:$0x3f]  ;;  %v16026_v16 = vld [vmem:[%s18584_s25 + $0x2f0] sm:$0xff] }
0x3026   : > { %17961 = vmatprep.subr.mxu0 %v18548_v1  ;;  %18026 = vmatprep.subr.mxu1 %v18548_v1 }
0x3027   : > { %17962 = vmatpush3.msra.mxu0 %v15964_v51  ;;  %18027 = vmatpush3.msra.mxu1 %v16008_v17  ;;  %v16025_v51 = vld [vmem:[%s18584_s25 + $0x2e8] sm:$0xff] }
0x3028   : > { %17963 = vmatprep.subr.mxu0 %v18548_v1  ;;  %18028 = vmatprep.subr.mxu1 %v18548_v1 }
0x3029   : > { %17964 = vmatpush3.msra.mxu0 %v15963_v45  ;;  %18029 = vmatpush3.msra.mxu1 %v16007_v18  ;;  %v16024_v45 = vld [vmem:[%s18584_s25 + $0x2e0] sm:$0xff] }
0x302a   : > { %17965 = vmatprep.subr.mxu0 %v18548_v1  ;;  %18030 = vmatprep.subr.mxu1 %v18548_v1 }
0x302b   : > { %17966 = vmatpush3.msra.mxu0 %v15962_v33  ;;  %17967 = vmatprep.mubr.msk.f32.mxu0 %vm18549_vm0, %v18548_v1  ;;  %v16043_v33 = vld [vmem:[%s20840_s3 + $0x2f8] sm:$0x3f] }
0x302c   : > { %18031 = vmatpush3.msra.mxu1 %v16006_v0  ;;  %18032 = vmatprep.mubr.msk.f32.mxu1 %vm18549_vm0, %v18548_v1  ;;  %v16042_v0 = vld [vmem:[%s20840_s3 + $0x2f0] sm:$0xff] }
0x302d   : > { %17968 = vmatmul.mubr.msk.f32.vlgmr.msra.gmra.mxu0 %vm1008_vm2, %v20355_v5  ;;  %18033 = vmatmul.mubr.msk.f32.vlgmr.msra.gmra.mxu1 %vm1008_vm2, %v20355_v5 }
0x302e   : > { %17970 = vmatprep.subr.mxu0 %v18548_v1  ;;  %17972 = vmatprep.mubr.msk.f32.mxu0 %vm18549_vm0, %v18548_v1 }
0x302f   : > { %18046 = vmatprep.subr.mxu1 %v18548_v1  ;;  %18048 = vmatprep.mubr.msk.f32.mxu1 %vm18549_vm0, %v18548_v1 }
0x30da   : > { %v12120_v23 = vpop.f32.mrf.mxu0  ;;  %v12455_v24 = vpop.f32.mrf.mxu1 }
0x30db   : > { %v12121_v31 = vadd.f32 %v15951_v29, %v12120_v23  ;;  %v12456_v50 = vadd.f32 %v15977_v48, %v12455_v24  ;;  %v16037_v23 = vld [vmem:[%s20836_s14 + $0x17] ss:$0 sm:$0xff]  ;;  %v16041_v24 = vld [vmem:[%s20840_s3 + $0x2e8] sm:$0xff]  ;;  %v16040_v29 = vld [vmem:[%s20840_s3 + $0x2e0] sm:$0xff] }
0x30dc   : > { %v17947_v25 = vpop.f32.mrf.mxu0  ;;  %v17985_v26 = vpop.f32.mrf.mxu1 }
0x30dd   : > { %v12124_v37 = vmul.f32 0.4082483, %v12121_v31  ;;  %v12459_v30 = vmul.f32 0.4082483, %v12456_v50  ;;  %v16061_v31 = vld [vmem:[%s18589_s29 + $0x318] sm:$0x3f] }
0x30de   : > { %v16052_v50 = vld [vmem:[%s18584_s25 + $0x310] sm:$0xff] }
0x30e3   : > { %v12207_v32 = vpop.f32.mrf.mxu0 }
0x30e4   : > { %v12208_v57 = vadd.f32 %v15959_v3, %v12207_v32  ;;  %v20419_v35 = vpop.f32.mrf.mxu1  ;;  %v16060_v32 = vld [vmem:[%s18589_s29 + $0x310] sm:$0xff] }
0x30e5   : > { %v17958_v12 = vpop.f32.mrf.mxu0 }
0x30e6   : > { %v18007_v36 = vpop.f32.mrf.mxu1  ;;  %17971 = vmatpush3.xpose.msk.msra.mxu0 %vm1294_vm4, %v12208_v57  ;;  %v16059_v57 = vld [vmem:[%s18589_s29 + $0x308] sm:$0xff]  ;;  %v16058_v12 = vld [vmem:[%s18589_s29 + $0x300] sm:$0xff] }
0x30e7   : > { %17986 = vmatprep.subr.mxu0 %v18548_v1 }
0x30e9   : > { %17973 = vmatmul.mubr.msk.f32.vlgmr.msra.gmra.mxu0 %vm1294_vm4, %v12124_v37 }
0x30ea   : > { %17987 = vmatpush3.msk.msra.mxu0 %vm1051_vm3, %v15983_v38  ;;  %17994 = vmatprep.mubr.msk.f32.mxu0 %vm18549_vm0, %v18548_v1 }
0x30eb   : > { %17988 = vmatprep.subr.mxu0 %v18548_v1 }
0x30ec   : > { %17989 = vmatpush3.msra.mxu0 %v15982_v39 }
0x30ed   : > { %v20432_v52 = vpop.f32.mrf.mxu0  ;;  %v12877_v42 = vpop.f32.mrf.mxu1  ;;  %17990 = vmatprep.subr.mxu0 %v18548_v1 }
0x30ee   : > { %v12878_v44 = vadd.f32 %v16011_v41, %v12877_v42  ;;  %17991 = vmatpush3.msra.mxu0 %v15981_v28 }
0x30ef   : > { %v17969_v7 = vpop.f32.mrf.mxu0  ;;  %v18034_v20 = vpop.f32.mrf.mxu1  ;;  %17992 = vmatprep.subr.mxu0 %v18548_v1 }
0x30f0   : > { %18047 = vmatpush3.xpose.msk.msra.mxu1 %vm1294_vm4, %v12878_v44  ;;  %17993 = vmatpush3.msra.mxu0 %v15980_v43  ;;  %v16029_v44 = vld [vmem:[%s20839_s8 + $0x17] ss:$0 sm:$0xff] }
0x30f1   : > { %17995 = vmatmul.mubr.msk.f32.vlgmr.msra.gmra.mxu0 %vm1008_vm2, %v20355_v5  ;;  %18008 = vmatprep.subr.mxu0 %v18548_v1 }
0x30f2   : > { %18010 = vmatprep.mubr.msk.f32.mxu0 %vm18549_vm0, %v18548_v1  ;;  %18051 = vmatprep.subr.mxu1 %v18548_v1 }
0x31a9   : > { %v20444_v47 = vpop.f32.mrf.mxu0 }
0x31aa   : > { %v13713_v8 = vsel %vm2711_vm5, %v20444_v47, -inf }
0x31ab   : > { %v17974_v56 = vpop.f32.mrf.mxu0 }
0x31b1   : > { %v12542_v62 = vpop.f32.mrf.mxu0 }
0x31b2   : > { %v12543_v53 = vadd.f32 %v15985_v49, %v12542_v62  ;;  %v16053_v49 = vld [vmem:[%s18584_s25 + $0x318] sm:$0x3f]  ;;  %v16051_v62 = vld [vmem:[%s18584_s25 + $0x308] sm:$0xff] }
0x31b3   : > { %v17996_v54 = vpop.f32.mrf.mxu0 }
0x31b4   : > { %18009 = vmatpush3.xpose.msk.msra.mxu0 %vm1294_vm4, %v12543_v53  ;;  %v16050_v54 = vld [vmem:[%s18584_s25 + $0x300] sm:$0xff] }
0x31b5   : > { %18013 = vmatprep.subr.mxu0 %v18548_v1 }
0x31b7   : > { %18011 = vmatmul.mubr.msk.f32.vlgmr.msra.gmra.mxu0 %vm1294_vm4, %v12459_v30 }
0x31b8   : > { %18014 = vmatpush3.msk.msra.mxu0 %vm1051_vm3, %v16001_v27  ;;  %18021 = vmatprep.mubr.msk.f32.mxu0 %vm18549_vm0, %v18548_v1  ;;  %v16069_v27 = vld [vmem:[%s20840_s3 + $0x318] sm:$0x3f] }
0x31b9   : > { %18015 = vmatprep.subr.mxu0 %v18548_v1 }
0x31ba   : > { %18016 = vmatpush3.msra.mxu0 %v16000_v55  ;;  %v16068_v55 = vld [vmem:[%s20840_s3 + $0x310] sm:$0xff] }
0x31bb   : > { %18017 = vmatprep.subr.mxu0 %v18548_v1 }
0x31bc   : > { %18018 = vmatpush3.msra.mxu0 %v15999_v21  ;;  %v16063_v21 = vld [vmem:[%s20836_s14 + $0x18] ss:$0 sm:$0xff]  ;;  %s18550_s14 = smov [#allocation2]  }
0x31bd   : > { %18019 = vmatprep.subr.mxu0 %v18548_v1 }
0x31be   : > { %18020 = vmatpush3.msra.mxu0 %v15998_v6  ;;  %v16067_v6 = vld [vmem:[%s20840_s3 + $0x308] sm:$0xff] }
0x31bf   : > { %18022 = vmatmul.mubr.msk.f32.vlgmr.msra.gmra.mxu0 %vm1008_vm2, %v20355_v5  ;;  %18035 = vmatprep.subr.mxu0 %v18548_v1 }
0x31c0   : > { %18036 = vmatpush3.msk.msra.mxu0 %vm1051_vm3, %v16017_v40  ;;  %18043 = vmatprep.mubr.msk.f32.mxu0 %vm18549_vm0, %v18548_v1 }
0x31c1   : > { %18037 = vmatprep.subr.mxu0 %v18548_v1 }
0x31c2   : > { %18038 = vmatpush3.msra.mxu0 %v16016_v58  ;;  %v15993_v58 = vld [vmem:[%s18609_s19 + $0x15] ss:$0 sm:$0xff] }
0x31c3   : > { %18039 = vmatprep.subr.mxu0 %v18548_v1 }
0x31c4   : > { %18040 = vmatpush3.msra.mxu0 %v16015_v59 }
0x31c5   : > { %18041 = vmatprep.subr.mxu0 %v18548_v1 }
0x31c6   : > { %18042 = vmatpush3.msra.mxu0 %v16014_v60  ;;  %v16066_v60 = vld [vmem:[%s20840_s3 + $0x300] sm:$0xff]  ;;  %s20850_s3 = sld [smem:[#allocation18_spill]] }
0x31c7   : > { %18044 = vmatmul.mubr.msk.f32.vlgmr.msra.gmra.mxu0 %vm1008_vm2, %v20355_v5  ;;  %18062 = vmatprep.subr.mxu0 %v18548_v1 }
0x31c8   : > { %18063 = vmatpush3.msk.msra.mxu0 %vm1051_vm3, %v16035_v61  ;;  %18070 = vmatprep.mubr.msk.f32.mxu0 %vm18549_vm0, %v18548_v1 }
0x31c9   : > { %18064 = vmatprep.subr.mxu0 %v18548_v1 }
0x31ca   : > { %18065 = vmatpush3.msra.mxu0 %v16034_v2  ;;  %v12629_v2 = vadd.f32 %v15993_v58, %v20419_v35 }
0x31cb   : > { %18066 = vmatprep.subr.mxu0 %v18548_v1 }
0x31cc   : > { %18067 = vmatpush3.msra.mxu0 %v16033_v22 }
0x31cd   : > { %18068 = vmatprep.subr.mxu0 %v18548_v1 }
0x31ce   : > { %18069 = vmatpush3.msra.mxu0 %v16032_v14 }
0x31cf   : > { %18071 = vmatmul.mubr.msk.f32.vlgmr.msra.gmra.mxu0 %vm1008_vm2, %v20355_v5  ;;  %18084 = vmatprep.subr.mxu0 %v18548_v1 }
0x31d0   : > { %18086 = vmatprep.mubr.msk.f32.mxu0 %vm18549_vm0, %v18548_v1 }
0x3277   : > { %v20492_v4 = vpop.f32.mrf.mxu0 }
0x3278   : > { %v13716_v34 = vsel %vm2711_vm5, %v20492_v4, -inf }
0x3279   : > { %13717 = vmax.xlane.f32.xlu0 %v13716_v34  ;;  %v18012_v63 = vpop.f32.mrf.mxu0 }
0x327d   : > { %13714 = vmax.xlane.f32.xlu0 %v13713_v8 }
0x327f   : > { %v12790_v9 = vpop.f32.mrf.mxu0 }
0x3280   : > { %v12791_v10 = vadd.f32 %v16003_v19, %v12790_v9 }
0x3281   : > { %v18023_v11 = vpop.f32.mrf.mxu0 }
0x3282   : > { %v12794_v13 = vmul.f32 0.4082483, %v12791_v10  ;;  %v16055_v11 = vld [vmem:[%s20839_s8 + $0x18] ss:$0 sm:$0xff]  ;;  %s20852_s8 = sld [smem:[#allocation17_spill]] }
0x3284   : > { %18049 = vmatmul.mubr.msk.f32.vlgmr.msra.gmra.mxu1 %vm1294_vm4, %v12794_v13 }
0x3285   : > { %18052 = vmatpush3.msk.msra.mxu1 %vm1051_vm3, %v16027_v15  ;;  %18059 = vmatprep.mubr.msk.f32.mxu1 %vm18549_vm0, %v18548_v1  ;;  %v15967_v15 = vld [vmem:[%s18609_s19 + $0x14] ss:$0 sm:$0xff] }
0x3286   : > { %18053 = vmatprep.subr.mxu1 %v18548_v1 }
0x3287   : > { %18054 = vmatpush3.msra.mxu1 %v16026_v16  ;;  %v20507_v17 = vpop.f32.mrf.mxu0 }
0x3288   : > { %18055 = vmatprep.subr.mxu1 %v18548_v1 }
0x3289   : > { %18056 = vmatpush3.msra.mxu1 %v16025_v51  ;;  %v18045_v18 = vpop.f32.mrf.mxu0 }
0x328a   : > { %18057 = vmatprep.subr.mxu1 %v18548_v1  ;;  %v12294_v18 = vadd.f32 %v15967_v15, %v20432_v52 }
0x328b   : > { %18058 = vmatpush3.msra.mxu1 %v16024_v45 }
0x328c   : > { %18060 = vmatmul.mubr.msk.f32.vlgmr.msra.gmra.mxu1 %vm1008_vm2, %v20355_v5  ;;  %18073 = vmatprep.subr.mxu1 %v18548_v1 }
0x328d   : > { %18074 = vmatpush3.msk.msra.mxu1 %vm1051_vm3, %v16043_v33  ;;  %18081 = vmatprep.mubr.msk.f32.mxu1 %vm18549_vm0, %v18548_v1 }
0x328e   : > { %18075 = vmatprep.subr.mxu1 %v18548_v1 }
0x328f   : > { %18076 = vmatpush3.msra.mxu1 %v16042_v0  ;;  %v13212_v25 = vpop.f32.mrf.mxu0 }
0x3290   : > { %v13213_v26 = vadd.f32 %v16037_v23, %v13212_v25  ;;  %18077 = vmatprep.subr.mxu1 %v18548_v1 }
0x3291   : > { %18078 = vmatpush3.msra.mxu1 %v16041_v24  ;;  %v18072_v3 = vpop.f32.mrf.mxu0 }
0x3292   : > { %18079 = vmatprep.subr.mxu1 %v18548_v1  ;;  %18085 = vmatpush3.xpose.msk.msra.mxu0 %vm1294_vm4, %v13213_v26 }
0x3293   : > { %18080 = vmatpush3.msra.mxu1 %v16040_v29  ;;  %18089 = vmatprep.subr.mxu0 %v18548_v1 }
0x3294   : > { %18082 = vmatmul.mubr.msk.f32.vlgmr.msra.gmra.mxu1 %vm1008_vm2, %v20355_v5  ;;  %18100 = vmatprep.subr.mxu1 %v18548_v1 }
0x3295   : > { %18101 = vmatpush3.msk.msra.mxu1 %vm1051_vm3, %v16061_v31  ;;  %18108 = vmatprep.mubr.msk.f32.mxu1 %vm18549_vm0, %v18548_v1 }
0x3296   : > { %18102 = vmatprep.subr.mxu1 %v18548_v1 }
0x3297   : > { %18103 = vmatpush3.msra.mxu1 %v16060_v32 }
0x3298   : > { %18104 = vmatprep.subr.mxu1 %v18548_v1 }
0x3299   : > { %18105 = vmatpush3.msra.mxu1 %v16059_v57  ;;  %v16079_v57 = vld [vmem:[%s18614_s24 + $0xa8] sm:$0x3f] }
0x329a   : > { %18106 = vmatprep.subr.mxu1 %v18548_v1 }
0x329b   : > { %18107 = vmatpush3.msra.mxu1 %v16058_v12  ;;  %v16019_v12 = vld [vmem:[%s18609_s19 + $0x16] ss:$0 sm:$0xff] }
0x329c   : > { %18109 = vmatmul.mubr.msk.f32.vlgmr.msra.gmra.mxu1 %vm1008_vm2, %v20355_v5  ;;  %18122 = vmatprep.subr.mxu1 %v18548_v1 }
0x329d   : > { %18124 = vmatprep.mubr.msk.f32.mxu1 %vm18549_vm0, %v18548_v1 }
0x3302   : > { %v13718_v36 = vpop.xlane.xlu0 %13717 }
0x3303   : > { %v13729_v37 = vsub.f32 %v20492_v4, %v13718_v36  ;;  %v12964_v36 = vadd.f32 %v16019_v12, %v20507_v17 }
0x3305   : > { %v13735_v38 = vmul.f32 1.442695, %v13729_v37 }
0x3307   : > { %18433 = vpow2.f32 %v13735_v38 }
0x3314   : > { %v18434_v39 = vpop.eup %18433 }
0x3315   : > { %v13746_v41 = vsel %vm2711_vm5, %v18434_v39, 0.0 }
0x3316   : > { %13747 = vadd.xlane.f32.xlu1 %v13746_v41 }
0x3344   : > { %v20548_v28 = vpop.f32.mrf.mxu1 }
0x3345   : > { %v13719_v42 = vsel %vm2711_vm5, %v20548_v28, -inf }
0x3346   : > { %13720 = vmax.xlane.f32.xlu1 %v13719_v42  ;;  %v18050_v43 = vpop.f32.mrf.mxu1 }
0x334c   : > { %v13125_v7 = vpop.f32.mrf.mxu1 }
0x334d   : > { %v13126_v20 = vadd.f32 %v16029_v44, %v13125_v7  ;;  %v16077_v7 = vld [vmem:[%s18614_s24 + $0xa0] sm:$0x3f] }
0x334e   : > { %v18061_v56 = vpop.f32.mrf.mxu1 }
0x334f   : > { %v13129_v48 = vmul.f32 0.4082483, %v13126_v20 }
0x3351   : > { %18087 = vmatmul.mubr.msk.f32.vlgmr.msra.gmra.mxu0 %vm1294_vm4, %v13129_v48 }
0x3352   : > { %18090 = vmatpush3.msk.msra.mxu0 %vm1051_vm3, %v16053_v49  ;;  %18097 = vmatprep.mubr.msk.f32.mxu0 %vm18549_vm0, %v18548_v1 }
0x3353   : > { %18091 = vmatprep.subr.mxu0 %v18548_v1 }
0x3354   : > { %18092 = vmatpush3.msra.mxu0 %v16052_v50  ;;  %v20561_v53 = vpop.f32.mrf.mxu1 }
0x3355   : > { %18093 = vmatprep.subr.mxu0 %v18548_v1 }
0x3356   : > { %18094 = vmatpush3.msra.mxu0 %v16051_v62  ;;  %v18083_v30 = vpop.f32.mrf.mxu1 }
0x3357   : > { %18095 = vmatprep.subr.mxu0 %v18548_v1 }
0x3358   : > { %18096 = vmatpush3.msra.mxu0 %v16050_v54 }
0x3359   : > { %18098 = vmatmul.mubr.msk.f32.vlgmr.msra.gmra.mxu0 %vm1008_vm2, %v20355_v5  ;;  %18111 = vmatprep.subr.mxu0 %v18548_v1 }
0x335a   : > { %18112 = vmatpush3.msk.msra.mxu0 %vm1051_vm3, %v16069_v27  ;;  %18119 = vmatprep.mubr.msk.f32.mxu0 %vm18549_vm0, %v18548_v1 }
0x335b   : > { %18113 = vmatprep.subr.mxu0 %v18548_v1 }
0x335c   : > { %18114 = vmatpush3.msra.mxu0 %v16068_v55  ;;  %v13547_v40 = vpop.f32.mrf.mxu1  ;;  %v16045_v55 = vld [vmem:[%s18609_s19 + $0x17] ss:$0 sm:$0xff] }
0x335d   : > { %v13548_v59 = vadd.f32 %v16063_v21, %v13547_v40  ;;  %18115 = vmatprep.subr.mxu0 %v18548_v1 }
0x335e   : > { %18116 = vmatpush3.msra.mxu0 %v16067_v6  ;;  %v18110_v61 = vpop.f32.mrf.mxu1 }
0x335f   : > { %18117 = vmatprep.subr.mxu0 %v18548_v1  ;;  %18123 = vmatpush3.xpose.msk.msra.mxu1 %vm1294_vm4, %v13548_v59  ;;  %v13299_v59 = vadd.f32 %v16045_v55, %v20561_v53  ;;  %v16085_v53 = vld [vmem:[%s18614_s24 + $0xb0] sm:$0x3f] }
0x3360   : > { %18118 = vmatpush3.msra.mxu0 %v16066_v60  ;;  %18127 = vmatprep.subr.mxu1 %v18548_v1  ;;  %v16071_v60 = vld [vmem:[%s18609_s19 + $0x18] ss:$0 sm:$0xff] }
0x3361   : > { %18120 = vmatmul.mubr.msk.f32.vlgmr.msra.gmra.mxu0 %vm1008_vm2, %v20355_v5  ;;  %18132 = vmatprep.subr.mxu0 %v18548_v1  ;;  %v13715_v5 = vpop.xlane.xlu0 %13714 }
0x3362   : > { %18133 = vmatpush3.msra.mxu0 %v12629_v2  ;;  %18134 = vmatprep.mubr.msk.f32.mxu0 %vm18549_vm0, %v18548_v1  ;;  %v13728_v35 = vsub.f32 %v20444_v47, %v13715_v5 }
0x3363   : > { %18142 = vmatprep.subr.mxu0 %v18548_v1 }
0x3364   : > { %v13733_v34 = vmul.f32 1.442695, %v13728_v35 }
0x339f   : > { %v13748_v22 = vpop.xlane.xlu1 %13747 }
0x33a0   : > { %18435 = vrcp.f32 %v13748_v22 }
0x33a1   : > { %18437 = vpow2.f32 %v13733_v34  ;;  %v16089_v34 = vld [vmem:[%s18614_s24 + $0xb8] sm:$0x3f] }
0x33ad   : > { %v18436_v14 = vpop.eup %18435 }
0x33ae   : > { %v13761_v4 = vmul.f32 %v18436_v14, %v18434_v39  ;;  %v18438_v19 = vpop.eup %18437 }
0x33af   : > { %v13743_v10 = vsel %vm2711_vm5, %v18438_v19, 0.0 }
0x33b0   : > { %18135 = vmatmul.mubr.msk.f32.vlgmr.msra.gmra.mxu0 %vm2711_vm5, %v13761_v4 }
0x33b1   : > { %18144 = vmatprep.mubr.msk.f32.mxu0 %vm18549_vm0, %v18548_v1  ;;  %18143 = vmatpush3.msk.msra.mxu0 %vm1051_vm3, %v16077_v7  ;;  %v16118_v7 = vld [vmem:[%s20845_s16 + $0x220] sm:$0xff] }
0x33b2   : > { %18152 = vmatprep.subr.mxu0 %v18548_v1 }
0x33cf   : > { %v13721_v37 = vpop.xlane.xlu1 %13720 }
0x33d0   : > { %v13730_v38 = vsub.f32 %v20548_v28, %v13721_v37  ;;  %v16103_v37 = vld [vmem:[%s18634_s20 + $0x88] sm:$0xff] }
0x33d2   : > { %v13737_v39 = vmul.f32 1.442695, %v13730_v38  ;;  %v16102_v38 = vld [vmem:[%s18634_s20 + $0x80] sm:$0xff] }
0x3411   : > { %v13374_v63 = vpop.f32.mrf.mxu0 }
0x3412   : > { %v13722_v8 = vsel %vm2711_vm5, %v13374_v63, -inf }
0x3413   : > { %13723 = vmax.xlane.f32.xlu0 %v13722_v8  ;;  %v18088_v9 = vpop.f32.mrf.mxu0 }
0x3417   : > { %13744 = vadd.xlane.f32.xlu0 %v13743_v10 }
0x3419   : > { %v13460_v13 = vpop.f32.mrf.mxu0 }
0x341a   : > { %v13461_v16 = vadd.f32 %v16055_v11, %v13460_v13 }
0x341b   : > { %v18099_v51 = vpop.f32.mrf.mxu0 }
0x341c   : > { %v13464_v45 = vmul.f32 0.4082483, %v13461_v16 }
0x341e   : > { %18125 = vmatmul.mubr.msk.f32.vlgmr.msra.gmra.mxu1 %vm1294_vm4, %v13464_v45 }
0x341f   : > { %18128 = vmatpush3.msra.mxu1 %v12294_v18  ;;  %18129 = vmatprep.mubr.msk.f32.mxu1 %vm18549_vm0, %v18548_v1 }
0x3420   : > { %18137 = vmatprep.subr.mxu1 %v18548_v1 }
0x3421   : > { %v20603_v47 = vpop.f32.mrf.mxu0 }
0x3422   : > { %v13634_v2 = vadd.f32 %v16071_v60, %v20603_v47  ;;  %v16110_v60 = vld [vmem:[%s20845_s16 + $0x1e0] sm:$0xff] }
0x3423   : > { %v18121_v33 = vpop.f32.mrf.mxu0 }
0x3470   : > { %v13912_v0 = vpop.f32.mrf.mxu0 }
0x3472   : > { %v18136_v23 = vpop.f32.mrf.mxu0 }
0x349c   : > { %v13724_v24 = vpop.xlane.xlu0 %13723 }
0x349d   : > { %v13731_v25 = vsub.f32 %v13374_v63, %v13724_v24  ;;  %v16097_v24 = vld [vmem:[%s18619_s30 + $0x4] ss:$0 sm:$0xff] }
0x349f   : > { %v13739_v26 = vmul.f32 1.442695, %v13731_v25 }
0x34a0   : > { %v13745_v29 = vpop.xlane.xlu0 %13744 }
0x34a1   : > { %18439 = vpow2.f32 %v13739_v26 }
0x34a2   : > { %18441 = vrcp.f32 %v13745_v29 }
0x34a3   : > { %18443 = vpow2.f32 %v13737_v39  ;;  %v16124_v39 = vld [vmem:[%s20845_s16 + $0x250] sm:$0xff] }
0x34ae   : > { %v18440_v52 = vpop.eup %18439 }
0x34af   : > { %v18442_v3 = vpop.eup %18441  ;;  %v13752_v31 = vsel %vm2711_vm5, %v18440_v52, 0.0 }
0x34b0   : > { %v13759_v32 = vmul.f32 %v18442_v3, %v18438_v19  ;;  %13753 = vadd.xlane.f32.xlu0 %v13752_v31  ;;  %v18444_v43 = vpop.eup %18443  ;;  %v16093_v19 = vld [vmem:[%s18614_s24 + $0xc0] sm:$0x3f] }
0x34b1   : > { %v13749_v44 = vsel %vm2711_vm5, %v18444_v43, 0.0 }
0x34b2   : > { %18130 = vmatmul.mubr.msk.f32.vlgmr.msra.gmra.mxu1 %vm2711_vm5, %v13759_v32 }
0x34b3   : > { %18138 = vmatpush3.msk.msra.mxu1 %vm1051_vm3, %v16079_v57  ;;  %18139 = vmatprep.mubr.msk.f32.mxu1 %vm18549_vm0, %v18548_v1 }
0x34b4   : > { %18147 = vmatprep.subr.mxu1 %v18548_v1 }
0x34b6   : > { %18140 = vmatmul.mubr.msk.f32.vlgmr.msra.gmra.mxu1 %vm1294_vm4, %v13912_v0 }
0x34b7   : > { %18148 = vmatpush3.msra.mxu1 %v12964_v36  ;;  %18149 = vmatprep.mubr.msk.f32.mxu1 %vm18549_vm0, %v18548_v1  ;;  %v16105_v36 = vld [vmem:[%s18634_s20 + $0x98] sm:$0x3f] }
0x34b8   : > { %18157 = vmatprep.subr.mxu1 %v18548_v1 }
0x34de   : > { %v13709_v41 = vpop.f32.mrf.mxu1 }
0x34df   : > { %v13725_v42 = vsel %vm2711_vm5, %v13709_v41, -inf }
0x34e0   : > { %13726 = vmax.xlane.f32.xlu1 %v13725_v42  ;;  %v18126_v17 = vpop.f32.mrf.mxu1  ;;  %v16122_v42 = vld [vmem:[%s20845_s16 + $0x240] sm:$0xff] }
0x34e1   : > { %v16120_v17 = vld [vmem:[%s20845_s16 + $0x230] sm:$0xff] }
0x34e4   : > { %13750 = vadd.xlane.f32.xlu1 %v13749_v44  ;;  %v16119_v44 = vld [vmem:[%s20845_s16 + $0x228] sm:$0xff] }
0x3539   : > { %v13754_v49 = vpop.xlane.xlu0 %13753 }
0x3569   : > { %v13727_v20 = vpop.xlane.xlu1 %13726 }
0x356a   : > { %v13732_v56 = vsub.f32 %v13709_v41, %v13727_v20  ;;  %v16123_v41 = vld [vmem:[%s20845_s16 + $0x248] sm:$0xff]  ;;  %v16117_v20 = vld [vmem:[%s20845_s16 + $0x218] sm:$0xff] }
0x356c   : > { %v13741_v28 = vmul.f32 1.442695, %v13732_v56  ;;  %v16116_v56 = vld [vmem:[%s20845_s16 + $0x210] sm:$0xff] }
0x356d   : > { %v13751_v48 = vpop.xlane.xlu1 %13750 }
0x356e   : > { %18445 = vpow2.f32 %v13741_v28  ;;  %v16115_v28 = vld [vmem:[%s20845_s16 + $0x208] sm:$0xff] }
0x356f   : > { %18447 = vrcp.f32 %v13751_v48  ;;  %v16114_v48 = vld [vmem:[%s20845_s16 + $0x200] sm:$0xff] }
0x3570   : > { %18449 = vrcp.f32 %v13754_v49  ;;  %v16113_v49 = vld [vmem:[%s20845_s16 + $0x1f8] sm:$0xff] }
0x3572   : > { %v13837_v50 = vpop.f32.mrf.mxu1 }
0x3573   : > { %18145 = vmatmul.mubr.msk.f32.vlgmr.msra.gmra.mxu0 %vm1294_vm4, %v13837_v50 }
0x3574   : > { %v18131_v62 = vpop.f32.mrf.mxu1  ;;  %18154 = vmatprep.mubr.msk.f32.mxu0 %vm18549_vm0, %v18548_v1  ;;  %18153 = vmatpush3.msk.msra.mxu0 %vm1051_vm3, %v16085_v53 }
0x3575   : > { %18162 = vmatprep.subr.mxu0 %v18548_v1 }
0x3576   : > { %v13990_v54 = vpop.f32.mrf.mxu1 }
0x3578   : > { %v18141_v30 = vpop.f32.mrf.mxu1 }
0x357b   : > { %v18446_v27 = vpop.eup %18445 }
0x357c   : > { %v18448_v21 = vpop.eup %18447  ;;  %v13755_v6 = vsel %vm2711_vm5, %v18446_v27, 0.0 }
0x357d   : > { %v13763_v40 = vmul.f32 %v18448_v21, %v18444_v43  ;;  %13756 = vadd.xlane.f32.xlu1 %v13755_v6  ;;  %v18450_v58 = vpop.eup %18449  ;;  %v16121_v43 = vld [vmem:[%s20845_s16 + $0x238] sm:$0xff]  ;;  %v16101_v21 = vld [vmem:[%s20847_s23 + $0x4] ss:$0 sm:$0xff] }
0x357e   : > { %v13765_v61 = vmul.f32 %v18450_v58, %v18440_v52  ;;  %v16112_v58 = vld [vmem:[%s20845_s16 + $0x1f0] sm:$0xff] }
0x357f   : > { %18150 = vmatmul.mubr.msk.f32.vlgmr.msra.gmra.mxu1 %vm2711_vm5, %v13763_v40 }
0x3580   : > { %18158 = vmatpush3.msra.mxu1 %v13299_v59  ;;  %18159 = vmatprep.mubr.msk.f32.mxu1 %vm18549_vm0, %v18548_v1  ;;  %v16111_v59 = vld [vmem:[%s20845_s16 + $0x1e8] sm:$0xff]  ;;  %s18461_s16 = sshll.u32 %s18550_s14, 4  ;;  %s18462_s16 = int_to_ptr.vmem [resolvable:$false] %s18461_s16 }
0x3581   : > { %18167 = vmatprep.subr.mxu1 %v18548_v1 }
0x3583   : > { %18160 = vmatmul.mubr.msk.f32.vlgmr.msra.gmra.mxu1 %vm2711_vm5, %v13765_v61  ;;  %v16107_v61 = vld [vmem:[%s20848_s5 + $0x4] ss:$0 sm:$0xff]  ;;  %s20851_s5 = sld [smem:[#allocation16_spill]] }
0x3584   : > { %18168 = vmatpush3.msra.mxu1 %v13634_v2  ;;  %18169 = vmatprep.mubr.msk.f32.mxu1 %vm18549_vm0, %v18548_v1 }
0x3585   : > { %18177 = vmatprep.subr.mxu1 %v18548_v1 }
0x3606   : > { %v13757_v22 = vpop.xlane.xlu1 %13756 }
0x3607   : > { %18451 = vrcp.f32 %v13757_v22 }
0x3614   : > { %v18452_v14 = vpop.eup %18451 }
0x3615   : > { %v13767_v4 = vmul.f32 %v18452_v14, %v18446_v27  ;;  %v16100_v27 = vld [vmem:[%s20846_s22 + $0x4] ss:$0 sm:$0xff] }
0x3617   : > { %18170 = vmatmul.mubr.msk.f32.vlgmr.msra.gmra.mxu1 %vm2711_vm5, %v13767_v4 }
0x3618   : > { %18185 = vmatprep.mubr.msk.f32.mxu1 %vm18549_vm0, %v18548_v1  ;;  %18178 = vmatpush3.msk.msra.mxu1 %vm1051_vm3, %v16105_v36 }
0x3619   : > { %18179 = vmatprep.subr.mxu1 %v18548_v1 }
0x3633   : > { %v14066_v5 = vpop.f32.mrf.mxu0 }
0x3634   : > { %v14067_v15 = vadd.f32 %v14066_v5, %v13990_v54  ;;  %v16127_v5 = vld [vmem:[%s20849_s9 + $0x4] ss:$0 sm:$0xff]  ;;  %s20853_s9 = sld [smem:[#allocation20_spill]] }
0x3635   : > { %v18146_v35 = vpop.f32.mrf.mxu0 }
0x363f   : > { %v14139_v63 = vpop.f32.mrf.mxu1 }
0x3640   : > { %18155 = vmatmul.mubr.msk.f32.vlgmr.msra.gmra.mxu0 %vm1294_vm4, %v14139_v63 }
0x3641   : > { %v18151_v8 = vpop.f32.mrf.mxu1  ;;  %18163 = vmatpush3.msk.msra.mxu0 %vm1051_vm3, %v16089_v34  ;;  %18164 = vmatprep.mubr.msk.f32.mxu0 %vm18549_vm0, %v18548_v1 }
0x3642   : > { %18172 = vmatprep.subr.mxu0 %v18548_v1 }
0x3643   : > { %v14291_v9 = vpop.f32.mrf.mxu1 }
0x3644   : > { %18165 = vmatmul.mubr.msk.f32.vlgmr.msra.gmra.mxu0 %vm1294_vm4, %v14291_v9 }
0x3645   : > { %v18161_v10 = vpop.f32.mrf.mxu1  ;;  %18173 = vmatpush3.msk.msra.mxu0 %vm1051_vm3, %v16093_v19  ;;  %18174 = vmatprep.mubr.msk.f32.mxu0 %vm18549_vm0, %v18548_v1 }
0x3646   : > { %18188 = vmatprep.subr.mxu0 %v18548_v1 }
0x36d7   : > { %v14443_v11 = vpop.f32.mrf.mxu1 }
0x36d8   : > { %18175 = vmatmul.mubr.msk.f32.vlgmr.msra.gmra.mxu0 %vm1294_vm4, %v14443_v11 }
0x36d9   : > { %v18171_v13 = vpop.f32.mrf.mxu1  ;;  %18218 = vmatprep.mubr.msk.f32.mxu0 %vm18549_vm0, %v18548_v1  ;;  %18189 = vmatpush3.msra.mxu0 %v16124_v39  ;;  %v14958_v39 = vld [vmem:[%s20838_s12 + $0x18] sm:$0x3f] }
0x36da   : > { %18190 = vmatprep.subr.mxu0 %v18548_v1 }
0x36db   : > { %18191 = vmatpush3.msra.mxu0 %v16123_v41  ;;  %v14957_v41 = vld [vmem:[%s20838_s12 + $0x10] sm:$0xff] }
0x36dc   : > { %18192 = vmatprep.subr.mxu0 %v18548_v1 }
0x36dd   : > { %18193 = vmatpush3.msra.mxu0 %v16122_v42  ;;  %v14956_v42 = vld [vmem:[%s20838_s12 + $0x8] sm:$0xff] }
0x36de   : > { %18194 = vmatprep.subr.mxu0 %v18548_v1 }
0x36df   : > { %18195 = vmatpush3.msra.mxu0 %v16121_v43  ;;  %v14955_v43 = vld [vmem:[%s20838_s12] sm:$0xff] }
0x36e0   : > { %18196 = vmatprep.subr.mxu0 %v18548_v1 }
0x36e1   : > { %18197 = vmatpush3.msra.mxu0 %v16120_v17 }
0x36e2   : > { %18198 = vmatprep.subr.mxu0 %v18548_v1 }
0x36e3   : > { %18199 = vmatpush3.msra.mxu0 %v16119_v44 }
0x36e4   : > { %18200 = vmatprep.subr.mxu0 %v18548_v1 }
0x36e5   : > { %18201 = vmatpush3.msra.mxu0 %v16118_v7 }
0x36e6   : > { %18202 = vmatprep.subr.mxu0 %v18548_v1 }
0x36e7   : > { %18203 = vmatpush3.msra.mxu0 %v16117_v20 }
0x36e8   : > { %18204 = vmatprep.subr.mxu0 %v18548_v1 }
0x36e9   : > { %18205 = vmatpush3.msra.mxu0 %v16116_v56 }
0x36ea   : > { %18206 = vmatprep.subr.mxu0 %v18548_v1 }
0x36eb   : > { %18207 = vmatpush3.msra.mxu0 %v16115_v28 }
0x36ec   : > { %18208 = vmatprep.subr.mxu0 %v18548_v1 }
0x36ed   : > { %18209 = vmatpush3.msra.mxu0 %v16114_v48 }
0x36ee   : > { %18210 = vmatprep.subr.mxu0 %v18548_v1 }
0x36ef   : > { %18211 = vmatpush3.msra.mxu0 %v16113_v49 }
0x36f0   : > { %18212 = vmatprep.subr.mxu0 %v18548_v1 }
0x36f1   : > { %18213 = vmatpush3.msra.mxu0 %v16112_v58 }
0x36f2   : > { %18214 = vmatprep.subr.mxu0 %v18548_v1 }
0x36f3   : > { %18215 = vmatpush3.msra.mxu0 %v16111_v59 }
0x36f4   : > { %18216 = vmatprep.subr.mxu0 %v18548_v1 }
0x36f5   : > { %18217 = vmatpush3.msra.mxu0 %v16110_v60 }
0x3700   : > { %v14217_v16 = vpop.f32.mrf.mxu0 }
0x3701   : > { %v14221_v51 = vadd.f32 %v14217_v16, %v14067_v15  ;;  %v14789_v15 = vld [vmem:[%s20850_s3 + $0x18] sm:$0x3f]  ;;  %v14788_v16 = vld [vmem:[%s20850_s3 + $0x10] sm:$0xff] }
0x3702   : > { %v18156_v45 = vpop.f32.mrf.mxu0 }
0x3703   : > { %v14786_v45 = vld [vmem:[%s20850_s3] sm:$0xff] }
0x3704   : > { %v14369_v18 = vpop.f32.mrf.mxu0 }
0x3705   : > { %v14373_v47 = vadd.f32 %v14369_v18, %v14221_v51  ;;  %v14787_v51 = vld [vmem:[%s20850_s3 + $0x8] sm:$0xff]  ;;  %s20854_s3 = sld [smem:[#allocation19_spill]] }
0x3706   : > { %v18166_v33 = vpop.f32.mrf.mxu0 }
0x3798   : > { %v14521_v0 = vpop.f32.mrf.mxu0 }
0x3799   : > { %v14525_v23 = vadd.f32 %v14521_v0, %v14373_v47 }
0x379a   : > { %v18176_v25 = vpop.f32.mrf.mxu0 }
0x379b   : > { %v14526_v26 = vadd.f32 %v14525_v23, %v20329_v46  ;;  %v16104_v46 = vld [vmem:[%s18634_s20 + $0x90] sm:$0xff]  ;;  %v16128_v23 = vld [vmem:[%s20851_s5] ss:$0 sm:$0xff]  ;;  %s20855_s5 = sld [smem:[#allocation22_spill]] }
0x379c   : > { %18180 = vmatpush3.msra.mxu1 %v16104_v46  ;;  %v16129_v25 = vld [vmem:[%s20852_s8] ss:$0 sm:$0xff]  ;;  %s927_s8 = scalar_lea.vmem %s18699_s27, %s18761_s2  ;;  %s915_s2 = sand.u32 1, %s18509_s10  }
0x379d   : > { %v20663_v29 = vadd.f32 %v16097_v24, %v14526_v26  ;;  %18181 = vmatprep.subr.mxu1 %v18548_v1  ;;  %v14950_v17 = vld [vmem:[%s927_s8] sm:$0x1]  ;;  %s16138_s8 = sshll.u32 %s18727_s0, 4 }
0x379e   : > { %18182 = vmatpush3.msra.mxu1 %v16103_v37 }
0x379f   : > { %v14540_v52 = vsel %vm1008_vm2, %v20663_v29, 0.0  ;;  %18183 = vmatprep.subr.mxu1 %v18548_v1 }
0x37a0   : > { %14541 = vadd.xlane.f32.xlu0 %v14540_v52  ;;  %18184 = vmatpush3.msra.mxu1 %v16102_v38 }
0x37a1   : > { %18221 = vmatprep.subr.mxu1 %v18548_v1  ;;  %v14954_v44 = vld [vmem:[%s20855_s5 + $0x18] sm:$0x3f]  ;;  %v14953_v7 = vld [vmem:[%s20855_s5 + $0x10] sm:$0xff]  ;;  %v14952_v20 = vld [vmem:[%s20855_s5 + $0x8] sm:$0xff] }
0x37a2   : > { %v14951_v56 = vld [vmem:[%s20855_s5] sm:$0xff]  ;;  %s15116_s5 = scalar_lea.sflag [#allocation3], %s915_s2 }
0x3829   : > { %v14542_v3 = vpop.xlane.xlu0 %14541 }
0x382a   : > { %v14543_v31 = vmul.f32 0.033333335, %v14542_v3  ;;  %v14872_v3 = vld [vmem:[%s20853_s9 + $0x18] sm:$0x3f] }
0x382c   : > { %v14544_v32 = vsub.f32 %v20663_v29, %v14543_v31  ;;  %v14871_v31 = vld [vmem:[%s20853_s9 + $0x10] sm:$0xff] }
0x382e   : > { %v14545_v57 = vmul.f32 %v14544_v32, %v14544_v32 }
0x3830   : > { %v14546_v12 = vsel %vm1008_vm2, %v14545_v57, 0.0  ;;  %v14869_v57 = vld [vmem:[%s20853_s9] sm:$0xff] }
0x3831   : > { %14547 = vadd.xlane.f32.xlu1 %v14546_v12  ;;  %v14790_v12 = vld [vmem:[%s20854_s3] sm:$0x1]  ;;  %s20856_s3 = sld [smem:[#allocation21_spill]] }
0x3837   : > { %v14873_v28 = vld [vmem:[%s20856_s3] sm:$0x1]  ;;  %s15126_s3 = scalar_lea.hbm %s18704_s4, %s16138_s8 }
0x38ba   : > { %v14548_v50 = vpop.xlane.xlu1 %14547 }
0x38bb   : > { %v14549_v62 = vmul.f32 0.033333335, %v14548_v50 }
0x38bd   : > { %v14550_v54 = vadd.f32 1e-05, %v14549_v62 }
0x38bf   : > { %18453 = vrsqrt.f32 %v14550_v54 }
0x38cc   : > { %v18454_v30 = vpop.eup %18453 }
0x38cd   : > { %v14552_v55 = vmul.f32 %v18454_v30, %v14544_v32  ;;  %v14870_v32 = vld [vmem:[%s20853_s9 + $0x8] sm:$0xff]  ;;  %s916_s9 = scalar_lea.vmem [#allocation2], %s915_s2 }
0x38ce   : > { %s15128_s12 = sshll.u32 %s916_s9, 4  ;;  %s15129_s12 = int_to_ptr.vmem [resolvable:$true] %s15128_s12 }
0x38cf   : > { %v14559_v6 = vmul.f32 %v16100_v27, %v14552_v55  ;;  %v15111_v27 = vld [vmem:[%s20857_s6] sm:$0x1]  ;;  %s18457_s13 = scalar_lea.vmem %s15129_s12, 16  ;;  %s18463_s6 = scalar_lea.vmem %s18462_s16, 32 }
0x38d0   : > { %p18458_p11 = scmp.ne.s32.totalorder %s15129_s12, %s18457_s13  ;;  %p18464_p0 = scmp.lt.s32.totalorder %s15129_s12, %s18462_s16 }
0x38d1   : > { %v14566_v40 = vadd.f32 %v16101_v21, %v14559_v6  ;;  %p18465_p1 = scmp.lt.s32.totalorder %s18463_s6, %s18457_s13 }
0x38d2   : > { %p18459_p12 = pnand %p18458_p11, %p18744_p5 }
0x38d3   : > { %18186 = vmatmul.mubr.msk.f32.vlgmr.msra.gmra.mxu1 %vm1008_vm2, %v14566_v40  ;;  %p18466_p2 = por %p18465_p1, %p18464_p0 }
0x38d4   : > { %18229 = vmatprep.mubr.msk.f32.mxu1 %vm18549_vm0, %v18548_v1  ;;  %18222 = vmatpush3.msk.msra.mxu1 %vm1051_vm3, %v14789_v15  ;;  %p18460_p13 = pneg %p18459_p12 }
0x38d5   : > { %18223 = vmatprep.subr.mxu1 %v18548_v1 }
0x38d6   : > { %18224 = vmatpush3.msra.mxu1 %v14788_v16  ;;  %p18467_p3 = pnand %p18466_p2, %p18460_p13 }
0x38d7   : > { %18225 = vmatprep.subr.mxu1 %v18548_v1 }
0x38d8   : > { %18226 = vmatpush3.msra.mxu1 %v14787_v51 }
0x38d9   : > { %18227 = vmatprep.subr.mxu1 %v18548_v1 }
0x38da   : > { %18228 = vmatpush3.msra.mxu1 %v14786_v45 }
0x38db   : > { %18232 = vmatprep.subr.mxu1 %v18548_v1 }
0x3993   : > { %v14652_v2 = vpop.f32.mrf.mxu1 }
0x3994   : > { %v14653_v53 = vadd.f32 %v16107_v61, %v14652_v2 }
0x3995   : > { %v18187_v22 = vpop.f32.mrf.mxu1 }
0x3996   : > { %v14656_v14 = vmax.f32 %v14653_v53, 0.0 }
0x3998   : > { %18219 = vmatmul.mubr.msk.f32.vlgmr.msra.gmra.mxu0 %vm3665_vm6, %v14656_v14 }
0x3a58   : > { %v14742_v4 = vpop.f32.mrf.mxu0 }
0x3a59   : > { %v14746_v35 = vadd.f32 %v14742_v4, %v20663_v29 }
0x3a5a   : > { %v18220_v34 = vpop.f32.mrf.mxu0 }
0x3a5b   : > { %v14755_v63 = vadd.f32 %v16127_v5, %v14746_v35 }
0x3a5d   : > { %v14759_v8 = vsel %vm14758_vm7, %v14755_v63, 0.0 }
0x3a5e   : > { %14760 = vadd.xlane.f32.xlu0 %v14759_v8 }
0x3ae7   : > { %v14761_v19 = vpop.xlane.xlu0 %14760 }
0x3ae8   : > { %v14762_v9 = vmul.f32 0.033333335, %v14761_v19 }
0x3aea   : > { %v14763_v10 = vsub.f32 %v14755_v63, %v14762_v9 }
0x3aec   : > { %v14764_v11 = vmul.f32 %v14763_v10, %v14763_v10 }
0x3aee   : > { %v14765_v13 = vsel %vm14758_vm7, %v14764_v11, 0.0 }
0x3aef   : > { %14766 = vadd.xlane.f32.xlu1 %v14765_v13 }
0x3b78   : > { %v14767_v18 = vpop.xlane.xlu1 %14766 }
0x3b79   : > { %v14768_v47 = vmul.f32 0.033333335, %v14767_v18 }
0x3b7b   : > { %v14769_v33 = vadd.f32 1e-05, %v14768_v47 }
0x3b7d   : > { %18455 = vrsqrt.f32 %v14769_v33 }
0x3b8a   : > { %v18456_v0 = vpop.eup %18455 }
0x3b8b   : > { %v14771_v24 = vmul.f32 %v18456_v0, %v14763_v10 }
0x3b8d   : > { %v14778_v26 = vmul.f32 %v16128_v23, %v14771_v24 }
0x3b8f   : > { %v14785_v29 = vadd.f32 %v16129_v25, %v14778_v26 }
0x3b91   : > { %v14792_v52 = vrot.slane %v14785_v29, 7 }
0x3b93   : > { %18230 = vmatmul.mubr.msk.f32.vlgmr.msra.gmra.mxu1 %vm1008_vm2, %v14792_v52 }
0x3b94   : > { %18233 = vmatpush3.msk.msra.mxu1 %vm1051_vm3, %v14872_v3  ;;  %18240 = vmatprep.mubr.msk.f32.mxu1 %vm18549_vm0, %v18548_v1 }
0x3b95   : > { %18234 = vmatprep.subr.mxu1 %v18548_v1 }
0x3b96   : > { %18235 = vmatpush3.msra.mxu1 %v14871_v31 }
0x3b97   : > { %18236 = vmatprep.subr.mxu1 %v18548_v1 }
0x3b98   : > { %18237 = vmatpush3.msra.mxu1 %v14870_v32 }
0x3b99   : > { %18238 = vmatprep.subr.mxu1 %v18548_v1 }
0x3b9a   : > { %18239 = vmatpush3.msra.mxu1 %v14869_v57 }
0x3b9b   : > { %18243 = vmatprep.subr.mxu1 %v18548_v1 }
0x3c53   : > { %v14864_v36 = vpop.f32.mrf.mxu1 }
0x3c54   : > { %v14865_v46 = vadd.f32 %v14864_v36, %v14790_v12 }
0x3c55   : > { %v18231_v37 = vpop.f32.mrf.mxu1 }
0x3c56   : > { %v14868_v38 = vmax.f32 %v14865_v46, 0.0 }
0x3c58   : > { %18241 = vmatmul.mubr.msk.f32.vlgmr.msra.gmra.mxu1 %vm1008_vm2, %v14868_v38 }
0x3c59   : > { %18244 = vmatpush3.msk.msra.mxu1 %vm1051_vm3, %v14958_v39  ;;  %18251 = vmatprep.mubr.msk.f32.mxu1 %vm18549_vm0, %v18548_v1 }
0x3c5a   : > { %18245 = vmatprep.subr.mxu1 %v18548_v1 }
0x3c5b   : > { %18246 = vmatpush3.msra.mxu1 %v14957_v41 }
0x3c5c   : > { %18247 = vmatprep.subr.mxu1 %v18548_v1 }
0x3c5d   : > { %18248 = vmatpush3.msra.mxu1 %v14956_v42 }
0x3c5e   : > { %18249 = vmatprep.subr.mxu1 %v18548_v1 }
0x3c5f   : > { %18250 = vmatpush3.msra.mxu1 %v14955_v43 }
0x3c60   : > { %18252 = vmatmul.mubr.msk.f32.vlgmr.msra.gmra.mxu1 %vm1008_vm2, %v14950_v17  ;;  %18254 = vmatprep.subr.mxu1 %v18548_v1 }
0x3c61   : > { %18255 = vmatpush3.msk.msra.mxu1 %vm1051_vm3, %v14954_v44  ;;  %18262 = vmatprep.mubr.msk.f32.mxu1 %vm18549_vm0, %v18548_v1 }
0x3c62   : > { %18256 = vmatprep.subr.mxu1 %v18548_v1 }
0x3c63   : > { %18257 = vmatpush3.msra.mxu1 %v14953_v7 }
0x3c64   : > { %18258 = vmatprep.subr.mxu1 %v18548_v1 }
0x3c65   : > { %18259 = vmatpush3.msra.mxu1 %v14952_v20 }
0x3c66   : > { %18260 = vmatprep.subr.mxu1 %v18548_v1 }
0x3c67   : > { %18261 = vmatpush3.msra.mxu1 %v14951_v56 }
0x3d18   : > { %v14946_v48 = vpop.f32.mrf.mxu1 }
0x3d19   : > { %v14947_v49 = vadd.f32 %v14946_v48, %v14873_v28 }
0x3d1a   : > { %v18242_v50 = vpop.f32.mrf.mxu1 }
0x3d1b   : > { %18263 = vmatmul.mubr.msk.f32.vlgmr.msra.gmra.mxu1 %vm1008_vm2, %v14947_v49 }
0x3d20   : > { %v15031_v62 = vpop.f32.mrf.mxu1 }
0x3d22   : > { %v18253_v54 = vpop.f32.mrf.mxu1 }
0x3ddb   : > { %v15107_v30 = vpop.f32.mrf.mxu1 }
0x3ddc   : > { %v15108_v55 = vadd.f32 %v15107_v30, %v15031_v62 }
0x3ddd   : > { %v18264_v21 = vpop.f32.mrf.mxu1 }
0x3dde   : > { %v15112_v1 = vadd.f32 %v15111_v27, %v15108_v55 }
0x3de0   : > { %15114 = vst.msk [vmem:[%s916_s9] sm:$0x1] %vm15113_vm8, %v15112_v1 }
0x3de1   : > { %18470 = shalt.err (!%p18467_p3)
}
0x3de2   : > { %s18471_s0 = scalar_lea.hbm %s15126_s3, 16  ;;  %s18475_s9 = scalar_lea.hbm %s18704_s4, 32 }
0x3de3   : > { %p18472_p4 = scmp.ne.s32.totalorder %s15126_s3, %s18471_s0  ;;  %p18476_p9 = scmp.lt.s32.totalorder %s15126_s3, %s18704_s4 }
0x3de4   : > { %p18477_p10 = scmp.lt.s32.totalorder %s18475_s9, %s18471_s0 }
0x3de5   : > { %p18473_p7 = pnand %p18472_p4, %p18744_p5 }
0x3de6   : > { %p18478_p11 = por %p18477_p10, %p18476_p9 }
0x3de7   : > { %p18474_p8 = pneg %p18473_p7 }
0x3de9   : > { %p18479_p12 = pnand %p18478_p11, %p18474_p8 }
0x3deb   : > { %18482 = shalt.err (!%p18479_p12)
}
0x3dec   : > { %18265 = dma.vmem_to_hbm [thread:$0]  (%p18744_p5), %s15129_s12, 16, %s15126_s3, %s15116_s5  }
0x3ded PF: > { %p18271_p13 = scmp.ge.s32.totalorder %s18517_s15, 2  ;;  %s15140_s13 = sand.u32 1, %s18505_s7  }
0x3dee   : > { %s15141_s14 = scalar_lea.sflag [#allocation3], %s15140_s13 }
0x3def   : > { %p18268_p0 = pnand %p18271_p13, %p18748_p6 }
0x3df1   : > { %p18269_p1 = pneg %p18268_p0 }
0x3df3   : > { %18500 = dma.done.wait (%p18269_p1), %s15141_s14, 16  }
0x3df4   : > { %18502 = vsyncadd (%p18269_p1), %s15141_s14, 4294967280  ;;  %p69_p2 = scmp.ge.s32.totalorder %s18731_s18, 4   ;;  %s20858_s7 = smov %s18509_s10 }
0x3df5   : > { %s20859_s10 = smov %s18513_s11  ;;  %s20860_s11 = smov %s18742_s26 }
0x3df6   : > { %s20861_s15 = smov %s18731_s18  ;;  %71 = sbr.rel (!%p69_p2) target bundleno = 57 (0x39), region = 410 }
0x3dfb   :  { %15145 = vsyncpa [#allocation3], 1 }
0x3dfc   :  { %15147 = vsyncpa [#allocation3 + $0x1], 1 }

</bundles_post_ra>
